<compile_context>
chip_gen: v5e
topology: v5e:2x2
jax: 0.10.0
libtpu: 0.0.40
codegen_flags: <defaults>
</compile_context>

<pallas_src>
import math

import jax
import jax.numpy as jnp
from jax import lax
from jax.experimental import pallas as pl
from jax.experimental.pallas import tpu as pltpu

# ----------------------------- model hyper-parameters -----------------------------
V_IN = 12          # len(inp_voc)
V_OUT = 10         # len(out_voc)
V_IN_PAD = 16      # one-hot width for input tokens inside the kernel
V_OUT_PAD = 16     # one-hot width for output tokens inside the kernel
EMB = 16           # emb_size
HID = 32           # hid_size
INP_EOS = 2        # inp_voc.eos_ix
OUT_BOS = 1        # out_voc.bos_ix
OUT_EOS = 2        # out_voc.eos_ix
V_PAD = 128        # lane-dense logits width inside the kernel
EPS = 1e-30
NEG_INF = -1e30    # finite "minus infinity" (avoids inf-inf NaNs on padded lanes)


# ===================================================================================
# Fused Pallas kernel: whole forward pass in one launch
# ===================================================================================
def fused_forward_kernel(
        # token ids (time-major) + end-of-sequence index + precomputed BOS log-softmax row
        x_tok_ref, d_tok_ref, eidx_ref, bos_ref,
        # enc0 forward / backward directions (W_ih pre-fused with emb_inp, rows padded to 16)
        e0f_wt, e0f_whh, e0f_b,
        e0b_wt, e0b_whh, e0b_b,
        # enc1
        e1_wih, e1_whh, e1_b,
        # dec_start Linear
        ds_w, ds_b,
        # dec0 LSTMCell: token-fused emb half, feed half, recurrence, bias
        d0_wt, d0_wih_h, d0_whh, d0_b,
        # dec1 LSTMCell (zero hidden each step, as in source)
        d1_wih_a, d1_wih_b, d1_b,
        # logits Linear (padded to V_PAD lanes; pad lanes of bias = NEG_INF)
        lg_w, lg_b,
        # output: log-probs [T_out, B_pad, V_PAD]
        out_ref,
        # scratch: enc0 forward / backward hidden slabs, [T_in, B_pad, HID] each
        seq_f_scr, seq_b_scr):
    T_in, B, _ = x_tok_ref.shape
    T_dec = d_tok_ref.shape[0]
    H = HID
    G = 4 * H
    zeros_bh = jnp.zeros((B, H), jnp.float32)

    # hoisted lane iotas for in-kernel one-hot token lookup
    lane_in = lax.broadcasted_iota(jnp.int32, (B, V_IN_PAD), 1)
    lane_out = lax.broadcasted_iota(jnp.int32, (B, V_OUT_PAD), 1)

    def onehot_in(tok):        # tok [B, 1] int32 -> [B, V_IN_PAD] f32
        return (lane_in == tok).astype(jnp.float32)

    def onehot_out(tok):       # tok [B, 1] int32 -> [B, V_OUT_PAD] f32
        return (lane_out == tok).astype(jnp.float32)

    def lstm_gates(gates, c_prev):
        # one full-vreg sigmoid + one full-vreg tanh, then slice i/f/g/o (PyTorch gate order)
        sig = jax.nn.sigmoid(gates)
        th = jnp.tanh(gates)
        i = sig[:, 0 * H:1 * H]
        f = sig[:, 1 * H:2 * H]
        g = th[:, 2 * H:3 * H]
        o = sig[:, 3 * H:4 * H]
        c_new = f * c_prev + i * g
        h_new = o * jnp.tanh(c_new)
        return h_new, c_new

    # ---------------- enc0: forward + backward directions interleaved ----------------
    # (independent recurrent chains -> the VLIW scheduler hides one direction's latency
    #  under the other's work; weights/biases hoisted out of the unrolled loop)
    Wf_t = e0f_wt[...]
    Wf_h = e0f_whh[...]
    bf = jnp.broadcast_to(e0f_b[...], (B, G))
    Wb_t = e0b_wt[...]
    Wb_h = e0b_whh[...]
    bb = jnp.broadcast_to(e0b_b[...], (B, G))

    def enc0_body(t, carry):
        hf, cf, hb, cb = carry
        rt = T_in - 1 - t
        oh_f = onehot_in(x_tok_ref[t])
        oh_b = onehot_in(x_tok_ref[rt])
        gf = (jnp.dot(oh_f, Wf_t, preferred_element_type=jnp.float32)
              + jnp.dot(hf, Wf_h, preferred_element_type=jnp.float32) + bf)
        gb = (jnp.dot(oh_b, Wb_t, preferred_element_type=jnp.float32)
              + jnp.dot(hb, Wb_h, preferred_element_type=jnp.float32) + bb)
        hf, cf = lstm_gates(gf, cf)
        hb, cb = lstm_gates(gb, cb)
        seq_f_scr[t] = hf
        seq_b_scr[rt] = hb
        return (hf, cf, hb, cb)

    # final backward-direction state == PyTorch cx1[0][-1], cx1[1][-1]
    _, _, h_bwd, c_bwd = lax.fori_loop(
        0, T_in, enc0_body, (zeros_bh, zeros_bh, zeros_bh, zeros_bh), unroll=True)

    # ---------------- enc1 + in-loop selection of enc_seq1/enc_seq2 at end_index -------------
    W1_i = e1_wih[...]
    W1_h = e1_whh[...]
    b1 = jnp.broadcast_to(e1_b[...], (B, G))
    eidx = eidx_ref[...]                           # [B, 1] int32

    def enc1_body(t, carry):
        h, c, last1, last2 = carry
        x1_t = seq_f_scr[t] + seq_b_scr[t]         # fwd+bwd add on read (no RMW on scratch)
        g = (jnp.dot(x1_t, W1_i, preferred_element_type=jnp.float32)
             + jnp.dot(h, W1_h, preferred_element_type=jnp.float32) + b1)
        h, c = lstm_gates(g, c)
        sel = (eidx == t)                          # [B, 1] -> broadcast over HID lanes
        last1 = jnp.where(sel, x1_t, last1)
        last2 = jnp.where(sel, h, last2)
        return (h, c, last1, last2)

    _, _, enc_last1, enc_last2 = lax.fori_loop(
        0, T_in, enc1_body, (zeros_bh, zeros_bh, zeros_bh, zeros_bh), unroll=True)

    # ---------------- dec_start Linear ----------------
    Wds = ds_w[...]
    bds = jnp.broadcast_to(ds_b[...], (B, H))
    dec_start1 = jnp.dot(enc_last1, Wds, preferred_element_type=jnp.float32) + bds
    dec_start2 = jnp.dot(enc_last2, Wds, preferred_element_type=jnp.float32) + bds

    # ---------------- first output row: precomputed BOS log-softmax constant ----------------
    out_ref[0] = jnp.broadcast_to(bos_ref[...], (B, V_PAD))

    # ---------------- teacher-forced decoder ----------------
    W0_t = d0_wt[...]
    W0_f = d0_wih_h[...]
    W0_h = d0_whh[...]
    b0 = jnp.broadcast_to(d0_b[...], (B, G))
    W1a = d1_wih_a[...]
    W1b = d1_wih_b[...]
    b1d = jnp.broadcast_to(d1_b[...], (B, G))
    Wlg = lg_w[...]
    blg = jnp.broadcast_to(lg_b[...], (B, V_PAD))  # pad lanes already NEG_INF -> mask-free softmax

    def log_softmax_row(z):
        # pad lanes sit at ~NEG_INF via the bias, so exp() underflows to 0 with no masking ops
        m = jnp.max(z, axis=-1, keepdims=True)
        e = jnp.exp(z - m)
        s = jnp.sum(e, axis=-1, keepdims=True)
        return z - m - jnp.log(s)

    # TODO(synk): on v6e/v7x the three dec0 gate matmuls could be fused into one MXU push via a
    #             staged [B,128] operand row (or MRB accumulation on v7x); skipped here because
    #             the staging VMEM round-trip lands on the latency-bound recurrent chain.
    def dec_body(t, carry):
        feed1, h1, c1, h2 = carry
        oh_t = onehot_out(d_tok_ref[t])

        # dec0: input = concat(prev_emb, feed1) via split matmuls, standard LSTMCell recurrence
        # TODO(synk): source passes prev_emb alone, which shape-mismatches LSTMCell(emb+hid, hid).
        gates0 = (jnp.dot(oh_t, W0_t, preferred_element_type=jnp.float32)
                  + jnp.dot(feed1, W0_f, preferred_element_type=jnp.float32)
                  + jnp.dot(h1, W0_h, preferred_element_type=jnp.float32) + b0)
        h1n, c1n = lstm_gates(gates0, c1)

        # dec1: input = concat(h1n, h2_prev); hidden defaults to zeros (as in source), so the
        # forget-gate term and the W_hh contribution vanish.
        gates1 = (jnp.dot(h1n, W1a, preferred_element_type=jnp.float32)
                  + jnp.dot(h2, W1b, preferred_element_type=jnp.float32) + b1d)
        sig1 = jax.nn.sigmoid(gates1)
        th1 = jnp.tanh(gates1)
        i1 = sig1[:, 0 * H:1 * H]
        g1 = th1[:, 2 * H:3 * H]
        o1 = sig1[:, 3 * H:4 * H]
        c2n = i1 * g1
        h2n = o1 * jnp.tanh(c2n)

        logits_t = jnp.dot(h2n, Wlg, preferred_element_type=jnp.float32) + blg
        out_ref[1 + t] = log_softmax_row(logits_t)

        # state update mirrors source: [new_dec_state1, cx1, new_dec_state2, cx2]
        return (h1n, h1n, c1n, h2n)

    lax.fori_loop(0, T_dec, dec_body,
                  (dec_start1, h_bwd, c_bwd, dec_start2), unroll=True)


# ===================================================================================
# Pallas wrapper (single launch, whole arrays resident in VMEM)
# ===================================================================================
def fused_forward(x_tok, d_tok, end_idx, p):
    """x_tok: [T_in, B_pad, 1] int32, d_tok: [T_dec, B_pad, 1] int32, end_idx: [B_pad, 1] int32.
    Returns log-probs [T_dec+1, B_pad, V_PAD] (lane-dense; slice to V_OUT outside)."""
    T_in, B_pad, _ = x_tok.shape
    T_out = d_tok.shape[0] + 1

    vmem = pl.BlockSpec(memory_space=pltpu.MemorySpace.VMEM)
    args = (x_tok, d_tok, end_idx, p["bos_logp"],
            p["enc0_f_wt"], p["enc0_f_whh"], p["enc0_f_b"],
            p["enc0_b_wt"], p["enc0_b_whh"], p["enc0_b_b"],
            p["enc1_wih"], p["enc1_whh"], p["enc1_b"],
            p["dec_start_w"], p["dec_start_b"],
            p["dec0_wt"], p["dec0_wih_hid"], p["dec0_whh"], p["dec0_b"],
            p["dec1_wih_a"], p["dec1_wih_b"], p["dec1_b"],
            p["logits_w_pad"], p["logits_b_pad"])
    return pl.pallas_call(
        fused_forward_kernel,
        out_shape=jax.ShapeDtypeStruct((T_out, B_pad, V_PAD), jnp.float32),
        in_specs=[vmem] * len(args),
        out_specs=vmem,
        scratch_shapes=[pltpu.VMEM((T_in, B_pad, HID), jnp.float32),
                        pltpu.VMEM((T_in, B_pad, HID), jnp.float32)],
        compiler_params=pltpu.CompilerParams(vmem_limit_bytes=16 * 1024 * 1024),
    )(*args)


# ===================================================================================
# Plain-JAX glue (length inference, padding, final slice) + parameter construction
# ===================================================================================
def infer_length(seq, eos_ix):
    """seq: int [B, T]; returns int32 [B] (same semantics as the PyTorch helper)."""
    is_eos = (seq == eos_ix).astype(jnp.float32)
    is_eos = jnp.concatenate([jnp.zeros_like(is_eos[:, :1]), is_eos[:, :-1]], axis=1)
    count_eos = jnp.cumsum(is_eos, axis=1)
    mask = (count_eos == 0).astype(jnp.float32)
    return jnp.sum(mask, axis=1).astype(jnp.int32)


def init_params(key):
    ks = jax.random.split(key, 18)
    s = 1.0 / math.sqrt(HID)
    u = lambda k, shape: jax.random.uniform(k, shape, jnp.float32, -s, s)
    p = {
        "emb_inp": jax.random.normal(ks[0], (V_IN, EMB), jnp.float32) * 0.1,
        "emb_out": jax.random.normal(ks[1], (V_OUT, EMB), jnp.float32) * 0.1,
        # enc0: bidirectional LSTM(EMB -> HID) (weights stored transposed: [in, 4H])
        "enc0_f_wih": u(ks[2], (EMB, 4 * HID)), "enc0_f_whh": u(ks[3], (HID, 4 * HID)),
        "enc0_f_b": u(ks[4], (1, 4 * HID)),
        "enc0_b_wih": u(ks[5], (EMB, 4 * HID)), "enc0_b_whh": u(ks[6], (HID, 4 * HID)),
        "enc0_b_b": u(ks[7], (1, 4 * HID)),
        # enc1: LSTM(HID -> HID)
        "enc1_wih": u(ks[8], (HID, 4 * HID)), "enc1_whh": u(ks[9], (HID, 4 * HID)),
        "enc1_b": u(ks[10], (1, 4 * HID)),
        # dec_start: Linear(HID -> HID)
        "dec_start_w": u(ks[11], (HID, HID)), "dec_start_b": u(ks[12], (1, HID)),
        # dec0: LSTMCell(EMB + HID -> HID), weight_ih split into emb / feed halves
        "dec0_wih_emb": u(ks[13], (EMB, 4 * HID)), "dec0_wih_hid": u(ks[14], (HID, 4 * HID)),
        "dec0_whh": u(ks[15], (HID, 4 * HID)), "dec0_b": u(ks[16], (1, 4 * HID)),
        # dec1: LSTMCell(2*HID -> HID); W_hh unused because hidden is zero (as in source)
        "dec1_wih_a": u(ks[17], (HID, 4 * HID)),
        "dec1_wih_b": u(jax.random.fold_in(ks[17], 1), (HID, 4 * HID)),
        "dec1_b": u(jax.random.fold_in(ks[17], 2), (1, 4 * HID)),
        # logits: Linear(HID -> V_OUT)
        "logits_w": u(jax.random.fold_in(ks[17], 3), (HID, V_OUT)),
        "logits_b": u(jax.random.fold_in(ks[17], 4), (1, V_OUT)),
    }

    # ---- derived, kernel-ready tensors (built ONCE so no per-call XLA glue is needed) ----
    def pad_rows(a, n):
        return jnp.zeros((n, a.shape[1]), jnp.float32).at[:a.shape[0]].set(a)

    # token-fused gate weights: one-hot(token) @ (emb @ W_ih) == W_ih(emb[token])
    p["enc0_f_wt"] = pad_rows(p["emb_inp"] @ p["enc0_f_wih"], V_IN_PAD)
    p["enc0_b_wt"] = pad_rows(p["emb_inp"] @ p["enc0_b_wih"], V_IN_PAD)
    p["dec0_wt"] = pad_rows(p["emb_out"] @ p["dec0_wih_emb"], V_OUT_PAD)
    # lane-dense logits weights; pad lanes of the bias carry NEG_INF (mask baked into bias)
    p["logits_w_pad"] = jnp.zeros((HID, V_PAD), jnp.float32).at[:, :V_OUT].set(p["logits_w"])
    p["logits_b_pad"] = jnp.full((1, V_PAD), NEG_INF,
                                 jnp.float32).at[0, :V_OUT].set(p["logits_b"][0])
    # precomputed BOS row: log_softmax(log(one_hot(bos, V_OUT) + eps))
    bos_logits = jnp.full((V_OUT,), math.log(EPS),
                          jnp.float32).at[OUT_BOS].set(math.log(1.0 + EPS))
    p["bos_logp"] = jnp.full((1, V_PAD), NEG_INF,
                             jnp.float32).at[0, :V_OUT].set(jax.nn.log_softmax(bos_logits))
    return p


@jax.jit
def forward(params, inp, out):
    """inp: int32 [B, T_in], out: int32 [B, T_out] -> log-probs [B, T_out, V_OUT]."""
    B, T_in = inp.shape
    _, T_out = out.shape
    B_pad = max(8, ((B + 7) // 8) * 8)            # pad batch to a full sublane group
    pad = B_pad - B

    inp_p = jnp.pad(inp, ((0, pad), (0, 0)))      # pad rows use token 0 (valid; sliced off later)
    out_p = jnp.pad(out, ((0, pad), (0, 0)))

    end_index = infer_length(inp_p, INP_EOS)
    end_index = jnp.minimum(end_index, T_in - 1).astype(jnp.int32)[:, None]   # [B_pad, 1]

    # embedding lookups happen INSIDE the kernel (one-hot @ fused weights); only tiny int32
    # token-id transposes remain here: kernel sees time-major [T, B_pad, 1]
    x_tok = jnp.transpose(inp_p, (1, 0))[:, :, None].astype(jnp.int32)
    d_tok = jnp.transpose(out_p[:, :-1], (1, 0))[:, :, None].astype(jnp.int32)

    logp_pad = fused_forward(x_tok, d_tok, end_index, params)   # [T_out, B_pad, V_PAD]
    return jnp.transpose(logp_pad[:, :B, :V_OUT], (1, 0, 2))

# TODO(synk): translate() (sampling loop with data-dependent termination) is not implemented;
#             only the teacher-forced forward() is reproduced.
# TODO(synk): if batch grows, add a leading grid axis over batch tiles with
#             dimension_semantics=("parallel",) instead of a core_map split of enc0.


# ===================================================================================
if __name__ == "__main__":
    key = jax.random.PRNGKey(0)
    k_param, k_inp, k_out = jax.random.split(key, 3)

    params = init_params(k_param)

    B, T_IN, T_OUT = 2, 8, 8
    inp = jax.random.randint(k_inp, (B, T_IN), 3, V_IN, dtype=jnp.int32)
    inp = inp.at[:, -2].set(INP_EOS)              # ensure an eos token appears
    out = jax.random.randint(k_out, (B, T_OUT), 3, V_OUT, dtype=jnp.int32)
    out = out.at[:, 0].set(OUT_BOS).at[:, -1].set(OUT_EOS)

    logp = jax.block_until_ready(forward(params, inp, out))

    assert logp.shape == (B, T_OUT, V_OUT), logp.shape
    assert bool(jnp.all(jnp.isfinite(logp)))
    # each row is a log-softmax -> exp-sums to 1
    assert bool(jnp.allclose(jnp.exp(logp).sum(-1), 1.0, atol=1e-4))
    print("KERNEL_OK")
</pallas_src>

<mosaic_0001>
module attributes {stable_mosaic.version = 11 : i64} {
  func.func @fused_forward_kernel(%arg0: memref<8x8x1xi32, #tpu.memory_space<vmem>>, %arg1: memref<7x8x1xi32, #tpu.memory_space<vmem>>, %arg2: memref<8x1xi32, #tpu.memory_space<vmem>>, %arg3: memref<1x128xf32, #tpu.memory_space<vmem>>, %arg4: memref<16x128xf32, #tpu.memory_space<vmem>>, %arg5: memref<32x128xf32, #tpu.memory_space<vmem>>, %arg6: memref<1x128xf32, #tpu.memory_space<vmem>>, %arg7: memref<16x128xf32, #tpu.memory_space<vmem>>, %arg8: memref<32x128xf32, #tpu.memory_space<vmem>>, %arg9: memref<1x128xf32, #tpu.memory_space<vmem>>, %arg10: memref<32x128xf32, #tpu.memory_space<vmem>>, %arg11: memref<32x128xf32, #tpu.memory_space<vmem>>, %arg12: memref<1x128xf32, #tpu.memory_space<vmem>>, %arg13: memref<32x32xf32, #tpu.memory_space<vmem>>, %arg14: memref<1x32xf32, #tpu.memory_space<vmem>>, %arg15: memref<16x128xf32, #tpu.memory_space<vmem>>, %arg16: memref<32x128xf32, #tpu.memory_space<vmem>>, %arg17: memref<32x128xf32, #tpu.memory_space<vmem>>, %arg18: memref<1x128xf32, #tpu.memory_space<vmem>>, %arg19: memref<32x128xf32, #tpu.memory_space<vmem>>, %arg20: memref<32x128xf32, #tpu.memory_space<vmem>>, %arg21: memref<1x128xf32, #tpu.memory_space<vmem>>, %arg22: memref<32x128xf32, #tpu.memory_space<vmem>>, %arg23: memref<1x128xf32, #tpu.memory_space<vmem>>, %arg24: memref<8x8x128xf32, #tpu.memory_space<vmem>>, %arg25: memref<8x8x32xf32, #tpu.memory_space<vmem>>, %arg26: memref<8x8x32xf32, #tpu.memory_space<vmem>>) attributes {dimension_semantics = [], scalar_prefetch = 0 : i64, scratch_operands = 2 : i64, tpu.core_type = #tpu.core_type<tc>} {
    %cst = arith.constant 0.000000e+00 : f32
    %0 = vector.broadcast %cst : f32 to vector<8x32xf32>
    %1 = tpu.iota {dimensions = array<i32: 1>} : vector<8x16xi32>
    %2 = tpu.iota {dimensions = array<i32: 1>} : vector<8x16xi32>
    %c0 = arith.constant 0 : index
    %c0_0 = arith.constant 0 : index
    %3 = vector.load %arg4[%c0, %c0_0] : memref<16x128xf32, #tpu.memory_space<vmem>>, vector<16x128xf32>
    %c0_1 = arith.constant 0 : index
    %c0_2 = arith.constant 0 : index
    %4 = vector.load %arg5[%c0_1, %c0_2] : memref<32x128xf32, #tpu.memory_space<vmem>>, vector<32x128xf32>
    %c0_3 = arith.constant 0 : index
    %c0_4 = arith.constant 0 : index
    %5 = vector.load %arg6[%c0_3, %c0_4] : memref<1x128xf32, #tpu.memory_space<vmem>>, vector<1x128xf32>
    %6 = vector.shape_cast %5 : vector<1x128xf32> to vector<1x128xf32>
    %7 = vector.broadcast %6 : vector<1x128xf32> to vector<8x128xf32>
    %c0_5 = arith.constant 0 : index
    %c0_6 = arith.constant 0 : index
    %8 = vector.load %arg7[%c0_5, %c0_6] : memref<16x128xf32, #tpu.memory_space<vmem>>, vector<16x128xf32>
    %c0_7 = arith.constant 0 : index
    %c0_8 = arith.constant 0 : index
    %9 = vector.load %arg8[%c0_7, %c0_8] : memref<32x128xf32, #tpu.memory_space<vmem>>, vector<32x128xf32>
    %c0_9 = arith.constant 0 : index
    %c0_10 = arith.constant 0 : index
    %10 = vector.load %arg9[%c0_9, %c0_10] : memref<1x128xf32, #tpu.memory_space<vmem>>, vector<1x128xf32>
    %11 = vector.shape_cast %10 : vector<1x128xf32> to vector<1x128xf32>
    %12 = vector.broadcast %11 : vector<1x128xf32> to vector<8x128xf32>
    %c0_i32 = arith.constant 0 : i32
    %c7_i32 = arith.constant 7 : i32
    %13 = arith.subi %c7_i32, %c0_i32 : i32
    %14 = arith.index_cast %c0_i32 : i32 to index
    %c0_11 = arith.constant 0 : index
    %c0_12 = arith.constant 0 : index
    %15 = vector.load %arg0[%14, %c0_11, %c0_12] : memref<8x8x1xi32, #tpu.memory_space<vmem>>, vector<1x8x1xi32>
    %16 = vector.shape_cast %15 : vector<1x8x1xi32> to vector<8x1xi32>
    %17 = vector.broadcast %16 : vector<8x1xi32> to vector<8x16xi32>
    %18 = arith.cmpi eq, %1, %17 : vector<8x16xi32>
    %19 = arith.extui %18 : vector<8x16xi1> to vector<8x16xi32>
    %20 = arith.sitofp %19 : vector<8x16xi32> to vector<8x16xf32>
    %21 = arith.index_cast %13 : i32 to index
    %c0_13 = arith.constant 0 : index
    %c0_14 = arith.constant 0 : index
    %22 = vector.load %arg0[%21, %c0_13, %c0_14] : memref<8x8x1xi32, #tpu.memory_space<vmem>>, vector<1x8x1xi32>
    %23 = vector.shape_cast %22 : vector<1x8x1xi32> to vector<8x1xi32>
    %24 = vector.broadcast %23 : vector<8x1xi32> to vector<8x16xi32>
    %25 = arith.cmpi eq, %1, %24 : vector<8x16xi32>
    %26 = arith.extui %25 : vector<8x16xi1> to vector<8x16xi32>
    %27 = arith.sitofp %26 : vector<8x16xi32> to vector<8x16xf32>
    %cst_15 = arith.constant dense<0.000000e+00> : vector<8x128xf32>
    %28 = tpu.matmul %20, %3, %cst_15 {dimension_numbers = #tpu.dot_dimension_numbers<[1], [0], [0], [1], [0, 0, 1, 1], [], []>} : vector<8x16xf32>, vector<16x128xf32>, vector<8x128xf32> -> vector<8x128xf32>
    %cst_16 = arith.constant dense<0.000000e+00> : vector<8x128xf32>
    %29 = tpu.matmul %0, %4, %cst_16 {dimension_numbers = #tpu.dot_dimension_numbers<[1], [0], [0], [1], [0, 0, 1, 1], [], []>} : vector<8x32xf32>, vector<32x128xf32>, vector<8x128xf32> -> vector<8x128xf32>
    %30 = arith.addf %28, %29 : vector<8x128xf32>
    %31 = arith.addf %30, %7 : vector<8x128xf32>
    %cst_17 = arith.constant dense<0.000000e+00> : vector<8x128xf32>
    %32 = tpu.matmul %27, %8, %cst_17 {dimension_numbers = #tpu.dot_dimension_numbers<[1], [0], [0], [1], [0, 0, 1, 1], [], []>} : vector<8x16xf32>, vector<16x128xf32>, vector<8x128xf32> -> vector<8x128xf32>
    %cst_18 = arith.constant dense<0.000000e+00> : vector<8x128xf32>
    %33 = tpu.matmul %0, %9, %cst_18 {dimension_numbers = #tpu.dot_dimension_numbers<[1], [0], [0], [1], [0, 0, 1, 1], [], []>} : vector<8x32xf32>, vector<32x128xf32>, vector<8x128xf32> -> vector<8x128xf32>
    %34 = arith.addf %32, %33 : vector<8x128xf32>
    %35 = arith.addf %34, %12 : vector<8x128xf32>
    %36 = arith.negf %31 : vector<8x128xf32>
    %37 = math.exp %36 : vector<8x128xf32>
    %cst_19 = arith.constant 1.000000e+00 : f32
    %38 = vector.broadcast %cst_19 : f32 to vector<8x128xf32>
    %39 = arith.addf %38, %37 : vector<8x128xf32>
    %40 = arith.divf %38, %39 : vector<8x128xf32>
    %41 = math.tanh %31 : vector<8x128xf32>
    %42 = vector.extract_strided_slice %40 {offsets = [0, 0], sizes = [8, 32], strides = [1, 1]} : vector<8x128xf32> to vector<8x32xf32>
    %43 = vector.extract_strided_slice %40 {offsets = [0, 32], sizes = [8, 32], strides = [1, 1]} : vector<8x128xf32> to vector<8x32xf32>
    %44 = vector.extract_strided_slice %41 {offsets = [0, 64], sizes = [8, 32], strides = [1, 1]} : vector<8x128xf32> to vector<8x32xf32>
    %45 = vector.extract_strided_slice %40 {offsets = [0, 96], sizes = [8, 32], strides = [1, 1]} : vector<8x128xf32> to vector<8x32xf32>
    %46 = arith.mulf %43, %0 : vector<8x32xf32>
    %47 = arith.mulf %42, %44 : vector<8x32xf32>
    %48 = arith.addf %46, %47 : vector<8x32xf32>
    %49 = math.tanh %48 : vector<8x32xf32>
    %50 = arith.mulf %45, %49 : vector<8x32xf32>
    %51 = arith.negf %35 : vector<8x128xf32>
    %52 = math.exp %51 : vector<8x128xf32>
    %cst_20 = arith.constant 1.000000e+00 : f32
    %53 = vector.broadcast %cst_20 : f32 to vector<8x128xf32>
    %54 = arith.addf %53, %52 : vector<8x128xf32>
    %55 = arith.divf %53, %54 : vector<8x128xf32>
    %56 = math.tanh %35 : vector<8x128xf32>
    %57 = vector.extract_strided_slice %55 {offsets = [0, 0], sizes = [8, 32], strides = [1, 1]} : vector<8x128xf32> to vector<8x32xf32>
    %58 = vector.extract_strided_slice %55 {offsets = [0, 32], sizes = [8, 32], strides = [1, 1]} : vector<8x128xf32> to vector<8x32xf32>
    %59 = vector.extract_strided_slice %56 {offsets = [0, 64], sizes = [8, 32], strides = [1, 1]} : vector<8x128xf32> to vector<8x32xf32>
    %60 = vector.extract_strided_slice %55 {offsets = [0, 96], sizes = [8, 32], strides = [1, 1]} : vector<8x128xf32> to vector<8x32xf32>
    %61 = arith.mulf %58, %0 : vector<8x32xf32>
    %62 = arith.mulf %57, %59 : vector<8x32xf32>
    %63 = arith.addf %61, %62 : vector<8x32xf32>
    %64 = math.tanh %63 : vector<8x32xf32>
    %65 = arith.mulf %60, %64 : vector<8x32xf32>
    %66 = arith.index_cast %c0_i32 : i32 to index
    %c0_21 = arith.constant 0 : index
    %c0_22 = arith.constant 0 : index
    %67 = vector.load %arg25[%66, %c0_21, %c0_22] : memref<8x8x32xf32, #tpu.memory_space<vmem>>, vector<1x8x32xf32>
    %68 = vector.shape_cast %67 : vector<1x8x32xf32> to vector<8x32xf32>
    %69 = vector.shape_cast %50 : vector<8x32xf32> to vector<1x8x32xf32>
    tpu.vector_store %arg25[%66, %c0_21, %c0_22], %69 {strides = array<i32>} : memref<8x8x32xf32, #tpu.memory_space<vmem>>, vector<1x8x32xf32>,
    %70 = arith.index_cast %13 : i32 to index
    %c0_23 = arith.constant 0 : index
    %c0_24 = arith.constant 0 : index
    %71 = vector.load %arg26[%70, %c0_23, %c0_24] : memref<8x8x32xf32, #tpu.memory_space<vmem>>, vector<1x8x32xf32>
    %72 = vector.shape_cast %71 : vector<1x8x32xf32> to vector<8x32xf32>
    %73 = vector.shape_cast %65 : vector<8x32xf32> to vector<1x8x32xf32>
    tpu.vector_store %arg26[%70, %c0_23, %c0_24], %73 {strides = array<i32>} : memref<8x8x32xf32, #tpu.memory_space<vmem>>, vector<1x8x32xf32>,
    %c1_i32 = arith.constant 1 : i32
    %c7_i32_25 = arith.constant 7 : i32
    %74 = arith.subi %c7_i32_25, %c1_i32 : i32
    %75 = arith.index_cast %c1_i32 : i32 to index
    %c0_26 = arith.constant 0 : index
    %c0_27 = arith.constant 0 : index
    %76 = vector.load %arg0[%75, %c0_26, %c0_27] : memref<8x8x1xi32, #tpu.memory_space<vmem>>, vector<1x8x1xi32>
    %77 = vector.shape_cast %76 : vector<1x8x1xi32> to vector<8x1xi32>
    %78 = vector.broadcast %77 : vector<8x1xi32> to vector<8x16xi32>
    %79 = arith.cmpi eq, %1, %78 : vector<8x16xi32>
    %80 = arith.extui %79 : vector<8x16xi1> to vector<8x16xi32>
    %81 = arith.sitofp %80 : vector<8x16xi32> to vector<8x16xf32>
    %82 = arith.index_cast %74 : i32 to index
    %c0_28 = arith.constant 0 : index
    %c0_29 = arith.constant 0 : index
    %83 = vector.load %arg0[%82, %c0_28, %c0_29] : memref<8x8x1xi32, #tpu.memory_space<vmem>>, vector<1x8x1xi32>
    %84 = vector.shape_cast %83 : vector<1x8x1xi32> to vector<8x1xi32>
    %85 = vector.broadcast %84 : vector<8x1xi32> to vector<8x16xi32>
    %86 = arith.cmpi eq, %1, %85 : vector<8x16xi32>
    %87 = arith.extui %86 : vector<8x16xi1> to vector<8x16xi32>
    %88 = arith.sitofp %87 : vector<8x16xi32> to vector<8x16xf32>
    %cst_30 = arith.constant dense<0.000000e+00> : vector<8x128xf32>
    %89 = tpu.matmul %81, %3, %cst_30 {dimension_numbers = #tpu.dot_dimension_numbers<[1], [0], [0], [1], [0, 0, 1, 1], [], []>} : vector<8x16xf32>, vector<16x128xf32>, vector<8x128xf32> -> vector<8x128xf32>
    %cst_31 = arith.constant dense<0.000000e+00> : vector<8x128xf32>
    %90 = tpu.matmul %50, %4, %cst_31 {dimension_numbers = #tpu.dot_dimension_numbers<[1], [0], [0], [1], [0, 0, 1, 1], [], []>} : vector<8x32xf32>, vector<32x128xf32>, vector<8x128xf32> -> vector<8x128xf32>
    %91 = arith.addf %89, %90 : vector<8x128xf32>
    %92 = arith.addf %91, %7 : vector<8x128xf32>
    %cst_32 = arith.constant dense<0.000000e+00> : vector<8x128xf32>
    %93 = tpu.matmul %88, %8, %cst_32 {dimension_numbers = #tpu.dot_dimension_numbers<[1], [0], [0], [1], [0, 0, 1, 1], [], []>} : vector<8x16xf32>, vector<16x128xf32>, vector<8x128xf32> -> vector<8x128xf32>
    %cst_33 = arith.constant dense<0.000000e+00> : vector<8x128xf32>
    %94 = tpu.matmul %65, %9, %cst_33 {dimension_numbers = #tpu.dot_dimension_numbers<[1], [0], [0], [1], [0, 0, 1, 1], [], []>} : vector<8x32xf32>, vector<32x128xf32>, vector<8x128xf32> -> vector<8x128xf32>
    %95 = arith.addf %93, %94 : vector<8x128xf32>
    %96 = arith.addf %95, %12 : vector<8x128xf32>
    %97 = arith.negf %92 : vector<8x128xf32>
    %98 = math.exp %97 : vector<8x128xf32>
    %cst_34 = arith.constant 1.000000e+00 : f32
    %99 = vector.broadcast %cst_34 : f32 to vector<8x128xf32>
    %100 = arith.addf %99, %98 : vector<8x128xf32>
    %101 = arith.divf %99, %100 : vector<8x128xf32>
    %102 = math.tanh %92 : vector<8x128xf32>
    %103 = vector.extract_strided_slice %101 {offsets = [0, 0], sizes = [8, 32], strides = [1, 1]} : vector<8x128xf32> to vector<8x32xf32>
    %104 = vector.extract_strided_slice %101 {offsets = [0, 32], sizes = [8, 32], strides = [1, 1]} : vector<8x128xf32> to vector<8x32xf32>
    %105 = vector.extract_strided_slice %102 {offsets = [0, 64], sizes = [8, 32], strides = [1, 1]} : vector<8x128xf32> to vector<8x32xf32>
    %106 = vector.extract_strided_slice %101 {offsets = [0, 96], sizes = [8, 32], strides = [1, 1]} : vector<8x128xf32> to vector<8x32xf32>
    %107 = arith.mulf %104, %48 : vector<8x32xf32>
    %108 = arith.mulf %103, %105 : vector<8x32xf32>
    %109 = arith.addf %107, %108 : vector<8x32xf32>
    %110 = math.tanh %109 : vector<8x32xf32>
    %111 = arith.mulf %106, %110 : vector<8x32xf32>
    %112 = arith.negf %96 : vector<8x128xf32>
    %113 = math.exp %112 : vector<8x128xf32>
    %cst_35 = arith.constant 1.000000e+00 : f32
    %114 = vector.broadcast %cst_35 : f32 to vector<8x128xf32>
    %115 = arith.addf %114, %113 : vector<8x128xf32>
    %116 = arith.divf %114, %115 : vector<8x128xf32>
    %117 = math.tanh %96 : vector<8x128xf32>
    %118 = vector.extract_strided_slice %116 {offsets = [0, 0], sizes = [8, 32], strides = [1, 1]} : vector<8x128xf32> to vector<8x32xf32>
    %119 = vector.extract_strided_slice %116 {offsets = [0, 32], sizes = [8, 32], strides = [1, 1]} : vector<8x128xf32> to vector<8x32xf32>
    %120 = vector.extract_strided_slice %117 {offsets = [0, 64], sizes = [8, 32], strides = [1, 1]} : vector<8x128xf32> to vector<8x32xf32>
    %121 = vector.extract_strided_slice %116 {offsets = [0, 96], sizes = [8, 32], strides = [1, 1]} : vector<8x128xf32> to vector<8x32xf32>
    %122 = arith.mulf %119, %63 : vector<8x32xf32>
    %123 = arith.mulf %118, %120 : vector<8x32xf32>
    %124 = arith.addf %122, %123 : vector<8x32xf32>
    %125 = math.tanh %124 : vector<8x32xf32>
    %126 = arith.mulf %121, %125 : vector<8x32xf32>
    %127 = arith.index_cast %c1_i32 : i32 to index
    %c0_36 = arith.constant 0 : index
    %c0_37 = arith.constant 0 : index
    %128 = vector.load %arg25[%127, %c0_36, %c0_37] : memref<8x8x32xf32, #tpu.memory_space<vmem>>, vector<1x8x32xf32>
    %129 = vector.shape_cast %128 : vector<1x8x32xf32> to vector<8x32xf32>
    %130 = vector.shape_cast %111 : vector<8x32xf32> to vector<1x8x32xf32>
    tpu.vector_store %arg25[%127, %c0_36, %c0_37], %130 {strides = array<i32>} : memref<8x8x32xf32, #tpu.memory_space<vmem>>, vector<1x8x32xf32>,
    %131 = arith.index_cast %74 : i32 to index
    %c0_38 = arith.constant 0 : index
    %c0_39 = arith.constant 0 : index
    %132 = vector.load %arg26[%131, %c0_38, %c0_39] : memref<8x8x32xf32, #tpu.memory_space<vmem>>, vector<1x8x32xf32>
    %133 = vector.shape_cast %132 : vector<1x8x32xf32> to vector<8x32xf32>
    %134 = vector.shape_cast %126 : vector<8x32xf32> to vector<1x8x32xf32>
    tpu.vector_store %arg26[%131, %c0_38, %c0_39], %134 {strides = array<i32>} : memref<8x8x32xf32, #tpu.memory_space<vmem>>, vector<1x8x32xf32>,
    %c2_i32 = arith.constant 2 : i32
    %c7_i32_40 = arith.constant 7 : i32
    %135 = arith.subi %c7_i32_40, %c2_i32 : i32
    %136 = arith.index_cast %c2_i32 : i32 to index
    %c0_41 = arith.constant 0 : index
    %c0_42 = arith.constant 0 : index
    %137 = vector.load %arg0[%136, %c0_41, %c0_42] : memref<8x8x1xi32, #tpu.memory_space<vmem>>, vector<1x8x1xi32>
    %138 = vector.shape_cast %137 : vector<1x8x1xi32> to vector<8x1xi32>
    %139 = vector.broadcast %138 : vector<8x1xi32> to vector<8x16xi32>
    %140 = arith.cmpi eq, %1, %139 : vector<8x16xi32>
    %141 = arith.extui %140 : vector<8x16xi1> to vector<8x16xi32>
    %142 = arith.sitofp %141 : vector<8x16xi32> to vector<8x16xf32>
    %143 = arith.index_cast %135 : i32 to index
    %c0_43 = arith.constant 0 : index
    %c0_44 = arith.constant 0 : index
    %144 = vector.load %arg0[%143, %c0_43, %c0_44] : memref<8x8x1xi32, #tpu.memory_space<vmem>>, vector<1x8x1xi32>
    %145 = vector.shape_cast %144 : vector<1x8x1xi32> to vector<8x1xi32>
    %146 = vector.broadcast %145 : vector<8x1xi32> to vector<8x16xi32>
    %147 = arith.cmpi eq, %1, %146 : vector<8x16xi32>
    %148 = arith.extui %147 : vector<8x16xi1> to vector<8x16xi32>
    %149 = arith.sitofp %148 : vector<8x16xi32> to vector<8x16xf32>
    %cst_45 = arith.constant dense<0.000000e+00> : vector<8x128xf32>
    %150 = tpu.matmul %142, %3, %cst_45 {dimension_numbers = #tpu.dot_dimension_numbers<[1], [0], [0], [1], [0, 0, 1, 1], [], []>} : vector<8x16xf32>, vector<16x128xf32>, vector<8x128xf32> -> vector<8x128xf32>
    %cst_46 = arith.constant dense<0.000000e+00> : vector<8x128xf32>
    %151 = tpu.matmul %111, %4, %cst_46 {dimension_numbers = #tpu.dot_dimension_numbers<[1], [0], [0], [1], [0, 0, 1, 1], [], []>} : vector<8x32xf32>, vector<32x128xf32>, vector<8x128xf32> -> vector<8x128xf32>
    %152 = arith.addf %150, %151 : vector<8x128xf32>
    %153 = arith.addf %152, %7 : vector<8x128xf32>
    %cst_47 = arith.constant dense<0.000000e+00> : vector<8x128xf32>
    %154 = tpu.matmul %149, %8, %cst_47 {dimension_numbers = #tpu.dot_dimension_numbers<[1], [0], [0], [1], [0, 0, 1, 1], [], []>} : vector<8x16xf32>, vector<16x128xf32>, vector<8x128xf32> -> vector<8x128xf32>
    %cst_48 = arith.constant dense<0.000000e+00> : vector<8x128xf32>
    %155 = tpu.matmul %126, %9, %cst_48 {dimension_numbers = #tpu.dot_dimension_numbers<[1], [0], [0], [1], [0, 0, 1, 1], [], []>} : vector<8x32xf32>, vector<32x128xf32>, vector<8x128xf32> -> vector<8x128xf32>
    %156 = arith.addf %154, %155 : vector<8x128xf32>
    %157 = arith.addf %156, %12 : vector<8x128xf32>
    %158 = arith.negf %153 : vector<8x128xf32>
    %159 = math.exp %158 : vector<8x128xf32>
    %cst_49 = arith.constant 1.000000e+00 : f32
    %160 = vector.broadcast %cst_49 : f32 to vector<8x128xf32>
    %161 = arith.addf %160, %159 : vector<8x128xf32>
    %162 = arith.divf %160, %161 : vector<8x128xf32>
    %163 = math.tanh %153 : vector<8x128xf32>
    %164 = vector.extract_strided_slice %162 {offsets = [0, 0], sizes = [8, 32], strides = [1, 1]} : vector<8x128xf32> to vector<8x32xf32>
    %165 = vector.extract_strided_slice %162 {offsets = [0, 32], sizes = [8, 32], strides = [1, 1]} : vector<8x128xf32> to vector<8x32xf32>
    %166 = vector.extract_strided_slice %163 {offsets = [0, 64], sizes = [8, 32], strides = [1, 1]} : vector<8x128xf32> to vector<8x32xf32>
    %167 = vector.extract_strided_slice %162 {offsets = [0, 96], sizes = [8, 32], strides = [1, 1]} : vector<8x128xf32> to vector<8x32xf32>
    %168 = arith.mulf %165, %109 : vector<8x32xf32>
    %169 = arith.mulf %164, %166 : vector<8x32xf32>
    %170 = arith.addf %168, %169 : vector<8x32xf32>
    %171 = math.tanh %170 : vector<8x32xf32>
    %172 = arith.mulf %167, %171 : vector<8x32xf32>
    %173 = arith.negf %157 : vector<8x128xf32>
    %174 = math.exp %173 : vector<8x128xf32>
    %cst_50 = arith.constant 1.000000e+00 : f32
    %175 = vector.broadcast %cst_50 : f32 to vector<8x128xf32>
    %176 = arith.addf %175, %174 : vector<8x128xf32>
    %177 = arith.divf %175, %176 : vector<8x128xf32>
    %178 = math.tanh %157 : vector<8x128xf32>
    %179 = vector.extract_strided_slice %177 {offsets = [0, 0], sizes = [8, 32], strides = [1, 1]} : vector<8x128xf32> to vector<8x32xf32>
    %180 = vector.extract_strided_slice %177 {offsets = [0, 32], sizes = [8, 32], strides = [1, 1]} : vector<8x128xf32> to vector<8x32xf32>
    %181 = vector.extract_strided_slice %178 {offsets = [0, 64], sizes = [8, 32], strides = [1, 1]} : vector<8x128xf32> to vector<8x32xf32>
    %182 = vector.extract_strided_slice %177 {offsets = [0, 96], sizes = [8, 32], strides = [1, 1]} : vector<8x128xf32> to vector<8x32xf32>
    %183 = arith.mulf %180, %124 : vector<8x32xf32>
    %184 = arith.mulf %179, %181 : vector<8x32xf32>
    %185 = arith.addf %183, %184 : vector<8x32xf32>
    %186 = math.tanh %185 : vector<8x32xf32>
    %187 = arith.mulf %182, %186 : vector<8x32xf32>
    %188 = arith.index_cast %c2_i32 : i32 to index
    %c0_51 = arith.constant 0 : index
    %c0_52 = arith.constant 0 : index
    %189 = vector.load %arg25[%188, %c0_51, %c0_52] : memref<8x8x32xf32, #tpu.memory_space<vmem>>, vector<1x8x32xf32>
    %190 = vector.shape_cast %189 : vector<1x8x32xf32> to vector<8x32xf32>
    %191 = vector.shape_cast %172 : vector<8x32xf32> to vector<1x8x32xf32>
    tpu.vector_store %arg25[%188, %c0_51, %c0_52], %191 {strides = array<i32>} : memref<8x8x32xf32, #tpu.memory_space<vmem>>, vector<1x8x32xf32>,
    %192 = arith.index_cast %135 : i32 to index
    %c0_53 = arith.constant 0 : index
    %c0_54 = arith.constant 0 : index
    %193 = vector.load %arg26[%192, %c0_53, %c0_54] : memref<8x8x32xf32, #tpu.memory_space<vmem>>, vector<1x8x32xf32>
    %194 = vector.shape_cast %193 : vector<1x8x32xf32> to vector<8x32xf32>
    %195 = vector.shape_cast %187 : vector<8x32xf32> to vector<1x8x32xf32>
    tpu.vector_store %arg26[%192, %c0_53, %c0_54], %195 {strides = array<i32>} : memref<8x8x32xf32, #tpu.memory_space<vmem>>, vector<1x8x32xf32>,
    %c3_i32 = arith.constant 3 : i32
    %c7_i32_55 = arith.constant 7 : i32
    %196 = arith.subi %c7_i32_55, %c3_i32 : i32
    %197 = arith.index_cast %c3_i32 : i32 to index
    %c0_56 = arith.constant 0 : index
    %c0_57 = arith.constant 0 : index
    %198 = vector.load %arg0[%197, %c0_56, %c0_57] : memref<8x8x1xi32, #tpu.memory_space<vmem>>, vector<1x8x1xi32>
    %199 = vector.shape_cast %198 : vector<1x8x1xi32> to vector<8x1xi32>
    %200 = vector.broadcast %199 : vector<8x1xi32> to vector<8x16xi32>
    %201 = arith.cmpi eq, %1, %200 : vector<8x16xi32>
    %202 = arith.extui %201 : vector<8x16xi1> to vector<8x16xi32>
    %203 = arith.sitofp %202 : vector<8x16xi32> to vector<8x16xf32>
    %204 = arith.index_cast %196 : i32 to index
    %c0_58 = arith.constant 0 : index
    %c0_59 = arith.constant 0 : index
    %205 = vector.load %arg0[%204, %c0_58, %c0_59] : memref<8x8x1xi32, #tpu.memory_space<vmem>>, vector<1x8x1xi32>
    %206 = vector.shape_cast %205 : vector<1x8x1xi32> to vector<8x1xi32>
    %207 = vector.broadcast %206 : vector<8x1xi32> to vector<8x16xi32>
    %208 = arith.cmpi eq, %1, %207 : vector<8x16xi32>
    %209 = arith.extui %208 : vector<8x16xi1> to vector<8x16xi32>
    %210 = arith.sitofp %209 : vector<8x16xi32> to vector<8x16xf32>
    %cst_60 = arith.constant dense<0.000000e+00> : vector<8x128xf32>
    %211 = tpu.matmul %203, %3, %cst_60 {dimension_numbers = #tpu.dot_dimension_numbers<[1], [0], [0], [1], [0, 0, 1, 1], [], []>} : vector<8x16xf32>, vector<16x128xf32>, vector<8x128xf32> -> vector<8x128xf32>
    %cst_61 = arith.constant dense<0.000000e+00> : vector<8x128xf32>
    %212 = tpu.matmul %172, %4, %cst_61 {dimension_numbers = #tpu.dot_dimension_numbers<[1], [0], [0], [1], [0, 0, 1, 1], [], []>} : vector<8x32xf32>, vector<32x128xf32>, vector<8x128xf32> -> vector<8x128xf32>
    %213 = arith.addf %211, %212 : vector<8x128xf32>
    %214 = arith.addf %213, %7 : vector<8x128xf32>
    %cst_62 = arith.constant dense<0.000000e+00> : vector<8x128xf32>
    %215 = tpu.matmul %210, %8, %cst_62 {dimension_numbers = #tpu.dot_dimension_numbers<[1], [0], [0], [1], [0, 0, 1, 1], [], []>} : vector<8x16xf32>, vector<16x128xf32>, vector<8x128xf32> -> vector<8x128xf32>
    %cst_63 = arith.constant dense<0.000000e+00> : vector<8x128xf32>
    %216 = tpu.matmul %187, %9, %cst_63 {dimension_numbers = #tpu.dot_dimension_numbers<[1], [0], [0], [1], [0, 0, 1, 1], [], []>} : vector<8x32xf32>, vector<32x128xf32>, vector<8x128xf32> -> vector<8x128xf32>
    %217 = arith.addf %215, %216 : vector<8x128xf32>
    %218 = arith.addf %217, %12 : vector<8x128xf32>
    %219 = arith.negf %214 : vector<8x128xf32>
    %220 = math.exp %219 : vector<8x128xf32>
    %cst_64 = arith.constant 1.000000e+00 : f32
    %221 = vector.broadcast %cst_64 : f32 to vector<8x128xf32>
    %222 = arith.addf %221, %220 : vector<8x128xf32>
    %223 = arith.divf %221, %222 : vector<8x128xf32>
    %224 = math.tanh %214 : vector<8x128xf32>
    %225 = vector.extract_strided_slice %223 {offsets = [0, 0], sizes = [8, 32], strides = [1, 1]} : vector<8x128xf32> to vector<8x32xf32>
    %226 = vector.extract_strided_slice %223 {offsets = [0, 32], sizes = [8, 32], strides = [1, 1]} : vector<8x128xf32> to vector<8x32xf32>
    %227 = vector.extract_strided_slice %224 {offsets = [0, 64], sizes = [8, 32], strides = [1, 1]} : vector<8x128xf32> to vector<8x32xf32>
    %228 = vector.extract_strided_slice %223 {offsets = [0, 96], sizes = [8, 32], strides = [1, 1]} : vector<8x128xf32> to vector<8x32xf32>
    %229 = arith.mulf %226, %170 : vector<8x32xf32>
    %230 = arith.mulf %225, %227 : vector<8x32xf32>
    %231 = arith.addf %229, %230 : vector<8x32xf32>
    %232 = math.tanh %231 : vector<8x32xf32>
    %233 = arith.mulf %228, %232 : vector<8x32xf32>
    %234 = arith.negf %218 : vector<8x128xf32>
    %235 = math.exp %234 : vector<8x128xf32>
    %cst_65 = arith.constant 1.000000e+00 : f32
    %236 = vector.broadcast %cst_65 : f32 to vector<8x128xf32>
    %237 = arith.addf %236, %235 : vector<8x128xf32>
    %238 = arith.divf %236, %237 : vector<8x128xf32>
    %239 = math.tanh %218 : vector<8x128xf32>
    %240 = vector.extract_strided_slice %238 {offsets = [0, 0], sizes = [8, 32], strides = [1, 1]} : vector<8x128xf32> to vector<8x32xf32>
    %241 = vector.extract_strided_slice %238 {offsets = [0, 32], sizes = [8, 32], strides = [1, 1]} : vector<8x128xf32> to vector<8x32xf32>
    %242 = vector.extract_strided_slice %239 {offsets = [0, 64], sizes = [8, 32], strides = [1, 1]} : vector<8x128xf32> to vector<8x32xf32>
    %243 = vector.extract_strided_slice %238 {offsets = [0, 96], sizes = [8, 32], strides = [1, 1]} : vector<8x128xf32> to vector<8x32xf32>
    %244 = arith.mulf %241, %185 : vector<8x32xf32>
    %245 = arith.mulf %240, %242 : vector<8x32xf32>
    %246 = arith.addf %244, %245 : vector<8x32xf32>
    %247 = math.tanh %246 : vector<8x32xf32>
    %248 = arith.mulf %243, %247 : vector<8x32xf32>
    %249 = arith.index_cast %c3_i32 : i32 to index
    %c0_66 = arith.constant 0 : index
    %c0_67 = arith.constant 0 : index
    %250 = vector.load %arg25[%249, %c0_66, %c0_67] : memref<8x8x32xf32, #tpu.memory_space<vmem>>, vector<1x8x32xf32>
    %251 = vector.shape_cast %250 : vector<1x8x32xf32> to vector<8x32xf32>
    %252 = vector.shape_cast %233 : vector<8x32xf32> to vector<1x8x32xf32>
    tpu.vector_store %arg25[%249, %c0_66, %c0_67], %252 {strides = array<i32>} : memref<8x8x32xf32, #tpu.memory_space<vmem>>, vector<1x8x32xf32>,
    %253 = arith.index_cast %196 : i32 to index
    %c0_68 = arith.constant 0 : index
    %c0_69 = arith.constant 0 : index
    %254 = vector.load %arg26[%253, %c0_68, %c0_69] : memref<8x8x32xf32, #tpu.memory_space<vmem>>, vector<1x8x32xf32>
    %255 = vector.shape_cast %254 : vector<1x8x32xf32> to vector<8x32xf32>
    %256 = vector.shape_cast %248 : vector<8x32xf32> to vector<1x8x32xf32>
    tpu.vector_store %arg26[%253, %c0_68, %c0_69], %256 {strides = array<i32>} : memref<8x8x32xf32, #tpu.memory_space<vmem>>, vector<1x8x32xf32>,
    %c4_i32 = arith.constant 4 : i32
    %c7_i32_70 = arith.constant 7 : i32
    %257 = arith.subi %c7_i32_70, %c4_i32 : i32
    %258 = arith.index_cast %c4_i32 : i32 to index
    %c0_71 = arith.constant 0 : index
    %c0_72 = arith.constant 0 : index
    %259 = vector.load %arg0[%258, %c0_71, %c0_72] : memref<8x8x1xi32, #tpu.memory_space<vmem>>, vector<1x8x1xi32>
    %260 = vector.shape_cast %259 : vector<1x8x1xi32> to vector<8x1xi32>
    %261 = vector.broadcast %260 : vector<8x1xi32> to vector<8x16xi32>
    %262 = arith.cmpi eq, %1, %261 : vector<8x16xi32>
    %263 = arith.extui %262 : vector<8x16xi1> to vector<8x16xi32>
    %264 = arith.sitofp %263 : vector<8x16xi32> to vector<8x16xf32>
    %265 = arith.index_cast %257 : i32 to index
    %c0_73 = arith.constant 0 : index
    %c0_74 = arith.constant 0 : index
    %266 = vector.load %arg0[%265, %c0_73, %c0_74] : memref<8x8x1xi32, #tpu.memory_space<vmem>>, vector<1x8x1xi32>
    %267 = vector.shape_cast %266 : vector<1x8x1xi32> to vector<8x1xi32>
    %268 = vector.broadcast %267 : vector<8x1xi32> to vector<8x16xi32>
    %269 = arith.cmpi eq, %1, %268 : vector<8x16xi32>
    %270 = arith.extui %269 : vector<8x16xi1> to vector<8x16xi32>
    %271 = arith.sitofp %270 : vector<8x16xi32> to vector<8x16xf32>
    %cst_75 = arith.constant dense<0.000000e+00> : vector<8x128xf32>
    %272 = tpu.matmul %264, %3, %cst_75 {dimension_numbers = #tpu.dot_dimension_numbers<[1], [0], [0], [1], [0, 0, 1, 1], [], []>} : vector<8x16xf32>, vector<16x128xf32>, vector<8x128xf32> -> vector<8x128xf32>
    %cst_76 = arith.constant dense<0.000000e+00> : vector<8x128xf32>
    %273 = tpu.matmul %233, %4, %cst_76 {dimension_numbers = #tpu.dot_dimension_numbers<[1], [0], [0], [1], [0, 0, 1, 1], [], []>} : vector<8x32xf32>, vector<32x128xf32>, vector<8x128xf32> -> vector<8x128xf32>
    %274 = arith.addf %272, %273 : vector<8x128xf32>
    %275 = arith.addf %274, %7 : vector<8x128xf32>
    %cst_77 = arith.constant dense<0.000000e+00> : vector<8x128xf32>
    %276 = tpu.matmul %271, %8, %cst_77 {dimension_numbers = #tpu.dot_dimension_numbers<[1], [0], [0], [1], [0, 0, 1, 1], [], []>} : vector<8x16xf32>, vector<16x128xf32>, vector<8x128xf32> -> vector<8x128xf32>
    %cst_78 = arith.constant dense<0.000000e+00> : vector<8x128xf32>
    %277 = tpu.matmul %248, %9, %cst_78 {dimension_numbers = #tpu.dot_dimension_numbers<[1], [0], [0], [1], [0, 0, 1, 1], [], []>} : vector<8x32xf32>, vector<32x128xf32>, vector<8x128xf32> -> vector<8x128xf32>
    %278 = arith.addf %276, %277 : vector<8x128xf32>
    %279 = arith.addf %278, %12 : vector<8x128xf32>
    %280 = arith.negf %275 : vector<8x128xf32>
    %281 = math.exp %280 : vector<8x128xf32>
    %cst_79 = arith.constant 1.000000e+00 : f32
    %282 = vector.broadcast %cst_79 : f32 to vector<8x128xf32>
    %283 = arith.addf %282, %281 : vector<8x128xf32>
    %284 = arith.divf %282, %283 : vector<8x128xf32>
    %285 = math.tanh %275 : vector<8x128xf32>
    %286 = vector.extract_strided_slice %284 {offsets = [0, 0], sizes = [8, 32], strides = [1, 1]} : vector<8x128xf32> to vector<8x32xf32>
    %287 = vector.extract_strided_slice %284 {offsets = [0, 32], sizes = [8, 32], strides = [1, 1]} : vector<8x128xf32> to vector<8x32xf32>
    %288 = vector.extract_strided_slice %285 {offsets = [0, 64], sizes = [8, 32], strides = [1, 1]} : vector<8x128xf32> to vector<8x32xf32>
    %289 = vector.extract_strided_slice %284 {offsets = [0, 96], sizes = [8, 32], strides = [1, 1]} : vector<8x128xf32> to vector<8x32xf32>
    %290 = arith.mulf %287, %231 : vector<8x32xf32>
    %291 = arith.mulf %286, %288 : vector<8x32xf32>
    %292 = arith.addf %290, %291 : vector<8x32xf32>
    %293 = math.tanh %292 : vector<8x32xf32>
    %294 = arith.mulf %289, %293 : vector<8x32xf32>
    %295 = arith.negf %279 : vector<8x128xf32>
    %296 = math.exp %295 : vector<8x128xf32>
    %cst_80 = arith.constant 1.000000e+00 : f32
    %297 = vector.broadcast %cst_80 : f32 to vector<8x128xf32>
    %298 = arith.addf %297, %296 : vector<8x128xf32>
    %299 = arith.divf %297, %298 : vector<8x128xf32>
    %300 = math.tanh %279 : vector<8x128xf32>
    %301 = vector.extract_strided_slice %299 {offsets = [0, 0], sizes = [8, 32], strides = [1, 1]} : vector<8x128xf32> to vector<8x32xf32>
    %302 = vector.extract_strided_slice %299 {offsets = [0, 32], sizes = [8, 32], strides = [1, 1]} : vector<8x128xf32> to vector<8x32xf32>
    %303 = vector.extract_strided_slice %300 {offsets = [0, 64], sizes = [8, 32], strides = [1, 1]} : vector<8x128xf32> to vector<8x32xf32>
    %304 = vector.extract_strided_slice %299 {offsets = [0, 96], sizes = [8, 32], strides = [1, 1]} : vector<8x128xf32> to vector<8x32xf32>
    %305 = arith.mulf %302, %246 : vector<8x32xf32>
    %306 = arith.mulf %301, %303 : vector<8x32xf32>
    %307 = arith.addf %305, %306 : vector<8x32xf32>
    %308 = math.tanh %307 : vector<8x32xf32>
    %309 = arith.mulf %304, %308 : vector<8x32xf32>
    %310 = arith.index_cast %c4_i32 : i32 to index
    %c0_81 = arith.constant 0 : index
    %c0_82 = arith.constant 0 : index
    %311 = vector.load %arg25[%310, %c0_81, %c0_82] : memref<8x8x32xf32, #tpu.memory_space<vmem>>, vector<1x8x32xf32>
    %312 = vector.shape_cast %311 : vector<1x8x32xf32> to vector<8x32xf32>
    %313 = vector.shape_cast %294 : vector<8x32xf32> to vector<1x8x32xf32>
    tpu.vector_store %arg25[%310, %c0_81, %c0_82], %313 {strides = array<i32>} : memref<8x8x32xf32, #tpu.memory_space<vmem>>, vector<1x8x32xf32>,
    %314 = arith.index_cast %257 : i32 to index
    %c0_83 = arith.constant 0 : index
    %c0_84 = arith.constant 0 : index
    %315 = vector.load %arg26[%314, %c0_83, %c0_84] : memref<8x8x32xf32, #tpu.memory_space<vmem>>, vector<1x8x32xf32>
    %316 = vector.shape_cast %315 : vector<1x8x32xf32> to vector<8x32xf32>
    %317 = vector.shape_cast %309 : vector<8x32xf32> to vector<1x8x32xf32>
    tpu.vector_store %arg26[%314, %c0_83, %c0_84], %317 {strides = array<i32>} : memref<8x8x32xf32, #tpu.memory_space<vmem>>, vector<1x8x32xf32>,
    %c5_i32 = arith.constant 5 : i32
    %c7_i32_85 = arith.constant 7 : i32
    %318 = arith.subi %c7_i32_85, %c5_i32 : i32
    %319 = arith.index_cast %c5_i32 : i32 to index
    %c0_86 = arith.constant 0 : index
    %c0_87 = arith.constant 0 : index
    %320 = vector.load %arg0[%319, %c0_86, %c0_87] : memref<8x8x1xi32, #tpu.memory_space<vmem>>, vector<1x8x1xi32>
    %321 = vector.shape_cast %320 : vector<1x8x1xi32> to vector<8x1xi32>
    %322 = vector.broadcast %321 : vector<8x1xi32> to vector<8x16xi32>
    %323 = arith.cmpi eq, %1, %322 : vector<8x16xi32>
    %324 = arith.extui %323 : vector<8x16xi1> to vector<8x16xi32>
    %325 = arith.sitofp %324 : vector<8x16xi32> to vector<8x16xf32>
    %326 = arith.index_cast %318 : i32 to index
    %c0_88 = arith.constant 0 : index
    %c0_89 = arith.constant 0 : index
    %327 = vector.load %arg0[%326, %c0_88, %c0_89] : memref<8x8x1xi32, #tpu.memory_space<vmem>>, vector<1x8x1xi32>
    %328 = vector.shape_cast %327 : vector<1x8x1xi32> to vector<8x1xi32>
    %329 = vector.broadcast %328 : vector<8x1xi32> to vector<8x16xi32>
    %330 = arith.cmpi eq, %1, %329 : vector<8x16xi32>
    %331 = arith.extui %330 : vector<8x16xi1> to vector<8x16xi32>
    %332 = arith.sitofp %331 : vector<8x16xi32> to vector<8x16xf32>
    %cst_90 = arith.constant dense<0.000000e+00> : vector<8x128xf32>
    %333 = tpu.matmul %325, %3, %cst_90 {dimension_numbers = #tpu.dot_dimension_numbers<[1], [0], [0], [1], [0, 0, 1, 1], [], []>} : vector<8x16xf32>, vector<16x128xf32>, vector<8x128xf32> -> vector<8x128xf32>
    %cst_91 = arith.constant dense<0.000000e+00> : vector<8x128xf32>
    %334 = tpu.matmul %294, %4, %cst_91 {dimension_numbers = #tpu.dot_dimension_numbers<[1], [0], [0], [1], [0, 0, 1, 1], [], []>} : vector<8x32xf32>, vector<32x128xf32>, vector<8x128xf32> -> vector<8x128xf32>
    %335 = arith.addf %333, %334 : vector<8x128xf32>
    %336 = arith.addf %335, %7 : vector<8x128xf32>
    %cst_92 = arith.constant dense<0.000000e+00> : vector<8x128xf32>
    %337 = tpu.matmul %332, %8, %cst_92 {dimension_numbers = #tpu.dot_dimension_numbers<[1], [0], [0], [1], [0, 0, 1, 1], [], []>} : vector<8x16xf32>, vector<16x128xf32>, vector<8x128xf32> -> vector<8x128xf32>
    %cst_93 = arith.constant dense<0.000000e+00> : vector<8x128xf32>
    %338 = tpu.matmul %309, %9, %cst_93 {dimension_numbers = #tpu.dot_dimension_numbers<[1], [0], [0], [1], [0, 0, 1, 1], [], []>} : vector<8x32xf32>, vector<32x128xf32>, vector<8x128xf32> -> vector<8x128xf32>
    %339 = arith.addf %337, %338 : vector<8x128xf32>
    %340 = arith.addf %339, %12 : vector<8x128xf32>
    %341 = arith.negf %336 : vector<8x128xf32>
    %342 = math.exp %341 : vector<8x128xf32>
    %cst_94 = arith.constant 1.000000e+00 : f32
    %343 = vector.broadcast %cst_94 : f32 to vector<8x128xf32>
    %344 = arith.addf %343, %342 : vector<8x128xf32>
    %345 = arith.divf %343, %344 : vector<8x128xf32>
    %346 = math.tanh %336 : vector<8x128xf32>
    %347 = vector.extract_strided_slice %345 {offsets = [0, 0], sizes = [8, 32], strides = [1, 1]} : vector<8x128xf32> to vector<8x32xf32>
    %348 = vector.extract_strided_slice %345 {offsets = [0, 32], sizes = [8, 32], strides = [1, 1]} : vector<8x128xf32> to vector<8x32xf32>
    %349 = vector.extract_strided_slice %346 {offsets = [0, 64], sizes = [8, 32], strides = [1, 1]} : vector<8x128xf32> to vector<8x32xf32>
    %350 = vector.extract_strided_slice %345 {offsets = [0, 96], sizes = [8, 32], strides = [1, 1]} : vector<8x128xf32> to vector<8x32xf32>
    %351 = arith.mulf %348, %292 : vector<8x32xf32>
    %352 = arith.mulf %347, %349 : vector<8x32xf32>
    %353 = arith.addf %351, %352 : vector<8x32xf32>
    %354 = math.tanh %353 : vector<8x32xf32>
    %355 = arith.mulf %350, %354 : vector<8x32xf32>
    %356 = arith.negf %340 : vector<8x128xf32>
    %357 = math.exp %356 : vector<8x128xf32>
    %cst_95 = arith.constant 1.000000e+00 : f32
    %358 = vector.broadcast %cst_95 : f32 to vector<8x128xf32>
    %359 = arith.addf %358, %357 : vector<8x128xf32>
    %360 = arith.divf %358, %359 : vector<8x128xf32>
    %361 = math.tanh %340 : vector<8x128xf32>
    %362 = vector.extract_strided_slice %360 {offsets = [0, 0], sizes = [8, 32], strides = [1, 1]} : vector<8x128xf32> to vector<8x32xf32>
    %363 = vector.extract_strided_slice %360 {offsets = [0, 32], sizes = [8, 32], strides = [1, 1]} : vector<8x128xf32> to vector<8x32xf32>
    %364 = vector.extract_strided_slice %361 {offsets = [0, 64], sizes = [8, 32], strides = [1, 1]} : vector<8x128xf32> to vector<8x32xf32>
    %365 = vector.extract_strided_slice %360 {offsets = [0, 96], sizes = [8, 32], strides = [1, 1]} : vector<8x128xf32> to vector<8x32xf32>
    %366 = arith.mulf %363, %307 : vector<8x32xf32>
    %367 = arith.mulf %362, %364 : vector<8x32xf32>
    %368 = arith.addf %366, %367 : vector<8x32xf32>
    %369 = math.tanh %368 : vector<8x32xf32>
    %370 = arith.mulf %365, %369 : vector<8x32xf32>
    %371 = arith.index_cast %c5_i32 : i32 to index
    %c0_96 = arith.constant 0 : index
    %c0_97 = arith.constant 0 : index
    %372 = vector.load %arg25[%371, %c0_96, %c0_97] : memref<8x8x32xf32, #tpu.memory_space<vmem>>, vector<1x8x32xf32>
    %373 = vector.shape_cast %372 : vector<1x8x32xf32> to vector<8x32xf32>
    %374 = vector.shape_cast %355 : vector<8x32xf32> to vector<1x8x32xf32>
    tpu.vector_store %arg25[%371, %c0_96, %c0_97], %374 {strides = array<i32>} : memref<8x8x32xf32, #tpu.memory_space<vmem>>, vector<1x8x32xf32>,
    %375 = arith.index_cast %318 : i32 to index
    %c0_98 = arith.constant 0 : index
    %c0_99 = arith.constant 0 : index
    %376 = vector.load %arg26[%375, %c0_98, %c0_99] : memref<8x8x32xf32, #tpu.memory_space<vmem>>, vector<1x8x32xf32>
    %377 = vector.shape_cast %376 : vector<1x8x32xf32> to vector<8x32xf32>
    %378 = vector.shape_cast %370 : vector<8x32xf32> to vector<1x8x32xf32>
    tpu.vector_store %arg26[%375, %c0_98, %c0_99], %378 {strides = array<i32>} : memref<8x8x32xf32, #tpu.memory_space<vmem>>, vector<1x8x32xf32>,
    %c6_i32 = arith.constant 6 : i32
    %c7_i32_100 = arith.constant 7 : i32
    %379 = arith.subi %c7_i32_100, %c6_i32 : i32
    %380 = arith.index_cast %c6_i32 : i32 to index
    %c0_101 = arith.constant 0 : index
    %c0_102 = arith.constant 0 : index
    %381 = vector.load %arg0[%380, %c0_101, %c0_102] : memref<8x8x1xi32, #tpu.memory_space<vmem>>, vector<1x8x1xi32>
    %382 = vector.shape_cast %381 : vector<1x8x1xi32> to vector<8x1xi32>
    %383 = vector.broadcast %382 : vector<8x1xi32> to vector<8x16xi32>
    %384 = arith.cmpi eq, %1, %383 : vector<8x16xi32>
    %385 = arith.extui %384 : vector<8x16xi1> to vector<8x16xi32>
    %386 = arith.sitofp %385 : vector<8x16xi32> to vector<8x16xf32>
    %387 = arith.index_cast %379 : i32 to index
    %c0_103 = arith.constant 0 : index
    %c0_104 = arith.constant 0 : index
    %388 = vector.load %arg0[%387, %c0_103, %c0_104] : memref<8x8x1xi32, #tpu.memory_space<vmem>>, vector<1x8x1xi32>
    %389 = vector.shape_cast %388 : vector<1x8x1xi32> to vector<8x1xi32>
    %390 = vector.broadcast %389 : vector<8x1xi32> to vector<8x16xi32>
    %391 = arith.cmpi eq, %1, %390 : vector<8x16xi32>
    %392 = arith.extui %391 : vector<8x16xi1> to vector<8x16xi32>
    %393 = arith.sitofp %392 : vector<8x16xi32> to vector<8x16xf32>
    %cst_105 = arith.constant dense<0.000000e+00> : vector<8x128xf32>
    %394 = tpu.matmul %386, %3, %cst_105 {dimension_numbers = #tpu.dot_dimension_numbers<[1], [0], [0], [1], [0, 0, 1, 1], [], []>} : vector<8x16xf32>, vector<16x128xf32>, vector<8x128xf32> -> vector<8x128xf32>
    %cst_106 = arith.constant dense<0.000000e+00> : vector<8x128xf32>
    %395 = tpu.matmul %355, %4, %cst_106 {dimension_numbers = #tpu.dot_dimension_numbers<[1], [0], [0], [1], [0, 0, 1, 1], [], []>} : vector<8x32xf32>, vector<32x128xf32>, vector<8x128xf32> -> vector<8x128xf32>
    %396 = arith.addf %394, %395 : vector<8x128xf32>
    %397 = arith.addf %396, %7 : vector<8x128xf32>
    %cst_107 = arith.constant dense<0.000000e+00> : vector<8x128xf32>
    %398 = tpu.matmul %393, %8, %cst_107 {dimension_numbers = #tpu.dot_dimension_numbers<[1], [0], [0], [1], [0, 0, 1, 1], [], []>} : vector<8x16xf32>, vector<16x128xf32>, vector<8x128xf32> -> vector<8x128xf32>
    %cst_108 = arith.constant dense<0.000000e+00> : vector<8x128xf32>
    %399 = tpu.matmul %370, %9, %cst_108 {dimension_numbers = #tpu.dot_dimension_numbers<[1], [0], [0], [1], [0, 0, 1, 1], [], []>} : vector<8x32xf32>, vector<32x128xf32>, vector<8x128xf32> -> vector<8x128xf32>
    %400 = arith.addf %398, %399 : vector<8x128xf32>
    %401 = arith.addf %400, %12 : vector<8x128xf32>
    %402 = arith.negf %397 : vector<8x128xf32>
    %403 = math.exp %402 : vector<8x128xf32>
    %cst_109 = arith.constant 1.000000e+00 : f32
    %404 = vector.broadcast %cst_109 : f32 to vector<8x128xf32>
    %405 = arith.addf %404, %403 : vector<8x128xf32>
    %406 = arith.divf %404, %405 : vector<8x128xf32>
    %407 = math.tanh %397 : vector<8x128xf32>
    %408 = vector.extract_strided_slice %406 {offsets = [0, 0], sizes = [8, 32], strides = [1, 1]} : vector<8x128xf32> to vector<8x32xf32>
    %409 = vector.extract_strided_slice %406 {offsets = [0, 32], sizes = [8, 32], strides = [1, 1]} : vector<8x128xf32> to vector<8x32xf32>
    %410 = vector.extract_strided_slice %407 {offsets = [0, 64], sizes = [8, 32], strides = [1, 1]} : vector<8x128xf32> to vector<8x32xf32>
    %411 = vector.extract_strided_slice %406 {offsets = [0, 96], sizes = [8, 32], strides = [1, 1]} : vector<8x128xf32> to vector<8x32xf32>
    %412 = arith.mulf %409, %353 : vector<8x32xf32>
    %413 = arith.mulf %408, %410 : vector<8x32xf32>
    %414 = arith.addf %412, %413 : vector<8x32xf32>
    %415 = math.tanh %414 : vector<8x32xf32>
    %416 = arith.mulf %411, %415 : vector<8x32xf32>
    %417 = arith.negf %401 : vector<8x128xf32>
    %418 = math.exp %417 : vector<8x128xf32>
    %cst_110 = arith.constant 1.000000e+00 : f32
    %419 = vector.broadcast %cst_110 : f32 to vector<8x128xf32>
    %420 = arith.addf %419, %418 : vector<8x128xf32>
    %421 = arith.divf %419, %420 : vector<8x128xf32>
    %422 = math.tanh %401 : vector<8x128xf32>
    %423 = vector.extract_strided_slice %421 {offsets = [0, 0], sizes = [8, 32], strides = [1, 1]} : vector<8x128xf32> to vector<8x32xf32>
    %424 = vector.extract_strided_slice %421 {offsets = [0, 32], sizes = [8, 32], strides = [1, 1]} : vector<8x128xf32> to vector<8x32xf32>
    %425 = vector.extract_strided_slice %422 {offsets = [0, 64], sizes = [8, 32], strides = [1, 1]} : vector<8x128xf32> to vector<8x32xf32>
    %426 = vector.extract_strided_slice %421 {offsets = [0, 96], sizes = [8, 32], strides = [1, 1]} : vector<8x128xf32> to vector<8x32xf32>
    %427 = arith.mulf %424, %368 : vector<8x32xf32>
    %428 = arith.mulf %423, %425 : vector<8x32xf32>
    %429 = arith.addf %427, %428 : vector<8x32xf32>
    %430 = math.tanh %429 : vector<8x32xf32>
    %431 = arith.mulf %426, %430 : vector<8x32xf32>
    %432 = arith.index_cast %c6_i32 : i32 to index
    %c0_111 = arith.constant 0 : index
    %c0_112 = arith.constant 0 : index
    %433 = vector.load %arg25[%432, %c0_111, %c0_112] : memref<8x8x32xf32, #tpu.memory_space<vmem>>, vector<1x8x32xf32>
    %434 = vector.shape_cast %433 : vector<1x8x32xf32> to vector<8x32xf32>
    %435 = vector.shape_cast %416 : vector<8x32xf32> to vector<1x8x32xf32>
    tpu.vector_store %arg25[%432, %c0_111, %c0_112], %435 {strides = array<i32>} : memref<8x8x32xf32, #tpu.memory_space<vmem>>, vector<1x8x32xf32>,
    %436 = arith.index_cast %379 : i32 to index
    %c0_113 = arith.constant 0 : index
    %c0_114 = arith.constant 0 : index
    %437 = vector.load %arg26[%436, %c0_113, %c0_114] : memref<8x8x32xf32, #tpu.memory_space<vmem>>, vector<1x8x32xf32>
    %438 = vector.shape_cast %437 : vector<1x8x32xf32> to vector<8x32xf32>
    %439 = vector.shape_cast %431 : vector<8x32xf32> to vector<1x8x32xf32>
    tpu.vector_store %arg26[%436, %c0_113, %c0_114], %439 {strides = array<i32>} : memref<8x8x32xf32, #tpu.memory_space<vmem>>, vector<1x8x32xf32>,
    %c7_i32_115 = arith.constant 7 : i32
    %c7_i32_116 = arith.constant 7 : i32
    %440 = arith.subi %c7_i32_116, %c7_i32_115 : i32
    %441 = arith.index_cast %c7_i32_115 : i32 to index
    %c0_117 = arith.constant 0 : index
    %c0_118 = arith.constant 0 : index
    %442 = vector.load %arg0[%441, %c0_117, %c0_118] : memref<8x8x1xi32, #tpu.memory_space<vmem>>, vector<1x8x1xi32>
    %443 = vector.shape_cast %442 : vector<1x8x1xi32> to vector<8x1xi32>
    %444 = vector.broadcast %443 : vector<8x1xi32> to vector<8x16xi32>
    %445 = arith.cmpi eq, %1, %444 : vector<8x16xi32>
    %446 = arith.extui %445 : vector<8x16xi1> to vector<8x16xi32>
    %447 = arith.sitofp %446 : vector<8x16xi32> to vector<8x16xf32>
    %448 = arith.index_cast %440 : i32 to index
    %c0_119 = arith.constant 0 : index
    %c0_120 = arith.constant 0 : index
    %449 = vector.load %arg0[%448, %c0_119, %c0_120] : memref<8x8x1xi32, #tpu.memory_space<vmem>>, vector<1x8x1xi32>
    %450 = vector.shape_cast %449 : vector<1x8x1xi32> to vector<8x1xi32>
    %451 = vector.broadcast %450 : vector<8x1xi32> to vector<8x16xi32>
    %452 = arith.cmpi eq, %1, %451 : vector<8x16xi32>
    %453 = arith.extui %452 : vector<8x16xi1> to vector<8x16xi32>
    %454 = arith.sitofp %453 : vector<8x16xi32> to vector<8x16xf32>
    %cst_121 = arith.constant dense<0.000000e+00> : vector<8x128xf32>
    %455 = tpu.matmul %447, %3, %cst_121 {dimension_numbers = #tpu.dot_dimension_numbers<[1], [0], [0], [1], [0, 0, 1, 1], [], []>} : vector<8x16xf32>, vector<16x128xf32>, vector<8x128xf32> -> vector<8x128xf32>
    %cst_122 = arith.constant dense<0.000000e+00> : vector<8x128xf32>
    %456 = tpu.matmul %416, %4, %cst_122 {dimension_numbers = #tpu.dot_dimension_numbers<[1], [0], [0], [1], [0, 0, 1, 1], [], []>} : vector<8x32xf32>, vector<32x128xf32>, vector<8x128xf32> -> vector<8x128xf32>
    %457 = arith.addf %455, %456 : vector<8x128xf32>
    %458 = arith.addf %457, %7 : vector<8x128xf32>
    %cst_123 = arith.constant dense<0.000000e+00> : vector<8x128xf32>
    %459 = tpu.matmul %454, %8, %cst_123 {dimension_numbers = #tpu.dot_dimension_numbers<[1], [0], [0], [1], [0, 0, 1, 1], [], []>} : vector<8x16xf32>, vector<16x128xf32>, vector<8x128xf32> -> vector<8x128xf32>
    %cst_124 = arith.constant dense<0.000000e+00> : vector<8x128xf32>
    %460 = tpu.matmul %431, %9, %cst_124 {dimension_numbers = #tpu.dot_dimension_numbers<[1], [0], [0], [1], [0, 0, 1, 1], [], []>} : vector<8x32xf32>, vector<32x128xf32>, vector<8x128xf32> -> vector<8x128xf32>
    %461 = arith.addf %459, %460 : vector<8x128xf32>
    %462 = arith.addf %461, %12 : vector<8x128xf32>
    %463 = arith.negf %458 : vector<8x128xf32>
    %464 = math.exp %463 : vector<8x128xf32>
    %cst_125 = arith.constant 1.000000e+00 : f32
    %465 = vector.broadcast %cst_125 : f32 to vector<8x128xf32>
    %466 = arith.addf %465, %464 : vector<8x128xf32>
    %467 = arith.divf %465, %466 : vector<8x128xf32>
    %468 = math.tanh %458 : vector<8x128xf32>
    %469 = vector.extract_strided_slice %467 {offsets = [0, 0], sizes = [8, 32], strides = [1, 1]} : vector<8x128xf32> to vector<8x32xf32>
    %470 = vector.extract_strided_slice %467 {offsets = [0, 32], sizes = [8, 32], strides = [1, 1]} : vector<8x128xf32> to vector<8x32xf32>
    %471 = vector.extract_strided_slice %468 {offsets = [0, 64], sizes = [8, 32], strides = [1, 1]} : vector<8x128xf32> to vector<8x32xf32>
    %472 = vector.extract_strided_slice %467 {offsets = [0, 96], sizes = [8, 32], strides = [1, 1]} : vector<8x128xf32> to vector<8x32xf32>
    %473 = arith.mulf %470, %414 : vector<8x32xf32>
    %474 = arith.mulf %469, %471 : vector<8x32xf32>
    %475 = arith.addf %473, %474 : vector<8x32xf32>
    %476 = math.tanh %475 : vector<8x32xf32>
    %477 = arith.mulf %472, %476 : vector<8x32xf32>
    %478 = arith.negf %462 : vector<8x128xf32>
    %479 = math.exp %478 : vector<8x128xf32>
    %cst_126 = arith.constant 1.000000e+00 : f32
    %480 = vector.broadcast %cst_126 : f32 to vector<8x128xf32>
    %481 = arith.addf %480, %479 : vector<8x128xf32>
    %482 = arith.divf %480, %481 : vector<8x128xf32>
    %483 = math.tanh %462 : vector<8x128xf32>
    %484 = vector.extract_strided_slice %482 {offsets = [0, 0], sizes = [8, 32], strides = [1, 1]} : vector<8x128xf32> to vector<8x32xf32>
    %485 = vector.extract_strided_slice %482 {offsets = [0, 32], sizes = [8, 32], strides = [1, 1]} : vector<8x128xf32> to vector<8x32xf32>
    %486 = vector.extract_strided_slice %483 {offsets = [0, 64], sizes = [8, 32], strides = [1, 1]} : vector<8x128xf32> to vector<8x32xf32>
    %487 = vector.extract_strided_slice %482 {offsets = [0, 96], sizes = [8, 32], strides = [1, 1]} : vector<8x128xf32> to vector<8x32xf32>
    %488 = arith.mulf %485, %429 : vector<8x32xf32>
    %489 = arith.mulf %484, %486 : vector<8x32xf32>
    %490 = arith.addf %488, %489 : vector<8x32xf32>
    %491 = math.tanh %490 : vector<8x32xf32>
    %492 = arith.mulf %487, %491 : vector<8x32xf32>
    %493 = arith.index_cast %c7_i32_115 : i32 to index
    %c0_127 = arith.constant 0 : index
    %c0_128 = arith.constant 0 : index
    %494 = vector.load %arg25[%493, %c0_127, %c0_128] : memref<8x8x32xf32, #tpu.memory_space<vmem>>, vector<1x8x32xf32>
    %495 = vector.shape_cast %494 : vector<1x8x32xf32> to vector<8x32xf32>
    %496 = vector.shape_cast %477 : vector<8x32xf32> to vector<1x8x32xf32>
    tpu.vector_store %arg25[%493, %c0_127, %c0_128], %496 {strides = array<i32>} : memref<8x8x32xf32, #tpu.memory_space<vmem>>, vector<1x8x32xf32>,
    %497 = arith.index_cast %440 : i32 to index
    %c0_129 = arith.constant 0 : index
    %c0_130 = arith.constant 0 : index
    %498 = vector.load %arg26[%497, %c0_129, %c0_130] : memref<8x8x32xf32, #tpu.memory_space<vmem>>, vector<1x8x32xf32>
    %499 = vector.shape_cast %498 : vector<1x8x32xf32> to vector<8x32xf32>
    %500 = vector.shape_cast %492 : vector<8x32xf32> to vector<1x8x32xf32>
    tpu.vector_store %arg26[%497, %c0_129, %c0_130], %500 {strides = array<i32>} : memref<8x8x32xf32, #tpu.memory_space<vmem>>, vector<1x8x32xf32>,
    %c8_i32 = arith.constant 8 : i32
    %c0_131 = arith.constant 0 : index
    %c0_132 = arith.constant 0 : index
    %501 = vector.load %arg10[%c0_131, %c0_132] : memref<32x128xf32, #tpu.memory_space<vmem>>, vector<32x128xf32>
    %c0_133 = arith.constant 0 : index
    %c0_134 = arith.constant 0 : index
    %502 = vector.load %arg11[%c0_133, %c0_134] : memref<32x128xf32, #tpu.memory_space<vmem>>, vector<32x128xf32>
    %c0_135 = arith.constant 0 : index
    %c0_136 = arith.constant 0 : index
    %503 = vector.load %arg12[%c0_135, %c0_136] : memref<1x128xf32, #tpu.memory_space<vmem>>, vector<1x128xf32>
    %504 = vector.shape_cast %503 : vector<1x128xf32> to vector<1x128xf32>
    %505 = vector.broadcast %504 : vector<1x128xf32> to vector<8x128xf32>
    %c0_137 = arith.constant 0 : index
    %c0_138 = arith.constant 0 : index
    %506 = vector.load %arg2[%c0_137, %c0_138] : memref<8x1xi32, #tpu.memory_space<vmem>>, vector<8x1xi32>
    %c0_i32_139 = arith.constant 0 : i32
    %507 = arith.index_cast %c0_i32_139 : i32 to index
    %c0_140 = arith.constant 0 : index
    %c0_141 = arith.constant 0 : index
    %508 = vector.load %arg25[%507, %c0_140, %c0_141] : memref<8x8x32xf32, #tpu.memory_space<vmem>>, vector<1x8x32xf32>
    %509 = vector.shape_cast %508 : vector<1x8x32xf32> to vector<8x32xf32>
    %510 = arith.index_cast %c0_i32_139 : i32 to index
    %c0_142 = arith.constant 0 : index
    %c0_143 = arith.constant 0 : index
    %511 = vector.load %arg26[%510, %c0_142, %c0_143] : memref<8x8x32xf32, #tpu.memory_space<vmem>>, vector<1x8x32xf32>
    %512 = vector.shape_cast %511 : vector<1x8x32xf32> to vector<8x32xf32>
    %513 = arith.addf %509, %512 : vector<8x32xf32>
    %cst_144 = arith.constant dense<0.000000e+00> : vector<8x128xf32>
    %514 = tpu.matmul %513, %501, %cst_144 {dimension_numbers = #tpu.dot_dimension_numbers<[1], [0], [0], [1], [0, 0, 1, 1], [], []>} : vector<8x32xf32>, vector<32x128xf32>, vector<8x128xf32> -> vector<8x128xf32>
    %cst_145 = arith.constant dense<0.000000e+00> : vector<8x128xf32>
    %515 = tpu.matmul %0, %502, %cst_145 {dimension_numbers = #tpu.dot_dimension_numbers<[1], [0], [0], [1], [0, 0, 1, 1], [], []>} : vector<8x32xf32>, vector<32x128xf32>, vector<8x128xf32> -> vector<8x128xf32>
    %516 = arith.addf %514, %515 : vector<8x128xf32>
    %517 = arith.addf %516, %505 : vector<8x128xf32>
    %518 = arith.negf %517 : vector<8x128xf32>
    %519 = math.exp %518 : vector<8x128xf32>
    %cst_146 = arith.constant 1.000000e+00 : f32
    %520 = vector.broadcast %cst_146 : f32 to vector<8x128xf32>
    %521 = arith.addf %520, %519 : vector<8x128xf32>
    %522 = arith.divf %520, %521 : vector<8x128xf32>
    %523 = math.tanh %517 : vector<8x128xf32>
    %524 = vector.extract_strided_slice %522 {offsets = [0, 0], sizes = [8, 32], strides = [1, 1]} : vector<8x128xf32> to vector<8x32xf32>
    %525 = vector.extract_strided_slice %522 {offsets = [0, 32], sizes = [8, 32], strides = [1, 1]} : vector<8x128xf32> to vector<8x32xf32>
    %526 = vector.extract_strided_slice %523 {offsets = [0, 64], sizes = [8, 32], strides = [1, 1]} : vector<8x128xf32> to vector<8x32xf32>
    %527 = vector.extract_strided_slice %522 {offsets = [0, 96], sizes = [8, 32], strides = [1, 1]} : vector<8x128xf32> to vector<8x32xf32>
    %528 = arith.mulf %525, %0 : vector<8x32xf32>
    %529 = arith.mulf %524, %526 : vector<8x32xf32>
    %530 = arith.addf %528, %529 : vector<8x32xf32>
    %531 = math.tanh %530 : vector<8x32xf32>
    %532 = arith.mulf %527, %531 : vector<8x32xf32>
    %533 = vector.broadcast %c0_i32_139 : i32 to vector<8x1xi32>
    %534 = arith.cmpi eq, %506, %533 : vector<8x1xi32>
    %535 = vector.shape_cast %534 : vector<8x1xi1> to vector<8x1xi1>
    %536 = vector.broadcast %535 : vector<8x1xi1> to vector<8x32xi1>
    %537 = arith.select %536, %513, %0 : vector<8x32xi1>, vector<8x32xf32>
    %538 = vector.shape_cast %534 : vector<8x1xi1> to vector<8x1xi1>
    %539 = vector.broadcast %538 : vector<8x1xi1> to vector<8x32xi1>
    %540 = arith.select %539, %532, %0 : vector<8x32xi1>, vector<8x32xf32>
    %c1_i32_147 = arith.constant 1 : i32
    %541 = arith.index_cast %c1_i32_147 : i32 to index
    %c0_148 = arith.constant 0 : index
    %c0_149 = arith.constant 0 : index
    %542 = vector.load %arg25[%541, %c0_148, %c0_149] : memref<8x8x32xf32, #tpu.memory_space<vmem>>, vector<1x8x32xf32>
    %543 = vector.shape_cast %542 : vector<1x8x32xf32> to vector<8x32xf32>
    %544 = arith.index_cast %c1_i32_147 : i32 to index
    %c0_150 = arith.constant 0 : index
    %c0_151 = arith.constant 0 : index
    %545 = vector.load %arg26[%544, %c0_150, %c0_151] : memref<8x8x32xf32, #tpu.memory_space<vmem>>, vector<1x8x32xf32>
    %546 = vector.shape_cast %545 : vector<1x8x32xf32> to vector<8x32xf32>
    %547 = arith.addf %543, %546 : vector<8x32xf32>
    %cst_152 = arith.constant dense<0.000000e+00> : vector<8x128xf32>
    %548 = tpu.matmul %547, %501, %cst_152 {dimension_numbers = #tpu.dot_dimension_numbers<[1], [0], [0], [1], [0, 0, 1, 1], [], []>} : vector<8x32xf32>, vector<32x128xf32>, vector<8x128xf32> -> vector<8x128xf32>
    %cst_153 = arith.constant dense<0.000000e+00> : vector<8x128xf32>
    %549 = tpu.matmul %532, %502, %cst_153 {dimension_numbers = #tpu.dot_dimension_numbers<[1], [0], [0], [1], [0, 0, 1, 1], [], []>} : vector<8x32xf32>, vector<32x128xf32>, vector<8x128xf32> -> vector<8x128xf32>
    %550 = arith.addf %548, %549 : vector<8x128xf32>
    %551 = arith.addf %550, %505 : vector<8x128xf32>
    %552 = arith.negf %551 : vector<8x128xf32>
    %553 = math.exp %552 : vector<8x128xf32>
    %cst_154 = arith.constant 1.000000e+00 : f32
    %554 = vector.broadcast %cst_154 : f32 to vector<8x128xf32>
    %555 = arith.addf %554, %553 : vector<8x128xf32>
    %556 = arith.divf %554, %555 : vector<8x128xf32>
    %557 = math.tanh %551 : vector<8x128xf32>
    %558 = vector.extract_strided_slice %556 {offsets = [0, 0], sizes = [8, 32], strides = [1, 1]} : vector<8x128xf32> to vector<8x32xf32>
    %559 = vector.extract_strided_slice %556 {offsets = [0, 32], sizes = [8, 32], strides = [1, 1]} : vector<8x128xf32> to vector<8x32xf32>
    %560 = vector.extract_strided_slice %557 {offsets = [0, 64], sizes = [8, 32], strides = [1, 1]} : vector<8x128xf32> to vector<8x32xf32>
    %561 = vector.extract_strided_slice %556 {offsets = [0, 96], sizes = [8, 32], strides = [1, 1]} : vector<8x128xf32> to vector<8x32xf32>
    %562 = arith.mulf %559, %530 : vector<8x32xf32>
    %563 = arith.mulf %558, %560 : vector<8x32xf32>
    %564 = arith.addf %562, %563 : vector<8x32xf32>
    %565 = math.tanh %564 : vector<8x32xf32>
    %566 = arith.mulf %561, %565 : vector<8x32xf32>
    %567 = vector.broadcast %c1_i32_147 : i32 to vector<8x1xi32>
    %568 = arith.cmpi eq, %506, %567 : vector<8x1xi32>
    %569 = vector.shape_cast %568 : vector<8x1xi1> to vector<8x1xi1>
    %570 = vector.broadcast %569 : vector<8x1xi1> to vector<8x32xi1>
    %571 = arith.select %570, %547, %537 : vector<8x32xi1>, vector<8x32xf32>
    %572 = vector.shape_cast %568 : vector<8x1xi1> to vector<8x1xi1>
    %573 = vector.broadcast %572 : vector<8x1xi1> to vector<8x32xi1>
    %574 = arith.select %573, %566, %540 : vector<8x32xi1>, vector<8x32xf32>
    %c2_i32_155 = arith.constant 2 : i32
    %575 = arith.index_cast %c2_i32_155 : i32 to index
    %c0_156 = arith.constant 0 : index
    %c0_157 = arith.constant 0 : index
    %576 = vector.load %arg25[%575, %c0_156, %c0_157] : memref<8x8x32xf32, #tpu.memory_space<vmem>>, vector<1x8x32xf32>
    %577 = vector.shape_cast %576 : vector<1x8x32xf32> to vector<8x32xf32>
    %578 = arith.index_cast %c2_i32_155 : i32 to index
    %c0_158 = arith.constant 0 : index
    %c0_159 = arith.constant 0 : index
    %579 = vector.load %arg26[%578, %c0_158, %c0_159] : memref<8x8x32xf32, #tpu.memory_space<vmem>>, vector<1x8x32xf32>
    %580 = vector.shape_cast %579 : vector<1x8x32xf32> to vector<8x32xf32>
    %581 = arith.addf %577, %580 : vector<8x32xf32>
    %cst_160 = arith.constant dense<0.000000e+00> : vector<8x128xf32>
    %582 = tpu.matmul %581, %501, %cst_160 {dimension_numbers = #tpu.dot_dimension_numbers<[1], [0], [0], [1], [0, 0, 1, 1], [], []>} : vector<8x32xf32>, vector<32x128xf32>, vector<8x128xf32> -> vector<8x128xf32>
    %cst_161 = arith.constant dense<0.000000e+00> : vector<8x128xf32>
    %583 = tpu.matmul %566, %502, %cst_161 {dimension_numbers = #tpu.dot_dimension_numbers<[1], [0], [0], [1], [0, 0, 1, 1], [], []>} : vector<8x32xf32>, vector<32x128xf32>, vector<8x128xf32> -> vector<8x128xf32>
    %584 = arith.addf %582, %583 : vector<8x128xf32>
    %585 = arith.addf %584, %505 : vector<8x128xf32>
    %586 = arith.negf %585 : vector<8x128xf32>
    %587 = math.exp %586 : vector<8x128xf32>
    %cst_162 = arith.constant 1.000000e+00 : f32
    %588 = vector.broadcast %cst_162 : f32 to vector<8x128xf32>
    %589 = arith.addf %588, %587 : vector<8x128xf32>
    %590 = arith.divf %588, %589 : vector<8x128xf32>
    %591 = math.tanh %585 : vector<8x128xf32>
    %592 = vector.extract_strided_slice %590 {offsets = [0, 0], sizes = [8, 32], strides = [1, 1]} : vector<8x128xf32> to vector<8x32xf32>
    %593 = vector.extract_strided_slice %590 {offsets = [0, 32], sizes = [8, 32], strides = [1, 1]} : vector<8x128xf32> to vector<8x32xf32>
    %594 = vector.extract_strided_slice %591 {offsets = [0, 64], sizes = [8, 32], strides = [1, 1]} : vector<8x128xf32> to vector<8x32xf32>
    %595 = vector.extract_strided_slice %590 {offsets = [0, 96], sizes = [8, 32], strides = [1, 1]} : vector<8x128xf32> to vector<8x32xf32>
    %596 = arith.mulf %593, %564 : vector<8x32xf32>
    %597 = arith.mulf %592, %594 : vector<8x32xf32>
    %598 = arith.addf %596, %597 : vector<8x32xf32>
    %599 = math.tanh %598 : vector<8x32xf32>
    %600 = arith.mulf %595, %599 : vector<8x32xf32>
    %601 = vector.broadcast %c2_i32_155 : i32 to vector<8x1xi32>
    %602 = arith.cmpi eq, %506, %601 : vector<8x1xi32>
    %603 = vector.shape_cast %602 : vector<8x1xi1> to vector<8x1xi1>
    %604 = vector.broadcast %603 : vector<8x1xi1> to vector<8x32xi1>
    %605 = arith.select %604, %581, %571 : vector<8x32xi1>, vector<8x32xf32>
    %606 = vector.shape_cast %602 : vector<8x1xi1> to vector<8x1xi1>
    %607 = vector.broadcast %606 : vector<8x1xi1> to vector<8x32xi1>
    %608 = arith.select %607, %600, %574 : vector<8x32xi1>, vector<8x32xf32>
    %c3_i32_163 = arith.constant 3 : i32
    %609 = arith.index_cast %c3_i32_163 : i32 to index
    %c0_164 = arith.constant 0 : index
    %c0_165 = arith.constant 0 : index
    %610 = vector.load %arg25[%609, %c0_164, %c0_165] : memref<8x8x32xf32, #tpu.memory_space<vmem>>, vector<1x8x32xf32>
    %611 = vector.shape_cast %610 : vector<1x8x32xf32> to vector<8x32xf32>
    %612 = arith.index_cast %c3_i32_163 : i32 to index
    %c0_166 = arith.constant 0 : index
    %c0_167 = arith.constant 0 : index
    %613 = vector.load %arg26[%612, %c0_166, %c0_167] : memref<8x8x32xf32, #tpu.memory_space<vmem>>, vector<1x8x32xf32>
    %614 = vector.shape_cast %613 : vector<1x8x32xf32> to vector<8x32xf32>
    %615 = arith.addf %611, %614 : vector<8x32xf32>
    %cst_168 = arith.constant dense<0.000000e+00> : vector<8x128xf32>
    %616 = tpu.matmul %615, %501, %cst_168 {dimension_numbers = #tpu.dot_dimension_numbers<[1], [0], [0], [1], [0, 0, 1, 1], [], []>} : vector<8x32xf32>, vector<32x128xf32>, vector<8x128xf32> -> vector<8x128xf32>
    %cst_169 = arith.constant dense<0.000000e+00> : vector<8x128xf32>
    %617 = tpu.matmul %600, %502, %cst_169 {dimension_numbers = #tpu.dot_dimension_numbers<[1], [0], [0], [1], [0, 0, 1, 1], [], []>} : vector<8x32xf32>, vector<32x128xf32>, vector<8x128xf32> -> vector<8x128xf32>
    %618 = arith.addf %616, %617 : vector<8x128xf32>
    %619 = arith.addf %618, %505 : vector<8x128xf32>
    %620 = arith.negf %619 : vector<8x128xf32>
    %621 = math.exp %620 : vector<8x128xf32>
    %cst_170 = arith.constant 1.000000e+00 : f32
    %622 = vector.broadcast %cst_170 : f32 to vector<8x128xf32>
    %623 = arith.addf %622, %621 : vector<8x128xf32>
    %624 = arith.divf %622, %623 : vector<8x128xf32>
    %625 = math.tanh %619 : vector<8x128xf32>
    %626 = vector.extract_strided_slice %624 {offsets = [0, 0], sizes = [8, 32], strides = [1, 1]} : vector<8x128xf32> to vector<8x32xf32>
    %627 = vector.extract_strided_slice %624 {offsets = [0, 32], sizes = [8, 32], strides = [1, 1]} : vector<8x128xf32> to vector<8x32xf32>
    %628 = vector.extract_strided_slice %625 {offsets = [0, 64], sizes = [8, 32], strides = [1, 1]} : vector<8x128xf32> to vector<8x32xf32>
    %629 = vector.extract_strided_slice %624 {offsets = [0, 96], sizes = [8, 32], strides = [1, 1]} : vector<8x128xf32> to vector<8x32xf32>
    %630 = arith.mulf %627, %598 : vector<8x32xf32>
    %631 = arith.mulf %626, %628 : vector<8x32xf32>
    %632 = arith.addf %630, %631 : vector<8x32xf32>
    %633 = math.tanh %632 : vector<8x32xf32>
    %634 = arith.mulf %629, %633 : vector<8x32xf32>
    %635 = vector.broadcast %c3_i32_163 : i32 to vector<8x1xi32>
    %636 = arith.cmpi eq, %506, %635 : vector<8x1xi32>
    %637 = vector.shape_cast %636 : vector<8x1xi1> to vector<8x1xi1>
    %638 = vector.broadcast %637 : vector<8x1xi1> to vector<8x32xi1>
    %639 = arith.select %638, %615, %605 : vector<8x32xi1>, vector<8x32xf32>
    %640 = vector.shape_cast %636 : vector<8x1xi1> to vector<8x1xi1>
    %641 = vector.broadcast %640 : vector<8x1xi1> to vector<8x32xi1>
    %642 = arith.select %641, %634, %608 : vector<8x32xi1>, vector<8x32xf32>
    %c4_i32_171 = arith.constant 4 : i32
    %643 = arith.index_cast %c4_i32_171 : i32 to index
    %c0_172 = arith.constant 0 : index
    %c0_173 = arith.constant 0 : index
    %644 = vector.load %arg25[%643, %c0_172, %c0_173] : memref<8x8x32xf32, #tpu.memory_space<vmem>>, vector<1x8x32xf32>
    %645 = vector.shape_cast %644 : vector<1x8x32xf32> to vector<8x32xf32>
    %646 = arith.index_cast %c4_i32_171 : i32 to index
    %c0_174 = arith.constant 0 : index
    %c0_175 = arith.constant 0 : index
    %647 = vector.load %arg26[%646, %c0_174, %c0_175] : memref<8x8x32xf32, #tpu.memory_space<vmem>>, vector<1x8x32xf32>
    %648 = vector.shape_cast %647 : vector<1x8x32xf32> to vector<8x32xf32>
    %649 = arith.addf %645, %648 : vector<8x32xf32>
    %cst_176 = arith.constant dense<0.000000e+00> : vector<8x128xf32>
    %650 = tpu.matmul %649, %501, %cst_176 {dimension_numbers = #tpu.dot_dimension_numbers<[1], [0], [0], [1], [0, 0, 1, 1], [], []>} : vector<8x32xf32>, vector<32x128xf32>, vector<8x128xf32> -> vector<8x128xf32>
    %cst_177 = arith.constant dense<0.000000e+00> : vector<8x128xf32>
    %651 = tpu.matmul %634, %502, %cst_177 {dimension_numbers = #tpu.dot_dimension_numbers<[1], [0], [0], [1], [0, 0, 1, 1], [], []>} : vector<8x32xf32>, vector<32x128xf32>, vector<8x128xf32> -> vector<8x128xf32>
    %652 = arith.addf %650, %651 : vector<8x128xf32>
    %653 = arith.addf %652, %505 : vector<8x128xf32>
    %654 = arith.negf %653 : vector<8x128xf32>
    %655 = math.exp %654 : vector<8x128xf32>
    %cst_178 = arith.constant 1.000000e+00 : f32
    %656 = vector.broadcast %cst_178 : f32 to vector<8x128xf32>
    %657 = arith.addf %656, %655 : vector<8x128xf32>
    %658 = arith.divf %656, %657 : vector<8x128xf32>
    %659 = math.tanh %653 : vector<8x128xf32>
    %660 = vector.extract_strided_slice %658 {offsets = [0, 0], sizes = [8, 32], strides = [1, 1]} : vector<8x128xf32> to vector<8x32xf32>
    %661 = vector.extract_strided_slice %658 {offsets = [0, 32], sizes = [8, 32], strides = [1, 1]} : vector<8x128xf32> to vector<8x32xf32>
    %662 = vector.extract_strided_slice %659 {offsets = [0, 64], sizes = [8, 32], strides = [1, 1]} : vector<8x128xf32> to vector<8x32xf32>
    %663 = vector.extract_strided_slice %658 {offsets = [0, 96], sizes = [8, 32], strides = [1, 1]} : vector<8x128xf32> to vector<8x32xf32>
    %664 = arith.mulf %661, %632 : vector<8x32xf32>
    %665 = arith.mulf %660, %662 : vector<8x32xf32>
    %666 = arith.addf %664, %665 : vector<8x32xf32>
    %667 = math.tanh %666 : vector<8x32xf32>
    %668 = arith.mulf %663, %667 : vector<8x32xf32>
    %669 = vector.broadcast %c4_i32_171 : i32 to vector<8x1xi32>
    %670 = arith.cmpi eq, %506, %669 : vector<8x1xi32>
    %671 = vector.shape_cast %670 : vector<8x1xi1> to vector<8x1xi1>
    %672 = vector.broadcast %671 : vector<8x1xi1> to vector<8x32xi1>
    %673 = arith.select %672, %649, %639 : vector<8x32xi1>, vector<8x32xf32>
    %674 = vector.shape_cast %670 : vector<8x1xi1> to vector<8x1xi1>
    %675 = vector.broadcast %674 : vector<8x1xi1> to vector<8x32xi1>
    %676 = arith.select %675, %668, %642 : vector<8x32xi1>, vector<8x32xf32>
    %c5_i32_179 = arith.constant 5 : i32
    %677 = arith.index_cast %c5_i32_179 : i32 to index
    %c0_180 = arith.constant 0 : index
    %c0_181 = arith.constant 0 : index
    %678 = vector.load %arg25[%677, %c0_180, %c0_181] : memref<8x8x32xf32, #tpu.memory_space<vmem>>, vector<1x8x32xf32>
    %679 = vector.shape_cast %678 : vector<1x8x32xf32> to vector<8x32xf32>
    %680 = arith.index_cast %c5_i32_179 : i32 to index
    %c0_182 = arith.constant 0 : index
    %c0_183 = arith.constant 0 : index
    %681 = vector.load %arg26[%680, %c0_182, %c0_183] : memref<8x8x32xf32, #tpu.memory_space<vmem>>, vector<1x8x32xf32>
    %682 = vector.shape_cast %681 : vector<1x8x32xf32> to vector<8x32xf32>
    %683 = arith.addf %679, %682 : vector<8x32xf32>
    %cst_184 = arith.constant dense<0.000000e+00> : vector<8x128xf32>
    %684 = tpu.matmul %683, %501, %cst_184 {dimension_numbers = #tpu.dot_dimension_numbers<[1], [0], [0], [1], [0, 0, 1, 1], [], []>} : vector<8x32xf32>, vector<32x128xf32>, vector<8x128xf32> -> vector<8x128xf32>
    %cst_185 = arith.constant dense<0.000000e+00> : vector<8x128xf32>
    %685 = tpu.matmul %668, %502, %cst_185 {dimension_numbers = #tpu.dot_dimension_numbers<[1], [0], [0], [1], [0, 0, 1, 1], [], []>} : vector<8x32xf32>, vector<32x128xf32>, vector<8x128xf32> -> vector<8x128xf32>
    %686 = arith.addf %684, %685 : vector<8x128xf32>
    %687 = arith.addf %686, %505 : vector<8x128xf32>
    %688 = arith.negf %687 : vector<8x128xf32>
    %689 = math.exp %688 : vector<8x128xf32>
    %cst_186 = arith.constant 1.000000e+00 : f32
    %690 = vector.broadcast %cst_186 : f32 to vector<8x128xf32>
    %691 = arith.addf %690, %689 : vector<8x128xf32>
    %692 = arith.divf %690, %691 : vector<8x128xf32>
    %693 = math.tanh %687 : vector<8x128xf32>
    %694 = vector.extract_strided_slice %692 {offsets = [0, 0], sizes = [8, 32], strides = [1, 1]} : vector<8x128xf32> to vector<8x32xf32>
    %695 = vector.extract_strided_slice %692 {offsets = [0, 32], sizes = [8, 32], strides = [1, 1]} : vector<8x128xf32> to vector<8x32xf32>
    %696 = vector.extract_strided_slice %693 {offsets = [0, 64], sizes = [8, 32], strides = [1, 1]} : vector<8x128xf32> to vector<8x32xf32>
    %697 = vector.extract_strided_slice %692 {offsets = [0, 96], sizes = [8, 32], strides = [1, 1]} : vector<8x128xf32> to vector<8x32xf32>
    %698 = arith.mulf %695, %666 : vector<8x32xf32>
    %699 = arith.mulf %694, %696 : vector<8x32xf32>
    %700 = arith.addf %698, %699 : vector<8x32xf32>
    %701 = math.tanh %700 : vector<8x32xf32>
    %702 = arith.mulf %697, %701 : vector<8x32xf32>
    %703 = vector.broadcast %c5_i32_179 : i32 to vector<8x1xi32>
    %704 = arith.cmpi eq, %506, %703 : vector<8x1xi32>
    %705 = vector.shape_cast %704 : vector<8x1xi1> to vector<8x1xi1>
    %706 = vector.broadcast %705 : vector<8x1xi1> to vector<8x32xi1>
    %707 = arith.select %706, %683, %673 : vector<8x32xi1>, vector<8x32xf32>
    %708 = vector.shape_cast %704 : vector<8x1xi1> to vector<8x1xi1>
    %709 = vector.broadcast %708 : vector<8x1xi1> to vector<8x32xi1>
    %710 = arith.select %709, %702, %676 : vector<8x32xi1>, vector<8x32xf32>
    %c6_i32_187 = arith.constant 6 : i32
    %711 = arith.index_cast %c6_i32_187 : i32 to index
    %c0_188 = arith.constant 0 : index
    %c0_189 = arith.constant 0 : index
    %712 = vector.load %arg25[%711, %c0_188, %c0_189] : memref<8x8x32xf32, #tpu.memory_space<vmem>>, vector<1x8x32xf32>
    %713 = vector.shape_cast %712 : vector<1x8x32xf32> to vector<8x32xf32>
    %714 = arith.index_cast %c6_i32_187 : i32 to index
    %c0_190 = arith.constant 0 : index
    %c0_191 = arith.constant 0 : index
    %715 = vector.load %arg26[%714, %c0_190, %c0_191] : memref<8x8x32xf32, #tpu.memory_space<vmem>>, vector<1x8x32xf32>
    %716 = vector.shape_cast %715 : vector<1x8x32xf32> to vector<8x32xf32>
    %717 = arith.addf %713, %716 : vector<8x32xf32>
    %cst_192 = arith.constant dense<0.000000e+00> : vector<8x128xf32>
    %718 = tpu.matmul %717, %501, %cst_192 {dimension_numbers = #tpu.dot_dimension_numbers<[1], [0], [0], [1], [0, 0, 1, 1], [], []>} : vector<8x32xf32>, vector<32x128xf32>, vector<8x128xf32> -> vector<8x128xf32>
    %cst_193 = arith.constant dense<0.000000e+00> : vector<8x128xf32>
    %719 = tpu.matmul %702, %502, %cst_193 {dimension_numbers = #tpu.dot_dimension_numbers<[1], [0], [0], [1], [0, 0, 1, 1], [], []>} : vector<8x32xf32>, vector<32x128xf32>, vector<8x128xf32> -> vector<8x128xf32>
    %720 = arith.addf %718, %719 : vector<8x128xf32>
    %721 = arith.addf %720, %505 : vector<8x128xf32>
    %722 = arith.negf %721 : vector<8x128xf32>
    %723 = math.exp %722 : vector<8x128xf32>
    %cst_194 = arith.constant 1.000000e+00 : f32
    %724 = vector.broadcast %cst_194 : f32 to vector<8x128xf32>
    %725 = arith.addf %724, %723 : vector<8x128xf32>
    %726 = arith.divf %724, %725 : vector<8x128xf32>
    %727 = math.tanh %721 : vector<8x128xf32>
    %728 = vector.extract_strided_slice %726 {offsets = [0, 0], sizes = [8, 32], strides = [1, 1]} : vector<8x128xf32> to vector<8x32xf32>
    %729 = vector.extract_strided_slice %726 {offsets = [0, 32], sizes = [8, 32], strides = [1, 1]} : vector<8x128xf32> to vector<8x32xf32>
    %730 = vector.extract_strided_slice %727 {offsets = [0, 64], sizes = [8, 32], strides = [1, 1]} : vector<8x128xf32> to vector<8x32xf32>
    %731 = vector.extract_strided_slice %726 {offsets = [0, 96], sizes = [8, 32], strides = [1, 1]} : vector<8x128xf32> to vector<8x32xf32>
    %732 = arith.mulf %729, %700 : vector<8x32xf32>
    %733 = arith.mulf %728, %730 : vector<8x32xf32>
    %734 = arith.addf %732, %733 : vector<8x32xf32>
    %735 = math.tanh %734 : vector<8x32xf32>
    %736 = arith.mulf %731, %735 : vector<8x32xf32>
    %737 = vector.broadcast %c6_i32_187 : i32 to vector<8x1xi32>
    %738 = arith.cmpi eq, %506, %737 : vector<8x1xi32>
    %739 = vector.shape_cast %738 : vector<8x1xi1> to vector<8x1xi1>
    %740 = vector.broadcast %739 : vector<8x1xi1> to vector<8x32xi1>
    %741 = arith.select %740, %717, %707 : vector<8x32xi1>, vector<8x32xf32>
    %742 = vector.shape_cast %738 : vector<8x1xi1> to vector<8x1xi1>
    %743 = vector.broadcast %742 : vector<8x1xi1> to vector<8x32xi1>
    %744 = arith.select %743, %736, %710 : vector<8x32xi1>, vector<8x32xf32>
    %c7_i32_195 = arith.constant 7 : i32
    %745 = arith.index_cast %c7_i32_195 : i32 to index
    %c0_196 = arith.constant 0 : index
    %c0_197 = arith.constant 0 : index
    %746 = vector.load %arg25[%745, %c0_196, %c0_197] : memref<8x8x32xf32, #tpu.memory_space<vmem>>, vector<1x8x32xf32>
    %747 = vector.shape_cast %746 : vector<1x8x32xf32> to vector<8x32xf32>
    %748 = arith.index_cast %c7_i32_195 : i32 to index
    %c0_198 = arith.constant 0 : index
    %c0_199 = arith.constant 0 : index
    %749 = vector.load %arg26[%748, %c0_198, %c0_199] : memref<8x8x32xf32, #tpu.memory_space<vmem>>, vector<1x8x32xf32>
    %750 = vector.shape_cast %749 : vector<1x8x32xf32> to vector<8x32xf32>
    %751 = arith.addf %747, %750 : vector<8x32xf32>
    %cst_200 = arith.constant dense<0.000000e+00> : vector<8x128xf32>
    %752 = tpu.matmul %751, %501, %cst_200 {dimension_numbers = #tpu.dot_dimension_numbers<[1], [0], [0], [1], [0, 0, 1, 1], [], []>} : vector<8x32xf32>, vector<32x128xf32>, vector<8x128xf32> -> vector<8x128xf32>
    %cst_201 = arith.constant dense<0.000000e+00> : vector<8x128xf32>
    %753 = tpu.matmul %736, %502, %cst_201 {dimension_numbers = #tpu.dot_dimension_numbers<[1], [0], [0], [1], [0, 0, 1, 1], [], []>} : vector<8x32xf32>, vector<32x128xf32>, vector<8x128xf32> -> vector<8x128xf32>
    %754 = arith.addf %752, %753 : vector<8x128xf32>
    %755 = arith.addf %754, %505 : vector<8x128xf32>
    %756 = arith.negf %755 : vector<8x128xf32>
    %757 = math.exp %756 : vector<8x128xf32>
    %cst_202 = arith.constant 1.000000e+00 : f32
    %758 = vector.broadcast %cst_202 : f32 to vector<8x128xf32>
    %759 = arith.addf %758, %757 : vector<8x128xf32>
    %760 = arith.divf %758, %759 : vector<8x128xf32>
    %761 = math.tanh %755 : vector<8x128xf32>
    %762 = vector.extract_strided_slice %760 {offsets = [0, 0], sizes = [8, 32], strides = [1, 1]} : vector<8x128xf32> to vector<8x32xf32>
    %763 = vector.extract_strided_slice %760 {offsets = [0, 32], sizes = [8, 32], strides = [1, 1]} : vector<8x128xf32> to vector<8x32xf32>
    %764 = vector.extract_strided_slice %761 {offsets = [0, 64], sizes = [8, 32], strides = [1, 1]} : vector<8x128xf32> to vector<8x32xf32>
    %765 = vector.extract_strided_slice %760 {offsets = [0, 96], sizes = [8, 32], strides = [1, 1]} : vector<8x128xf32> to vector<8x32xf32>
    %766 = arith.mulf %763, %734 : vector<8x32xf32>
    %767 = arith.mulf %762, %764 : vector<8x32xf32>
    %768 = arith.addf %766, %767 : vector<8x32xf32>
    %769 = math.tanh %768 : vector<8x32xf32>
    %770 = arith.mulf %765, %769 : vector<8x32xf32>
    %771 = vector.broadcast %c7_i32_195 : i32 to vector<8x1xi32>
    %772 = arith.cmpi eq, %506, %771 : vector<8x1xi32>
    %773 = vector.shape_cast %772 : vector<8x1xi1> to vector<8x1xi1>
    %774 = vector.broadcast %773 : vector<8x1xi1> to vector<8x32xi1>
    %775 = arith.select %774, %751, %741 : vector<8x32xi1>, vector<8x32xf32>
    %776 = vector.shape_cast %772 : vector<8x1xi1> to vector<8x1xi1>
    %777 = vector.broadcast %776 : vector<8x1xi1> to vector<8x32xi1>
    %778 = arith.select %777, %770, %744 : vector<8x32xi1>, vector<8x32xf32>
    %c8_i32_203 = arith.constant 8 : i32
    %c0_204 = arith.constant 0 : index
    %c0_205 = arith.constant 0 : index
    %779 = vector.load %arg13[%c0_204, %c0_205] : memref<32x32xf32, #tpu.memory_space<vmem>>, vector<32x32xf32>
    %c0_206 = arith.constant 0 : index
    %c0_207 = arith.constant 0 : index
    %780 = vector.load %arg14[%c0_206, %c0_207] : memref<1x32xf32, #tpu.memory_space<vmem>>, vector<1x32xf32>
    %781 = vector.shape_cast %780 : vector<1x32xf32> to vector<1x32xf32>
    %782 = vector.broadcast %781 : vector<1x32xf32> to vector<8x32xf32>
    %cst_208 = arith.constant dense<0.000000e+00> : vector<8x32xf32>
    %783 = tpu.matmul %775, %779, %cst_208 {dimension_numbers = #tpu.dot_dimension_numbers<[1], [0], [0], [1], [0, 0, 1, 1], [], []>} : vector<8x32xf32>, vector<32x32xf32>, vector<8x32xf32> -> vector<8x32xf32>
    %784 = arith.addf %783, %782 : vector<8x32xf32>
    %cst_209 = arith.constant dense<0.000000e+00> : vector<8x32xf32>
    %785 = tpu.matmul %778, %779, %cst_209 {dimension_numbers = #tpu.dot_dimension_numbers<[1], [0], [0], [1], [0, 0, 1, 1], [], []>} : vector<8x32xf32>, vector<32x32xf32>, vector<8x32xf32> -> vector<8x32xf32>
    %786 = arith.addf %785, %782 : vector<8x32xf32>
    %c0_210 = arith.constant 0 : index
    %c0_211 = arith.constant 0 : index
    %787 = vector.load %arg3[%c0_210, %c0_211] : memref<1x128xf32, #tpu.memory_space<vmem>>, vector<1x128xf32>
    %788 = vector.shape_cast %787 : vector<1x128xf32> to vector<1x128xf32>
    %789 = vector.broadcast %788 : vector<1x128xf32> to vector<8x128xf32>
    %c0_212 = arith.constant 0 : index
    %c0_213 = arith.constant 0 : index
    %c0_214 = arith.constant 0 : index
    %790 = vector.load %arg24[%c0_212, %c0_213, %c0_214] : memref<8x8x128xf32, #tpu.memory_space<vmem>>, vector<1x8x128xf32>
    %791 = vector.shape_cast %790 : vector<1x8x128xf32> to vector<8x128xf32>
    %792 = vector.shape_cast %789 : vector<8x128xf32> to vector<1x8x128xf32>
    tpu.vector_store %arg24[%c0_212, %c0_213, %c0_214], %792 {strides = array<i32>} : memref<8x8x128xf32, #tpu.memory_space<vmem>>, vector<1x8x128xf32>,
    %c0_215 = arith.constant 0 : index
    %c0_216 = arith.constant 0 : index
    %793 = vector.load %arg15[%c0_215, %c0_216] : memref<16x128xf32, #tpu.memory_space<vmem>>, vector<16x128xf32>
    %c0_217 = arith.constant 0 : index
    %c0_218 = arith.constant 0 : index
    %794 = vector.load %arg16[%c0_217, %c0_218] : memref<32x128xf32, #tpu.memory_space<vmem>>, vector<32x128xf32>
    %c0_219 = arith.constant 0 : index
    %c0_220 = arith.constant 0 : index
    %795 = vector.load %arg17[%c0_219, %c0_220] : memref<32x128xf32, #tpu.memory_space<vmem>>, vector<32x128xf32>
    %c0_221 = arith.constant 0 : index
    %c0_222 = arith.constant 0 : index
    %796 = vector.load %arg18[%c0_221, %c0_222] : memref<1x128xf32, #tpu.memory_space<vmem>>, vector<1x128xf32>
    %797 = vector.shape_cast %796 : vector<1x128xf32> to vector<1x128xf32>
    %798 = vector.broadcast %797 : vector<1x128xf32> to vector<8x128xf32>
    %c0_223 = arith.constant 0 : index
    %c0_224 = arith.constant 0 : index
    %799 = vector.load %arg19[%c0_223, %c0_224] : memref<32x128xf32, #tpu.memory_space<vmem>>, vector<32x128xf32>
    %c0_225 = arith.constant 0 : index
    %c0_226 = arith.constant 0 : index
    %800 = vector.load %arg20[%c0_225, %c0_226] : memref<32x128xf32, #tpu.memory_space<vmem>>, vector<32x128xf32>
    %c0_227 = arith.constant 0 : index
    %c0_228 = arith.constant 0 : index
    %801 = vector.load %arg21[%c0_227, %c0_228] : memref<1x128xf32, #tpu.memory_space<vmem>>, vector<1x128xf32>
    %802 = vector.shape_cast %801 : vector<1x128xf32> to vector<1x128xf32>
    %803 = vector.broadcast %802 : vector<1x128xf32> to vector<8x128xf32>
    %c0_229 = arith.constant 0 : index
    %c0_230 = arith.constant 0 : index
    %804 = vector.load %arg22[%c0_229, %c0_230] : memref<32x128xf32, #tpu.memory_space<vmem>>, vector<32x128xf32>
    %c0_231 = arith.constant 0 : index
    %c0_232 = arith.constant 0 : index
    %805 = vector.load %arg23[%c0_231, %c0_232] : memref<1x128xf32, #tpu.memory_space<vmem>>, vector<1x128xf32>
    %806 = vector.shape_cast %805 : vector<1x128xf32> to vector<1x128xf32>
    %807 = vector.broadcast %806 : vector<1x128xf32> to vector<8x128xf32>
    %c0_i32_233 = arith.constant 0 : i32
    %808 = arith.index_cast %c0_i32_233 : i32 to index
    %c0_234 = arith.constant 0 : index
    %c0_235 = arith.constant 0 : index
    %809 = vector.load %arg1[%808, %c0_234, %c0_235] : memref<7x8x1xi32, #tpu.memory_space<vmem>>, vector<1x8x1xi32>
    %810 = vector.shape_cast %809 : vector<1x8x1xi32> to vector<8x1xi32>
    %811 = vector.broadcast %810 : vector<8x1xi32> to vector<8x16xi32>
    %812 = arith.cmpi eq, %2, %811 : vector<8x16xi32>
    %813 = arith.extui %812 : vector<8x16xi1> to vector<8x16xi32>
    %814 = arith.sitofp %813 : vector<8x16xi32> to vector<8x16xf32>
    %cst_236 = arith.constant dense<0.000000e+00> : vector<8x128xf32>
    %815 = tpu.matmul %814, %793, %cst_236 {dimension_numbers = #tpu.dot_dimension_numbers<[1], [0], [0], [1], [0, 0, 1, 1], [], []>} : vector<8x16xf32>, vector<16x128xf32>, vector<8x128xf32> -> vector<8x128xf32>
    %cst_237 = arith.constant dense<0.000000e+00> : vector<8x128xf32>
    %816 = tpu.matmul %784, %794, %cst_237 {dimension_numbers = #tpu.dot_dimension_numbers<[1], [0], [0], [1], [0, 0, 1, 1], [], []>} : vector<8x32xf32>, vector<32x128xf32>, vector<8x128xf32> -> vector<8x128xf32>
    %817 = arith.addf %815, %816 : vector<8x128xf32>
    %cst_238 = arith.constant dense<0.000000e+00> : vector<8x128xf32>
    %818 = tpu.matmul %492, %795, %cst_238 {dimension_numbers = #tpu.dot_dimension_numbers<[1], [0], [0], [1], [0, 0, 1, 1], [], []>} : vector<8x32xf32>, vector<32x128xf32>, vector<8x128xf32> -> vector<8x128xf32>
    %819 = arith.addf %817, %818 : vector<8x128xf32>
    %820 = arith.addf %819, %798 : vector<8x128xf32>
    %821 = arith.negf %820 : vector<8x128xf32>
    %822 = math.exp %821 : vector<8x128xf32>
    %cst_239 = arith.constant 1.000000e+00 : f32
    %823 = vector.broadcast %cst_239 : f32 to vector<8x128xf32>
    %824 = arith.addf %823, %822 : vector<8x128xf32>
    %825 = arith.divf %823, %824 : vector<8x128xf32>
    %826 = math.tanh %820 : vector<8x128xf32>
    %827 = vector.extract_strided_slice %825 {offsets = [0, 0], sizes = [8, 32], strides = [1, 1]} : vector<8x128xf32> to vector<8x32xf32>
    %828 = vector.extract_strided_slice %825 {offsets = [0, 32], sizes = [8, 32], strides = [1, 1]} : vector<8x128xf32> to vector<8x32xf32>
    %829 = vector.extract_strided_slice %826 {offsets = [0, 64], sizes = [8, 32], strides = [1, 1]} : vector<8x128xf32> to vector<8x32xf32>
    %830 = vector.extract_strided_slice %825 {offsets = [0, 96], sizes = [8, 32], strides = [1, 1]} : vector<8x128xf32> to vector<8x32xf32>
    %831 = arith.mulf %828, %490 : vector<8x32xf32>
    %832 = arith.mulf %827, %829 : vector<8x32xf32>
    %833 = arith.addf %831, %832 : vector<8x32xf32>
    %834 = math.tanh %833 : vector<8x32xf32>
    %835 = arith.mulf %830, %834 : vector<8x32xf32>
    %cst_240 = arith.constant dense<0.000000e+00> : vector<8x128xf32>
    %836 = tpu.matmul %835, %799, %cst_240 {dimension_numbers = #tpu.dot_dimension_numbers<[1], [0], [0], [1], [0, 0, 1, 1], [], []>} : vector<8x32xf32>, vector<32x128xf32>, vector<8x128xf32> -> vector<8x128xf32>
    %cst_241 = arith.constant dense<0.000000e+00> : vector<8x128xf32>
    %837 = tpu.matmul %786, %800, %cst_241 {dimension_numbers = #tpu.dot_dimension_numbers<[1], [0], [0], [1], [0, 0, 1, 1], [], []>} : vector<8x32xf32>, vector<32x128xf32>, vector<8x128xf32> -> vector<8x128xf32>
    %838 = arith.addf %836, %837 : vector<8x128xf32>
    %839 = arith.addf %838, %803 : vector<8x128xf32>
    %840 = arith.negf %839 : vector<8x128xf32>
    %841 = math.exp %840 : vector<8x128xf32>
    %cst_242 = arith.constant 1.000000e+00 : f32
    %842 = vector.broadcast %cst_242 : f32 to vector<8x128xf32>
    %843 = arith.addf %842, %841 : vector<8x128xf32>
    %844 = arith.divf %842, %843 : vector<8x128xf32>
    %845 = math.tanh %839 : vector<8x128xf32>
    %846 = vector.extract_strided_slice %844 {offsets = [0, 0], sizes = [8, 32], strides = [1, 1]} : vector<8x128xf32> to vector<8x32xf32>
    %847 = vector.extract_strided_slice %845 {offsets = [0, 64], sizes = [8, 32], strides = [1, 1]} : vector<8x128xf32> to vector<8x32xf32>
    %848 = vector.extract_strided_slice %844 {offsets = [0, 96], sizes = [8, 32], strides = [1, 1]} : vector<8x128xf32> to vector<8x32xf32>
    %849 = arith.mulf %846, %847 : vector<8x32xf32>
    %850 = math.tanh %849 : vector<8x32xf32>
    %851 = arith.mulf %848, %850 : vector<8x32xf32>
    %cst_243 = arith.constant dense<0.000000e+00> : vector<8x128xf32>
    %852 = tpu.matmul %851, %804, %cst_243 {dimension_numbers = #tpu.dot_dimension_numbers<[1], [0], [0], [1], [0, 0, 1, 1], [], []>} : vector<8x32xf32>, vector<32x128xf32>, vector<8x128xf32> -> vector<8x128xf32>
    %853 = arith.addf %852, %807 : vector<8x128xf32>
    %cst_244 = arith.constant dense<0xFF800000> : vector<8xf32>
    %854 = vector.multi_reduction <maximumf>, %853, %cst_244 [1] : vector<8x128xf32> to vector<8xf32>
    %855 = vector.shape_cast %854 : vector<8xf32> to vector<8x1xf32>
    %856 = vector.broadcast %855 : vector<8x1xf32> to vector<8x128xf32>
    %857 = arith.subf %853, %856 : vector<8x128xf32>
    %858 = math.exp %857 : vector<8x128xf32>
    %cst_245 = arith.constant dense<0.000000e+00> : vector<8xf32>
    %859 = vector.multi_reduction <add>, %858, %cst_245 [1] : vector<8x128xf32> to vector<8xf32>
    %860 = vector.shape_cast %859 : vector<8xf32> to vector<8x1xf32>
    %861 = vector.broadcast %855 : vector<8x1xf32> to vector<8x128xf32>
    %862 = arith.subf %853, %861 : vector<8x128xf32>
    %863 = math.log %860 : vector<8x1xf32>
    %864 = vector.broadcast %863 : vector<8x1xf32> to vector<8x128xf32>
    %865 = arith.subf %862, %864 : vector<8x128xf32>
    %c1_i32_246 = arith.constant 1 : i32
    %866 = arith.addi %c1_i32_246, %c0_i32_233 : i32
    %867 = arith.index_cast %866 : i32 to index
    %c0_247 = arith.constant 0 : index
    %c0_248 = arith.constant 0 : index
    %868 = vector.load %arg24[%867, %c0_247, %c0_248] : memref<8x8x128xf32, #tpu.memory_space<vmem>>, vector<1x8x128xf32>
    %869 = vector.shape_cast %868 : vector<1x8x128xf32> to vector<8x128xf32>
    %870 = vector.shape_cast %865 : vector<8x128xf32> to vector<1x8x128xf32>
    tpu.vector_store %arg24[%867, %c0_247, %c0_248], %870 {strides = array<i32>} : memref<8x8x128xf32, #tpu.memory_space<vmem>>, vector<1x8x128xf32>,
    %c1_i32_249 = arith.constant 1 : i32
    %871 = arith.index_cast %c1_i32_249 : i32 to index
    %c0_250 = arith.constant 0 : index
    %c0_251 = arith.constant 0 : index
    %872 = vector.load %arg1[%871, %c0_250, %c0_251] : memref<7x8x1xi32, #tpu.memory_space<vmem>>, vector<1x8x1xi32>
    %873 = vector.shape_cast %872 : vector<1x8x1xi32> to vector<8x1xi32>
    %874 = vector.broadcast %873 : vector<8x1xi32> to vector<8x16xi32>
    %875 = arith.cmpi eq, %2, %874 : vector<8x16xi32>
    %876 = arith.extui %875 : vector<8x16xi1> to vector<8x16xi32>
    %877 = arith.sitofp %876 : vector<8x16xi32> to vector<8x16xf32>
    %cst_252 = arith.constant dense<0.000000e+00> : vector<8x128xf32>
    %878 = tpu.matmul %877, %793, %cst_252 {dimension_numbers = #tpu.dot_dimension_numbers<[1], [0], [0], [1], [0, 0, 1, 1], [], []>} : vector<8x16xf32>, vector<16x128xf32>, vector<8x128xf32> -> vector<8x128xf32>
    %cst_253 = arith.constant dense<0.000000e+00> : vector<8x128xf32>
    %879 = tpu.matmul %835, %794, %cst_253 {dimension_numbers = #tpu.dot_dimension_numbers<[1], [0], [0], [1], [0, 0, 1, 1], [], []>} : vector<8x32xf32>, vector<32x128xf32>, vector<8x128xf32> -> vector<8x128xf32>
    %880 = arith.addf %878, %879 : vector<8x128xf32>
    %cst_254 = arith.constant dense<0.000000e+00> : vector<8x128xf32>
    %881 = tpu.matmul %835, %795, %cst_254 {dimension_numbers = #tpu.dot_dimension_numbers<[1], [0], [0], [1], [0, 0, 1, 1], [], []>} : vector<8x32xf32>, vector<32x128xf32>, vector<8x128xf32> -> vector<8x128xf32>
    %882 = arith.addf %880, %881 : vector<8x128xf32>
    %883 = arith.addf %882, %798 : vector<8x128xf32>
    %884 = arith.negf %883 : vector<8x128xf32>
    %885 = math.exp %884 : vector<8x128xf32>
    %cst_255 = arith.constant 1.000000e+00 : f32
    %886 = vector.broadcast %cst_255 : f32 to vector<8x128xf32>
    %887 = arith.addf %886, %885 : vector<8x128xf32>
    %888 = arith.divf %886, %887 : vector<8x128xf32>
    %889 = math.tanh %883 : vector<8x128xf32>
    %890 = vector.extract_strided_slice %888 {offsets = [0, 0], sizes = [8, 32], strides = [1, 1]} : vector<8x128xf32> to vector<8x32xf32>
    %891 = vector.extract_strided_slice %888 {offsets = [0, 32], sizes = [8, 32], strides = [1, 1]} : vector<8x128xf32> to vector<8x32xf32>
    %892 = vector.extract_strided_slice %889 {offsets = [0, 64], sizes = [8, 32], strides = [1, 1]} : vector<8x128xf32> to vector<8x32xf32>
    %893 = vector.extract_strided_slice %888 {offsets = [0, 96], sizes = [8, 32], strides = [1, 1]} : vector<8x128xf32> to vector<8x32xf32>
    %894 = arith.mulf %891, %833 : vector<8x32xf32>
    %895 = arith.mulf %890, %892 : vector<8x32xf32>
    %896 = arith.addf %894, %895 : vector<8x32xf32>
    %897 = math.tanh %896 : vector<8x32xf32>
    %898 = arith.mulf %893, %897 : vector<8x32xf32>
    %cst_256 = arith.constant dense<0.000000e+00> : vector<8x128xf32>
    %899 = tpu.matmul %898, %799, %cst_256 {dimension_numbers = #tpu.dot_dimension_numbers<[1], [0], [0], [1], [0, 0, 1, 1], [], []>} : vector<8x32xf32>, vector<32x128xf32>, vector<8x128xf32> -> vector<8x128xf32>
    %cst_257 = arith.constant dense<0.000000e+00> : vector<8x128xf32>
    %900 = tpu.matmul %851, %800, %cst_257 {dimension_numbers = #tpu.dot_dimension_numbers<[1], [0], [0], [1], [0, 0, 1, 1], [], []>} : vector<8x32xf32>, vector<32x128xf32>, vector<8x128xf32> -> vector<8x128xf32>
    %901 = arith.addf %899, %900 : vector<8x128xf32>
    %902 = arith.addf %901, %803 : vector<8x128xf32>
    %903 = arith.negf %902 : vector<8x128xf32>
    %904 = math.exp %903 : vector<8x128xf32>
    %cst_258 = arith.constant 1.000000e+00 : f32
    %905 = vector.broadcast %cst_258 : f32 to vector<8x128xf32>
    %906 = arith.addf %905, %904 : vector<8x128xf32>
    %907 = arith.divf %905, %906 : vector<8x128xf32>
    %908 = math.tanh %902 : vector<8x128xf32>
    %909 = vector.extract_strided_slice %907 {offsets = [0, 0], sizes = [8, 32], strides = [1, 1]} : vector<8x128xf32> to vector<8x32xf32>
    %910 = vector.extract_strided_slice %908 {offsets = [0, 64], sizes = [8, 32], strides = [1, 1]} : vector<8x128xf32> to vector<8x32xf32>
    %911 = vector.extract_strided_slice %907 {offsets = [0, 96], sizes = [8, 32], strides = [1, 1]} : vector<8x128xf32> to vector<8x32xf32>
    %912 = arith.mulf %909, %910 : vector<8x32xf32>
    %913 = math.tanh %912 : vector<8x32xf32>
    %914 = arith.mulf %911, %913 : vector<8x32xf32>
    %cst_259 = arith.constant dense<0.000000e+00> : vector<8x128xf32>
    %915 = tpu.matmul %914, %804, %cst_259 {dimension_numbers = #tpu.dot_dimension_numbers<[1], [0], [0], [1], [0, 0, 1, 1], [], []>} : vector<8x32xf32>, vector<32x128xf32>, vector<8x128xf32> -> vector<8x128xf32>
    %916 = arith.addf %915, %807 : vector<8x128xf32>
    %cst_260 = arith.constant dense<0xFF800000> : vector<8xf32>
    %917 = vector.multi_reduction <maximumf>, %916, %cst_260 [1] : vector<8x128xf32> to vector<8xf32>
    %918 = vector.shape_cast %917 : vector<8xf32> to vector<8x1xf32>
    %919 = vector.broadcast %918 : vector<8x1xf32> to vector<8x128xf32>
    %920 = arith.subf %916, %919 : vector<8x128xf32>
    %921 = math.exp %920 : vector<8x128xf32>
    %cst_261 = arith.constant dense<0.000000e+00> : vector<8xf32>
    %922 = vector.multi_reduction <add>, %921, %cst_261 [1] : vector<8x128xf32> to vector<8xf32>
    %923 = vector.shape_cast %922 : vector<8xf32> to vector<8x1xf32>
    %924 = vector.broadcast %918 : vector<8x1xf32> to vector<8x128xf32>
    %925 = arith.subf %916, %924 : vector<8x128xf32>
    %926 = math.log %923 : vector<8x1xf32>
    %927 = vector.broadcast %926 : vector<8x1xf32> to vector<8x128xf32>
    %928 = arith.subf %925, %927 : vector<8x128xf32>
    %c1_i32_262 = arith.constant 1 : i32
    %929 = arith.addi %c1_i32_262, %c1_i32_249 : i32
    %930 = arith.index_cast %929 : i32 to index
    %c0_263 = arith.constant 0 : index
    %c0_264 = arith.constant 0 : index
    %931 = vector.load %arg24[%930, %c0_263, %c0_264] : memref<8x8x128xf32, #tpu.memory_space<vmem>>, vector<1x8x128xf32>
    %932 = vector.shape_cast %931 : vector<1x8x128xf32> to vector<8x128xf32>
    %933 = vector.shape_cast %928 : vector<8x128xf32> to vector<1x8x128xf32>
    tpu.vector_store %arg24[%930, %c0_263, %c0_264], %933 {strides = array<i32>} : memref<8x8x128xf32, #tpu.memory_space<vmem>>, vector<1x8x128xf32>,
    %c2_i32_265 = arith.constant 2 : i32
    %934 = arith.index_cast %c2_i32_265 : i32 to index
    %c0_266 = arith.constant 0 : index
    %c0_267 = arith.constant 0 : index
    %935 = vector.load %arg1[%934, %c0_266, %c0_267] : memref<7x8x1xi32, #tpu.memory_space<vmem>>, vector<1x8x1xi32>
    %936 = vector.shape_cast %935 : vector<1x8x1xi32> to vector<8x1xi32>
    %937 = vector.broadcast %936 : vector<8x1xi32> to vector<8x16xi32>
    %938 = arith.cmpi eq, %2, %937 : vector<8x16xi32>
    %939 = arith.extui %938 : vector<8x16xi1> to vector<8x16xi32>
    %940 = arith.sitofp %939 : vector<8x16xi32> to vector<8x16xf32>
    %cst_268 = arith.constant dense<0.000000e+00> : vector<8x128xf32>
    %941 = tpu.matmul %940, %793, %cst_268 {dimension_numbers = #tpu.dot_dimension_numbers<[1], [0], [0], [1], [0, 0, 1, 1], [], []>} : vector<8x16xf32>, vector<16x128xf32>, vector<8x128xf32> -> vector<8x128xf32>
    %cst_269 = arith.constant dense<0.000000e+00> : vector<8x128xf32>
    %942 = tpu.matmul %898, %794, %cst_269 {dimension_numbers = #tpu.dot_dimension_numbers<[1], [0], [0], [1], [0, 0, 1, 1], [], []>} : vector<8x32xf32>, vector<32x128xf32>, vector<8x128xf32> -> vector<8x128xf32>
    %943 = arith.addf %941, %942 : vector<8x128xf32>
    %cst_270 = arith.constant dense<0.000000e+00> : vector<8x128xf32>
    %944 = tpu.matmul %898, %795, %cst_270 {dimension_numbers = #tpu.dot_dimension_numbers<[1], [0], [0], [1], [0, 0, 1, 1], [], []>} : vector<8x32xf32>, vector<32x128xf32>, vector<8x128xf32> -> vector<8x128xf32>
    %945 = arith.addf %943, %944 : vector<8x128xf32>
    %946 = arith.addf %945, %798 : vector<8x128xf32>
    %947 = arith.negf %946 : vector<8x128xf32>
    %948 = math.exp %947 : vector<8x128xf32>
    %cst_271 = arith.constant 1.000000e+00 : f32
    %949 = vector.broadcast %cst_271 : f32 to vector<8x128xf32>
    %950 = arith.addf %949, %948 : vector<8x128xf32>
    %951 = arith.divf %949, %950 : vector<8x128xf32>
    %952 = math.tanh %946 : vector<8x128xf32>
    %953 = vector.extract_strided_slice %951 {offsets = [0, 0], sizes = [8, 32], strides = [1, 1]} : vector<8x128xf32> to vector<8x32xf32>
    %954 = vector.extract_strided_slice %951 {offsets = [0, 32], sizes = [8, 32], strides = [1, 1]} : vector<8x128xf32> to vector<8x32xf32>
    %955 = vector.extract_strided_slice %952 {offsets = [0, 64], sizes = [8, 32], strides = [1, 1]} : vector<8x128xf32> to vector<8x32xf32>
    %956 = vector.extract_strided_slice %951 {offsets = [0, 96], sizes = [8, 32], strides = [1, 1]} : vector<8x128xf32> to vector<8x32xf32>
    %957 = arith.mulf %954, %896 : vector<8x32xf32>
    %958 = arith.mulf %953, %955 : vector<8x32xf32>
    %959 = arith.addf %957, %958 : vector<8x32xf32>
    %960 = math.tanh %959 : vector<8x32xf32>
    %961 = arith.mulf %956, %960 : vector<8x32xf32>
    %cst_272 = arith.constant dense<0.000000e+00> : vector<8x128xf32>
    %962 = tpu.matmul %961, %799, %cst_272 {dimension_numbers = #tpu.dot_dimension_numbers<[1], [0], [0], [1], [0, 0, 1, 1], [], []>} : vector<8x32xf32>, vector<32x128xf32>, vector<8x128xf32> -> vector<8x128xf32>
    %cst_273 = arith.constant dense<0.000000e+00> : vector<8x128xf32>
    %963 = tpu.matmul %914, %800, %cst_273 {dimension_numbers = #tpu.dot_dimension_numbers<[1], [0], [0], [1], [0, 0, 1, 1], [], []>} : vector<8x32xf32>, vector<32x128xf32>, vector<8x128xf32> -> vector<8x128xf32>
    %964 = arith.addf %962, %963 : vector<8x128xf32>
    %965 = arith.addf %964, %803 : vector<8x128xf32>
    %966 = arith.negf %965 : vector<8x128xf32>
    %967 = math.exp %966 : vector<8x128xf32>
    %cst_274 = arith.constant 1.000000e+00 : f32
    %968 = vector.broadcast %cst_274 : f32 to vector<8x128xf32>
    %969 = arith.addf %968, %967 : vector<8x128xf32>
    %970 = arith.divf %968, %969 : vector<8x128xf32>
    %971 = math.tanh %965 : vector<8x128xf32>
    %972 = vector.extract_strided_slice %970 {offsets = [0, 0], sizes = [8, 32], strides = [1, 1]} : vector<8x128xf32> to vector<8x32xf32>
    %973 = vector.extract_strided_slice %971 {offsets = [0, 64], sizes = [8, 32], strides = [1, 1]} : vector<8x128xf32> to vector<8x32xf32>
    %974 = vector.extract_strided_slice %970 {offsets = [0, 96], sizes = [8, 32], strides = [1, 1]} : vector<8x128xf32> to vector<8x32xf32>
    %975 = arith.mulf %972, %973 : vector<8x32xf32>
    %976 = math.tanh %975 : vector<8x32xf32>
    %977 = arith.mulf %974, %976 : vector<8x32xf32>
    %cst_275 = arith.constant dense<0.000000e+00> : vector<8x128xf32>
    %978 = tpu.matmul %977, %804, %cst_275 {dimension_numbers = #tpu.dot_dimension_numbers<[1], [0], [0], [1], [0, 0, 1, 1], [], []>} : vector<8x32xf32>, vector<32x128xf32>, vector<8x128xf32> -> vector<8x128xf32>
    %979 = arith.addf %978, %807 : vector<8x128xf32>
    %cst_276 = arith.constant dense<0xFF800000> : vector<8xf32>
    %980 = vector.multi_reduction <maximumf>, %979, %cst_276 [1] : vector<8x128xf32> to vector<8xf32>
    %981 = vector.shape_cast %980 : vector<8xf32> to vector<8x1xf32>
    %982 = vector.broadcast %981 : vector<8x1xf32> to vector<8x128xf32>
    %983 = arith.subf %979, %982 : vector<8x128xf32>
    %984 = math.exp %983 : vector<8x128xf32>
    %cst_277 = arith.constant dense<0.000000e+00> : vector<8xf32>
    %985 = vector.multi_reduction <add>, %984, %cst_277 [1] : vector<8x128xf32> to vector<8xf32>
    %986 = vector.shape_cast %985 : vector<8xf32> to vector<8x1xf32>
    %987 = vector.broadcast %981 : vector<8x1xf32> to vector<8x128xf32>
    %988 = arith.subf %979, %987 : vector<8x128xf32>
    %989 = math.log %986 : vector<8x1xf32>
    %990 = vector.broadcast %989 : vector<8x1xf32> to vector<8x128xf32>
    %991 = arith.subf %988, %990 : vector<8x128xf32>
    %c1_i32_278 = arith.constant 1 : i32
    %992 = arith.addi %c1_i32_278, %c2_i32_265 : i32
    %993 = arith.index_cast %992 : i32 to index
    %c0_279 = arith.constant 0 : index
    %c0_280 = arith.constant 0 : index
    %994 = vector.load %arg24[%993, %c0_279, %c0_280] : memref<8x8x128xf32, #tpu.memory_space<vmem>>, vector<1x8x128xf32>
    %995 = vector.shape_cast %994 : vector<1x8x128xf32> to vector<8x128xf32>
    %996 = vector.shape_cast %991 : vector<8x128xf32> to vector<1x8x128xf32>
    tpu.vector_store %arg24[%993, %c0_279, %c0_280], %996 {strides = array<i32>} : memref<8x8x128xf32, #tpu.memory_space<vmem>>, vector<1x8x128xf32>,
    %c3_i32_281 = arith.constant 3 : i32
    %997 = arith.index_cast %c3_i32_281 : i32 to index
    %c0_282 = arith.constant 0 : index
    %c0_283 = arith.constant 0 : index
    %998 = vector.load %arg1[%997, %c0_282, %c0_283] : memref<7x8x1xi32, #tpu.memory_space<vmem>>, vector<1x8x1xi32>
    %999 = vector.shape_cast %998 : vector<1x8x1xi32> to vector<8x1xi32>
    %1000 = vector.broadcast %999 : vector<8x1xi32> to vector<8x16xi32>
    %1001 = arith.cmpi eq, %2, %1000 : vector<8x16xi32>
    %1002 = arith.extui %1001 : vector<8x16xi1> to vector<8x16xi32>
    %1003 = arith.sitofp %1002 : vector<8x16xi32> to vector<8x16xf32>
    %cst_284 = arith.constant dense<0.000000e+00> : vector<8x128xf32>
    %1004 = tpu.matmul %1003, %793, %cst_284 {dimension_numbers = #tpu.dot_dimension_numbers<[1], [0], [0], [1], [0, 0, 1, 1], [], []>} : vector<8x16xf32>, vector<16x128xf32>, vector<8x128xf32> -> vector<8x128xf32>
    %cst_285 = arith.constant dense<0.000000e+00> : vector<8x128xf32>
    %1005 = tpu.matmul %961, %794, %cst_285 {dimension_numbers = #tpu.dot_dimension_numbers<[1], [0], [0], [1], [0, 0, 1, 1], [], []>} : vector<8x32xf32>, vector<32x128xf32>, vector<8x128xf32> -> vector<8x128xf32>
    %1006 = arith.addf %1004, %1005 : vector<8x128xf32>
    %cst_286 = arith.constant dense<0.000000e+00> : vector<8x128xf32>
    %1007 = tpu.matmul %961, %795, %cst_286 {dimension_numbers = #tpu.dot_dimension_numbers<[1], [0], [0], [1], [0, 0, 1, 1], [], []>} : vector<8x32xf32>, vector<32x128xf32>, vector<8x128xf32> -> vector<8x128xf32>
    %1008 = arith.addf %1006, %1007 : vector<8x128xf32>
    %1009 = arith.addf %1008, %798 : vector<8x128xf32>
    %1010 = arith.negf %1009 : vector<8x128xf32>
    %1011 = math.exp %1010 : vector<8x128xf32>
    %cst_287 = arith.constant 1.000000e+00 : f32
    %1012 = vector.broadcast %cst_287 : f32 to vector<8x128xf32>
    %1013 = arith.addf %1012, %1011 : vector<8x128xf32>
    %1014 = arith.divf %1012, %1013 : vector<8x128xf32>
    %1015 = math.tanh %1009 : vector<8x128xf32>
    %1016 = vector.extract_strided_slice %1014 {offsets = [0, 0], sizes = [8, 32], strides = [1, 1]} : vector<8x128xf32> to vector<8x32xf32>
    %1017 = vector.extract_strided_slice %1014 {offsets = [0, 32], sizes = [8, 32], strides = [1, 1]} : vector<8x128xf32> to vector<8x32xf32>
    %1018 = vector.extract_strided_slice %1015 {offsets = [0, 64], sizes = [8, 32], strides = [1, 1]} : vector<8x128xf32> to vector<8x32xf32>
    %1019 = vector.extract_strided_slice %1014 {offsets = [0, 96], sizes = [8, 32], strides = [1, 1]} : vector<8x128xf32> to vector<8x32xf32>
    %1020 = arith.mulf %1017, %959 : vector<8x32xf32>
    %1021 = arith.mulf %1016, %1018 : vector<8x32xf32>
    %1022 = arith.addf %1020, %1021 : vector<8x32xf32>
    %1023 = math.tanh %1022 : vector<8x32xf32>
    %1024 = arith.mulf %1019, %1023 : vector<8x32xf32>
    %cst_288 = arith.constant dense<0.000000e+00> : vector<8x128xf32>
    %1025 = tpu.matmul %1024, %799, %cst_288 {dimension_numbers = #tpu.dot_dimension_numbers<[1], [0], [0], [1], [0, 0, 1, 1], [], []>} : vector<8x32xf32>, vector<32x128xf32>, vector<8x128xf32> -> vector<8x128xf32>
    %cst_289 = arith.constant dense<0.000000e+00> : vector<8x128xf32>
    %1026 = tpu.matmul %977, %800, %cst_289 {dimension_numbers = #tpu.dot_dimension_numbers<[1], [0], [0], [1], [0, 0, 1, 1], [], []>} : vector<8x32xf32>, vector<32x128xf32>, vector<8x128xf32> -> vector<8x128xf32>
    %1027 = arith.addf %1025, %1026 : vector<8x128xf32>
    %1028 = arith.addf %1027, %803 : vector<8x128xf32>
    %1029 = arith.negf %1028 : vector<8x128xf32>
    %1030 = math.exp %1029 : vector<8x128xf32>
    %cst_290 = arith.constant 1.000000e+00 : f32
    %1031 = vector.broadcast %cst_290 : f32 to vector<8x128xf32>
    %1032 = arith.addf %1031, %1030 : vector<8x128xf32>
    %1033 = arith.divf %1031, %1032 : vector<8x128xf32>
    %1034 = math.tanh %1028 : vector<8x128xf32>
    %1035 = vector.extract_strided_slice %1033 {offsets = [0, 0], sizes = [8, 32], strides = [1, 1]} : vector<8x128xf32> to vector<8x32xf32>
    %1036 = vector.extract_strided_slice %1034 {offsets = [0, 64], sizes = [8, 32], strides = [1, 1]} : vector<8x128xf32> to vector<8x32xf32>
    %1037 = vector.extract_strided_slice %1033 {offsets = [0, 96], sizes = [8, 32], strides = [1, 1]} : vector<8x128xf32> to vector<8x32xf32>
    %1038 = arith.mulf %1035, %1036 : vector<8x32xf32>
    %1039 = math.tanh %1038 : vector<8x32xf32>
    %1040 = arith.mulf %1037, %1039 : vector<8x32xf32>
    %cst_291 = arith.constant dense<0.000000e+00> : vector<8x128xf32>
    %1041 = tpu.matmul %1040, %804, %cst_291 {dimension_numbers = #tpu.dot_dimension_numbers<[1], [0], [0], [1], [0, 0, 1, 1], [], []>} : vector<8x32xf32>, vector<32x128xf32>, vector<8x128xf32> -> vector<8x128xf32>
    %1042 = arith.addf %1041, %807 : vector<8x128xf32>
    %cst_292 = arith.constant dense<0xFF800000> : vector<8xf32>
    %1043 = vector.multi_reduction <maximumf>, %1042, %cst_292 [1] : vector<8x128xf32> to vector<8xf32>
    %1044 = vector.shape_cast %1043 : vector<8xf32> to vector<8x1xf32>
    %1045 = vector.broadcast %1044 : vector<8x1xf32> to vector<8x128xf32>
    %1046 = arith.subf %1042, %1045 : vector<8x128xf32>
    %1047 = math.exp %1046 : vector<8x128xf32>
    %cst_293 = arith.constant dense<0.000000e+00> : vector<8xf32>
    %1048 = vector.multi_reduction <add>, %1047, %cst_293 [1] : vector<8x128xf32> to vector<8xf32>
    %1049 = vector.shape_cast %1048 : vector<8xf32> to vector<8x1xf32>
    %1050 = vector.broadcast %1044 : vector<8x1xf32> to vector<8x128xf32>
    %1051 = arith.subf %1042, %1050 : vector<8x128xf32>
    %1052 = math.log %1049 : vector<8x1xf32>
    %1053 = vector.broadcast %1052 : vector<8x1xf32> to vector<8x128xf32>
    %1054 = arith.subf %1051, %1053 : vector<8x128xf32>
    %c1_i32_294 = arith.constant 1 : i32
    %1055 = arith.addi %c1_i32_294, %c3_i32_281 : i32
    %1056 = arith.index_cast %1055 : i32 to index
    %c0_295 = arith.constant 0 : index
    %c0_296 = arith.constant 0 : index
    %1057 = vector.load %arg24[%1056, %c0_295, %c0_296] : memref<8x8x128xf32, #tpu.memory_space<vmem>>, vector<1x8x128xf32>
    %1058 = vector.shape_cast %1057 : vector<1x8x128xf32> to vector<8x128xf32>
    %1059 = vector.shape_cast %1054 : vector<8x128xf32> to vector<1x8x128xf32>
    tpu.vector_store %arg24[%1056, %c0_295, %c0_296], %1059 {strides = array<i32>} : memref<8x8x128xf32, #tpu.memory_space<vmem>>, vector<1x8x128xf32>,
    %c4_i32_297 = arith.constant 4 : i32
    %1060 = arith.index_cast %c4_i32_297 : i32 to index
    %c0_298 = arith.constant 0 : index
    %c0_299 = arith.constant 0 : index
    %1061 = vector.load %arg1[%1060, %c0_298, %c0_299] : memref<7x8x1xi32, #tpu.memory_space<vmem>>, vector<1x8x1xi32>
    %1062 = vector.shape_cast %1061 : vector<1x8x1xi32> to vector<8x1xi32>
    %1063 = vector.broadcast %1062 : vector<8x1xi32> to vector<8x16xi32>
    %1064 = arith.cmpi eq, %2, %1063 : vector<8x16xi32>
    %1065 = arith.extui %1064 : vector<8x16xi1> to vector<8x16xi32>
    %1066 = arith.sitofp %1065 : vector<8x16xi32> to vector<8x16xf32>
    %cst_300 = arith.constant dense<0.000000e+00> : vector<8x128xf32>
    %1067 = tpu.matmul %1066, %793, %cst_300 {dimension_numbers = #tpu.dot_dimension_numbers<[1], [0], [0], [1], [0, 0, 1, 1], [], []>} : vector<8x16xf32>, vector<16x128xf32>, vector<8x128xf32> -> vector<8x128xf32>
    %cst_301 = arith.constant dense<0.000000e+00> : vector<8x128xf32>
    %1068 = tpu.matmul %1024, %794, %cst_301 {dimension_numbers = #tpu.dot_dimension_numbers<[1], [0], [0], [1], [0, 0, 1, 1], [], []>} : vector<8x32xf32>, vector<32x128xf32>, vector<8x128xf32> -> vector<8x128xf32>
    %1069 = arith.addf %1067, %1068 : vector<8x128xf32>
    %cst_302 = arith.constant dense<0.000000e+00> : vector<8x128xf32>
    %1070 = tpu.matmul %1024, %795, %cst_302 {dimension_numbers = #tpu.dot_dimension_numbers<[1], [0], [0], [1], [0, 0, 1, 1], [], []>} : vector<8x32xf32>, vector<32x128xf32>, vector<8x128xf32> -> vector<8x128xf32>
    %1071 = arith.addf %1069, %1070 : vector<8x128xf32>
    %1072 = arith.addf %1071, %798 : vector<8x128xf32>
    %1073 = arith.negf %1072 : vector<8x128xf32>
    %1074 = math.exp %1073 : vector<8x128xf32>
    %cst_303 = arith.constant 1.000000e+00 : f32
    %1075 = vector.broadcast %cst_303 : f32 to vector<8x128xf32>
    %1076 = arith.addf %1075, %1074 : vector<8x128xf32>
    %1077 = arith.divf %1075, %1076 : vector<8x128xf32>
    %1078 = math.tanh %1072 : vector<8x128xf32>
    %1079 = vector.extract_strided_slice %1077 {offsets = [0, 0], sizes = [8, 32], strides = [1, 1]} : vector<8x128xf32> to vector<8x32xf32>
    %1080 = vector.extract_strided_slice %1077 {offsets = [0, 32], sizes = [8, 32], strides = [1, 1]} : vector<8x128xf32> to vector<8x32xf32>
    %1081 = vector.extract_strided_slice %1078 {offsets = [0, 64], sizes = [8, 32], strides = [1, 1]} : vector<8x128xf32> to vector<8x32xf32>
    %1082 = vector.extract_strided_slice %1077 {offsets = [0, 96], sizes = [8, 32], strides = [1, 1]} : vector<8x128xf32> to vector<8x32xf32>
    %1083 = arith.mulf %1080, %1022 : vector<8x32xf32>
    %1084 = arith.mulf %1079, %1081 : vector<8x32xf32>
    %1085 = arith.addf %1083, %1084 : vector<8x32xf32>
    %1086 = math.tanh %1085 : vector<8x32xf32>
    %1087 = arith.mulf %1082, %1086 : vector<8x32xf32>
    %cst_304 = arith.constant dense<0.000000e+00> : vector<8x128xf32>
    %1088 = tpu.matmul %1087, %799, %cst_304 {dimension_numbers = #tpu.dot_dimension_numbers<[1], [0], [0], [1], [0, 0, 1, 1], [], []>} : vector<8x32xf32>, vector<32x128xf32>, vector<8x128xf32> -> vector<8x128xf32>
    %cst_305 = arith.constant dense<0.000000e+00> : vector<8x128xf32>
    %1089 = tpu.matmul %1040, %800, %cst_305 {dimension_numbers = #tpu.dot_dimension_numbers<[1], [0], [0], [1], [0, 0, 1, 1], [], []>} : vector<8x32xf32>, vector<32x128xf32>, vector<8x128xf32> -> vector<8x128xf32>
    %1090 = arith.addf %1088, %1089 : vector<8x128xf32>
    %1091 = arith.addf %1090, %803 : vector<8x128xf32>
    %1092 = arith.negf %1091 : vector<8x128xf32>
    %1093 = math.exp %1092 : vector<8x128xf32>
    %cst_306 = arith.constant 1.000000e+00 : f32
    %1094 = vector.broadcast %cst_306 : f32 to vector<8x128xf32>
    %1095 = arith.addf %1094, %1093 : vector<8x128xf32>
    %1096 = arith.divf %1094, %1095 : vector<8x128xf32>
    %1097 = math.tanh %1091 : vector<8x128xf32>
    %1098 = vector.extract_strided_slice %1096 {offsets = [0, 0], sizes = [8, 32], strides = [1, 1]} : vector<8x128xf32> to vector<8x32xf32>
    %1099 = vector.extract_strided_slice %1097 {offsets = [0, 64], sizes = [8, 32], strides = [1, 1]} : vector<8x128xf32> to vector<8x32xf32>
    %1100 = vector.extract_strided_slice %1096 {offsets = [0, 96], sizes = [8, 32], strides = [1, 1]} : vector<8x128xf32> to vector<8x32xf32>
    %1101 = arith.mulf %1098, %1099 : vector<8x32xf32>
    %1102 = math.tanh %1101 : vector<8x32xf32>
    %1103 = arith.mulf %1100, %1102 : vector<8x32xf32>
    %cst_307 = arith.constant dense<0.000000e+00> : vector<8x128xf32>
    %1104 = tpu.matmul %1103, %804, %cst_307 {dimension_numbers = #tpu.dot_dimension_numbers<[1], [0], [0], [1], [0, 0, 1, 1], [], []>} : vector<8x32xf32>, vector<32x128xf32>, vector<8x128xf32> -> vector<8x128xf32>
    %1105 = arith.addf %1104, %807 : vector<8x128xf32>
    %cst_308 = arith.constant dense<0xFF800000> : vector<8xf32>
    %1106 = vector.multi_reduction <maximumf>, %1105, %cst_308 [1] : vector<8x128xf32> to vector<8xf32>
    %1107 = vector.shape_cast %1106 : vector<8xf32> to vector<8x1xf32>
    %1108 = vector.broadcast %1107 : vector<8x1xf32> to vector<8x128xf32>
    %1109 = arith.subf %1105, %1108 : vector<8x128xf32>
    %1110 = math.exp %1109 : vector<8x128xf32>
    %cst_309 = arith.constant dense<0.000000e+00> : vector<8xf32>
    %1111 = vector.multi_reduction <add>, %1110, %cst_309 [1] : vector<8x128xf32> to vector<8xf32>
    %1112 = vector.shape_cast %1111 : vector<8xf32> to vector<8x1xf32>
    %1113 = vector.broadcast %1107 : vector<8x1xf32> to vector<8x128xf32>
    %1114 = arith.subf %1105, %1113 : vector<8x128xf32>
    %1115 = math.log %1112 : vector<8x1xf32>
    %1116 = vector.broadcast %1115 : vector<8x1xf32> to vector<8x128xf32>
    %1117 = arith.subf %1114, %1116 : vector<8x128xf32>
    %c1_i32_310 = arith.constant 1 : i32
    %1118 = arith.addi %c1_i32_310, %c4_i32_297 : i32
    %1119 = arith.index_cast %1118 : i32 to index
    %c0_311 = arith.constant 0 : index
    %c0_312 = arith.constant 0 : index
    %1120 = vector.load %arg24[%1119, %c0_311, %c0_312] : memref<8x8x128xf32, #tpu.memory_space<vmem>>, vector<1x8x128xf32>
    %1121 = vector.shape_cast %1120 : vector<1x8x128xf32> to vector<8x128xf32>
    %1122 = vector.shape_cast %1117 : vector<8x128xf32> to vector<1x8x128xf32>
    tpu.vector_store %arg24[%1119, %c0_311, %c0_312], %1122 {strides = array<i32>} : memref<8x8x128xf32, #tpu.memory_space<vmem>>, vector<1x8x128xf32>,
    %c5_i32_313 = arith.constant 5 : i32
    %1123 = arith.index_cast %c5_i32_313 : i32 to index
    %c0_314 = arith.constant 0 : index
    %c0_315 = arith.constant 0 : index
    %1124 = vector.load %arg1[%1123, %c0_314, %c0_315] : memref<7x8x1xi32, #tpu.memory_space<vmem>>, vector<1x8x1xi32>
    %1125 = vector.shape_cast %1124 : vector<1x8x1xi32> to vector<8x1xi32>
    %1126 = vector.broadcast %1125 : vector<8x1xi32> to vector<8x16xi32>
    %1127 = arith.cmpi eq, %2, %1126 : vector<8x16xi32>
    %1128 = arith.extui %1127 : vector<8x16xi1> to vector<8x16xi32>
    %1129 = arith.sitofp %1128 : vector<8x16xi32> to vector<8x16xf32>
    %cst_316 = arith.constant dense<0.000000e+00> : vector<8x128xf32>
    %1130 = tpu.matmul %1129, %793, %cst_316 {dimension_numbers = #tpu.dot_dimension_numbers<[1], [0], [0], [1], [0, 0, 1, 1], [], []>} : vector<8x16xf32>, vector<16x128xf32>, vector<8x128xf32> -> vector<8x128xf32>
    %cst_317 = arith.constant dense<0.000000e+00> : vector<8x128xf32>
    %1131 = tpu.matmul %1087, %794, %cst_317 {dimension_numbers = #tpu.dot_dimension_numbers<[1], [0], [0], [1], [0, 0, 1, 1], [], []>} : vector<8x32xf32>, vector<32x128xf32>, vector<8x128xf32> -> vector<8x128xf32>
    %1132 = arith.addf %1130, %1131 : vector<8x128xf32>
    %cst_318 = arith.constant dense<0.000000e+00> : vector<8x128xf32>
    %1133 = tpu.matmul %1087, %795, %cst_318 {dimension_numbers = #tpu.dot_dimension_numbers<[1], [0], [0], [1], [0, 0, 1, 1], [], []>} : vector<8x32xf32>, vector<32x128xf32>, vector<8x128xf32> -> vector<8x128xf32>
    %1134 = arith.addf %1132, %1133 : vector<8x128xf32>
    %1135 = arith.addf %1134, %798 : vector<8x128xf32>
    %1136 = arith.negf %1135 : vector<8x128xf32>
    %1137 = math.exp %1136 : vector<8x128xf32>
    %cst_319 = arith.constant 1.000000e+00 : f32
    %1138 = vector.broadcast %cst_319 : f32 to vector<8x128xf32>
    %1139 = arith.addf %1138, %1137 : vector<8x128xf32>
    %1140 = arith.divf %1138, %1139 : vector<8x128xf32>
    %1141 = math.tanh %1135 : vector<8x128xf32>
    %1142 = vector.extract_strided_slice %1140 {offsets = [0, 0], sizes = [8, 32], strides = [1, 1]} : vector<8x128xf32> to vector<8x32xf32>
    %1143 = vector.extract_strided_slice %1140 {offsets = [0, 32], sizes = [8, 32], strides = [1, 1]} : vector<8x128xf32> to vector<8x32xf32>
    %1144 = vector.extract_strided_slice %1141 {offsets = [0, 64], sizes = [8, 32], strides = [1, 1]} : vector<8x128xf32> to vector<8x32xf32>
    %1145 = vector.extract_strided_slice %1140 {offsets = [0, 96], sizes = [8, 32], strides = [1, 1]} : vector<8x128xf32> to vector<8x32xf32>
    %1146 = arith.mulf %1143, %1085 : vector<8x32xf32>
    %1147 = arith.mulf %1142, %1144 : vector<8x32xf32>
    %1148 = arith.addf %1146, %1147 : vector<8x32xf32>
    %1149 = math.tanh %1148 : vector<8x32xf32>
    %1150 = arith.mulf %1145, %1149 : vector<8x32xf32>
    %cst_320 = arith.constant dense<0.000000e+00> : vector<8x128xf32>
    %1151 = tpu.matmul %1150, %799, %cst_320 {dimension_numbers = #tpu.dot_dimension_numbers<[1], [0], [0], [1], [0, 0, 1, 1], [], []>} : vector<8x32xf32>, vector<32x128xf32>, vector<8x128xf32> -> vector<8x128xf32>
    %cst_321 = arith.constant dense<0.000000e+00> : vector<8x128xf32>
    %1152 = tpu.matmul %1103, %800, %cst_321 {dimension_numbers = #tpu.dot_dimension_numbers<[1], [0], [0], [1], [0, 0, 1, 1], [], []>} : vector<8x32xf32>, vector<32x128xf32>, vector<8x128xf32> -> vector<8x128xf32>
    %1153 = arith.addf %1151, %1152 : vector<8x128xf32>
    %1154 = arith.addf %1153, %803 : vector<8x128xf32>
    %1155 = arith.negf %1154 : vector<8x128xf32>
    %1156 = math.exp %1155 : vector<8x128xf32>
    %cst_322 = arith.constant 1.000000e+00 : f32
    %1157 = vector.broadcast %cst_322 : f32 to vector<8x128xf32>
    %1158 = arith.addf %1157, %1156 : vector<8x128xf32>
    %1159 = arith.divf %1157, %1158 : vector<8x128xf32>
    %1160 = math.tanh %1154 : vector<8x128xf32>
    %1161 = vector.extract_strided_slice %1159 {offsets = [0, 0], sizes = [8, 32], strides = [1, 1]} : vector<8x128xf32> to vector<8x32xf32>
    %1162 = vector.extract_strided_slice %1160 {offsets = [0, 64], sizes = [8, 32], strides = [1, 1]} : vector<8x128xf32> to vector<8x32xf32>
    %1163 = vector.extract_strided_slice %1159 {offsets = [0, 96], sizes = [8, 32], strides = [1, 1]} : vector<8x128xf32> to vector<8x32xf32>
    %1164 = arith.mulf %1161, %1162 : vector<8x32xf32>
    %1165 = math.tanh %1164 : vector<8x32xf32>
    %1166 = arith.mulf %1163, %1165 : vector<8x32xf32>
    %cst_323 = arith.constant dense<0.000000e+00> : vector<8x128xf32>
    %1167 = tpu.matmul %1166, %804, %cst_323 {dimension_numbers = #tpu.dot_dimension_numbers<[1], [0], [0], [1], [0, 0, 1, 1], [], []>} : vector<8x32xf32>, vector<32x128xf32>, vector<8x128xf32> -> vector<8x128xf32>
    %1168 = arith.addf %1167, %807 : vector<8x128xf32>
    %cst_324 = arith.constant dense<0xFF800000> : vector<8xf32>
    %1169 = vector.multi_reduction <maximumf>, %1168, %cst_324 [1] : vector<8x128xf32> to vector<8xf32>
    %1170 = vector.shape_cast %1169 : vector<8xf32> to vector<8x1xf32>
    %1171 = vector.broadcast %1170 : vector<8x1xf32> to vector<8x128xf32>
    %1172 = arith.subf %1168, %1171 : vector<8x128xf32>
    %1173 = math.exp %1172 : vector<8x128xf32>
    %cst_325 = arith.constant dense<0.000000e+00> : vector<8xf32>
    %1174 = vector.multi_reduction <add>, %1173, %cst_325 [1] : vector<8x128xf32> to vector<8xf32>
    %1175 = vector.shape_cast %1174 : vector<8xf32> to vector<8x1xf32>
    %1176 = vector.broadcast %1170 : vector<8x1xf32> to vector<8x128xf32>
    %1177 = arith.subf %1168, %1176 : vector<8x128xf32>
    %1178 = math.log %1175 : vector<8x1xf32>
    %1179 = vector.broadcast %1178 : vector<8x1xf32> to vector<8x128xf32>
    %1180 = arith.subf %1177, %1179 : vector<8x128xf32>
    %c1_i32_326 = arith.constant 1 : i32
    %1181 = arith.addi %c1_i32_326, %c5_i32_313 : i32
    %1182 = arith.index_cast %1181 : i32 to index
    %c0_327 = arith.constant 0 : index
    %c0_328 = arith.constant 0 : index
    %1183 = vector.load %arg24[%1182, %c0_327, %c0_328] : memref<8x8x128xf32, #tpu.memory_space<vmem>>, vector<1x8x128xf32>
    %1184 = vector.shape_cast %1183 : vector<1x8x128xf32> to vector<8x128xf32>
    %1185 = vector.shape_cast %1180 : vector<8x128xf32> to vector<1x8x128xf32>
    tpu.vector_store %arg24[%1182, %c0_327, %c0_328], %1185 {strides = array<i32>} : memref<8x8x128xf32, #tpu.memory_space<vmem>>, vector<1x8x128xf32>,
    %c6_i32_329 = arith.constant 6 : i32
    %1186 = arith.index_cast %c6_i32_329 : i32 to index
    %c0_330 = arith.constant 0 : index
    %c0_331 = arith.constant 0 : index
    %1187 = vector.load %arg1[%1186, %c0_330, %c0_331] : memref<7x8x1xi32, #tpu.memory_space<vmem>>, vector<1x8x1xi32>
    %1188 = vector.shape_cast %1187 : vector<1x8x1xi32> to vector<8x1xi32>
    %1189 = vector.broadcast %1188 : vector<8x1xi32> to vector<8x16xi32>
    %1190 = arith.cmpi eq, %2, %1189 : vector<8x16xi32>
    %1191 = arith.extui %1190 : vector<8x16xi1> to vector<8x16xi32>
    %1192 = arith.sitofp %1191 : vector<8x16xi32> to vector<8x16xf32>
    %cst_332 = arith.constant dense<0.000000e+00> : vector<8x128xf32>
    %1193 = tpu.matmul %1192, %793, %cst_332 {dimension_numbers = #tpu.dot_dimension_numbers<[1], [0], [0], [1], [0, 0, 1, 1], [], []>} : vector<8x16xf32>, vector<16x128xf32>, vector<8x128xf32> -> vector<8x128xf32>
    %cst_333 = arith.constant dense<0.000000e+00> : vector<8x128xf32>
    %1194 = tpu.matmul %1150, %794, %cst_333 {dimension_numbers = #tpu.dot_dimension_numbers<[1], [0], [0], [1], [0, 0, 1, 1], [], []>} : vector<8x32xf32>, vector<32x128xf32>, vector<8x128xf32> -> vector<8x128xf32>
    %1195 = arith.addf %1193, %1194 : vector<8x128xf32>
    %cst_334 = arith.constant dense<0.000000e+00> : vector<8x128xf32>
    %1196 = tpu.matmul %1150, %795, %cst_334 {dimension_numbers = #tpu.dot_dimension_numbers<[1], [0], [0], [1], [0, 0, 1, 1], [], []>} : vector<8x32xf32>, vector<32x128xf32>, vector<8x128xf32> -> vector<8x128xf32>
    %1197 = arith.addf %1195, %1196 : vector<8x128xf32>
    %1198 = arith.addf %1197, %798 : vector<8x128xf32>
    %1199 = arith.negf %1198 : vector<8x128xf32>
    %1200 = math.exp %1199 : vector<8x128xf32>
    %cst_335 = arith.constant 1.000000e+00 : f32
    %1201 = vector.broadcast %cst_335 : f32 to vector<8x128xf32>
    %1202 = arith.addf %1201, %1200 : vector<8x128xf32>
    %1203 = arith.divf %1201, %1202 : vector<8x128xf32>
    %1204 = math.tanh %1198 : vector<8x128xf32>
    %1205 = vector.extract_strided_slice %1203 {offsets = [0, 0], sizes = [8, 32], strides = [1, 1]} : vector<8x128xf32> to vector<8x32xf32>
    %1206 = vector.extract_strided_slice %1203 {offsets = [0, 32], sizes = [8, 32], strides = [1, 1]} : vector<8x128xf32> to vector<8x32xf32>
    %1207 = vector.extract_strided_slice %1204 {offsets = [0, 64], sizes = [8, 32], strides = [1, 1]} : vector<8x128xf32> to vector<8x32xf32>
    %1208 = vector.extract_strided_slice %1203 {offsets = [0, 96], sizes = [8, 32], strides = [1, 1]} : vector<8x128xf32> to vector<8x32xf32>
    %1209 = arith.mulf %1206, %1148 : vector<8x32xf32>
    %1210 = arith.mulf %1205, %1207 : vector<8x32xf32>
    %1211 = arith.addf %1209, %1210 : vector<8x32xf32>
    %1212 = math.tanh %1211 : vector<8x32xf32>
    %1213 = arith.mulf %1208, %1212 : vector<8x32xf32>
    %cst_336 = arith.constant dense<0.000000e+00> : vector<8x128xf32>
    %1214 = tpu.matmul %1213, %799, %cst_336 {dimension_numbers = #tpu.dot_dimension_numbers<[1], [0], [0], [1], [0, 0, 1, 1], [], []>} : vector<8x32xf32>, vector<32x128xf32>, vector<8x128xf32> -> vector<8x128xf32>
    %cst_337 = arith.constant dense<0.000000e+00> : vector<8x128xf32>
    %1215 = tpu.matmul %1166, %800, %cst_337 {dimension_numbers = #tpu.dot_dimension_numbers<[1], [0], [0], [1], [0, 0, 1, 1], [], []>} : vector<8x32xf32>, vector<32x128xf32>, vector<8x128xf32> -> vector<8x128xf32>
    %1216 = arith.addf %1214, %1215 : vector<8x128xf32>
    %1217 = arith.addf %1216, %803 : vector<8x128xf32>
    %1218 = arith.negf %1217 : vector<8x128xf32>
    %1219 = math.exp %1218 : vector<8x128xf32>
    %cst_338 = arith.constant 1.000000e+00 : f32
    %1220 = vector.broadcast %cst_338 : f32 to vector<8x128xf32>
    %1221 = arith.addf %1220, %1219 : vector<8x128xf32>
    %1222 = arith.divf %1220, %1221 : vector<8x128xf32>
    %1223 = math.tanh %1217 : vector<8x128xf32>
    %1224 = vector.extract_strided_slice %1222 {offsets = [0, 0], sizes = [8, 32], strides = [1, 1]} : vector<8x128xf32> to vector<8x32xf32>
    %1225 = vector.extract_strided_slice %1223 {offsets = [0, 64], sizes = [8, 32], strides = [1, 1]} : vector<8x128xf32> to vector<8x32xf32>
    %1226 = vector.extract_strided_slice %1222 {offsets = [0, 96], sizes = [8, 32], strides = [1, 1]} : vector<8x128xf32> to vector<8x32xf32>
    %1227 = arith.mulf %1224, %1225 : vector<8x32xf32>
    %1228 = math.tanh %1227 : vector<8x32xf32>
    %1229 = arith.mulf %1226, %1228 : vector<8x32xf32>
    %cst_339 = arith.constant dense<0.000000e+00> : vector<8x128xf32>
    %1230 = tpu.matmul %1229, %804, %cst_339 {dimension_numbers = #tpu.dot_dimension_numbers<[1], [0], [0], [1], [0, 0, 1, 1], [], []>} : vector<8x32xf32>, vector<32x128xf32>, vector<8x128xf32> -> vector<8x128xf32>
    %1231 = arith.addf %1230, %807 : vector<8x128xf32>
    %cst_340 = arith.constant dense<0xFF800000> : vector<8xf32>
    %1232 = vector.multi_reduction <maximumf>, %1231, %cst_340 [1] : vector<8x128xf32> to vector<8xf32>
    %1233 = vector.shape_cast %1232 : vector<8xf32> to vector<8x1xf32>
    %1234 = vector.broadcast %1233 : vector<8x1xf32> to vector<8x128xf32>
    %1235 = arith.subf %1231, %1234 : vector<8x128xf32>
    %1236 = math.exp %1235 : vector<8x128xf32>
    %cst_341 = arith.constant dense<0.000000e+00> : vector<8xf32>
    %1237 = vector.multi_reduction <add>, %1236, %cst_341 [1] : vector<8x128xf32> to vector<8xf32>
    %1238 = vector.shape_cast %1237 : vector<8xf32> to vector<8x1xf32>
    %1239 = vector.broadcast %1233 : vector<8x1xf32> to vector<8x128xf32>
    %1240 = arith.subf %1231, %1239 : vector<8x128xf32>
    %1241 = math.log %1238 : vector<8x1xf32>
    %1242 = vector.broadcast %1241 : vector<8x1xf32> to vector<8x128xf32>
    %1243 = arith.subf %1240, %1242 : vector<8x128xf32>
    %c1_i32_342 = arith.constant 1 : i32
    %1244 = arith.addi %c1_i32_342, %c6_i32_329 : i32
    %1245 = arith.index_cast %1244 : i32 to index
    %c0_343 = arith.constant 0 : index
    %c0_344 = arith.constant 0 : index
    %1246 = vector.load %arg24[%1245, %c0_343, %c0_344] : memref<8x8x128xf32, #tpu.memory_space<vmem>>, vector<1x8x128xf32>
    %1247 = vector.shape_cast %1246 : vector<1x8x128xf32> to vector<8x128xf32>
    %1248 = vector.shape_cast %1243 : vector<8x128xf32> to vector<1x8x128xf32>
    tpu.vector_store %arg24[%1245, %c0_343, %c0_344], %1248 {strides = array<i32>} : memref<8x8x128xf32, #tpu.memory_space<vmem>>, vector<1x8x128xf32>,
    %c7_i32_345 = arith.constant 7 : i32
    return
  }
}

</mosaic_0001>

<bundles_post_ra>
// kernel: forward.1
= control target key start
LH: loop header
LB: loop body
LE: loop exit
PB: predicated region body
PF: predicated region fallthrough
CT: control target
= control target key end

     0   :  { %s6353_s0 = inlined_call_operand.vmem [shape: s32[8,8,1], index: 0, kind: input, shape index: {}]   ;;  %s6354_s1 = inlined_call_operand.vmem [shape: s32[7,8,1], index: 1, kind: input, shape index: {}]   ;;  %s6355_s2 = inlined_call_operand.vmem [shape: s32[8,1], index: 2, kind: input, shape index: {}]   ;;  %s6356_s3 = inlined_call_operand.vmem [shape: f32[1,128], index: 3, kind: input, shape index: {}]   ;;  %s6357_s4 = inlined_call_operand.vmem [shape: f32[16,128], index: 4, kind: input, shape index: {}]   ;;  %s6358_s5 = inlined_call_operand.vmem [shape: f32[32,128], index: 5, kind: input, shape index: {}]   ;;  %s6359_s6 = inlined_call_operand.vmem [shape: f32[1,128], index: 6, kind: input, shape index: {}]   ;;  %s6360_s7 = inlined_call_operand.hbm [shape: f32[16,128], index: 7, kind: input, shape index: {}]   ;;  %s6361_s8 = inlined_call_operand.vmem [shape: f32[32,128], index: 8, kind: input, shape index: {}]   ;;  %s6362_s9 = inlined_call_operand.vmem [shape: f32[1,128], index: 9, kind: input, shape index: {}]   ;;  %s6363_s10 = inlined_call_operand.vmem [shape: f32[32,128], index: 10, kind: input, shape index: {}]   ;;  %s6364_s11 = inlined_call_operand.vmem [shape: f32[32,128], index: 11, kind: input, shape index: {}]   ;;  %s6365_s12 = inlined_call_operand.vmem [shape: f32[1,128], index: 12, kind: input, shape index: {}]   ;;  %s6366_s13 = inlined_call_operand.vmem [shape: f32[32,32], index: 13, kind: input, shape index: {}]   ;;  %s6367_s14 = inlined_call_operand.vmem [shape: f32[1,32], index: 14, kind: input, shape index: {}]   ;;  %s6368_s15 = inlined_call_operand.hbm [shape: f32[16,128], index: 15, kind: input, shape index: {}]   ;;  %s6369_s16 = inlined_call_operand.vmem [shape: f32[32,128], index: 16, kind: input, shape index: {}]   ;;  %s6370_s17 = inlined_call_operand.vmem [shape: f32[32,128], index: 17, kind: input, shape index: {}]   ;;  %s6371_s18 = inlined_call_operand.hbm [shape: f32[1,128], index: 18, kind: input, shape index: {}]   ;;  %s6372_s19 = inlined_call_operand.hbm [shape: f32[32,128], index: 19, kind: input, shape index: {}]   ;;  %s6373_s20 = inlined_call_operand.hbm [shape: f32[32,128], index: 20, kind: input, shape index: {}]   ;;  %s6374_s21 = inlined_call_operand.hbm [shape: f32[1,128], index: 21, kind: input, shape index: {}]   ;;  %s6375_s22 = inlined_call_operand.hbm [shape: f32[32,128], index: 22, kind: input, shape index: {}]   ;;  %s6376_s23 = inlined_call_operand.vmem [shape: f32[1,128], index: 23, kind: input, shape index: {}]   ;;  %s6377_s24 = inlined_call_operand.vmem [shape: f32[8,8,128], index: 24, kind: output, shape index: {}]  }
   0x1   :  { %6384 = sst [smem:[#allocation19_spill]] %s6353_s0 }
   0x2   :  { %6385 = sst [smem:[#allocation20_spill]] %s6354_s1 }
   0x3   :  { %6386 = sst [smem:[#allocation21_spill]] %s6355_s2 }
   0x4   :  { %6387 = sst [smem:[#allocation22_spill]] %s6356_s3 }
   0x5   :  { %6388 = sst [smem:[#allocation23_spill]] %s6357_s4 }
   0x6   :  { %6389 = sst [smem:[#allocation24_spill]] %s6358_s5 }
   0x7   :  { %6390 = sst [smem:[#allocation25_spill]] %s6359_s6 }
   0x8   :  { %6391 = sst [smem:[#allocation26_spill]] %s6360_s7 }
   0x9   :  { %6392 = sst [smem:[#allocation27_spill]] %s6361_s8 }
   0xa   :  { %29 = vsyncpa [#allocation5], 0 }
   0xb   :  { %30 = vsyncpa [#allocation7], 0 }
   0xc   :  { %31 = vsyncpa [#allocation10], 0 }
   0xd   :  { %32 = vsyncpa [#allocation13], 0  ;;  %s78_s27 = sshll.u32 %s6368_s15, 4  ;;  %s4942_s28 = smov [#allocation6]   ;;  %s79_s27 = int_to_ptr.hbm [resolvable:$true] %s78_s27 }
   0xe   :  { %s80_s6 = sshll.u32 %s4942_s28, 4  ;;  %s106_s0 = sshll.u32 %s6372_s19, 4  ;;  %s81_s6 = int_to_ptr.vmem [resolvable:$true] %s80_s6  ;;  %s107_s0 = int_to_ptr.hbm [resolvable:$true] %s106_s0 }
   0xf   :  { %s4943_s7 = smov 128   ;;  %s4944_s30 = smov 8  }
  0x10   :  { %86 = dma.hbm_to_vmem [thread:$0]  %s79_s27, 256, %s81_s6, [#allocation7], %s4943_s7, %s4943_s7, %s4944_s30  }
  0x11   :  { %s4945_s3 = smov [#allocation9]   ;;  %s133_s15 = sshll.u32 %s6374_s21, 4  ;;  %s134_s15 = int_to_ptr.hbm [resolvable:$true] %s133_s15 }
  0x12   :  { %s108_s25 = sshll.u32 %s4945_s3, 4  ;;  %s6393_s5 = sld [smem:[#allocation26_spill]]  ;;  %s109_s25 = int_to_ptr.vmem [resolvable:$true] %s108_s25 }
  0x13   :  { %114 = dma.hbm_to_vmem [thread:$0]  %s107_s0, 512, %s109_s25, [#allocation10], %s4943_s7, %s4943_s7, %s4944_s30  }
  0x14   :  { %s4946_s28 = smov [#allocation12]   ;;  %s4947_s27 = smov [#allocation4]  }
  0x15   :  { %s135_s2 = sshll.u32 %s4946_s28, 4  ;;  %s53_s6 = sshll.u32 %s4947_s27, 4  ;;  %s136_s2 = int_to_ptr.vmem [resolvable:$true] %s135_s2  ;;  %s54_s6 = int_to_ptr.vmem [resolvable:$true] %s53_s6 }
  0x16   :  { %138 = dma.hbm_to_vmem [thread:$0]  %s134_s15, 16, %s136_s2, [#allocation13]  }
  0x17   :  { %s96_s21 = sshll.u32 %s6371_s18, 4  ;;  %s119_s8 = sshll.u32 %s6373_s20, 4  ;;  %s97_s21 = int_to_ptr.hbm [resolvable:$true] %s96_s21  ;;  %s120_s8 = int_to_ptr.hbm [resolvable:$true] %s119_s8 }
  0x18   :  { %s51_s26 = sshll.u32 %s6393_s5, 4  ;;  %s4948_s4 = smov [#allocation8]   ;;  %s52_s26 = int_to_ptr.hbm [resolvable:$true] %s51_s26 }
  0x19   :  { %59 = dma.hbm_to_vmem [thread:$0]  %s52_s26, 256, %s54_s6, [#allocation5], %s4943_s7, %s4943_s7, %s4944_s30  }
  0x1a   :  { %s98_s19 = sshll.u32 %s4948_s4, 4  ;;  %s4949_s15 = smov [#allocation11]   ;;  %s99_s19 = int_to_ptr.vmem [resolvable:$true] %s98_s19 }
  0x1b   :  { %101 = dma.hbm_to_vmem [thread:$0]  %s97_s21, 16, %s99_s19, [#allocation7]  }
  0x1c   :  { %s121_s1 = sshll.u32 %s4949_s15, 4  ;;  %s143_s18 = sshll.u32 %s6375_s22, 4  ;;  %s122_s1 = int_to_ptr.vmem [resolvable:$true] %s121_s1  ;;  %s144_s18 = int_to_ptr.hbm [resolvable:$true] %s143_s18 }
  0x1d   :  { %127 = dma.hbm_to_vmem [thread:$0]  %s120_s8, 512, %s122_s1, [#allocation10], %s4943_s7, %s4943_s7, %s4944_s30  }
  0x1e   :  { %s4950_s26 = smov [#allocation14]  }
  0x1f   :  { %s145_s2 = sshll.u32 %s4950_s26, 4  ;;  %s146_s2 = int_to_ptr.vmem [resolvable:$true] %s145_s2 }
  0x20   :  { %151 = dma.hbm_to_vmem [thread:$0]  %s144_s18, 512, %s146_s2, [#allocation13], %s4943_s7, %s4943_s7, %s4944_s30  }
  0x21   :  { %4934 = dma.done.wait [#allocation5], 256  }
  0x22   :  { %4935 = vsyncadd [#allocation5], 4294967040 }
  0x23   :  { %4936 = dma.done.wait [#allocation7], 272  }
  0x24   :  { %4937 = vsyncadd [#allocation7], 4294967024 }
  0x25   :  { %4938 = dma.done.wait [#allocation10], 1024  }
  0x26   :  { %4939 = vsyncadd [#allocation10], 4294966272 }
  0x27   :  { %4940 = dma.done.wait [#allocation13], 528  }
  0x28   :  { %4941 = vsyncadd [#allocation13], 4294966768  ;;  %v4951_v0 = vmov 0   ;;  %s6394_s27 = sld [smem:[#allocation22_spill]]  ;;  %v5146_v6 = vld [vmem:[#allocation4 + $0x8] sm:$0xff]  ;;  %v5155_v8 = vld [vmem:[#allocation4] sm:$0xff]  ;;  %v182_v10 = vlaneseq }
  0x29   :  { %4399 = vset.pattern.permute.xlu0 %v4951_v0  ;;  %4400 = vset.pattern.permute.xlu2 %v4951_v0  ;;  %s6395_s6 = sld [smem:[#allocation19_spill]]  ;;  %v4952_v9 = vmov 0.0   ;;  %vm243_vm0 = vcmask 130048   ;;  %v5172_v15 = vld [vmem:[%s6362_s9] ss:$0 sm:$0xff]  ;;  %s4953_s26 = smov 64  }
  0x2a   :  { %4401 = vset.pattern.permute.xlu1 %v4951_v0  ;;  %s6396_s21 = sld [smem:[#allocation27_spill]]  ;;  %305 = vmatpush.msra.mxu3 %v5146_v6  ;;  %v5164_v11 = vand.u32 127, %v182_v10  ;;  %s4954_s28 = smov 32   ;;  %vm219_vm8 = vcmask 261120  }
  0x2b   :  { %s6397_s7 = sld [smem:[#allocation24_spill]]  ;;  %s4955_s18 = smov 96  }
  0x2c   :  { %306 = vmatpush.msra.mxu3 %v5155_v8  ;;  %s6398_s4 = sld [smem:[#allocation23_spill]] }
  0x2d   :  { %s6400_s25 = sld [smem:[#allocation21_spill]] }
  0x2e   :  { %v4402_v1 = vld [vmem:[%s6394_s27] ss:$0 sm:$0xff]  ;;  %s6399_s27 = sld [smem:[#allocation25_spill]] }
  0x2f   :  { %v4209_v2 = vld [vmem:[%s6395_s6 + $0x38] sm:$0xff]  ;;  %2590 = vst [vmem:[%s6377_s24] sm:$0xff] %v4402_v1  ;;  %v204_v20 = vld [vmem:[%s6395_s6] sm:$0xff]  ;;  %v4217_v47 = vld [vmem:[%s6395_s6 + $0x30] sm:$0xff] }
  0x30   :  { %214 = vperm.xlu0 %4399, %v4209_v2   ;;  %v5129_v3 = vld [vmem:[%s6396_s21 + $0x18] sm:$0xff]  ;;  %v5134_v4 = vld [vmem:[%s6396_s21 + $0x10] sm:$0xff]  ;;  %v5144_v5 = vld [vmem:[%s6396_s21 + $0x8] sm:$0xff]  ;;  %408 = vperm.xlu2 %4400, %v4217_v47  }
  0x31   :  { %280 = vmatpush.msra.mxu2 %v5129_v3  ;;  %v5153_v7 = vld [vmem:[%s6396_s21] sm:$0xff]  ;;  %v5182_v24 = vld [vmem:[%s6397_s7 + $0x18] sm:$0xff]  ;;  %v5187_v25 = vld [vmem:[%s6397_s7 + $0x10] sm:$0xff] }
  0x32   :  { %235 = vmatpush.msra.mxu0 %v5182_v24  ;;  %v5194_v26 = vld [vmem:[%s6397_s7 + $0x8] sm:$0xff]  ;;  %v5206_v28 = vld [vmem:[%s6397_s7] sm:$0xff] }
  0x33   :  { %281 = vmatpush.msra.mxu2 %v5134_v4  ;;  %v5199_v27 = vld [vmem:[%s6398_s4 + $0x8] sm:$0xff]  ;;  %v5211_v29 = vld [vmem:[%s6398_s4] sm:$0xff] }
  0x34   :  { %236 = vmatpush.msra.mxu0 %v5187_v25  ;;  %261 = vmatpush.msra.mxu1 %v5199_v27  ;;  %v5255_v53 = vld [vmem:[%s6399_s27] ss:$0 sm:$0xff] }
  0x35   :  { %282 = vmatpush.msra.mxu2 %v5144_v5  ;;  %452 = vmatpush.msrb.mxu3 %v5199_v27 }
  0x36   :  { %237 = vmatpush.msra.mxu0 %v5194_v26  ;;  %262 = vmatpush.msra.mxu1 %v5211_v29 }
  0x37   :  { %283 = vmatpush.msra.mxu2 %v5153_v7  ;;  %453 = vmatpush.msrb.mxu3 %v5211_v29 }
  0x38   :  { %284 = vmatmul.f32.vlgmr.msra.gmra.mxu2 %v4952_v9  ;;  %238 = vmatpush.msra.mxu0 %v5206_v28 }
  0x39   :  { %498 = vmatpush.msrb.mxu2 %v5146_v6  ;;  %239 = vmatmul.f32.vlgmr.msra.gmra.mxu0 %v4952_v9 }
  0x3a   :  { %473 = vmatpush.msrb.mxu0 %v5129_v3  ;;  %427 = vmatpush.msrb.mxu1 %v5182_v24 }
  0x3b   :  { %499 = vmatpush.msrb.mxu2 %v5155_v8 }
  0x3c   :  { %474 = vmatpush.msrb.mxu0 %v5134_v4  ;;  %428 = vmatpush.msrb.mxu1 %v5187_v25 }
  0x3d   :  { %692 = vmatpush.msra.mxu2 %v5146_v6 }
  0x3e   :  { %475 = vmatpush.msrb.mxu0 %v5144_v5  ;;  %429 = vmatpush.msrb.mxu1 %v5194_v26 }
  0x3f   :  { %693 = vmatpush.msra.mxu2 %v5155_v8 }
  0x40   :  { %476 = vmatpush.msrb.mxu0 %v5153_v7  ;;  %430 = vmatpush.msrb.mxu1 %v5206_v28 }
  0x42   :  { %667 = vmatpush.msra.mxu0 %v5129_v3 }
  0x44   :  { %668 = vmatpush.msra.mxu0 %v5134_v4 }
  0x46   :  { %669 = vmatpush.msra.mxu0 %v5144_v5 }
  0x48   :  { %670 = vmatpush.msra.mxu0 %v5153_v7 }
  0x8a   :  { %v409_v49 = vpop.permute.xlu2 %408 }
  0x8b   :  { %vm410_vm7 = vcmp.eq.s32.totalorder %v5164_v11, %v409_v49 }
  0x8c   :  { %v4218_v50 = vsel %vm410_vm7, 1.0, %v4952_v9 }
  0x8d   :  { %4222 = vmatmul.msk.f32.vlgmr.msrb.gmra.mxu2 %vm243_vm0, %v4218_v50 }
  0x8e   :  { %886 = vmatpush.msrb.mxu2 %v5146_v6 }
  0x90   :  { %887 = vmatpush.msrb.mxu2 %v5155_v8 }
  0xa2   :  { %v215_v12 = vpop.permute.xlu0 %214 }
  0xa3   :  { %vm216_vm1 = vcmp.eq.s32.totalorder %v5164_v11, %v215_v12 }
  0xa4   :  { %v4210_v13 = vsel %vm216_vm1, 1.0, %v4952_v9 }
  0xa5   :  { %4212 = vmatmul.msk.f32.vlgmr.msra.gmra.mxu3 %vm243_vm0, %v4210_v13 }
  0xa6   :  { %646 = vmatpush.msra.mxu3 %v5199_v27 }
  0xa8   :  { %647 = vmatpush.msra.mxu3 %v5211_v29 }
  0xb6   :  { %v240_v51 = vpop.f32.mrf.mxu0 }
  0xbb   :  { %v285_v14 = vpop.f32.mrf.mxu2 }
 0x110   :  { %v501_v2 = vpop.f32.mrf.mxu2 }
 0x128   :  { %v308_v16 = vpop.f32.mrf.mxu3 }
 0x129   :  { %v309_v17 = vadd.f32 %v308_v16, %v285_v14 }
 0x12b   :  { %v311_v18 = vadd.f32 %v5172_v15, %v309_v17 }
 0x12d   :  { %4410 = vtanh.f32 %v311_v18  ;;  %v4214_v21 = vmul.f32 -1.442695, %v311_v18 }
 0x12f   :  { %4412 = vpow2.f32 %v4214_v21 }
 0x133   :  { %v4411_v19 = vpop.eup %4410 }
 0x134   :  { %371 = vrot.lane.b32.xlu0 %v4411_v19, %s4953_s26 }
 0x135   :  { %v4413_v22 = vpop.eup %4412 }
 0x136   :  { %v352_v23 = vadd.f32 1.0, %v4413_v22 }
 0x138   :  { %4414 = vrcp.f32 %v352_v23  ;;  %v364_v35 = vand.u32 2147483648, %v352_v23  ;;  %vm358_vm3 = vweird.f32 %v352_v23  ;;  %v362_v36 = vand.u32 2147483647, %v352_v23 }
 0x13a   :  { %v365_v38 = vor.u32 1.1754944e-38, %v364_v35  ;;  %vm363_vm5 = vcmp.eq.f32.partialorder %v362_v36, 8.507059e+37 }
 0x13c   :  { %206 = vperm.xlu0 %4399, %v204_v20  }
 0x13e   :  { %v4415_v30 = vpop.eup %4414 }
 0x13f   :  { %v354_v31 = vmul.f32 %v4415_v30, %v352_v23  ;;  %vm359_vm2 = vweird.f32 %v4415_v30 }
 0x140   :  { %vm360_vm4 = vmor %vm358_vm3, %vm359_vm2 }
 0x141   :  { %v355_v32 = vsub.f32 1.0, %v354_v31 }
 0x143   :  { %v356_v33 = vmul.f32 %v4415_v30, %v355_v32 }
 0x145   :  { %v357_v34 = vadd.f32 %v4415_v30, %v356_v33 }
 0x147   :  { %v361_v37 = vsel %vm360_vm4, %v4415_v30, %v357_v34 }
 0x148   :  { %v366_v40 = vsel %vm363_vm5, %v365_v38, %v361_v37 }
 0x149   :  { %v369_v44 = vmul.f32 0.0, %v366_v40 }
 0x1a6   :  { %v372_v39 = vpop.permute.xlu0 %371 }
 0x1a7   :  { %v374_v41 = vmul.f32 %v372_v39, %v366_v40 }
 0x1a9   :  { %376 = vrot.lane.b32.xlu1 %v374_v41, %s4954_s28 }
 0x1ae   :  { %v207_v42 = vpop.permute.xlu0 %206 }
 0x1af   :  { %vm208_vm6 = vcmp.eq.s32.totalorder %v5164_v11, %v207_v42 }
 0x1b0   :  { %v4208_v43 = vsel %vm208_vm6, 1.0, %v4952_v9 }
 0x1b1   :  { %4211 = vmatmul.msk.f32.vlgmr.msra.gmra.mxu1 %vm243_vm0, %v4208_v43 }
 0x1b2   :  { %621 = vmatpush.msra.mxu1 %v5182_v24 }
 0x1b4   :  { %622 = vmatpush.msra.mxu1 %v5187_v25 }
 0x1b6   :  { %623 = vmatpush.msra.mxu1 %v5194_v26 }
 0x1b8   :  { %624 = vmatpush.msra.mxu1 %v5206_v28 }
 0x21b   :  { %v377_v45 = vpop.permute.xlu1 %376 }
 0x21c   :  { %v5240_v46 = vadd.f32 %v377_v45, %v369_v44 }
 0x21e   :  { %4416 = vtanh.f32 %v5240_v46 }
 0x224   :  { %v4417_v48 = vpop.eup %4416 }
 0x225   :  { %382 = vrot.lane.b32.xlu1 %v4417_v48, %s4953_s26 }
 0x22e   :  { %v264_v52 = vpop.f32.mrf.mxu1 }
 0x22f   :  { %v265_v54 = vadd.f32 %v264_v52, %v240_v51  ;;  %v5277_v52 = vld [vmem:[%s6395_s6 + $0x28] sm:$0xff] }
 0x231   :  { %v267_v55 = vadd.f32 %v5255_v53, %v265_v54 }
 0x233   :  { %4418 = vtanh.f32 %v267_v55  ;;  %v4213_v60 = vmul.f32 -1.442695, %v267_v55 }
 0x235   :  { %4420 = vpow2.f32 %v4213_v60 }
 0x239   :  { %v4419_v58 = vpop.eup %4418 }
 0x23b   :  { %v4421_v61 = vpop.eup %4420 }
 0x23c   :  { %v315_v62 = vadd.f32 1.0, %v4421_v61 }
 0x23e   :  { %4422 = vrcp.f32 %v315_v62  ;;  %v327_v19 = vand.u32 2147483648, %v315_v62  ;;  %vm321_vm10 = vweird.f32 %v315_v62  ;;  %v325_v20 = vand.u32 2147483647, %v315_v62 }
 0x240   :  { %v328_v23 = vor.u32 1.1754944e-38, %v327_v19  ;;  %vm326_vm12 = vcmp.eq.f32.partialorder %v325_v20, 8.507059e+37 }
 0x244   :  { %v4423_v63 = vpop.eup %4422 }
 0x245   :  { %v317_v1 = vmul.f32 %v4423_v63, %v315_v62  ;;  %vm322_vm9 = vweird.f32 %v4423_v63 }
 0x246   :  { %vm323_vm11 = vmor %vm321_vm10, %vm322_vm9 }
 0x247   :  { %v318_v13 = vsub.f32 1.0, %v317_v1 }
 0x249   :  { %v319_v16 = vmul.f32 %v4423_v63, %v318_v13 }
 0x24b   :  { %v320_v17 = vadd.f32 %v4423_v63, %v319_v16 }
 0x24d   :  { %v324_v21 = vsel %vm323_vm11, %v4423_v63, %v320_v17 }
 0x24e   :  { %v329_v30 = vsel %vm326_vm12, %v328_v23, %v324_v21 }
 0x24f   :  { %v332_v48 = vmul.f32 0.0, %v329_v30 }
 0x297   :  { %v383_v56 = vpop.permute.xlu1 %382 }
 0x298   :  { %v385_v57 = vmul.f32 %v383_v56, %v366_v40 }
 0x29a   :  { %392 = vrot.lane.b32.xlu2 %v385_v57, %s4954_s28 }
 0x2a2   :  { %334 = vrot.lane.b32.xlu2 %v4419_v58, %s4953_s26 }
 0x2f4   :  { %v393_v59 = vpop.permute.xlu2 %392 }
 0x2f5   :  { %396 = vst.msk [vmem:[#allocation3 + $0x38] sm:$0xff] %vm219_vm8, %v393_v59  ;;  %4221 = vmatmul.msk.f32.vlgmr.msrb.gmra.mxu0 %vm219_vm8, %v393_v59  ;;  %v5288_v59 = vld [vmem:[%s6395_s6 + $0x8] sm:$0xff] }
 0x2f6   :  { %861 = vmatpush.msrb.mxu0 %v5129_v3 }
 0x2f8   :  { %862 = vmatpush.msrb.mxu0 %v5134_v4 }
 0x2fa   :  { %863 = vmatpush.msrb.mxu0 %v5144_v5 }
 0x2fc   :  { %864 = vmatpush.msrb.mxu0 %v5153_v7  ;;  %v335_v22 = vpop.permute.xlu2 %334 }
 0x2fd   :  { %v337_v31 = vmul.f32 %v335_v22, %v329_v30 }
 0x372   :  { %v478_v10 = vpop.f32.mrf.mxu0 }
 0x373   :  { %v502_v12 = vadd.f32 %v501_v2, %v478_v10 }
 0x375   :  { %v504_v14 = vadd.f32 %v5172_v15, %v502_v12 }
 0x377   :  { %4424 = vtanh.f32 %v504_v14  ;;  %v4224_v32 = vmul.f32 -1.442695, %v504_v14 }
 0x379   :  { %4426 = vpow2.f32 %v4224_v32 }
 0x37d   :  { %v4425_v18 = vpop.eup %4424 }
 0x37e   :  { %564 = vrot.lane.b32.xlu1 %v4425_v18, %s4953_s26 }
 0x37f   :  { %v4427_v33 = vpop.eup %4426 }
 0x380   :  { %v545_v34 = vadd.f32 1.0, %v4427_v33 }
 0x382   :  { %4428 = vrcp.f32 %v545_v34  ;;  %v557_v40 = vand.u32 2147483648, %v545_v34  ;;  %vm551_vm14 = vweird.f32 %v545_v34  ;;  %v555_v41 = vand.u32 2147483647, %v545_v34 }
 0x384   :  { %v558_v43 = vor.u32 1.1754944e-38, %v557_v40  ;;  %vm556_vm1 = vcmp.eq.f32.partialorder %v555_v41, 8.507059e+37 }
 0x386   :  { %339 = vrot.lane.b32.xlu1 %v337_v31, %s4954_s28 }
 0x388   :  { %v4429_v35 = vpop.eup %4428 }
 0x389   :  { %v547_v36 = vmul.f32 %v4429_v35, %v545_v34  ;;  %vm552_vm13 = vweird.f32 %v4429_v35 }
 0x38a   :  { %vm553_vm15 = vmor %vm551_vm14, %vm552_vm13 }
 0x38b   :  { %v548_v37 = vsub.f32 1.0, %v547_v36 }
 0x38d   :  { %v549_v38 = vmul.f32 %v4429_v35, %v548_v37 }
 0x38e   :  { %602 = vperm.xlu1 %4401, %v5277_v52  }
 0x38f   :  { %v550_v39 = vadd.f32 %v4429_v35, %v549_v38 }
 0x391   :  { %v554_v42 = vsel %vm553_vm15, %v4429_v35, %v550_v39 }
 0x392   :  { %v559_v45 = vsel %vm556_vm1, %v558_v43, %v554_v42 }
 0x393   :  { %v562_v54 = vmul.f32 %v559_v45, %v5240_v46 }
 0x3f0   :  { %v565_v44 = vpop.permute.xlu1 %564 }
 0x3f1   :  { %v567_v47 = vmul.f32 %v565_v44, %v559_v45 }
 0x3f3   :  { %569 = vrot.lane.b32.xlu0 %v567_v47, %s4954_s28 }
 0x3f8   :  { %v340_v49 = vpop.permute.xlu1 %339 }
 0x3f9   :  { %v5270_v50 = vadd.f32 %v340_v49, %v332_v48 }
 0x3fb   :  { %4430 = vtanh.f32 %v5270_v50 }
 0x400   :  { %v603_v46 = vpop.permute.xlu1 %602 }
 0x401   :  { %v4431_v51 = vpop.eup %4430  ;;  %vm604_vm2 = vcmp.eq.s32.totalorder %v5164_v11, %v603_v46 }
 0x402   :  { %345 = vrot.lane.b32.xlu0 %v4431_v51, %s4953_s26  ;;  %v4228_v61 = vsel %vm604_vm2, 1.0, %v4952_v9 }
 0x403   :  { %4232 = vmatmul.msk.f32.vlgmr.msra.gmra.mxu2 %vm243_vm0, %v4228_v61 }
 0x404   :  { %1078 = vmatpush.msra.mxu2 %v5146_v6 }
 0x406   :  { %1079 = vmatpush.msra.mxu2 %v5155_v8 }
 0x465   :  { %v570_v55 = vpop.permute.xlu0 %569 }
 0x466   :  { %v5281_v56 = vadd.f32 %v570_v55, %v562_v54 }
 0x468   :  { %4432 = vtanh.f32 %v5281_v56 }
 0x46e   :  { %v4433_v57 = vpop.eup %4432 }
 0x46f   :  { %575 = vrot.lane.b32.xlu2 %v4433_v57, %s4953_s26 }
 0x474   :  { %v346_v58 = vpop.permute.xlu0 %345 }
 0x475   :  { %v348_v60 = vmul.f32 %v346_v58, %v329_v30 }
 0x477   :  { %400 = vperm.xlu2 %4400, %v5288_v59   ;;  %387 = vrot.lane.b32.xlu1 %v348_v60, %s4954_s28 }
 0x486   :  { %v695_v20 = vpop.f32.mrf.mxu2 }
 0x4c9   :  { %v576_v62 = vpop.permute.xlu2 %575 }
 0x4ca   :  { %v578_v63 = vmul.f32 %v576_v62, %v559_v45  ;;  %v5323_v45 = vld [vmem:[%s6395_s6 + $0x20] sm:$0xff] }
 0x4cc   :  { %586 = vrot.lane.b32.xlu0 %v578_v63, %s4954_s28 }
 0x4d1   :  { %v401_v1 = vpop.permute.xlu2 %400 }
 0x4d2   :  { %vm402_vm3 = vcmp.eq.s32.totalorder %v5164_v11, %v401_v1 }
 0x4d3   :  { %v4216_v2 = vsel %vm402_vm3, 1.0, %v4952_v9 }
 0x4d4   :  { %4220 = vmatmul.msk.f32.vlgmr.msrb.gmra.mxu3 %vm243_vm0, %v4216_v2 }
 0x4d5   :  { %840 = vmatpush.msrb.mxu3 %v5199_v27 }
 0x4d7   :  { %841 = vmatpush.msrb.mxu3 %v5211_v29 }
 0x4e9   :  { %v388_v10 = vpop.permute.xlu1 %387 }
 0x4ea   :  { %390 = vst.msk [vmem:[#allocation2] sm:$0xff] %vm219_vm8, %v388_v10  ;;  %4219 = vmatmul.msk.f32.vlgmr.msrb.gmra.mxu1 %vm219_vm8, %v388_v10 }
 0x4eb   :  { %815 = vmatpush.msrb.mxu1 %v5182_v24 }
 0x4ed   :  { %816 = vmatpush.msrb.mxu1 %v5187_v25 }
 0x4ef   :  { %817 = vmatpush.msrb.mxu1 %v5194_v26 }
 0x4f1   :  { %818 = vmatpush.msrb.mxu1 %v5206_v28 }
 0x53e   :  { %v587_v12 = vpop.permute.xlu0 %586 }
 0x53f   :  { %590 = vst.msk [vmem:[#allocation3 + $0x30] sm:$0xff] %vm219_vm8, %v587_v12  ;;  %4231 = vmatmul.msk.f32.vlgmr.msra.gmra.mxu0 %vm219_vm8, %v587_v12 }
 0x540   :  { %1053 = vmatpush.msra.mxu0 %v5129_v3 }
 0x542   :  { %1054 = vmatpush.msra.mxu0 %v5134_v4 }
 0x544   :  { %1055 = vmatpush.msra.mxu0 %v5144_v5 }
 0x546   :  { %1056 = vmatpush.msra.mxu0 %v5153_v7 }
 0x557   :  { %v455_v13 = vpop.f32.mrf.mxu3 }
 0x567   :  { %v432_v14 = vpop.f32.mrf.mxu1 }
 0x568   :  { %v456_v16 = vadd.f32 %v455_v13, %v432_v14 }
 0x56a   :  { %v458_v17 = vadd.f32 %v5255_v53, %v456_v16 }
 0x56c   :  { %4434 = vtanh.f32 %v458_v17  ;;  %v4223_v19 = vmul.f32 -1.442695, %v458_v17 }
 0x56e   :  { %4436 = vpow2.f32 %v4223_v19 }
 0x572   :  { %v4435_v18 = vpop.eup %4434 }
 0x573   :  { %527 = vrot.lane.b32.xlu0 %v4435_v18, %s4953_s26 }
 0x574   :  { %v4437_v30 = vpop.eup %4436 }
 0x575   :  { %v508_v31 = vadd.f32 1.0, %v4437_v30 }
 0x577   :  { %v520_v38 = vand.u32 2147483648, %v508_v31  ;;  %vm514_vm5 = vweird.f32 %v508_v31  ;;  %v518_v39 = vand.u32 2147483647, %v508_v31 }
 0x579   :  { %v521_v41 = vor.u32 1.1754944e-38, %v520_v38  ;;  %vm519_vm7 = vcmp.eq.f32.partialorder %v518_v39, 8.507059e+37 }
 0x5bc   :  { %v672_v21 = vpop.f32.mrf.mxu0 }
 0x5bd   :  { %v696_v22 = vadd.f32 %v695_v20, %v672_v21  ;;  %v5345_v21 = vld [vmem:[%s6395_s6 + $0x10] sm:$0xff] }
 0x5bf   :  { %v698_v23 = vadd.f32 %v5172_v15, %v696_v22 }
 0x5c1   :  { %4438 = vtanh.f32 %v698_v23  ;;  %v4234_v47 = vmul.f32 -1.442695, %v698_v23 }
 0x5c2   :  { %4440 = vrcp.f32 %v508_v31 }
 0x5c3   :  { %4442 = vpow2.f32 %v4234_v47 }
 0x5c7   :  { %v4439_v32 = vpop.eup %4438 }
 0x5c8   :  { %758 = vrot.lane.b32.xlu2 %v4439_v32, %s4953_s26  ;;  %v4441_v33 = vpop.eup %4440 }
 0x5c9   :  { %v510_v34 = vmul.f32 %v4441_v33, %v508_v31  ;;  %vm515_vm4 = vweird.f32 %v4441_v33  ;;  %v4443_v48 = vpop.eup %4442 }
 0x5ca   :  { %vm516_vm6 = vmor %vm514_vm5, %vm515_vm4  ;;  %v739_v49 = vadd.f32 1.0, %v4443_v48 }
 0x5cb   :  { %v511_v35 = vsub.f32 1.0, %v510_v34 }
 0x5cc   :  { %4444 = vrcp.f32 %v739_v49  ;;  %v751_v60 = vand.u32 2147483648, %v739_v49  ;;  %vm745_vm10 = vweird.f32 %v739_v49  ;;  %v749_v46 = vand.u32 2147483647, %v739_v49 }
 0x5cd   :  { %v512_v36 = vmul.f32 %v4441_v33, %v511_v35 }
 0x5ce   :  { %v752_v62 = vor.u32 1.1754944e-38, %v751_v60  ;;  %vm750_vm12 = vcmp.eq.f32.partialorder %v749_v46, 8.507059e+37 }
 0x5cf   :  { %v513_v37 = vadd.f32 %v4441_v33, %v512_v36 }
 0x5d1   :  { %v517_v40 = vsel %vm516_vm6, %v4441_v33, %v513_v37 }
 0x5d2   :  { %v522_v42 = vsel %vm519_vm7, %v521_v41, %v517_v40  ;;  %v4445_v51 = vpop.eup %4444 }
 0x5d3   :  { %v741_v54 = vmul.f32 %v4445_v51, %v739_v49  ;;  %vm746_vm9 = vweird.f32 %v4445_v51  ;;  %v525_v10 = vmul.f32 %v522_v42, %v5270_v50 }
 0x5d4   :  { %vm747_vm11 = vmor %vm745_vm10, %vm746_vm9 }
 0x5d5   :  { %v742_v55 = vsub.f32 1.0, %v741_v54 }
 0x5d7   :  { %v743_v57 = vmul.f32 %v4445_v51, %v742_v55 }
 0x5d9   :  { %v744_v58 = vadd.f32 %v4445_v51, %v743_v57 }
 0x5db   :  { %v748_v61 = vsel %vm747_vm11, %v4445_v51, %v744_v58 }
 0x5dc   :  { %v753_v1 = vsel %vm750_vm12, %v752_v62, %v748_v61 }
 0x5dd   :  { %v756_v50 = vmul.f32 %v753_v1, %v5281_v56 }
 0x5e5   :  { %v528_v43 = vpop.permute.xlu0 %527 }
 0x5e6   :  { %v530_v44 = vmul.f32 %v528_v43, %v522_v42 }
 0x5e8   :  { %532 = vrot.lane.b32.xlu2 %v530_v44, %s4954_s28 }
 0x5f0   :  { %796 = vperm.xlu2 %4400, %v5323_v45  }
 0x622   :  { %v759_v63 = vpop.permute.xlu2 %758 }
 0x623   :  { %v761_v2 = vmul.f32 %v759_v63, %v753_v1 }
 0x625   :  { %763 = vrot.lane.b32.xlu1 %v761_v2, %s4954_s28 }
 0x642   :  { %v533_v12 = vpop.permute.xlu2 %532 }
 0x643   :  { %v5328_v13 = vadd.f32 %v533_v12, %v525_v10  ;;  %v4247_v10 = vld [vmem:[%s6395_s6 + $0x18] sm:$0xff] }
 0x645   :  { %4446 = vtanh.f32 %v5328_v13 }
 0x64a   :  { %v797_v14 = vpop.permute.xlu2 %796 }
 0x64b   :  { %v4447_v16 = vpop.eup %4446  ;;  %vm798_vm13 = vcmp.eq.s32.totalorder %v5164_v11, %v797_v14 }
 0x64c   :  { %v4238_v17 = vsel %vm798_vm13, 1.0, %v4952_v9  ;;  %538 = vrot.lane.b32.xlu1 %v4447_v16, %s4953_s26 }
 0x64d   :  { %4242 = vmatmul.msk.f32.vlgmr.msrb.gmra.mxu2 %vm243_vm0, %v4238_v17 }
 0x64e   :  { %1270 = vmatpush.msrb.mxu2 %v5146_v6 }
 0x650   :  { %1271 = vmatpush.msrb.mxu2 %v5155_v8 }
 0x697   :  { %v764_v18 = vpop.permute.xlu1 %763 }
 0x698   :  { %v5338_v19 = vadd.f32 %v764_v18, %v756_v50 }
 0x69a   :  { %4448 = vtanh.f32 %v5338_v19 }
 0x6a0   :  { %v4449_v20 = vpop.eup %4448 }
 0x6a1   :  { %769 = vrot.lane.b32.xlu0 %v4449_v20, %s4953_s26 }
 0x6a9   :  { %594 = vperm.xlu0 %4399, %v5345_v21  }
 0x6be   :  { %v539_v22 = vpop.permute.xlu1 %538 }
 0x6bf   :  { %v541_v23 = vmul.f32 %v539_v22, %v522_v42 }
 0x6c1   :  { %580 = vrot.lane.b32.xlu2 %v541_v23, %s4954_s28 }
 0x6d0   :  { %v889_v43 = vpop.f32.mrf.mxu2 }
 0x713   :  { %v770_v56 = vpop.permute.xlu0 %769 }
 0x714   :  { %v772_v30 = vmul.f32 %v770_v56, %v753_v1 }
 0x716   :  { %780 = vrot.lane.b32.xlu1 %v772_v30, %s4954_s28 }
 0x71b   :  { %v581_v31 = vpop.permute.xlu2 %580  ;;  %v595_v32 = vpop.permute.xlu0 %594 }
 0x71c   :  { %584 = vst.msk [vmem:[#allocation2 + $0x8] sm:$0xff] %vm219_vm8, %v581_v31  ;;  %vm596_vm14 = vcmp.eq.s32.totalorder %v5164_v11, %v595_v32  ;;  %4229 = vmatmul.msk.f32.vlgmr.msra.gmra.mxu1 %vm219_vm8, %v581_v31 }
 0x71d   :  { %v4226_v33 = vsel %vm596_vm14, 1.0, %v4952_v9  ;;  %1007 = vmatpush.msra.mxu1 %v5182_v24 }
 0x71e   :  { %4230 = vmatmul.msk.f32.vlgmr.msra.gmra.mxu3 %vm243_vm0, %v4226_v33 }
 0x71f   :  { %1032 = vmatpush.msra.mxu3 %v5199_v27  ;;  %1008 = vmatpush.msra.mxu1 %v5187_v25 }
 0x721   :  { %1033 = vmatpush.msra.mxu3 %v5211_v29  ;;  %1009 = vmatpush.msra.mxu1 %v5194_v26 }
 0x723   :  { %1010 = vmatpush.msra.mxu1 %v5206_v28 }
 0x788   :  { %v781_v34 = vpop.permute.xlu1 %780 }
 0x789   :  { %784 = vst.msk [vmem:[#allocation3 + $0x28] sm:$0xff] %vm219_vm8, %v781_v34  ;;  %4241 = vmatmul.msk.f32.vlgmr.msrb.gmra.mxu0 %vm219_vm8, %v781_v34 }
 0x78a   :  { %1245 = vmatpush.msrb.mxu0 %v5129_v3 }
 0x78c   :  { %1246 = vmatpush.msrb.mxu0 %v5134_v4 }
 0x78e   :  { %1247 = vmatpush.msrb.mxu0 %v5144_v5 }
 0x790   :  { %1248 = vmatpush.msrb.mxu0 %v5153_v7 }
 0x799   :  { %v626_v35 = vpop.f32.mrf.mxu1 }
 0x7a1   :  { %v649_v36 = vpop.f32.mrf.mxu3 }
 0x7a2   :  { %v650_v37 = vadd.f32 %v649_v36, %v626_v35 }
 0x7a4   :  { %v652_v38 = vadd.f32 %v5255_v53, %v650_v37 }
 0x7a6   :  { %4450 = vtanh.f32 %v652_v38  ;;  %v4233_v40 = vmul.f32 -1.442695, %v652_v38 }
 0x7a8   :  { %4452 = vpow2.f32 %v4233_v40 }
 0x7ac   :  { %v4451_v39 = vpop.eup %4450 }
 0x7ad   :  { %721 = vrot.lane.b32.xlu1 %v4451_v39, %s4953_s26 }
 0x7ae   :  { %v4453_v41 = vpop.eup %4452 }
 0x7af   :  { %v702_v42 = vadd.f32 1.0, %v4453_v41 }
 0x7b1   :  { %4454 = vrcp.f32 %v702_v42  ;;  %v714_v60 = vand.u32 2147483648, %v702_v42  ;;  %vm708_vm1 = vweird.f32 %v702_v42  ;;  %v712_v46 = vand.u32 2147483647, %v702_v42 }
 0x7b3   :  { %v715_v62 = vor.u32 1.1754944e-38, %v714_v60  ;;  %vm713_vm3 = vcmp.eq.f32.partialorder %v712_v46, 8.507059e+37 }
 0x7b7   :  { %v4455_v48 = vpop.eup %4454 }
 0x7b8   :  { %v704_v51 = vmul.f32 %v4455_v48, %v702_v42  ;;  %vm709_vm15 = vweird.f32 %v4455_v48 }
 0x7b9   :  { %vm710_vm2 = vmor %vm708_vm1, %vm709_vm15 }
 0x7ba   :  { %v705_v54 = vsub.f32 1.0, %v704_v51 }
 0x7bc   :  { %v706_v57 = vmul.f32 %v4455_v48, %v705_v54 }
 0x7be   :  { %v707_v58 = vadd.f32 %v4455_v48, %v706_v57 }
 0x7c0   :  { %v711_v61 = vsel %vm710_vm2, %v4455_v48, %v707_v58 }
 0x7c1   :  { %v716_v1 = vsel %vm713_vm3, %v715_v62, %v711_v61 }
 0x7c2   :  { %v719_v35 = vmul.f32 %v716_v1, %v5328_v13 }
 0x806   :  { %v866_v44 = vpop.f32.mrf.mxu0 }
 0x807   :  { %v890_v47 = vadd.f32 %v889_v43, %v866_v44 }
 0x809   :  { %v892_v49 = vadd.f32 %v5172_v15, %v890_v47 }
 0x80b   :  { %4456 = vtanh.f32 %v892_v49  ;;  %v4244_v12 = vmul.f32 -1.442695, %v892_v49 }
 0x80d   :  { %4458 = vpow2.f32 %v4244_v12 }
 0x811   :  { %v4457_v55 = vpop.eup %4456 }
 0x812   :  { %952 = vrot.lane.b32.xlu0 %v4457_v55, %s4953_s26 }
 0x813   :  { %v4459_v14 = vpop.eup %4458 }
 0x814   :  { %v933_v16 = vadd.f32 1.0, %v4459_v14 }
 0x816   :  { %4460 = vrcp.f32 %v933_v16  ;;  %v945_v23 = vand.u32 2147483648, %v933_v16  ;;  %vm939_vm5 = vweird.f32 %v933_v16  ;;  %v943_v56 = vand.u32 2147483647, %v933_v16 }
 0x818   :  { %v946_v31 = vor.u32 1.1754944e-38, %v945_v23  ;;  %vm944_vm7 = vcmp.eq.f32.partialorder %v943_v56, 8.507059e+37 }
 0x81c   :  { %v4461_v17 = vpop.eup %4460 }
 0x81d   :  { %v935_v50 = vmul.f32 %v4461_v17, %v933_v16  ;;  %vm940_vm4 = vweird.f32 %v4461_v17 }
 0x81e   :  { %vm941_vm6 = vmor %vm939_vm5, %vm940_vm4 }
 0x81f   :  { %v722_v63 = vpop.permute.xlu1 %721  ;;  %v936_v18 = vsub.f32 1.0, %v935_v50 }
 0x820   :  { %v724_v2 = vmul.f32 %v722_v63, %v716_v1 }
 0x821   :  { %v937_v20 = vmul.f32 %v4461_v17, %v936_v18 }
 0x822   :  { %726 = vrot.lane.b32.xlu0 %v724_v2, %s4954_s28 }
 0x823   :  { %v938_v22 = vadd.f32 %v4461_v17, %v937_v20 }
 0x825   :  { %v942_v30 = vsel %vm941_vm6, %v4461_v17, %v938_v22 }
 0x826   :  { %v947_v32 = vsel %vm944_vm7, %v946_v31, %v942_v30 }
 0x827   :  { %v950_v13 = vmul.f32 %v947_v32, %v5338_v19 }
 0x82a   :  { %988 = vperm.xlu0 %4399, %v4247_v10  }
 0x884   :  { %v953_v33 = vpop.permute.xlu0 %952 }
 0x885   :  { %v955_v34 = vmul.f32 %v953_v33, %v947_v32 }
 0x887   :  { %957 = vrot.lane.b32.xlu2 %v955_v34, %s4954_s28 }
 0x894   :  { %v727_v36 = vpop.permute.xlu0 %726 }
 0x895   :  { %v5377_v37 = vadd.f32 %v727_v36, %v719_v35 }
 0x897   :  { %4462 = vtanh.f32 %v5377_v37 }
 0x89c   :  { %v989_v38 = vpop.permute.xlu0 %988 }
 0x89d   :  { %v4463_v39 = vpop.eup %4462  ;;  %vm990_vm9 = vcmp.eq.s32.totalorder %v5164_v11, %v989_v38 }
 0x89e   :  { %v4248_v40 = vsel %vm990_vm9, 1.0, %v4952_v9  ;;  %732 = vrot.lane.b32.xlu2 %v4463_v39, %s4953_s26 }
 0x89f   :  { %4252 = vmatmul.msk.f32.vlgmr.msra.gmra.mxu2 %vm243_vm0, %v4248_v40 }
 0x8a0   :  { %1462 = vmatpush.msra.mxu2 %v5146_v6 }
 0x8a2   :  { %1463 = vmatpush.msra.mxu2 %v5155_v8 }
 0x8e1   :  { %v958_v41 = vpop.permute.xlu2 %957 }
 0x8e2   :  { %v5387_v42 = vadd.f32 %v958_v41, %v950_v13 }
 0x8e4   :  { %4464 = vtanh.f32 %v5387_v42 }
 0x8ea   :  { %v4465_v43 = vpop.eup %4464 }
 0x8eb   :  { %963 = vrot.lane.b32.xlu1 %v4465_v43, %s4953_s26 }
 0x8f3   :  { %788 = vperm.xlu1 %4401, %v4247_v10  }
 0x8f8   :  { %v733_v44 = vpop.permute.xlu2 %732 }
 0x8f9   :  { %v735_v47 = vmul.f32 %v733_v44, %v716_v1 }
 0x8fb   :  { %774 = vrot.lane.b32.xlu0 %v735_v47, %s4954_s28 }
 0x95d   :  { %v964_v48 = vpop.permute.xlu1 %963 }
 0x95e   :  { %v966_v49 = vmul.f32 %v964_v48, %v947_v32 }
 0x960   :  { %974 = vrot.lane.b32.xlu2 %v966_v49, %s4954_s28 }
 0x965   :  { %v789_v51 = vpop.permute.xlu1 %788 }
 0x966   :  { %vm790_vm10 = vcmp.eq.s32.totalorder %v5164_v11, %v789_v51 }
 0x967   :  { %v4236_v19 = vsel %vm790_vm10, 1.0, %v4952_v9 }
 0x968   :  { %4240 = vmatmul.msk.f32.vlgmr.msrb.gmra.mxu3 %vm243_vm0, %v4236_v19 }
 0x969   :  { %1224 = vmatpush.msrb.mxu3 %v5199_v27 }
 0x96b   :  { %1225 = vmatpush.msrb.mxu3 %v5211_v29 }
 0x96d   :  { %v775_v54 = vpop.permute.xlu0 %774 }
 0x96e   :  { %778 = vst.msk [vmem:[#allocation2 + $0x10] sm:$0xff] %vm219_vm8, %v775_v54  ;;  %4239 = vmatmul.msk.f32.vlgmr.msrb.gmra.mxu1 %vm219_vm8, %v775_v54 }
 0x96f   :  { %1199 = vmatpush.msrb.mxu1 %v5182_v24 }
 0x971   :  { %1200 = vmatpush.msrb.mxu1 %v5187_v25 }
 0x973   :  { %1201 = vmatpush.msrb.mxu1 %v5194_v26 }
 0x975   :  { %1202 = vmatpush.msrb.mxu1 %v5206_v28 }
 0x9ba   :  { %v975_v55 = vpop.permute.xlu2 %974 }
 0x9bb   :  { %978 = vst.msk [vmem:[#allocation3 + $0x20] sm:$0xff] %vm219_vm8, %v975_v55  ;;  %4251 = vmatmul.msk.f32.vlgmr.msra.gmra.mxu0 %vm219_vm8, %v975_v55 }
 0x9bc   :  { %1437 = vmatpush.msra.mxu0 %v5129_v3  ;;  %v1081_v3 = vpop.f32.mrf.mxu2 }
 0x9be   :  { %1438 = vmatpush.msra.mxu0 %v5134_v4 }
 0x9c0   :  { %1439 = vmatpush.msra.mxu0 %v5144_v5 }
 0x9c2   :  { %1440 = vmatpush.msra.mxu0 %v5153_v7 }
 0x9eb   :  { %v820_v57 = vpop.f32.mrf.mxu1  ;;  %v843_v58 = vpop.f32.mrf.mxu3 }
 0x9ec   :  { %v844_v60 = vadd.f32 %v843_v58, %v820_v57 }
 0x9ee   :  { %v846_v46 = vadd.f32 %v5255_v53, %v844_v60 }
 0x9f0   :  { %4466 = vtanh.f32 %v846_v46  ;;  %v4243_v62 = vmul.f32 -1.442695, %v846_v46 }
 0x9f2   :  { %4468 = vpow2.f32 %v4243_v62 }
 0x9f6   :  { %v4467_v61 = vpop.eup %4466 }
 0x9f7   :  { %915 = vrot.lane.b32.xlu2 %v4467_v61, %s4953_s26 }
 0x9f8   :  { %v4469_v63 = vpop.eup %4468 }
 0x9f9   :  { %v896_v1 = vadd.f32 1.0, %v4469_v63 }
 0x9fb   :  { %4470 = vrcp.f32 %v896_v1  ;;  %v908_v50 = vand.u32 2147483648, %v896_v1  ;;  %vm902_vm12 = vweird.f32 %v896_v1  ;;  %v906_v18 = vand.u32 2147483647, %v896_v1 }
 0x9fd   :  { %v909_v22 = vor.u32 1.1754944e-38, %v908_v50  ;;  %vm907_vm14 = vcmp.eq.f32.partialorder %v906_v18, 8.507059e+37 }
 0xa01   :  { %v4471_v5 = vpop.eup %4470 }
 0xa02   :  { %v898_v10 = vmul.f32 %v4471_v5, %v896_v1  ;;  %vm903_vm11 = vweird.f32 %v4471_v5 }
 0xa03   :  { %vm904_vm13 = vmor %vm902_vm12, %vm903_vm11 }
 0xa04   :  { %v899_v12 = vsub.f32 1.0, %v898_v10 }
 0xa06   :  { %v900_v16 = vmul.f32 %v4471_v5, %v899_v12 }
 0xa08   :  { %v901_v17 = vadd.f32 %v4471_v5, %v900_v16 }
 0xa0a   :  { %v905_v20 = vsel %vm904_vm13, %v4471_v5, %v901_v17 }
 0xa0b   :  { %v910_v56 = vsel %vm907_vm14, %v909_v22, %v905_v20 }
 0xa0c   :  { %v913_v47 = vmul.f32 %v910_v56, %v5377_v37 }
 0xa38   :  { %v1058_v4 = vpop.f32.mrf.mxu0 }
 0xa39   :  { %v1082_v2 = vadd.f32 %v1081_v3, %v1058_v4 }
 0xa3b   :  { %v1084_v7 = vadd.f32 %v5172_v15, %v1082_v2 }
 0xa3d   :  { %4472 = vtanh.f32 %v1084_v7  ;;  %v4254_v15 = vmul.f32 -1.442695, %v1084_v7  ;;  %v5465_v7 = vld [vmem:[%s6362_s9] ss:$0 sm:$0xff] }
 0xa3f   :  { %4474 = vpow2.f32 %v4254_v15 }
 0xa43   :  { %v4473_v14 = vpop.eup %4472 }
 0xa44   :  { %1144 = vrot.lane.b32.xlu1 %v4473_v14, %s4953_s26 }
 0xa45   :  { %v4475_v31 = vpop.eup %4474 }
 0xa46   :  { %v1125_v32 = vadd.f32 1.0, %v4475_v31 }
 0xa48   :  { %4476 = vrcp.f32 %v1125_v32  ;;  %v1137_v39 = vand.u32 2147483648, %v1125_v32  ;;  %vm1131_vm1 = vweird.f32 %v1125_v32  ;;  %v1135_v40 = vand.u32 2147483647, %v1125_v32 }
 0xa4a   :  { %v1138_v41 = vor.u32 1.1754944e-38, %v1137_v39  ;;  %vm1136_vm3 = vcmp.eq.f32.partialorder %v1135_v40, 8.507059e+37 }
 0xa4e   :  { %v4477_v33 = vpop.eup %4476 }
 0xa4f   :  { %v1127_v34 = vmul.f32 %v4477_v33, %v1125_v32  ;;  %vm1132_vm15 = vweird.f32 %v4477_v33 }
 0xa50   :  { %vm1133_vm2 = vmor %vm1131_vm1, %vm1132_vm15 }
 0xa51   :  { %v916_v23 = vpop.permute.xlu2 %915  ;;  %v1128_v35 = vsub.f32 1.0, %v1127_v34 }
 0xa52   :  { %v918_v30 = vmul.f32 %v916_v23, %v910_v56 }
 0xa53   :  { %v1129_v36 = vmul.f32 %v4477_v33, %v1128_v35 }
 0xa54   :  { %920 = vrot.lane.b32.xlu1 %v918_v30, %s4954_s28 }
 0xa55   :  { %v1130_v38 = vadd.f32 %v4477_v33, %v1129_v36 }
 0xa57   :  { %v1134_v13 = vsel %vm1133_vm2, %v4477_v33, %v1130_v38 }
 0xa5c   :  { %1180 = vperm.xlu1 %4401, %v5345_v21   ;;  %v1139_v21 = vsel %vm1136_vm3, %v1138_v41, %v1134_v13 }
 0xa5d   :  { %v1142_v37 = vmul.f32 %v1139_v21, %v5387_v42 }
 0xab6   :  { %v1145_v43 = vpop.permute.xlu1 %1144 }
 0xab7   :  { %v1147_v44 = vmul.f32 %v1145_v43, %v1139_v21 }
 0xab9   :  { %1149 = vrot.lane.b32.xlu0 %v1147_v44, %s4954_s28 }
 0xac6   :  { %v921_v48 = vpop.permute.xlu1 %920 }
 0xac7   :  { %v5418_v49 = vadd.f32 %v921_v48, %v913_v47 }
 0xac9   :  { %4478 = vtanh.f32 %v5418_v49 }
 0xace   :  { %v1181_v51 = vpop.permute.xlu1 %1180 }
 0xacf   :  { %v4479_v19 = vpop.eup %4478  ;;  %vm1182_vm4 = vcmp.eq.s32.totalorder %v5164_v11, %v1181_v51 }
 0xad0   :  { %v4258_v54 = vsel %vm1182_vm4, 1.0, %v4952_v9  ;;  %926 = vrot.lane.b32.xlu0 %v4479_v19, %s4953_s26 }
 0xad1   :  { %4262 = vmatmul.msk.f32.vlgmr.msrb.gmra.mxu2 %vm243_vm0, %v4258_v54 }
 0xad2   :  { %1654 = vmatpush.msrb.mxu2 %v5146_v6 }
 0xad4   :  { %1655 = vmatpush.msrb.mxu2 %v5155_v8 }
 0xb2b   :  { %v1150_v55 = vpop.permute.xlu0 %1149 }
 0xb2c   :  { %v5428_v57 = vadd.f32 %v1150_v55, %v1142_v37 }
 0xb2e   :  { %4480 = vtanh.f32 %v5428_v57 }
 0xb34   :  { %v4481_v58 = vpop.eup %4480 }
 0xb35   :  { %1155 = vrot.lane.b32.xlu2 %v4481_v58, %s4953_s26 }
 0xb3d   :  { %981 = vperm.xlu2 %4400, %v5323_v45  }
 0xb42   :  { %v927_v60 = vpop.permute.xlu0 %926 }
 0xb43   :  { %v929_v46 = vmul.f32 %v927_v60, %v910_v56 }
 0xb45   :  { %968 = vrot.lane.b32.xlu1 %v929_v46, %s4954_s28 }
 0xb54   :  { %v1273_v4 = vpop.f32.mrf.mxu2 }
 0xb8f   :  { %v1156_v61 = vpop.permute.xlu2 %1155 }
 0xb90   :  { %v1158_v6 = vmul.f32 %v1156_v61, %v1139_v21 }
 0xb92   :  { %1166 = vrot.lane.b32.xlu0 %v1158_v6, %s4954_s28 }
 0xb97   :  { %v982_v8 = vpop.permute.xlu2 %981 }
 0xb98   :  { %vm983_vm5 = vcmp.eq.s32.totalorder %v5164_v11, %v982_v8 }
 0xb99   :  { %v4246_v42 = vsel %vm983_vm5, 1.0, %v4952_v9 }
 0xb9a   :  { %4250 = vmatmul.msk.f32.vlgmr.msra.gmra.mxu3 %vm243_vm0, %v4246_v42 }
 0xb9b   :  { %1416 = vmatpush.msra.mxu3 %v5199_v27  ;;  %v4742_v27 = vld [vmem:[%s6396_s21 + $0x18] sm:$0xff] }
 0xb9d   :  { %1417 = vmatpush.msra.mxu3 %v5211_v29 }
 0xbb7   :  { %v969_v45 = vpop.permute.xlu1 %968 }
 0xbb8   :  { %972 = vst.msk [vmem:[#allocation2 + $0x18] sm:$0xff] %vm219_vm8, %v969_v45  ;;  %4249 = vmatmul.msk.f32.vlgmr.msra.gmra.mxu1 %vm219_vm8, %v969_v45 }
 0xbb9   :  { %1391 = vmatpush.msra.mxu1 %v5182_v24  ;;  %v4743_v24 = vld [vmem:[%s6396_s21 + $0x10] sm:$0xff] }
 0xbbb   :  { %1392 = vmatpush.msra.mxu1 %v5187_v25  ;;  %v4744_v25 = vld [vmem:[%s6396_s21 + $0x8] sm:$0xff] }
 0xbbd   :  { %1393 = vmatpush.msra.mxu1 %v5194_v26  ;;  %v4745_v26 = vld [vmem:[%s6396_s21] sm:$0xff]  ;;  %s6401_s21 = sld [smem:[#allocation20_spill]] }
 0xbbf   :  { %1394 = vmatpush.msra.mxu1 %v5206_v28 }
 0xc04   :  { %v1167_v62 = vpop.permute.xlu0 %1166 }
 0xc05   :  { %1170 = vst.msk [vmem:[#allocation3 + $0x18] sm:$0xff] %vm219_vm8, %v1167_v62  ;;  %4261 = vmatmul.msk.f32.vlgmr.msrb.gmra.mxu0 %vm219_vm8, %v1167_v62 }
 0xc06   :  { %1629 = vmatpush.msrb.mxu0 %v4742_v27 }
 0xc08   :  { %1630 = vmatpush.msrb.mxu0 %v4743_v24  ;;  %v4747_v24 = vld [vmem:[%s6398_s4 + $0x8] sm:$0xff] }
 0xc0a   :  { %1631 = vmatpush.msrb.mxu0 %v4744_v25 }
 0xc0c   :  { %1632 = vmatpush.msrb.mxu0 %v4745_v26  ;;  %v4749_v26 = vld [vmem:[%s6397_s7 + $0x18] sm:$0xff] }
 0xc1d   :  { %v1035_v28 = vpop.f32.mrf.mxu3 }
 0xc35   :  { %v1012_v29 = vpop.f32.mrf.mxu1 }
 0xc36   :  { %v1036_v63 = vadd.f32 %v1035_v28, %v1012_v29  ;;  %v4750_v28 = vld [vmem:[%s6397_s7 + $0x10] sm:$0xff]  ;;  %v4751_v29 = vld [vmem:[%s6397_s7 + $0x8] sm:$0xff] }
 0xc38   :  { %v1038_v1 = vadd.f32 %v5255_v53, %v1036_v63  ;;  %v4752_v63 = vld [vmem:[%s6397_s7] sm:$0xff] }
 0xc3a   :  { %4482 = vtanh.f32 %v1038_v1  ;;  %v4253_v12 = vmul.f32 -1.442695, %v1038_v1 }
 0xc40   :  { %v4483_v3 = vpop.eup %4482 }
 0xc41   :  { %1107 = vrot.lane.b32.xlu0 %v4483_v3, %s4953_s26 }
 0xc82   :  { %v1250_v2 = vpop.f32.mrf.mxu0 }
 0xc83   :  { %v1274_v5 = vadd.f32 %v1273_v4, %v1250_v2 }
 0xc85   :  { %v1276_v10 = vadd.f32 %v5465_v7, %v1274_v5  ;;  %v5516_v5 = vld [vmem:[%s6399_s27] ss:$0 sm:$0xff] }
 0xc87   :  { %4484 = vtanh.f32 %v1276_v10  ;;  %v4264_v34 = vmul.f32 -1.442695, %v1276_v10 }
 0xc88   :  { %4486 = vpow2.f32 %v4253_v12 }
 0xc8d   :  { %v4485_v14 = vpop.eup %4484 }
 0xc8e   :  { %1336 = vrot.lane.b32.xlu2 %v4485_v14, %s4953_s26  ;;  %v4487_v53 = vpop.eup %4486 }
 0xc8f   :  { %v1088_v16 = vadd.f32 1.0, %v4487_v53 }
 0xc91   :  { %4488 = vrcp.f32 %v1088_v16  ;;  %v1100_v23 = vand.u32 2147483648, %v1088_v16  ;;  %vm1094_vm7 = vweird.f32 %v1088_v16  ;;  %v1098_v56 = vand.u32 2147483647, %v1088_v16 }
 0xc92   :  { %4490 = vpow2.f32 %v4264_v34 }
 0xc93   :  { %v1101_v15 = vor.u32 1.1754944e-38, %v1100_v23  ;;  %vm1099_vm10 = vcmp.eq.f32.partialorder %v1098_v56, 8.507059e+37 }
 0xc97   :  { %v4489_v17 = vpop.eup %4488 }
 0xc98   :  { %v1090_v50 = vmul.f32 %v4489_v17, %v1088_v16  ;;  %vm1095_vm6 = vweird.f32 %v4489_v17  ;;  %v4491_v35 = vpop.eup %4490 }
 0xc99   :  { %vm1096_vm9 = vmor %vm1094_vm7, %vm1095_vm6  ;;  %v1317_v36 = vadd.f32 1.0, %v4491_v35 }
 0xc9a   :  { %v1091_v18 = vsub.f32 1.0, %v1090_v50 }
 0xc9b   :  { %4492 = vrcp.f32 %v1317_v36  ;;  %v1329_v43 = vand.u32 2147483648, %v1317_v36  ;;  %vm1323_vm12 = vweird.f32 %v1317_v36  ;;  %v1327_v21 = vand.u32 2147483647, %v1317_v36 }
 0xc9c   :  { %v1092_v20 = vmul.f32 %v4489_v17, %v1091_v18 }
 0xc9d   :  { %v1330_v47 = vor.u32 1.1754944e-38, %v1329_v43  ;;  %vm1328_vm14 = vcmp.eq.f32.partialorder %v1327_v21, 8.507059e+37 }
 0xc9e   :  { %v1093_v22 = vadd.f32 %v4489_v17, %v1092_v20 }
 0xca0   :  { %v1097_v30 = vsel %vm1096_vm9, %v4489_v17, %v1093_v22 }
 0xca1   :  { %v1102_v31 = vsel %vm1099_vm10, %v1101_v15, %v1097_v30  ;;  %v4493_v38 = vpop.eup %4492 }
 0xca2   :  { %v1319_v39 = vmul.f32 %v4493_v38, %v1317_v36  ;;  %vm1324_vm11 = vweird.f32 %v4493_v38  ;;  %v1105_v19 = vmul.f32 %v1102_v31, %v5418_v49 }
 0xca3   :  { %vm1325_vm13 = vmor %vm1323_vm12, %vm1324_vm11 }
 0xca4   :  { %v1320_v40 = vsub.f32 1.0, %v1319_v39 }
 0xca6   :  { %v1321_v13 = vmul.f32 %v4493_v38, %v1320_v40  ;;  %v1562_v40 = vld [vmem:[%s6395_s6] sm:$0xff] }
 0xca8   :  { %v1322_v41 = vadd.f32 %v4493_v38, %v1321_v13 }
 0xcaa   :  { %v1326_v44 = vsel %vm1325_vm13, %v4493_v38, %v1322_v41 }
 0xcab   :  { %v1331_v51 = vsel %vm1328_vm14, %v1330_v47, %v1326_v44 }
 0xcac   :  { %v1334_v46 = vmul.f32 %v1331_v51, %v5428_v57 }
 0xcb3   :  { %v1108_v32 = vpop.permute.xlu0 %1107 }
 0xcb4   :  { %v1110_v33 = vmul.f32 %v1108_v32, %v1102_v31 }
 0xcb6   :  { %1112 = vrot.lane.b32.xlu2 %v1110_v33, %s4954_s28 }
 0xcbe   :  { %1372 = vperm.xlu2 %4400, %v5288_v59  }
 0xce8   :  { %v1337_v48 = vpop.permute.xlu2 %1336 }
 0xce9   :  { %v1339_v59 = vmul.f32 %v1337_v48, %v1331_v51 }
 0xceb   :  { %1341 = vrot.lane.b32.xlu1 %v1339_v59, %s4954_s28 }
 0xd10   :  { %v1113_v54 = vpop.permute.xlu2 %1112 }
 0xd11   :  { %v5473_v37 = vadd.f32 %v1113_v54, %v1105_v19 }
 0xd13   :  { %4494 = vtanh.f32 %v5473_v37 }
 0xd18   :  { %v1373_v55 = vpop.permute.xlu2 %1372 }
 0xd19   :  { %v4495_v58 = vpop.eup %4494  ;;  %vm1374_vm15 = vcmp.eq.s32.totalorder %v5164_v11, %v1373_v55 }
 0xd1a   :  { %v4268_v60 = vsel %vm1374_vm15, 1.0, %v4952_v9  ;;  %1118 = vrot.lane.b32.xlu1 %v4495_v58, %s4953_s26 }
 0xd1b   :  { %4272 = vmatmul.msk.f32.vlgmr.msra.gmra.mxu2 %vm243_vm0, %v4268_v60 }
 0xd5d   :  { %v1342_v61 = vpop.permute.xlu1 %1341 }
 0xd5e   :  { %v5481_v6 = vadd.f32 %v1342_v61, %v1334_v46 }
 0xd60   :  { %4496 = vtanh.f32 %v5481_v6 }
 0xd66   :  { %v4497_v49 = vpop.eup %4496 }
 0xd67   :  { %1347 = vrot.lane.b32.xlu0 %v4497_v49, %s4953_s26 }
 0xd6f   :  { %1173 = vperm.xlu0 %4399, %v5277_v52   ;;  %v4748_v52 = vld [vmem:[%s6398_s4] sm:$0xff] }
 0xd8c   :  { %v1119_v8 = vpop.permute.xlu1 %1118 }
 0xd8d   :  { %v1121_v42 = vmul.f32 %v1119_v8, %v1102_v31 }
 0xd8f   :  { %1160 = vrot.lane.b32.xlu2 %v1121_v42, %s4954_s28 }
 0xd9e   :  { %v1465_v17 = vpop.f32.mrf.mxu2 }
 0xdd9   :  { %v1348_v45 = vpop.permute.xlu0 %1347 }
 0xdda   :  { %v1350_v62 = vmul.f32 %v1348_v45, %v1331_v51 }
 0xddc   :  { %1358 = vrot.lane.b32.xlu1 %v1350_v62, %s4954_s28 }
 0xde1   :  { %v1174_v27 = vpop.permute.xlu0 %1173 }
 0xde2   :  { %vm1175_vm1 = vcmp.eq.s32.totalorder %v5164_v11, %v1174_v27 }
 0xde3   :  { %v4256_v57 = vsel %vm1175_vm1, 1.0, %v4952_v9 }
 0xde4   :  { %4260 = vmatmul.msk.f32.vlgmr.msrb.gmra.mxu3 %vm243_vm0, %v4256_v57 }
 0xde5   :  { %1608 = vmatpush.msrb.mxu3 %v4747_v24 }
 0xde7   :  { %1609 = vmatpush.msrb.mxu3 %v4748_v52  ;;  %v4265_v52 = vld [vmem:[%s6395_s6 + $0x30] sm:$0xff] }
 0xde9   :  { %v1161_v25 = vpop.permute.xlu2 %1160 }
 0xdea   :  { %1164 = vst.msk [vmem:[#allocation2 + $0x20] sm:$0xff] %vm219_vm8, %v1161_v25  ;;  %4259 = vmatmul.msk.f32.vlgmr.msrb.gmra.mxu1 %vm219_vm8, %v1161_v25 }
 0xdeb   :  { %1583 = vmatpush.msrb.mxu1 %v4749_v26 }
 0xded   :  { %1584 = vmatpush.msrb.mxu1 %v4750_v28 }
 0xdef   :  { %1585 = vmatpush.msrb.mxu1 %v4751_v29 }
 0xdf1   :  { %1586 = vmatpush.msrb.mxu1 %v4752_v63 }
 0xe4e   :  { %v1359_v1 = vpop.permute.xlu1 %1358 }
 0xe4f   :  { %1362 = vst.msk [vmem:[#allocation3 + $0x10] sm:$0xff] %vm219_vm8, %v1359_v1  ;;  %4271 = vmatmul.msk.f32.vlgmr.msra.gmra.mxu0 %vm219_vm8, %v1359_v1 }
 0xe67   :  { %v1204_v3 = vpop.f32.mrf.mxu1  ;;  %v1227_v4 = vpop.f32.mrf.mxu3 }
 0xe68   :  { %v1228_v2 = vadd.f32 %v1227_v4, %v1204_v3  ;;  %v5553_v3 = vld [vmem:[%s6363_s10 + $0x18] sm:$0xff]  ;;  %v5558_v4 = vld [vmem:[%s6363_s10 + $0x10] sm:$0xff] }
 0xe69   :  { %1894 = vmatpush.msra.mxu2 %v5553_v3 }
 0xe6a   :  { %v1230_v10 = vadd.f32 %v5516_v5, %v1228_v2  ;;  %v5565_v2 = vld [vmem:[%s6363_s10 + $0x8] sm:$0xff] }
 0xe6b   :  { %1895 = vmatpush.msra.mxu2 %v5558_v4 }
 0xe6c   :  { %4498 = vtanh.f32 %v1230_v10  ;;  %v4263_v14 = vmul.f32 -1.442695, %v1230_v10  ;;  %v5572_v10 = vld [vmem:[%s6363_s10] sm:$0xff] }
 0xe6d   :  { %1896 = vmatpush.msra.mxu2 %v5565_v2 }
 0xe6e   :  { %4500 = vpow2.f32 %v4263_v14  ;;  %v1851_v14 = vld [vmem:[#allocation2 + $0x8] sm:$0xff] }
 0xe6f   :  { %1897 = vmatpush.msra.mxu2 %v5572_v10 }
 0xe72   :  { %v4499_v12 = vpop.eup %4498 }
 0xe73   :  { %1299 = vrot.lane.b32.xlu1 %v4499_v12, %s4953_s26 }
 0xe74   :  { %v4501_v53 = vpop.eup %4500 }
 0xe75   :  { %v1280_v16 = vadd.f32 1.0, %v4501_v53 }
 0xe77   :  { %4502 = vrcp.f32 %v1280_v16  ;;  %v1292_v32 = vand.u32 2147483648, %v1280_v16  ;;  %vm1286_vm3 = vweird.f32 %v1280_v16  ;;  %v1290_v33 = vand.u32 2147483647, %v1280_v16 }
 0xe79   :  { %v1293_v35 = vor.u32 1.1754944e-38, %v1292_v32  ;;  %vm1291_vm5 = vcmp.eq.f32.partialorder %v1290_v33, 8.507059e+37 }
 0xe7d   :  { %v4503_v20 = vpop.eup %4502 }
 0xe7e   :  { %v1282_v23 = vmul.f32 %v4503_v20, %v1280_v16  ;;  %vm1287_vm2 = vweird.f32 %v4503_v20 }
 0xe7f   :  { %vm1288_vm4 = vmor %vm1286_vm3, %vm1287_vm2 }
 0xe80   :  { %v1283_v56 = vsub.f32 1.0, %v1282_v23 }
 0xe82   :  { %v1284_v15 = vmul.f32 %v4503_v20, %v1283_v56 }
 0xe84   :  { %v1285_v31 = vadd.f32 %v4503_v20, %v1284_v15 }
 0xe86   :  { %v1289_v34 = vsel %vm1288_vm4, %v4503_v20, %v1285_v31 }
 0xe87   :  { %v1294_v38 = vsel %vm1291_vm5, %v1293_v35, %v1289_v34 }
 0xe88   :  { %v1297_v61 = vmul.f32 %v1294_v38, %v5473_v37 }
 0xecc   :  { %v1442_v50 = vpop.f32.mrf.mxu0 }
 0xecd   :  { %v1466_v18 = vadd.f32 %v1465_v17, %v1442_v50  ;;  %v2046_v17 = vld [vmem:[#allocation3 + $0x18] sm:$0xff] }
 0xece   :  { %v2045_v50 = vld [vmem:[#allocation2 + $0x18] sm:$0xff] }
 0xecf   :  { %v1468_v22 = vadd.f32 %v5465_v7, %v1466_v18  ;;  %v5591_v18 = vadd.f32 %v2046_v17, %v2045_v50 }
 0xed1   :  { %4504 = vtanh.f32 %v1468_v22  ;;  %v4274_v13 = vmul.f32 -1.442695, %v1468_v22  ;;  %v2240_v22 = vld [vmem:[#allocation3 + $0x28] sm:$0xff] }
 0xed3   :  { %4506 = vpow2.f32 %v4274_v13 }
 0xed7   :  { %v4505_v30 = vpop.eup %4504 }
 0xed8   :  { %1528 = vrot.lane.b32.xlu0 %v4505_v30, %s4953_s26 }
 0xed9   :  { %v4507_v41 = vpop.eup %4506 }
 0xeda   :  { %v1509_v43 = vadd.f32 1.0, %v4507_v41 }
 0xedc   :  { %4508 = vrcp.f32 %v1509_v43  ;;  %v1521_v59 = vand.u32 2147483648, %v1509_v43  ;;  %vm1515_vm7 = vweird.f32 %v1509_v43  ;;  %v1519_v19 = vand.u32 2147483647, %v1509_v43 }
 0xede   :  { %v1522_v55 = vor.u32 1.1754944e-38, %v1521_v59  ;;  %vm1520_vm10 = vcmp.eq.f32.partialorder %v1519_v19, 8.507059e+37 }
 0xee2   :  { %v4509_v21 = vpop.eup %4508 }
 0xee3   :  { %v1511_v44 = vmul.f32 %v4509_v21, %v1509_v43  ;;  %vm1516_vm6 = vweird.f32 %v4509_v21 }
 0xee4   :  { %vm1517_vm9 = vmor %vm1515_vm7, %vm1516_vm6 }
 0xee5   :  { %v1300_v36 = vpop.permute.xlu1 %1299  ;;  %v1512_v47 = vsub.f32 1.0, %v1511_v44 }
 0xee6   :  { %v1302_v39 = vmul.f32 %v1300_v36, %v1294_v38 }
 0xee7   :  { %v1513_v48 = vmul.f32 %v4509_v21, %v1512_v47 }
 0xee8   :  { %1304 = vrot.lane.b32.xlu0 %v1302_v39, %s4954_s28 }
 0xee9   :  { %v1514_v51 = vadd.f32 %v4509_v21, %v1513_v48 }
 0xeeb   :  { %v1518_v54 = vsel %vm1517_vm9, %v4509_v21, %v1514_v51 }
 0xeec   :  { %v1523_v58 = vsel %vm1520_vm10, %v1522_v55, %v1518_v54 }
 0xeed   :  { %v1526_v27 = vmul.f32 %v1523_v58, %v5481_v6 }
 0xef0   :  { %1564 = vperm.xlu0 %4399, %v1562_v40  }
 0xf4a   :  { %v1529_v60 = vpop.permute.xlu0 %1528 }
 0xf4b   :  { %v1531_v46 = vmul.f32 %v1529_v60, %v1523_v58 }
 0xf4d   :  { %1533 = vrot.lane.b32.xlu2 %v1531_v46, %s4954_s28 }
 0xf5a   :  { %v1305_v49 = vpop.permute.xlu0 %1304 }
 0xf5b   :  { %v5528_v8 = vadd.f32 %v1305_v49, %v1297_v61 }
 0xf5d   :  { %4510 = vtanh.f32 %v5528_v8 }
 0xf62   :  { %v1565_v42 = vpop.permute.xlu0 %1564 }
 0xf63   :  { %v4511_v45 = vpop.eup %4510  ;;  %vm1566_vm11 = vcmp.eq.s32.totalorder %v5164_v11, %v1565_v42 }
 0xf64   :  { %v4277_v62 = vsel %vm1566_vm11, 1.0, %v4952_v9  ;;  %1310 = vrot.lane.b32.xlu2 %v4511_v45, %s4953_s26 }
 0xf65   :  { %4281 = vmatmul.msk.f32.vlgmr.msrb.gmra.mxu2 %vm243_vm0, %v4277_v62 }
 0xf66   :  { %2088 = vmatpush.msrb.mxu2 %v5553_v3 }
 0xf68   :  { %2089 = vmatpush.msrb.mxu2 %v5558_v4 }
 0xf6a   :  { %2090 = vmatpush.msrb.mxu2 %v5565_v2 }
 0xf6c   :  { %2091 = vmatpush.msrb.mxu2 %v5572_v10 }
 0xfa7   :  { %v1534_v57 = vpop.permute.xlu2 %1533 }
 0xfa8   :  { %v5536_v24 = vadd.f32 %v1534_v57, %v1526_v27 }
 0xfaa   :  { %4512 = vtanh.f32 %v5536_v24 }
 0xfb0   :  { %v4513_v37 = vpop.eup %4512 }
 0xfb1   :  { %1539 = vrot.lane.b32.xlu1 %v4513_v37, %s4953_s26 }
 0xfb9   :  { %1365 = vperm.xlu1 %4401, %v4265_v52  }
 0xfbe   :  { %v1311_v25 = vpop.permute.xlu2 %1310 }
 0xfbf   :  { %v1313_v26 = vmul.f32 %v1311_v25, %v1294_v38 }
 0xfc1   :  { %1352 = vrot.lane.b32.xlu0 %v1313_v26, %s4954_s28 }
 0xfe8   :  { %v1657_v36 = vpop.f32.mrf.mxu2 }
0x1023   :  { %v1540_v28 = vpop.permute.xlu1 %1539 }
0x1024   :  { %v1542_v29 = vmul.f32 %v1540_v28, %v1523_v58 }
0x1026   :  { %1550 = vrot.lane.b32.xlu2 %v1542_v29, %s4954_s28 }
0x102b   :  { %v1366_v6 = vpop.permute.xlu1 %1365 }
0x102c   :  { %vm1367_vm12 = vcmp.eq.s32.totalorder %v5164_v11, %v1366_v6 }
0x102d   :  { %v4266_v63 = vsel %vm1367_vm12, 1.0, %v4952_v9 }
0x102e   :  { %4270 = vmatmul.msk.f32.vlgmr.msra.gmra.mxu3 %vm243_vm0, %v4266_v63 }
0x102f   :  { %1797 = vmatpush.msra.mxu3 %v5553_v3 }
0x1031   :  { %1798 = vmatpush.msra.mxu3 %v5558_v4 }
0x1033   :  { %v1353_v1 = vpop.permute.xlu0 %1352  ;;  %1799 = vmatpush.msra.mxu3 %v5565_v2 }
0x1034   :  { %1356 = vst.msk [vmem:[#allocation2 + $0x28] sm:$0xff] %vm219_vm8, %v1353_v1  ;;  %4269 = vmatmul.msk.f32.vlgmr.msra.gmra.mxu1 %vm219_vm8, %v1353_v1 }
0x1035   :  { %1800 = vmatpush.msra.mxu3 %v5572_v10 }
0x103b   :  { %v2239_v20 = vld [vmem:[#allocation2 + $0x28] sm:$0xff] }
0x103c   :  { %v5599_v23 = vadd.f32 %v2240_v22, %v2239_v20 }
0x1080   :  { %v1551_v12 = vpop.permute.xlu2 %1550 }
0x1081   :  { %1554 = vst.msk [vmem:[#allocation3 + $0x8] sm:$0xff] %vm219_vm8, %v1551_v12  ;;  %4280 = vmatmul.msk.f32.vlgmr.msrb.gmra.mxu0 %vm219_vm8, %v1551_v12 }
0x1088   :  { %v1852_v53 = vld [vmem:[#allocation3 + $0x8] sm:$0xff] }
0x1089   :  { %v5584_v16 = vadd.f32 %v1852_v53, %v1851_v14 }
0x108b   :  { %4287 = vmatmul.msk.f32.vlgmr.msra.gmra.mxu2 %vm219_vm8, %v5584_v16 }
0x108c   :  { %2282 = vmatpush.msra.mxu2 %v5553_v3 }
0x108e   :  { %2283 = vmatpush.msra.mxu2 %v5558_v4 }
0x1090   :  { %2284 = vmatpush.msra.mxu2 %v5565_v2 }
0x1092   :  { %2285 = vmatpush.msra.mxu2 %v5572_v10 }
0x1093   :  { %4293 = vmatmul.msk.f32.vlgmr.msrb.gmra.mxu2 %vm219_vm8, %v5591_v18 }
0x1094   :  { %2476 = vmatpush.msrb.mxu2 %v5553_v3 }
0x1096   :  { %2477 = vmatpush.msrb.mxu2 %v5558_v4 }
0x1098   :  { %2478 = vmatpush.msrb.mxu2 %v5565_v2 }
0x109a   :  { %2479 = vmatpush.msrb.mxu2 %v5572_v10 }
0x109b   :  { %4299 = vmatmul.msk.f32.vlgmr.msra.gmra.mxu2 %vm219_vm8, %v5599_v23 }
0x10b1   :  { %v1396_v56 = vpop.f32.mrf.mxu1  ;;  %v1419_v30 = vpop.f32.mrf.mxu3 }
0x10b2   :  { %v1420_v15 = vadd.f32 %v1419_v30, %v1396_v56 }
0x10b4   :  { %v1422_v31 = vadd.f32 %v5516_v5, %v1420_v15 }
0x10b6   :  { %4514 = vtanh.f32 %v1422_v31  ;;  %v4273_v33 = vmul.f32 -1.442695, %v1422_v31 }
0x10b8   :  { %4516 = vpow2.f32 %v4273_v33  ;;  %v5651_v33 = vld [vmem:[%s6364_s11 + $0x8] sm:$0xff] }
0x10bc   :  { %v4515_v32 = vpop.eup %4514 }
0x10bd   :  { %1491 = vrot.lane.b32.xlu2 %v4515_v32, %s4953_s26  ;;  %v5642_v32 = vld [vmem:[%s6364_s11 + $0x10] sm:$0xff] }
0x10be   :  { %v4517_v34 = vpop.eup %4516 }
0x10bf   :  { %v1472_v35 = vadd.f32 1.0, %v4517_v34  ;;  %v5656_v34 = vld [vmem:[%s6364_s11] sm:$0xff] }
0x10c1   :  { %4518 = vrcp.f32 %v1472_v35  ;;  %v1484_v48 = vand.u32 2147483648, %v1472_v35  ;;  %vm1478_vm14 = vweird.f32 %v1472_v35  ;;  %v1482_v51 = vand.u32 2147483647, %v1472_v35 }
0x10c3   :  { %v1485_v19 = vor.u32 1.1754944e-38, %v1484_v48  ;;  %vm1483_vm1 = vcmp.eq.f32.partialorder %v1482_v51, 8.507059e+37  ;;  %v2337_v48 = vld [vmem:[#allocation3 + $0x30] sm:$0xff] }
0x10c7   :  { %v4519_v40 = vpop.eup %4518 }
0x10c8   :  { %v1474_v41 = vmul.f32 %v4519_v40, %v1472_v35  ;;  %vm1479_vm13 = vweird.f32 %v4519_v40 }
0x10c9   :  { %vm1480_vm15 = vmor %vm1478_vm14, %vm1479_vm13 }
0x10ca   :  { %v1475_v43 = vsub.f32 1.0, %v1474_v41 }
0x10cc   :  { %v1476_v44 = vmul.f32 %v4519_v40, %v1475_v43  ;;  %v2142_v43 = vld [vmem:[#allocation2 + $0x20] sm:$0xff] }
0x10ce   :  { %v1477_v47 = vadd.f32 %v4519_v40, %v1476_v44 }
0x10d0   :  { %v1481_v59 = vsel %vm1480_vm15, %v4519_v40, %v1477_v47  ;;  %v1949_v40 = vld [vmem:[#allocation3 + $0x10] sm:$0xff] }
0x10d1   :  { %v1486_v55 = vsel %vm1483_vm1, %v1485_v19, %v1481_v59 }
0x10d2   :  { %v1489_v6 = vmul.f32 %v1486_v55, %v5528_v8 }
0x10fe   :  { %v1634_v38 = vpop.f32.mrf.mxu0 }
0x10ff   :  { %v1658_v39 = vadd.f32 %v1657_v36, %v1634_v38  ;;  %v1759_v36 = vld [vmem:[#allocation2] sm:$0xff] }
0x1101   :  { %v1660_v13 = vadd.f32 %v5465_v7, %v1658_v39  ;;  %v4275_v7 = vld [vmem:[%s6395_s6 + $0x38] sm:$0xff] }
0x1103   :  { %4520 = vtanh.f32 %v1660_v13  ;;  %v4283_v60 = vmul.f32 -1.442695, %v1660_v13  ;;  %v1948_v13 = vld [vmem:[#allocation2 + $0x10] sm:$0xff] }
0x1104   :  { %v5686_v41 = vadd.f32 %v1949_v40, %v1948_v13 }
0x1105   :  { %4522 = vpow2.f32 %v4283_v60 }
0x1109   :  { %v4521_v21 = vpop.eup %4520 }
0x110a   :  { %1720 = vrot.lane.b32.xlu1 %v4521_v21, %s4953_s26  ;;  %v2143_v21 = vld [vmem:[#allocation3 + $0x20] sm:$0xff] }
0x110b   :  { %v4523_v46 = vpop.eup %4522  ;;  %v5694_v44 = vadd.f32 %v2143_v21, %v2142_v43 }
0x110c   :  { %v1701_v61 = vadd.f32 1.0, %v4523_v46 }
0x110e   :  { %4524 = vrcp.f32 %v1701_v61  ;;  %v1713_v57 = vand.u32 2147483648, %v1701_v61  ;;  %vm1707_vm3 = vweird.f32 %v1701_v61  ;;  %v1711_v37 = vand.u32 2147483647, %v1701_v61 }
0x1110   :  { %v1714_v25 = vor.u32 1.1754944e-38, %v1713_v57  ;;  %vm1712_vm5 = vcmp.eq.f32.partialorder %v1711_v37, 8.507059e+37 }
0x1114   :  { %v4525_v49 = vpop.eup %4524 }
0x1115   :  { %v1703_v42 = vmul.f32 %v4525_v49, %v1701_v61  ;;  %vm1708_vm2 = vweird.f32 %v4525_v49 }
0x1116   :  { %vm1709_vm4 = vmor %vm1707_vm3, %vm1708_vm2 }
0x1117   :  { %v1492_v54 = vpop.permute.xlu2 %1491  ;;  %v1704_v45 = vsub.f32 1.0, %v1703_v42 }
0x1118   :  { %v1494_v58 = vmul.f32 %v1492_v54, %v1486_v55 }
0x1119   :  { %v1705_v62 = vmul.f32 %v4525_v49, %v1704_v45 }
0x111a   :  { %1496 = vrot.lane.b32.xlu1 %v1494_v58, %s4954_s28 }
0x111b   :  { %v1706_v27 = vadd.f32 %v4525_v49, %v1705_v62 }
0x111d   :  { %v1710_v52 = vsel %vm1709_vm4, %v4525_v49, %v1706_v27 }
0x111e   :  { %v1715_v28 = vsel %vm1712_vm5, %v1714_v25, %v1710_v52 }
0x111f   :  { %v1718_v8 = vmul.f32 %v1715_v28, %v5536_v24  ;;  %v5637_v24 = vld [vmem:[%s6364_s11 + $0x18] sm:$0xff] }
0x1120   :  { %1774 = vmatpush.msra.mxu1 %v5637_v24  ;;  %1871 = vmatpush.msra.mxu0 %v5637_v24 }
0x1122   :  { %1557 = vperm.xlu1 %4401, %v4275_v7   ;;  %1775 = vmatpush.msra.mxu1 %v5642_v32 }
0x1123   :  { %1872 = vmatpush.msra.mxu0 %v5642_v32 }
0x1124   :  { %1776 = vmatpush.msra.mxu1 %v5651_v33 }
0x1125   :  { %1873 = vmatpush.msra.mxu0 %v5651_v33 }
0x1126   :  { %1777 = vmatpush.msra.mxu1 %v5656_v34 }
0x1127   :  { %1874 = vmatpush.msra.mxu0 %v5656_v34 }
0x1129   :  { %2065 = vmatpush.msrb.mxu0 %v5637_v24 }
0x112b   :  { %2066 = vmatpush.msrb.mxu0 %v5642_v32 }
0x112d   :  { %2067 = vmatpush.msrb.mxu0 %v5651_v33 }
0x112f   :  { %2068 = vmatpush.msrb.mxu0 %v5656_v34 }
0x117c   :  { %v1721_v26 = vpop.permute.xlu1 %1720 }
0x117d   :  { %v1723_v29 = vmul.f32 %v1721_v26, %v1715_v28 }
0x117f   :  { %1725 = vrot.lane.b32.xlu0 %v1723_v29, %s4954_s28 }
0x118c   :  { %v1497_v63 = vpop.permute.xlu1 %1496 }
0x118d   :  { %v5614_v1 = vadd.f32 %v1497_v63, %v1489_v6 }
0x118f   :  { %4526 = vtanh.f32 %v5614_v1 }
0x1194   :  { %v1558_v12 = vpop.permute.xlu1 %1557 }
0x1195   :  { %v4527_v14 = vpop.eup %4526  ;;  %vm1559_vm6 = vcmp.eq.s32.totalorder %v5164_v11, %v1558_v12 }
0x1196   :  { %v4276_v53 = vsel %vm1559_vm6, 1.0, %v4952_v9  ;;  %1502 = vrot.lane.b32.xlu0 %v4527_v14, %s4953_s26 }
0x1197   :  { %4279 = vmatmul.msk.f32.vlgmr.msrb.gmra.mxu3 %vm243_vm0, %v4276_v53 }
0x1198   :  { %1991 = vmatpush.msrb.mxu3 %v5553_v3 }
0x119a   :  { %1992 = vmatpush.msrb.mxu3 %v5558_v4 }
0x119c   :  { %1993 = vmatpush.msrb.mxu3 %v5565_v2 }
0x119e   :  { %1994 = vmatpush.msrb.mxu3 %v5572_v10 }
0x11f1   :  { %v1726_v17 = vpop.permute.xlu0 %1725 }
0x11f2   :  { %v5626_v50 = vadd.f32 %v1726_v17, %v1718_v8  ;;  %v1899_v8 = vpop.f32.mrf.mxu2 }
0x11f4   :  { %4528 = vtanh.f32 %v5626_v50 }
0x11fa   :  { %v4529_v20 = vpop.eup %4528 }
0x11fb   :  { %1731 = vrot.lane.b32.xlu2 %v4529_v20, %s4953_s26 }
0x1208   :  { %v1503_v22 = vpop.permute.xlu0 %1502 }
0x1209   :  { %v1505_v56 = vmul.f32 %v1503_v22, %v1486_v55 }
0x120b   :  { %1544 = vrot.lane.b32.xlu0 %v1505_v56, %s4954_s28 }
0x1255   :  { %v1732_v30 = vpop.permute.xlu2 %1731 }
0x1256   :  { %v1734_v15 = vmul.f32 %v1732_v30, %v1715_v28 }
0x1258   :  { %1742 = vrot.lane.b32.xlu2 %v1734_v15, %s4954_s28 }
0x127d   :  { %v1545_v31 = vpop.permute.xlu0 %1544 }
0x127e   :  { %1548 = vst.msk [vmem:[#allocation2 + $0x30] sm:$0xff] %vm219_vm8, %v1545_v31  ;;  %4278 = vmatmul.msk.f32.vlgmr.msrb.gmra.mxu1 %vm219_vm8, %v1545_v31 }
0x127f   :  { %1968 = vmatpush.msrb.mxu1 %v5637_v24 }
0x1281   :  { %1969 = vmatpush.msrb.mxu1 %v5642_v32 }
0x1283   :  { %1970 = vmatpush.msrb.mxu1 %v5651_v33 }
0x1285   :  { %1971 = vmatpush.msrb.mxu1 %v5656_v34  ;;  %v2336_v47 = vld [vmem:[#allocation2 + $0x30] sm:$0xff] }
0x1286   :  { %1778 = vmatmul.f32.vlgmr.msra.gmra.mxu1 %v4952_v9  ;;  %v5699_v51 = vadd.f32 %v2337_v48, %v2336_v47 }
0x1287   :  { %2162 = vmatpush.msra.mxu1 %v5637_v24 }
0x1289   :  { %2163 = vmatpush.msra.mxu1 %v5642_v32 }
0x128b   :  { %2164 = vmatpush.msra.mxu1 %v5651_v33 }
0x128d   :  { %2165 = vmatpush.msra.mxu1 %v5656_v34 }
0x12b2   :  { %v5675_v35 = vpop.permute.xlu2 %1742 }
0x12b3   :  { %1745 = vst.msk [vmem:[#allocation3] sm:$0xff] %vm219_vm8, %v5675_v35 }
0x12ba   :  { %v1760_v38 = vld [vmem:[#allocation3] sm:$0xff] }
0x12bb   :  { %v5679_v39 = vadd.f32 %v1760_v38, %v1759_v36 }
0x12bd   :  { %4284 = vmatmul.msk.f32.vlgmr.msra.gmra.mxu3 %vm219_vm8, %v5679_v39 }
0x12be   :  { %2185 = vmatpush.msra.mxu3 %v5553_v3 }
0x12c0   :  { %2186 = vmatpush.msra.mxu3 %v5558_v4 }
0x12c2   :  { %2187 = vmatpush.msra.mxu3 %v5565_v2 }
0x12c4   :  { %2188 = vmatpush.msra.mxu3 %v5572_v10 }
0x12c5   :  { %4290 = vmatmul.msk.f32.vlgmr.msrb.gmra.mxu3 %vm219_vm8, %v5686_v41 }
0x12c6   :  { %2379 = vmatpush.msrb.mxu3 %v5553_v3 }
0x12c8   :  { %2380 = vmatpush.msrb.mxu3 %v5558_v4  ;;  %v5705_v4 = vpop.f32.mrf.mxu3 }
0x12ca   :  { %2381 = vmatpush.msrb.mxu3 %v5565_v2  ;;  %v5710_v2 = vld [vmem:[%s6365_s12] ss:$0 sm:$0xff] }
0x12cc   :  { %2382 = vmatpush.msrb.mxu3 %v5572_v10 }
0x12cd   :  { %4296 = vmatmul.msk.f32.vlgmr.msra.gmra.mxu3 %vm219_vm8, %v5694_v44 }
0x12d5   :  { %4302 = vmatmul.msk.f32.vlgmr.msrb.gmra.mxu3 %vm219_vm8, %v5699_v51 }
0x12fb   :  { %v5703_v3 = vpop.f32.mrf.mxu1 }
0x1303   :  { %v1779_v59 = vpop.f32.mrf.mxu1 }
0x1340   :  { %v1802_v10 = vpop.f32.mrf.mxu3 }
0x1341   :  { %v1803_v19 = vadd.f32 %v1802_v10, %v1779_v59 }
0x1343   :  { %v1805_v54 = vadd.f32 %v5710_v2, %v1803_v19 }
0x1345   :  { %4530 = vtanh.f32 %v1805_v54  ;;  %v4285_v58 = vmul.f32 -1.442695, %v1805_v54 }
0x1347   :  { %4532 = vpow2.f32 %v4285_v58 }
0x134b   :  { %v4531_v55 = vpop.eup %4530 }
0x134c   :  { %1828 = vrot.lane.b32.xlu1 %v4531_v55, %s4953_s26 }
0x134d   :  { %v4533_v7 = vpop.eup %4532 }
0x134e   :  { %v1809_v60 = vadd.f32 1.0, %v4533_v7 }
0x1350   :  { %4534 = vrcp.f32 %v1809_v60  ;;  %v1821_v62 = vand.u32 2147483648, %v1809_v60  ;;  %vm1815_vm9 = vweird.f32 %v1809_v60  ;;  %v1819_v27 = vand.u32 2147483647, %v1809_v60 }
0x1352   :  { %v1822_v37 = vor.u32 1.1754944e-38, %v1821_v62  ;;  %vm1820_vm11 = vcmp.eq.f32.partialorder %v1819_v27, 8.507059e+37 }
0x1356   :  { %v4535_v46 = vpop.eup %4534 }
0x1357   :  { %v1811_v61 = vmul.f32 %v4535_v46, %v1809_v60  ;;  %vm1816_vm7 = vweird.f32 %v4535_v46 }
0x1358   :  { %vm1817_vm10 = vmor %vm1815_vm9, %vm1816_vm7 }
0x1359   :  { %v1812_v49 = vsub.f32 1.0, %v1811_v61 }
0x135b   :  { %v1813_v42 = vmul.f32 %v4535_v46, %v1812_v49 }
0x135d   :  { %v1814_v45 = vadd.f32 %v4535_v46, %v1813_v42  ;;  %v1996_v42 = vpop.f32.mrf.mxu3 }
0x135f   :  { %v1818_v57 = vsel %vm1817_vm10, %v4535_v46, %v1814_v45 }
0x1360   :  { %v1823_v25 = vsel %vm1820_vm11, %v1822_v37, %v1818_v57 }
0x1361   :  { %v1826_v28 = vmul.f32 0.0, %v1823_v25 }
0x13be   :  { %v1829_v52 = vpop.permute.xlu1 %1828 }
0x13bf   :  { %v1831_v26 = vmul.f32 %v1829_v52, %v1823_v25 }
0x13c1   :  { %1833 = vrot.lane.b32.xlu2 %v1831_v26, %s4954_s28 }
0x141b   :  { %v1834_v29 = vpop.permute.xlu2 %1833 }
0x141c   :  { %v1836_v6 = vadd.f32 %v1834_v29, %v1826_v28 }
0x141e   :  { %4536 = vtanh.f32 %v1836_v6 }
0x1424   :  { %v4537_v63 = vpop.eup %4536 }
0x1425   :  { %1839 = vrot.lane.b32.xlu0 %v4537_v63, %s4953_s26 }
0x1497   :  { %v1840_v12 = vpop.permute.xlu0 %1839 }
0x1498   :  { %v5716_v14 = vmul.f32 %v1840_v12, %v1823_v25 }
0x149a   :  { %1855 = vrot.lane.b32.xlu1 %v5716_v14, %s4954_s28 }
0x150c   :  { %v1856_v53 = vpop.permute.xlu1 %1855 }
0x150d   :  { %4286 = vmatmul.msk.f32.vlgmr.msra.gmra.mxu0 %vm219_vm8, %v1856_v53 }
0x150e   :  { %2259 = vmatpush.msra.mxu0 %v5637_v24 }
0x1510   :  { %2260 = vmatpush.msra.mxu0 %v5642_v32 }
0x1512   :  { %2261 = vmatpush.msra.mxu0 %v5651_v33 }
0x1514   :  { %2262 = vmatpush.msra.mxu0 %v5656_v34 }
0x158a   :  { %v1876_v17 = vpop.f32.mrf.mxu0 }
0x158b   :  { %v1900_v20 = vadd.f32 %v1899_v8, %v1876_v17 }
0x158d   :  { %v1902_v22 = vadd.f32 %v5710_v2, %v1900_v20 }
0x158f   :  { %4538 = vtanh.f32 %v1902_v22  ;;  %v4288_v30 = vmul.f32 -1.442695, %v1902_v22 }
0x1591   :  { %4540 = vpow2.f32 %v4288_v30 }
0x1595   :  { %v4539_v56 = vpop.eup %4538 }
0x1596   :  { %1925 = vrot.lane.b32.xlu2 %v4539_v56, %s4953_s26 }
0x1597   :  { %v4541_v15 = vpop.eup %4540 }
0x1598   :  { %v1906_v31 = vadd.f32 1.0, %v4541_v15 }
0x159a   :  { %4542 = vrcp.f32 %v1906_v31  ;;  %v1918_v21 = vand.u32 2147483648, %v1906_v31  ;;  %vm1912_vm13 = vweird.f32 %v1906_v31  ;;  %v1916_v47 = vand.u32 2147483647, %v1906_v31 }
0x159c   :  { %v1919_v59 = vor.u32 1.1754944e-38, %v1918_v21  ;;  %vm1917_vm15 = vcmp.eq.f32.partialorder %v1916_v47, 8.507059e+37 }
0x15a0   :  { %v4543_v36 = vpop.eup %4542 }
0x15a1   :  { %v1908_v38 = vmul.f32 %v4543_v36, %v1906_v31  ;;  %vm1913_vm12 = vweird.f32 %v4543_v36 }
0x15a2   :  { %vm1914_vm14 = vmor %vm1912_vm13, %vm1913_vm12 }
0x15a3   :  { %v1909_v40 = vsub.f32 1.0, %v1908_v38 }
0x15a5   :  { %v1910_v13 = vmul.f32 %v4543_v36, %v1909_v40 }
0x15a7   :  { %v1911_v43 = vadd.f32 %v4543_v36, %v1910_v13 }
0x15a9   :  { %v1915_v48 = vsel %vm1914_vm14, %v4543_v36, %v1911_v43  ;;  %v2093_v43 = vpop.f32.mrf.mxu2 }
0x15aa   :  { %v1920_v19 = vsel %vm1917_vm15, %v1919_v59, %v1915_v48 }
0x15ab   :  { %v1923_v55 = vmul.f32 %v1920_v19, %v1836_v6 }
0x15f0   :  { %v1926_v10 = vpop.permute.xlu2 %1925 }
0x15f1   :  { %v1928_v54 = vmul.f32 %v1926_v10, %v1920_v19 }
0x15f3   :  { %1930 = vrot.lane.b32.xlu0 %v1928_v54, %s4954_s28 }
0x1665   :  { %v1931_v58 = vpop.permute.xlu0 %1930 }
0x1666   :  { %v1933_v7 = vadd.f32 %v1931_v58, %v1923_v55 }
0x1668   :  { %4544 = vtanh.f32 %v1933_v7 }
0x166e   :  { %v4545_v60 = vpop.eup %4544 }
0x166f   :  { %1936 = vrot.lane.b32.xlu1 %v4545_v60, %s4953_s26 }
0x16e1   :  { %v1937_v46 = vpop.permute.xlu1 %1936 }
0x16e2   :  { %v5729_v61 = vmul.f32 %v1937_v46, %v1920_v19 }
0x16e4   :  { %1952 = vrot.lane.b32.xlu2 %v5729_v61, %s4954_s28 }
0x173e   :  { %v1953_v49 = vpop.permute.xlu2 %1952 }
0x173f   :  { %4289 = vmatmul.msk.f32.vlgmr.msrb.gmra.mxu1 %vm219_vm8, %v1953_v49 }
0x1740   :  { %2356 = vmatpush.msrb.mxu1 %v5637_v24 }
0x1742   :  { %2357 = vmatpush.msrb.mxu1 %v5642_v32 }
0x1744   :  { %2358 = vmatpush.msrb.mxu1 %v5651_v33 }
0x1746   :  { %2359 = vmatpush.msrb.mxu1 %v5656_v34 }
0x17bc   :  { %v1973_v45 = vpop.f32.mrf.mxu1 }
0x17bd   :  { %v1997_v62 = vadd.f32 %v1996_v42, %v1973_v45 }
0x17bf   :  { %v1999_v27 = vadd.f32 %v5710_v2, %v1997_v62 }
0x17c1   :  { %4546 = vtanh.f32 %v1999_v27  ;;  %v4291_v37 = vmul.f32 -1.442695, %v1999_v27 }
0x17c3   :  { %4548 = vpow2.f32 %v4291_v37 }
0x17c7   :  { %v4547_v57 = vpop.eup %4546 }
0x17c8   :  { %2022 = vrot.lane.b32.xlu0 %v4547_v57, %s4953_s26 }
0x17c9   :  { %v4549_v52 = vpop.eup %4548 }
0x17ca   :  { %v2003_v25 = vadd.f32 1.0, %v4549_v52 }
0x17cc   :  { %4550 = vrcp.f32 %v2003_v25  ;;  %v2015_v12 = vand.u32 2147483648, %v2003_v25  ;;  %vm2009_vm2 = vweird.f32 %v2003_v25  ;;  %v2013_v53 = vand.u32 2147483647, %v2003_v25 }
0x17ce   :  { %v2016_v17 = vor.u32 1.1754944e-38, %v2015_v12  ;;  %vm2014_vm4 = vcmp.eq.f32.partialorder %v2013_v53, 8.507059e+37 }
0x17d2   :  { %v4551_v26 = vpop.eup %4550 }
0x17d3   :  { %v2005_v28 = vmul.f32 %v4551_v26, %v2003_v25  ;;  %vm2010_vm1 = vweird.f32 %v4551_v26 }
0x17d4   :  { %vm2011_vm3 = vmor %vm2009_vm2, %vm2010_vm1 }
0x17d5   :  { %v2006_v29 = vsub.f32 1.0, %v2005_v28  ;;  %v2190_v28 = vpop.f32.mrf.mxu3 }
0x17d7   :  { %v2007_v6 = vmul.f32 %v4551_v26, %v2006_v29 }
0x17d9   :  { %v2008_v63 = vadd.f32 %v4551_v26, %v2007_v6 }
0x17db   :  { %v2012_v8 = vsel %vm2011_vm3, %v4551_v26, %v2008_v63 }
0x17dc   :  { %v2017_v22 = vsel %vm2014_vm4, %v2016_v17, %v2012_v8 }
0x17dd   :  { %v2020_v30 = vmul.f32 %v2017_v22, %v1933_v7 }
0x183a   :  { %v2023_v20 = vpop.permute.xlu0 %2022 }
0x183b   :  { %v2025_v56 = vmul.f32 %v2023_v20, %v2017_v22 }
0x183d   :  { %2027 = vrot.lane.b32.xlu1 %v2025_v56, %s4954_s28 }
0x18af   :  { %v2028_v15 = vpop.permute.xlu1 %2027 }
0x18b0   :  { %v2030_v31 = vadd.f32 %v2028_v15, %v2020_v30 }
0x18b2   :  { %4552 = vtanh.f32 %v2030_v31 }
0x18b8   :  { %v4553_v36 = vpop.eup %4552 }
0x18b9   :  { %2033 = vrot.lane.b32.xlu2 %v4553_v36, %s4953_s26 }
0x1913   :  { %v2034_v38 = vpop.permute.xlu2 %2033 }
0x1914   :  { %v5742_v40 = vmul.f32 %v2034_v38, %v2017_v22 }
0x1916   :  { %2049 = vrot.lane.b32.xlu0 %v5742_v40, %s4954_s28 }
0x1988   :  { %v2050_v13 = vpop.permute.xlu0 %2049 }
0x1989   :  { %4292 = vmatmul.msk.f32.vlgmr.msrb.gmra.mxu0 %vm219_vm8, %v2050_v13 }
0x198a   :  { %2453 = vmatpush.msrb.mxu0 %v5637_v24 }
0x198c   :  { %2454 = vmatpush.msrb.mxu0 %v5642_v32 }
0x198e   :  { %2455 = vmatpush.msrb.mxu0 %v5651_v33 }
0x1990   :  { %2456 = vmatpush.msrb.mxu0 %v5656_v34 }
0x1a06   :  { %v2070_v21 = vpop.f32.mrf.mxu0 }
0x1a07   :  { %v2094_v47 = vadd.f32 %v2093_v43, %v2070_v21 }
0x1a09   :  { %v2096_v48 = vadd.f32 %v5710_v2, %v2094_v47 }
0x1a0b   :  { %4554 = vtanh.f32 %v2096_v48  ;;  %v4294_v10 = vmul.f32 -1.442695, %v2096_v48 }
0x1a0d   :  { %4556 = vpow2.f32 %v4294_v10 }
0x1a11   :  { %v4555_v59 = vpop.eup %4554 }
0x1a12   :  { %2119 = vrot.lane.b32.xlu1 %v4555_v59, %s4953_s26 }
0x1a13   :  { %v4557_v19 = vpop.eup %4556 }
0x1a14   :  { %v2100_v54 = vadd.f32 1.0, %v4557_v19 }
0x1a16   :  { %4558 = vrcp.f32 %v2100_v54  ;;  %v2112_v34 = vand.u32 2147483648, %v2100_v54  ;;  %vm2106_vm6 = vweird.f32 %v2100_v54  ;;  %v2110_v7 = vand.u32 2147483647, %v2100_v54 }
0x1a18   :  { %v2113_v46 = vor.u32 1.1754944e-38, %v2112_v34  ;;  %vm2111_vm9 = vcmp.eq.f32.partialorder %v2110_v7, 8.507059e+37 }
0x1a1c   :  { %v4559_v24 = vpop.eup %4558 }
0x1a1d   :  { %v2102_v32 = vmul.f32 %v4559_v24, %v2100_v54  ;;  %vm2107_vm5 = vweird.f32 %v4559_v24 }
0x1a1e   :  { %vm2108_vm7 = vmor %vm2106_vm6, %vm2107_vm5 }
0x1a1f   :  { %v2103_v55 = vsub.f32 1.0, %v2102_v32 }
0x1a21   :  { %v2104_v33 = vmul.f32 %v4559_v24, %v2103_v55  ;;  %v2287_v55 = vpop.f32.mrf.mxu2 }
0x1a23   :  { %v2105_v58 = vadd.f32 %v4559_v24, %v2104_v33 }
0x1a25   :  { %v2109_v60 = vsel %vm2108_vm7, %v4559_v24, %v2105_v58 }
0x1a26   :  { %v2114_v42 = vsel %vm2111_vm9, %v2113_v46, %v2109_v60 }
0x1a27   :  { %v2117_v62 = vmul.f32 %v2114_v42, %v2030_v31 }
0x1a84   :  { %v2120_v49 = vpop.permute.xlu1 %2119 }
0x1a85   :  { %v2122_v45 = vmul.f32 %v2120_v49, %v2114_v42 }
0x1a87   :  { %2124 = vrot.lane.b32.xlu2 %v2122_v45, %s4954_s28 }
0x1ae1   :  { %v2125_v27 = vpop.permute.xlu2 %2124 }
0x1ae2   :  { %v2127_v57 = vadd.f32 %v2125_v27, %v2117_v62 }
0x1ae4   :  { %4560 = vtanh.f32 %v2127_v57 }
0x1aea   :  { %v4561_v37 = vpop.eup %4560 }
0x1aeb   :  { %2130 = vrot.lane.b32.xlu0 %v4561_v37, %s4953_s26 }
0x1b5d   :  { %v2131_v52 = vpop.permute.xlu0 %2130 }
0x1b5e   :  { %v5755_v25 = vmul.f32 %v2131_v52, %v2114_v42 }
0x1b60   :  { %2146 = vrot.lane.b32.xlu1 %v5755_v25, %s4954_s28 }
0x1bd2   :  { %v2147_v26 = vpop.permute.xlu1 %2146 }
0x1bd3   :  { %4295 = vmatmul.msk.f32.vlgmr.msra.gmra.mxu1 %vm219_vm8, %v2147_v26  ;;  %v1612_v26 = vadd.f32 %v5705_v4, %v5703_v3 }
0x1c50   :  { %v2167_v29 = vpop.f32.mrf.mxu1 }
0x1c51   :  { %v2191_v6 = vadd.f32 %v2190_v28, %v2167_v29 }
0x1c53   :  { %v2193_v63 = vadd.f32 %v5710_v2, %v2191_v6  ;;  %v1614_v6 = vadd.f32 %v5516_v5, %v1612_v26 }
0x1c55   :  { %4562 = vtanh.f32 %v2193_v63  ;;  %v4297_v53 = vmul.f32 -1.442695, %v2193_v63  ;;  %v4282_v4 = vmul.f32 -1.442695, %v1614_v6 }
0x1c57   :  { %4564 = vpow2.f32 %v4297_v53 }
0x1c5b   :  { %v4563_v12 = vpop.eup %4562 }
0x1c5c   :  { %2216 = vrot.lane.b32.xlu2 %v4563_v12, %s4953_s26 }
0x1c5d   :  { %v4565_v8 = vpop.eup %4564 }
0x1c5e   :  { %v2197_v17 = vadd.f32 1.0, %v4565_v8 }
0x1c60   :  { %4566 = vrcp.f32 %v2197_v17  ;;  %v2209_v31 = vand.u32 2147483648, %v2197_v17  ;;  %vm2203_vm11 = vweird.f32 %v2197_v17  ;;  %v2207_v36 = vand.u32 2147483647, %v2197_v17 }
0x1c62   :  { %v2210_v13 = vor.u32 1.1754944e-38, %v2209_v31  ;;  %vm2208_vm13 = vcmp.eq.f32.partialorder %v2207_v36, 8.507059e+37 }
0x1c66   :  { %v4567_v20 = vpop.eup %4566 }
0x1c67   :  { %v2199_v22 = vmul.f32 %v4567_v20, %v2197_v17  ;;  %vm2204_vm10 = vweird.f32 %v4567_v20 }
0x1c68   :  { %vm2205_vm12 = vmor %vm2203_vm11, %vm2204_vm10 }
0x1c69   :  { %v2200_v56 = vsub.f32 1.0, %v2199_v22 }
0x1c6b   :  { %v2201_v30 = vmul.f32 %v4567_v20, %v2200_v56 }
0x1c6d   :  { %v2202_v15 = vadd.f32 %v4567_v20, %v2201_v30 }
0x1c6f   :  { %v2206_v38 = vsel %vm2205_vm12, %v4567_v20, %v2202_v15 }
0x1c70   :  { %v2211_v21 = vsel %vm2208_vm13, %v2210_v13, %v2206_v38 }
0x1c71   :  { %v2214_v48 = vmul.f32 %v2211_v21, %v2127_v57 }
0x1cb6   :  { %v2217_v43 = vpop.permute.xlu2 %2216 }
0x1cb7   :  { %v2219_v47 = vmul.f32 %v2217_v43, %v2211_v21 }
0x1cb9   :  { %2221 = vrot.lane.b32.xlu0 %v2219_v47, %s4954_s28 }
0x1d2b   :  { %v2222_v59 = vpop.permute.xlu0 %2221 }
0x1d2c   :  { %v2224_v10 = vadd.f32 %v2222_v59, %v2214_v48 }
0x1d2e   :  { %4568 = vtanh.f32 %v2224_v10 }
0x1d34   :  { %v4569_v19 = vpop.eup %4568 }
0x1d35   :  { %2227 = vrot.lane.b32.xlu1 %v4569_v19, %s4953_s26 }
0x1da7   :  { %v2228_v54 = vpop.permute.xlu1 %2227 }
0x1da8   :  { %v5764_v24 = vmul.f32 %v2228_v54, %v2211_v21 }
0x1daa   :  { %2243 = vrot.lane.b32.xlu2 %v5764_v24, %s4954_s28 }
0x1e04   :  { %v2244_v32 = vpop.permute.xlu2 %2243 }
0x1e05   :  { %4298 = vmatmul.msk.f32.vlgmr.msra.gmra.mxu0 %vm219_vm8, %v2244_v32 }
0x1e82   :  { %v2264_v33 = vpop.f32.mrf.mxu0 }
0x1e83   :  { %v2288_v58 = vadd.f32 %v2287_v55, %v2264_v33  ;;  %v2384_v55 = vpop.f32.mrf.mxu3 }
0x1e85   :  { %v2290_v34 = vadd.f32 %v5710_v2, %v2288_v58 }
0x1e87   :  { %4570 = vtanh.f32 %v2290_v34  ;;  %v4300_v60 = vmul.f32 -1.442695, %v2290_v34 }
0x1e89   :  { %4572 = vpow2.f32 %v4300_v60 }
0x1e8d   :  { %v4571_v7 = vpop.eup %4570 }
0x1e8e   :  { %2313 = vrot.lane.b32.xlu0 %v4571_v7, %s4953_s26 }
0x1e8f   :  { %v4573_v46 = vpop.eup %4572 }
0x1e90   :  { %v2294_v49 = vadd.f32 1.0, %v4573_v46 }
0x1e92   :  { %4574 = vrcp.f32 %v2294_v49  ;;  %v2306_v37 = vand.u32 2147483648, %v2294_v49  ;;  %vm2300_vm15 = vweird.f32 %v2294_v49  ;;  %v2304_v52 = vand.u32 2147483647, %v2294_v49 }
0x1e93   :  { %4576 = vtanh.f32 %v1614_v6 }
0x1e94   :  { %v2307_v29 = vor.u32 1.1754944e-38, %v2306_v37  ;;  %vm2305_vm2 = vcmp.eq.f32.partialorder %v2304_v52, 8.507059e+37 }
0x1e98   :  { %v4575_v42 = vpop.eup %4574 }
0x1e99   :  { %v2296_v45 = vmul.f32 %v4575_v42, %v2294_v49  ;;  %vm2301_vm14 = vweird.f32 %v4575_v42  ;;  %v4577_v8 = vpop.eup %4576 }
0x1e9a   :  { %vm2302_vm1 = vmor %vm2300_vm15, %vm2301_vm14 }
0x1e9b   :  { %v2297_v62 = vsub.f32 1.0, %v2296_v45 }
0x1e9d   :  { %v2298_v27 = vmul.f32 %v4575_v42, %v2297_v62 }
0x1e9f   :  { %v2299_v57 = vadd.f32 %v4575_v42, %v2298_v27 }
0x1ea1   :  { %v2303_v28 = vsel %vm2302_vm1, %v4575_v42, %v2299_v57 }
0x1ea2   :  { %v2308_v12 = vsel %vm2305_vm2, %v2307_v29, %v2303_v28 }
0x1ea3   :  { %v2311_v17 = vmul.f32 %v2308_v12, %v2224_v10 }
0x1f00   :  { %v2314_v63 = vpop.permute.xlu0 %2313 }
0x1f01   :  { %v2316_v53 = vmul.f32 %v2314_v63, %v2308_v12 }
0x1f03   :  { %2318 = vrot.lane.b32.xlu1 %v2316_v53, %s4954_s28 }
0x1f0b   :  { %1683 = vrot.lane.b32.xlu1 %v4577_v8, %s4953_s26 }
0x1f75   :  { %v2319_v20 = vpop.permute.xlu1 %2318 }
0x1f76   :  { %v5776_v22 = vadd.f32 %v2319_v20, %v2311_v17 }
0x1f78   :  { %4578 = vtanh.f32 %v5776_v22 }
0x1f79   :  { %4580 = vpow2.f32 %v4282_v4 }
0x1f7d   :  { %v1684_v59 = vpop.permute.xlu1 %1683 }
0x1f7e   :  { %v4579_v3 = vpop.eup %4578 }
0x1f7f   :  { %2324 = vrot.lane.b32.xlu2 %v4579_v3, %s4953_s26  ;;  %v4581_v5 = vpop.eup %4580  ;;  %v1758_v3 = vld [vmem:[%s6400_s25] sm:$0xff] }
0x1f80   :  { %v1664_v56 = vadd.f32 1.0, %v4581_v5  ;;  %vm1940_vm12 = vcmp.eq.s32.totalorder %v1758_v3, 1  ;;  %vm2231_vm13 = vcmp.eq.s32.totalorder %v1758_v3, 4  ;;  %vm2522_vm14 = vcmp.eq.s32.totalorder %v1758_v3, 7 }
0x1f81   :  { %v1941_v4 = vsel %vm1940_vm12, 1, %v4951_v0  ;;  %v2232_v5 = vsel %vm2231_vm13, 1, %v4951_v0  ;;  %vm1843_vm15 = vcmp.eq.s32.totalorder %v1758_v3, 0  ;;  %vm2134_vm1 = vcmp.eq.s32.totalorder %v1758_v3, 3 }
0x1f82   :  { %4582 = vrcp.f32 %v1664_v56  ;;  %v1676_v21 = vand.u32 2147483648, %v1664_v56  ;;  %vm1670_vm4 = vweird.f32 %v1664_v56  ;;  %v1674_v47 = vand.u32 2147483647, %v1664_v56 }
0x1f83   :  { %vm2425_vm2 = vcmp.eq.s32.totalorder %v1758_v3, 6 }
0x1f84   :  { %v1677_v10 = vor.u32 1.1754944e-38, %v1676_v21  ;;  %vm1675_vm6 = vcmp.eq.f32.partialorder %v1674_v47, 8.507059e+37  ;;  %v2434_v47 = vld [vmem:[#allocation3 + $0x38] sm:$0xff] }
0x1f88   :  { %v4583_v30 = vpop.eup %4582 }
0x1f89   :  { %v1666_v15 = vmul.f32 %v4583_v30, %v1664_v56  ;;  %vm1671_vm3 = vweird.f32 %v4583_v30  ;;  %v2523_v56 = vsel %vm2522_vm14, 1, %v4951_v0 }
0x1f8a   :  { %vm1672_vm5 = vmor %vm1670_vm4, %vm1671_vm3  ;;  %vm2037_vm3 = vcmp.eq.s32.totalorder %v1758_v3, 2 }
0x1f8b   :  { %v1667_v31 = vsub.f32 1.0, %v1666_v15 }
0x1f8d   :  { %v1668_v36 = vmul.f32 %v4583_v30, %v1667_v31 }
0x1f8f   :  { %v1669_v13 = vadd.f32 %v4583_v30, %v1668_v36 }
0x1f91   :  { %v1673_v48 = vsel %vm1672_vm5, %v4583_v30, %v1669_v13  ;;  %v1844_v13 = vsel %vm1843_vm15, 1, %v4951_v0 }
0x1f92   :  { %v1678_v19 = vsel %vm1675_vm6, %v1677_v10, %v1673_v48  ;;  %vm2328_vm6 = vcmp.eq.s32.totalorder %v1758_v3, 5 }
0x1f93   :  { %v1686_v54 = vmul.f32 %v1684_v59, %v1678_v19  ;;  %v1681_v60 = vmul.f32 %v1678_v19, %v5614_v1  ;;  %v2426_v59 = vsel %vm2425_vm2, 1, %v4951_v0 }
0x1fd9   :  { %v2325_v38 = vpop.permute.xlu2 %2324 }
0x1fda   :  { %v5780_v43 = vmul.f32 %v2325_v38, %v2308_v12 }
0x1fdc   :  { %2340 = vrot.lane.b32.xlu0 %v5780_v43, %s4954_s28 }
0x1fe4   :  { %1688 = vrot.lane.b32.xlu0 %v1686_v54, %s4954_s28 }
0x204e   :  { %v2341_v32 = vpop.permute.xlu0 %2340 }
0x204f   :  { %4301 = vmatmul.msk.f32.vlgmr.msrb.gmra.mxu1 %vm219_vm8, %v2341_v32 }
0x2056   :  { %v1689_v7 = vpop.permute.xlu0 %1688 }
0x2057   :  { %v1691_v46 = vadd.f32 %v1689_v7, %v1681_v60  ;;  %v2625_v7 = vld [vmem:[%s6401_s21] sm:$0xff]  ;;  %v2533_v60 = vld [vmem:[%s6366_s13 + $0x18] sm:$0xff] }
0x2058   :  { %2553 = vmatpush.msra.mxu1 %v2533_v60  ;;  %2578 = vmatpush.msra.mxu3 %v2533_v60 }
0x20cc   :  { %v2361_v33 = vpop.f32.mrf.mxu1 }
0x20cd   :  { %v2385_v58 = vadd.f32 %v2384_v55, %v2361_v33  ;;  %v2038_v55 = vsel %vm2037_vm3, 1, %v4951_v0 }
0x20cf   :  { %v2387_v34 = vadd.f32 %v5710_v2, %v2385_v58 }
0x20d1   :  { %4584 = vtanh.f32 %v2387_v34  ;;  %v4303_v45 = vmul.f32 -1.442695, %v2387_v34  ;;  %v2329_v34 = vsel %vm2328_vm6, 1, %v4951_v0 }
0x20d2   :  { %4586 = vtanh.f32 %v1691_v46  ;;  %v5839_v46 = vld [vmem:[%s6370_s17 + $0x18] sm:$0xff] }
0x20d3   :  { %4588 = vpow2.f32 %v4303_v45  ;;  %v5851_v45 = vld [vmem:[#allocation6] sm:$0xff] }
0x20d7   :  { %v4585_v49 = vpop.eup %4584 }
0x20d8   :  { %2410 = vrot.lane.b32.xlu2 %v4585_v49, %s4953_s26  ;;  %v4587_v42 = vpop.eup %4586  ;;  %v5841_v49 = vld [vmem:[#allocation6 + $0x8] sm:$0xff] }
0x20d9   :  { %v4589_v62 = vpop.eup %4588  ;;  %2672 = vmatpush.msra.mxu2 %v5841_v49 }
0x20da   :  { %v2391_v27 = vadd.f32 1.0, %v4589_v62  ;;  %v5856_v62 = vld [vmem:[%s6370_s17 + $0x8] sm:$0xff] }
0x20db   :  { %2673 = vmatpush.msra.mxu2 %v5851_v45 }
0x20dc   :  { %4590 = vrcp.f32 %v2391_v27  ;;  %v2403_v1 = vand.u32 2147483648, %v2391_v27  ;;  %vm2397_vm9 = vweird.f32 %v2391_v27  ;;  %v2401_v29 = vand.u32 2147483647, %v2391_v27 }
0x20de   :  { %v2404_v63 = vor.u32 1.1754944e-38, %v2403_v1  ;;  %vm2402_vm11 = vcmp.eq.f32.partialorder %v2401_v29, 8.507059e+37 }
0x20e0   :  { %1694 = vrot.lane.b32.xlu2 %v4587_v42, %s4953_s26  ;;  %v5846_v42 = vld [vmem:[%s6370_s17 + $0x10] sm:$0xff] }
0x20e2   :  { %v4591_v57 = vpop.eup %4590 }
0x20e3   :  { %v2393_v37 = vmul.f32 %v4591_v57, %v2391_v27  ;;  %vm2398_vm7 = vweird.f32 %v4591_v57  ;;  %v5863_v27 = vld [vmem:[%s6370_s17] sm:$0xff] }
0x20e4   :  { %vm2399_vm10 = vmor %vm2397_vm9, %vm2398_vm7 }
0x20e5   :  { %v2394_v52 = vsub.f32 1.0, %v2393_v37 }
0x20e7   :  { %v2395_v26 = vmul.f32 %v4591_v57, %v2394_v52 }
0x20e9   :  { %v2396_v28 = vadd.f32 %v4591_v57, %v2395_v26 }
0x20eb   :  { %v2400_v6 = vsel %vm2399_vm10, %v4591_v57, %v2396_v28 }
0x20ec   :  { %v2405_v53 = vsel %vm2402_vm11, %v2404_v63, %v2400_v6 }
0x20ed   :  { %v2408_v30 = vmul.f32 %v2405_v53, %v5776_v22  ;;  %v2135_v22 = vsel %vm2134_vm1, 1, %v4951_v0  ;;  %v2531_v0 = vld [vmem:[%s6366_s13 + $0x8] sm:$0xff] }
0x2132   :  { %v2411_v12 = vpop.permute.xlu2 %2410 }
0x2133   :  { %v2413_v8 = vmul.f32 %v2411_v12, %v2405_v53 }
0x2135   :  { %2415 = vrot.lane.b32.xlu1 %v2413_v8, %s4954_s28 }
0x213a   :  { %v1695_v17 = vpop.permute.xlu2 %1694 }
0x213b   :  { %v1697_v20 = vmul.f32 %v1695_v17, %v1678_v19 }
0x213d   :  { %1736 = vrot.lane.b32.xlu1 %v1697_v20, %s4954_s28 }
0x2145   :  { %1943 = vperm.xlu1 %4401, %v1941_v4  }
0x214d   :  { %2234 = vperm.xlu1 %4401, %v2232_v5  }
0x2155   :  { %2525 = vperm.xlu1 %4401, %v2523_v56  }
0x21a7   :  { %v2416_v15 = vpop.permute.xlu1 %2415 }
0x21a8   :  { %v5799_v31 = vadd.f32 %v2416_v15, %v2408_v30  ;;  %v5928_v15 = vld [vmem:[%s6367_s14] ss:$0 sm:$0xff] }
0x21aa   :  { %4592 = vtanh.f32 %v5799_v31 }
0x21af   :  { %v1737_v36 = vpop.permute.xlu1 %1736 }
0x21b0   :  { %v4593_v38 = vpop.eup %4592  ;;  %1740 = vst.msk [vmem:[#allocation2 + $0x38] sm:$0xff] %vm219_vm8, %v1737_v36 }
0x21b1   :  { %2421 = vrot.lane.b32.xlu0 %v4593_v38, %s4953_s26 }
0x21b7   :  { %v2433_v21 = vld [vmem:[#allocation2 + $0x38] sm:$0xff]  ;;  %v1944_v54 = vpop.permute.xlu1 %1943 }
0x21b8   :  { %v5805_v48 = vadd.f32 %v2434_v47, %v2433_v21  ;;  %vm1945_vm5 = vcmp.eq.s32.totalorder %v1944_v54, 1 }
0x21b9   :  { %1846 = vperm.xlu0 %4399, %v1844_v13  }
0x21ba   :  { %4305 = vmatmul.msk.f32.vlgmr.msrb.gmra.mxu2 %vm219_vm8, %v5805_v48 }
0x21bf   :  { %v2235_v52 = vpop.permute.xlu1 %2234 }
0x21c0   :  { %vm2236_vm10 = vcmp.eq.s32.totalorder %v2235_v52, 1 }
0x21c1   :  { %2137 = vperm.xlu0 %4399, %v2135_v22  }
0x21c7   :  { %v5876_v17 = vpop.permute.xlu1 %2525 }
0x21c8   :  { %vm2527_vm13 = vcmp.eq.s32.totalorder %v5876_v17, 1  ;;  %v5963_v17 = vld [vmem:[#allocation9] sm:$0xff] }
0x21c9   :  { %2428 = vperm.xlu0 %4399, %v2426_v59  }
0x2223   :  { %v2422_v10 = vpop.permute.xlu0 %2421 }
0x2224   :  { %v5811_v19 = vmul.f32 %v2422_v10, %v2405_v53 }
0x2226   :  { %2437 = vrot.lane.b32.xlu2 %v5811_v19, %s4954_s28 }
0x222b   :  { %v1847_v32 = vpop.permute.xlu0 %1846 }
0x222c   :  { %vm1848_vm4 = vcmp.eq.s32.totalorder %v1847_v32, 1 }
0x222d   :  { %v1850_v33 = vsel %vm1848_vm4, %v5716_v14, 0.0  ;;  %v2532_v14 = vld [vmem:[%s6366_s13 + $0x10] sm:$0xff]  ;;  %v1849_v26 = vsel %vm1848_vm4, %v5679_v39, 0.0 }
0x222e   :  { %v1947_v58 = vsel %vm1945_vm5, %v5729_v61, %v1850_v33  ;;  %2040 = vperm.xlu2 %4400, %v2038_v55   ;;  %2554 = vmatpush.msra.mxu1 %v2532_v14  ;;  %v2530_v61 = vld [vmem:[%s6366_s13] sm:$0xff]  ;;  %v1946_v1 = vsel %vm1945_vm5, %v5584_v16, %v1849_v26  ;;  %v4319_v26 = vld [vmem:[%s6401_s21 + $0x8] sm:$0xff] }
0x222f   :  { %2579 = vmatpush.msra.mxu3 %v2532_v14  ;;  %v5933_v14 = vld [vmem:[#allocation8] ss:$0 sm:$0xff] }
0x2230   :  { %2555 = vmatpush.msra.mxu1 %v2531_v0 }
0x2231   :  { %2580 = vmatpush.msra.mxu3 %v2531_v0 }
0x2232   :  { %2556 = vmatpush.msra.mxu1 %v2530_v61 }
0x2233   :  { %2581 = vmatpush.msra.mxu3 %v2530_v61  ;;  %v2138_v37 = vpop.permute.xlu0 %2137 }
0x2234   :  { %2692 = vmatpush.msrb.mxu1 %v5839_v46  ;;  %vm2139_vm9 = vcmp.eq.s32.totalorder %v2138_v37, 1 }
0x2236   :  { %2331 = vperm.xlu2 %4400, %v2329_v34   ;;  %2693 = vmatpush.msrb.mxu1 %v5846_v42 }
0x2238   :  { %2694 = vmatpush.msrb.mxu1 %v5856_v62 }
0x223a   :  { %2695 = vmatpush.msrb.mxu1 %v5863_v27 }
0x223b   :  { %v2429_v8 = vpop.permute.xlu0 %2428 }
0x223c   :  { %vm2430_vm12 = vcmp.eq.s32.totalorder %v2429_v8, 1 }
0x223d   :  { %v2481_v3 = vpop.f32.mrf.mxu2 }
0x223e   :  { %2627 = vperm.xlu2 %4400, %v2625_v7  }
0x2280   :  { %v2438_v57 = vpop.permute.xlu2 %2437 }
0x2281   :  { %4304 = vmatmul.msk.f32.vlgmr.msrb.gmra.mxu0 %vm219_vm8, %v2438_v57 }
0x2288   :  { %v2041_v28 = vpop.permute.xlu2 %2040 }
0x2289   :  { %vm2042_vm7 = vcmp.eq.s32.totalorder %v2041_v28, 1 }
0x228a   :  { %v2044_v29 = vsel %vm2042_vm7, %v5742_v40, %v1947_v58  ;;  %v2043_v6 = vsel %vm2042_vm7, %v5686_v41, %v1946_v1 }
0x228b   :  { %v2141_v63 = vsel %vm2139_vm9, %v5755_v25, %v2044_v29  ;;  %v2140_v53 = vsel %vm2139_vm9, %v5591_v18, %v2043_v6 }
0x228c   :  { %v2238_v12 = vsel %vm2236_vm10, %v5764_v24, %v2141_v63  ;;  %v2237_v20 = vsel %vm2236_vm10, %v5694_v44, %v2140_v53  ;;  %v5904_v24 = vld [vmem:[%s6369_s16 + $0x10] sm:$0xff] }
0x2290   :  { %v2332_v39 = vpop.permute.xlu2 %2331 }
0x2291   :  { %vm2333_vm11 = vcmp.eq.s32.totalorder %v2332_v39, 1 }
0x2292   :  { %v2334_v16 = vsel %vm2333_vm11, %v5599_v23, %v2237_v20  ;;  %v2335_v40 = vsel %vm2333_vm11, %v5780_v43, %v2238_v12  ;;  %v5919_v43 = vld [vmem:[%s6369_s16] sm:$0xff] }
0x2293   :  { %v2431_v41 = vsel %vm2430_vm12, %v5699_v51, %v2334_v16  ;;  %v5884_v25 = vsel %vm2430_vm12, %v5811_v19, %v2335_v40  ;;  %v5898_v51 = vld [vmem:[%s6369_s16 + $0x18] sm:$0xff] }
0x2294   :  { %v2528_v18 = vsel %vm2527_vm13, %v5805_v48, %v2431_v41  ;;  %2647 = vmatpush.msra.mxu0 %v5898_v51 }
0x2295   :  { %4307 = vmatmul.msk.f32.vlgmr.msra.gmra.mxu1 %vm219_vm8, %v2528_v18 }
0x2296   :  { %2876 = vmatpush.msra.mxu1 %v5898_v51  ;;  %2648 = vmatpush.msra.mxu0 %v5904_v24 }
0x2298   :  { %v2628_v44 = vpop.permute.xlu2 %2627  ;;  %2877 = vmatpush.msra.mxu1 %v5904_v24 }
0x2299   :  { %vm2629_vm14 = vcmp.eq.s32.totalorder %v5164_v11, %v2628_v44 }
0x229a   :  { %v4309_v23 = vsel %vm2629_vm14, 1.0, %v4952_v9 }
0x229b   :  { %4311 = vmatmul.msk.f32.vlgmr.msra.gmra.mxu2 %vm243_vm0, %v4309_v23 }
0x229d   :  { %4312 = vmatmul.msk.f32.vlgmr.msrb.gmra.mxu1 %vm219_vm8, %v5675_v35  ;;  %v5912_v35 = vld [vmem:[%s6369_s16 + $0x8] sm:$0xff] }
0x229e   :  { %2649 = vmatpush.msra.mxu0 %v5912_v35  ;;  %2878 = vmatpush.msra.mxu1 %v5912_v35 }
0x22a0   :  { %2650 = vmatpush.msra.mxu0 %v5919_v43  ;;  %2879 = vmatpush.msra.mxu1 %v5919_v43 }
0x22fe   :  { %v2458_v4 = vpop.f32.mrf.mxu0 }
0x22ff   :  { %v2482_v5 = vadd.f32 %v2481_v3, %v2458_v4 }
0x2301   :  { %v2484_v56 = vadd.f32 %v5710_v2, %v2482_v5 }
0x2303   :  { %4594 = vtanh.f32 %v2484_v56  ;;  %v4306_v13 = vmul.f32 -1.442695, %v2484_v56 }
0x2305   :  { %4596 = vpow2.f32 %v4306_v13 }
0x2309   :  { %v4595_v30 = vpop.eup %4594 }
0x230a   :  { %2507 = vrot.lane.b32.xlu0 %v4595_v30, %s4953_s26 }
0x230b   :  { %v4597_v21 = vpop.eup %4596 }
0x230c   :  { %v2488_v47 = vadd.f32 1.0, %v4597_v21 }
0x230e   :  { %4598 = vrcp.f32 %v2488_v47  ;;  %v2500_v19 = vand.u32 2147483648, %v2488_v47  ;;  %vm2494_vm1 = vweird.f32 %v2488_v47  ;;  %v2498_v54 = vand.u32 2147483647, %v2488_v47 }
0x2310   :  { %v2501_v55 = vor.u32 1.1754944e-38, %v2500_v19  ;;  %vm2499_vm3 = vcmp.eq.f32.partialorder %v2498_v54, 8.507059e+37  ;;  %v5979_v19 = vld [vmem:[#allocation11 + $0x8] sm:$0xff]  ;;  %v5983_v54 = vld [vmem:[#allocation11] sm:$0xff] }
0x2312   :  { %v2558_v36 = vpop.f32.mrf.mxu1 }
0x2313   :  { %v2559_v38 = vadd.f32 %v5928_v15, %v2558_v36 }
0x2314   :  { %v4599_v2 = vpop.eup %4598 }
0x2315   :  { %4310 = vmatmul.msk.f32.vlgmr.msra.gmra.mxu0 %vm219_vm8, %v2559_v38  ;;  %v2490_v48 = vmul.f32 %v4599_v2, %v2488_v47  ;;  %vm2495_vm15 = vweird.f32 %v4599_v2 }
0x2316   :  { %vm2496_vm2 = vmor %vm2494_vm1, %vm2495_vm15 }
0x2317   :  { %v2491_v22 = vsub.f32 1.0, %v2490_v48  ;;  %v5955_v48 = vld [vmem:[#allocation9 + $0x10] sm:$0xff] }
0x2319   :  { %v2492_v59 = vmul.f32 %v4599_v2, %v2491_v22 }
0x231a   :  { %v2697_v61 = vpop.f32.mrf.mxu1 }
0x231b   :  { %v2493_v10 = vadd.f32 %v4599_v2, %v2492_v59  ;;  %v5974_v59 = vld [vmem:[#allocation11 + $0x18] sm:$0xff] }
0x231c   :  { %2754 = vmatpush.msrb.mxu3 %v5974_v59 }
0x231d   :  { %v2497_v32 = vsel %vm2496_vm2, %v4599_v2, %v2493_v10  ;;  %v5953_v2 = vld [vmem:[#allocation9 + $0x18] sm:$0xff]  ;;  %v5976_v10 = vld [vmem:[#allocation11 + $0x10] sm:$0xff] }
0x231e   :  { %v2502_v33 = vsel %vm2499_vm3, %v2501_v55, %v2497_v32  ;;  %v2675_v7 = vpop.f32.mrf.mxu2  ;;  %2779 = vmatpush.msrb.mxu0 %v5953_v2  ;;  %3003 = vmatpush.msrb.mxu1 %v5953_v2 }
0x231f   :  { %v2505_v29 = vmul.f32 %v2502_v33, %v5799_v31  ;;  %2755 = vmatpush.msrb.mxu3 %v5976_v10 }
0x2320   :  { %2780 = vmatpush.msrb.mxu0 %v5955_v48  ;;  %3004 = vmatpush.msrb.mxu1 %v5955_v48 }
0x2321   :  { %2756 = vmatpush.msrb.mxu3 %v5979_v19 }
0x2323   :  { %2757 = vmatpush.msrb.mxu3 %v5983_v54 }
0x237c   :  { %v2508_v58 = vpop.permute.xlu0 %2507 }
0x237d   :  { %v2510_v34 = vmul.f32 %v2508_v58, %v2502_v33 }
0x237f   :  { %2512 = vrot.lane.b32.xlu1 %v2510_v34, %s4954_s28  ;;  %v6008_v34 = vld [vmem:[#allocation12] ss:$0 sm:$0xff] }
0x2392   :  { %v2652_v60 = vpop.f32.mrf.mxu0 }
0x2393   :  { %v2676_v0 = vadd.f32 %v2675_v7, %v2652_v60 }
0x2395   :  { %v2700_v57 = vadd.f32 %v2697_v61, %v2676_v0 }
0x2397   :  { %v2701_v37 = vadd.f32 %v5933_v14, %v2700_v57 }
0x2399   :  { %4600 = vtanh.f32 %v2701_v37  ;;  %v4313_v28 = vmul.f32 -1.442695, %v2701_v37 }
0x239b   :  { %4602 = vpow2.f32 %v4313_v28 }
0x239f   :  { %v4601_v52 = vpop.eup %4600 }
0x23a0   :  { %2724 = vrot.lane.b32.xlu1 %v4601_v52, %s4953_s26 }
0x23a1   :  { %v4603_v1 = vpop.eup %4602 }
0x23a2   :  { %v2705_v63 = vadd.f32 1.0, %v4603_v1 }
0x23a4   :  { %v2717_v41 = vand.u32 2147483648, %v2705_v63  ;;  %vm2711_vm5 = vweird.f32 %v2705_v63  ;;  %v2715_v18 = vand.u32 2147483647, %v2705_v63 }
0x23a6   :  { %v2718_v31 = vor.u32 1.1754944e-38, %v2717_v41  ;;  %vm2716_vm7 = vcmp.eq.f32.partialorder %v2715_v18, 8.507059e+37 }
0x23a8   :  { %2859 = vperm.xlu1 %4401, %v4319_v26  }
0x23f1   :  { %v2513_v6 = vpop.permute.xlu1 %2512 }
0x23f2   :  { %v2515_v12 = vadd.f32 %v2513_v6, %v2505_v29 }
0x23f4   :  { %4604 = vtanh.f32 %v2515_v12 }
0x23f5   :  { %4606 = vrcp.f32 %v2705_v63 }
0x23fa   :  { %v4605_v53 = vpop.eup %4604 }
0x23fb   :  { %2518 = vrot.lane.b32.xlu2 %v4605_v53, %s4953_s26  ;;  %v4607_v8 = vpop.eup %4606 }
0x23fc   :  { %v2707_v39 = vmul.f32 %v4607_v8, %v2705_v63  ;;  %vm2712_vm4 = vweird.f32 %v4607_v8 }
0x23fd   :  { %vm2713_vm6 = vmor %vm2711_vm5, %vm2712_vm4 }
0x23fe   :  { %v2708_v20 = vsub.f32 1.0, %v2707_v39 }
0x2400   :  { %v2709_v16 = vmul.f32 %v4607_v8, %v2708_v20 }
0x2402   :  { %v2710_v40 = vadd.f32 %v4607_v8, %v2709_v16 }
0x2404   :  { %v2714_v44 = vsel %vm2713_vm6, %v4607_v8, %v2710_v40 }
0x2405   :  { %v2719_v23 = vsel %vm2716_vm7, %v2718_v31, %v2714_v44 }
0x2406   :  { %v2722_v36 = vmul.f32 %v2719_v23, %v5626_v50  ;;  %v5959_v50 = vld [vmem:[#allocation9 + $0x8] sm:$0xff] }
0x2407   :  { %2781 = vmatpush.msrb.mxu0 %v5959_v50  ;;  %3005 = vmatpush.msrb.mxu1 %v5959_v50 }
0x2409   :  { %2782 = vmatpush.msrb.mxu0 %v5963_v17  ;;  %3006 = vmatpush.msrb.mxu1 %v5963_v17 }
0x240b   :  { %2919 = vmatpush.msra.mxu0 %v5839_v46 }
0x240d   :  { %2920 = vmatpush.msra.mxu0 %v5846_v42 }
0x240f   :  { %2921 = vmatpush.msra.mxu0 %v5856_v62 }
0x2411   :  { %2922 = vmatpush.msra.mxu0 %v5863_v27 }
0x2412   :  { %v2725_v3 = vpop.permute.xlu1 %2724 }
0x2413   :  { %v2727_v4 = vmul.f32 %v2725_v3, %v2719_v23 }
0x2415   :  { %2729 = vrot.lane.b32.xlu2 %v2727_v4, %s4954_s28 }
0x241a   :  { %v2860_v58 = vpop.permute.xlu1 %2859 }
0x241b   :  { %vm2861_vm9 = vcmp.eq.s32.totalorder %v5164_v11, %v2860_v58 }
0x2455   :  { %v2519_v5 = vpop.permute.xlu2 %2518 }
0x2456   :  { %v2521_v56 = vmul.f32 %v2519_v5, %v2502_v33 }
0x2458   :  { %v2529_v30 = vsel %vm2527_vm13, %v2521_v56, %v5884_v25 }
0x2459   :  { %2562 = vrot.lane.b32.xlu0 %v2529_v30, %s4954_s28 }
0x246f   :  { %v2730_v38 = vpop.permute.xlu2 %2729 }
0x2470   :  { %v5948_v13 = vadd.f32 %v2730_v38, %v2722_v36 }
0x2472   :  { %4608 = vtanh.f32 %v5948_v13 }
0x2478   :  { %v4609_v21 = vpop.eup %4608 }
0x2479   :  { %2735 = vrot.lane.b32.xlu0 %v4609_v21, %s4953_s26 }
0x24cb   :  { %v2563_v47 = vpop.permute.xlu0 %2562 }
0x24cc   :  { %4308 = vmatmul.msk.f32.vlgmr.msra.gmra.mxu3 %vm219_vm8, %v2563_v47 }
0x24cd   :  { %2901 = vmatpush.msra.mxu3 %v5841_v49 }
0x24cf   :  { %2902 = vmatpush.msra.mxu3 %v5851_v45 }
0x24eb   :  { %v2736_v25 = vpop.permute.xlu0 %2735 }
0x24ec   :  { %v2738_v22 = vmul.f32 %v2736_v25, %v2719_v23 }
0x24ee   :  { %2763 = vrot.lane.b32.xlu2 %v2738_v22, %s4954_s28 }
0x2548   :  { %v2764_v32 = vpop.permute.xlu2 %2763 }
0x2549   :  { %4315 = vmatmul.msk.f32.vlgmr.msrb.gmra.mxu0 %vm219_vm8, %v2764_v32  ;;  %4321 = vmatmul.msk.f32.vlgmr.msra.gmra.mxu1 %vm219_vm8, %v2764_v32 }
0x254a   :  { %3100 = vmatpush.msrb.mxu0 %v5898_v51  ;;  %3143 = vmatpush.msra.mxu1 %v5839_v46 }
0x254c   :  { %3101 = vmatpush.msrb.mxu0 %v5904_v24  ;;  %3144 = vmatpush.msra.mxu1 %v5846_v42 }
0x254e   :  { %3102 = vmatpush.msrb.mxu0 %v5912_v35  ;;  %3145 = vmatpush.msra.mxu1 %v5856_v62 }
0x254f   :  { %v2583_v55 = vpop.f32.mrf.mxu3 }
0x2550   :  { %v2584_v33 = vadd.f32 %v5928_v15, %v2583_v55  ;;  %3103 = vmatpush.msrb.mxu0 %v5919_v43  ;;  %3146 = vmatpush.msra.mxu1 %v5863_v27  ;;  %v4320_v15 = vsel %vm2861_vm9, 1.0, %v4952_v9 }
0x2551   :  { %4323 = vmatmul.msk.f32.vlgmr.msra.gmra.mxu0 %vm219_vm8, %v2764_v32 }
0x2552   :  { %4314 = vmatmul.msk.f32.vlgmr.msrb.gmra.mxu3 %vm219_vm8, %v2584_v33  ;;  %3227 = vmatpush.msra.mxu0 %v5953_v2 }
0x2554   :  { %3228 = vmatpush.msra.mxu0 %v5955_v48 }
0x2556   :  { %3229 = vmatpush.msra.mxu0 %v5959_v50 }
0x2558   :  { %3230 = vmatpush.msra.mxu0 %v5963_v17 }
0x255a   :  { %4322 = vmatmul.msk.f32.vlgmr.msra.gmra.mxu3 %vm243_vm0, %v4320_v15 }
0x25c6   :  { %v2784_v7 = vpop.f32.mrf.mxu0  ;;  %v2881_v57 = vpop.f32.mrf.mxu1 }
0x25ce   :  { %v2924_v26 = vpop.f32.mrf.mxu0 }
0x25d5   :  { %v2759_v60 = vpop.f32.mrf.mxu3 }
0x25d6   :  { %v2785_v0 = vadd.f32 %v2784_v7, %v2759_v60 }
0x25d8   :  { %v2787_v61 = vadd.f32 %v6008_v34, %v2785_v0  ;;  %v4330_v0 = vld [vmem:[%s6401_s21 + $0x10] sm:$0xff] }
0x25da   :  { %4610 = vtanh.f32 %v2787_v61  ;;  %v4316_v63 = vmul.f32 -1.442695, %v2787_v61 }
0x25dd   :  { %v2904_v37 = vpop.f32.mrf.mxu3 }
0x25de   :  { %v2905_v52 = vadd.f32 %v2904_v37, %v2881_v57  ;;  %v6020_v57 = vld [vmem:[#allocation14 + $0x18] sm:$0xff]  ;;  %v6022_v37 = vld [vmem:[#allocation14 + $0x10] sm:$0xff] }
0x25df   :  { %2836 = vmatpush.msrb.mxu2 %v6020_v57  ;;  %3060 = vmatpush.msrb.mxu3 %v6020_v57 }
0x25e0   :  { %v4611_v28 = vpop.eup %4610  ;;  %v2927_v1 = vadd.f32 %v2924_v26, %v2905_v52 }
0x25e1   :  { %2809 = vrot.lane.b32.xlu1 %v4611_v28, %s4953_s26  ;;  %v6028_v28 = vld [vmem:[#allocation14 + $0x8] sm:$0xff]  ;;  %2837 = vmatpush.msrb.mxu2 %v6022_v37 }
0x25e2   :  { %v2928_v29 = vadd.f32 %v5933_v14, %v2927_v1  ;;  %3061 = vmatpush.msrb.mxu3 %v6022_v37 }
0x25e3   :  { %2838 = vmatpush.msrb.mxu2 %v6028_v28 }
0x25e4   :  { %4612 = vtanh.f32 %v2928_v29  ;;  %v4324_v53 = vmul.f32 -1.442695, %v2928_v29  ;;  %3062 = vmatpush.msrb.mxu3 %v6028_v28 }
0x25e5   :  { %4614 = vpow2.f32 %v4316_v63 }
0x25e6   :  { %4616 = vpow2.f32 %v4324_v53 }
0x25ea   :  { %v4613_v6 = vpop.eup %4612 }
0x25eb   :  { %2951 = vrot.lane.b32.xlu0 %v4613_v6, %s4953_s26  ;;  %v4615_v12 = vpop.eup %4614 }
0x25ec   :  { %v2791_v8 = vadd.f32 1.0, %v4615_v12  ;;  %v4617_v39 = vpop.eup %4616 }
0x25ed   :  { %v2932_v16 = vadd.f32 1.0, %v4617_v39 }
0x25ee   :  { %4618 = vrcp.f32 %v2791_v8  ;;  %v2803_v3 = vand.u32 2147483648, %v2791_v8  ;;  %vm2797_vm11 = vweird.f32 %v2791_v8  ;;  %v2801_v4 = vand.u32 2147483647, %v2791_v8 }
0x25ef   :  { %4620 = vrcp.f32 %v2932_v16  ;;  %v2944_v22 = vand.u32 2147483648, %v2932_v16  ;;  %vm2938_vm15 = vweird.f32 %v2932_v16  ;;  %v2942_v32 = vand.u32 2147483647, %v2932_v16 }
0x25f0   :  { %v2804_v30 = vor.u32 1.1754944e-38, %v2803_v3  ;;  %vm2802_vm13 = vcmp.eq.f32.partialorder %v2801_v4, 8.507059e+37 }
0x25f1   :  { %v2945_v33 = vor.u32 1.1754944e-38, %v2944_v22  ;;  %vm2943_vm2 = vcmp.eq.f32.partialorder %v2942_v32, 8.507059e+37 }
0x25f4   :  { %v4619_v20 = vpop.eup %4618 }
0x25f5   :  { %v2793_v40 = vmul.f32 %v4619_v20, %v2791_v8  ;;  %v4621_v18 = vpop.eup %4620  ;;  %vm2798_vm10 = vweird.f32 %v4619_v20 }
0x25f6   :  { %v2934_v31 = vmul.f32 %v4621_v18, %v2932_v16  ;;  %vm2799_vm12 = vmor %vm2797_vm11, %vm2798_vm10  ;;  %vm2939_vm14 = vweird.f32 %v4621_v18 }
0x25f7   :  { %v2794_v41 = vsub.f32 1.0, %v2793_v40  ;;  %vm2940_vm1 = vmor %vm2938_vm15, %vm2939_vm14 }
0x25f8   :  { %v2935_v5 = vsub.f32 1.0, %v2934_v31 }
0x25f9   :  { %v2795_v44 = vmul.f32 %v4619_v20, %v2794_v41 }
0x25fa   :  { %v2936_v36 = vmul.f32 %v4621_v18, %v2935_v5 }
0x25fb   :  { %v2796_v23 = vadd.f32 %v4619_v20, %v2795_v44 }
0x25fc   :  { %v2937_v25 = vadd.f32 %v4621_v18, %v2936_v36 }
0x25fd   :  { %v2800_v56 = vsel %vm2799_vm12, %v4619_v20, %v2796_v23 }
0x25fe   :  { %v2805_v38 = vsel %vm2802_vm13, %v2804_v30, %v2800_v56  ;;  %v2941_v55 = vsel %vm2940_vm1, %v4621_v18, %v2937_v25 }
0x25ff   :  { %v2946_v7 = vsel %vm2943_vm2, %v2945_v33, %v2941_v55 }
0x2600   :  { %v2949_v61 = vmul.f32 %v2946_v7, %v5948_v13  ;;  %v6033_v13 = vld [vmem:[#allocation14] sm:$0xff] }
0x2601   :  { %2839 = vmatpush.msrb.mxu2 %v6033_v13  ;;  %3063 = vmatpush.msrb.mxu3 %v6033_v13 }
0x2603   :  { %2978 = vmatpush.msra.mxu2 %v5974_v59  ;;  %3202 = vmatpush.msra.mxu3 %v5974_v59 }
0x2605   :  { %2979 = vmatpush.msra.mxu2 %v5976_v10  ;;  %3203 = vmatpush.msra.mxu3 %v5976_v10 }
0x2607   :  { %2980 = vmatpush.msra.mxu2 %v5979_v19  ;;  %3204 = vmatpush.msra.mxu3 %v5979_v19 }
0x2609   :  { %2981 = vmatpush.msra.mxu2 %v5983_v54  ;;  %3205 = vmatpush.msra.mxu3 %v5983_v54 }
0x2653   :  { %v2810_v21 = vpop.permute.xlu1 %2809 }
0x2654   :  { %v2812_v47 = vmul.f32 %v2810_v21, %v2805_v38 }
0x2656   :  { %4622 = vtanh.f32 %v2812_v47 }
0x265c   :  { %v4623_v58 = vpop.eup %4622 }
0x265d   :  { %v2952_v15 = vpop.permute.xlu0 %2951  ;;  %2815 = vrot.lane.b32.xlu0 %v4623_v58, %s4955_s18 }
0x265e   :  { %v2954_v60 = vmul.f32 %v2952_v15, %v2946_v7 }
0x2660   :  { %2956 = vrot.lane.b32.xlu2 %v2954_v60, %s4954_s28 }
0x2665   :  { %3083 = vperm.xlu0 %4399, %v4330_v0  }
0x26ba   :  { %v2957_v52 = vpop.permute.xlu2 %2956 }
0x26bb   :  { %v6026_v26 = vadd.f32 %v2957_v52, %v2949_v61 }
0x26bd   :  { %4624 = vtanh.f32 %v6026_v26 }
0x26c3   :  { %v4625_v1 = vpop.eup %4624 }
0x26c4   :  { %2962 = vrot.lane.b32.xlu1 %v4625_v1, %s4953_s26 }
0x26cf   :  { %v2816_v29 = vpop.permute.xlu0 %2815 }
0x26d0   :  { %v2818_v6 = vmul.f32 %v2816_v29, %v2805_v38 }
0x26d2   :  { %2820 = vrot.lane.b32.xlu2 %v2818_v6, %s4954_s28 }
0x26d7   :  { %v3084_v12 = vpop.permute.xlu0 %3083 }
0x26d8   :  { %vm3085_vm3 = vcmp.eq.s32.totalorder %v5164_v11, %v3084_v12 }
0x26d9   :  { %v4331_v39 = vsel %vm3085_vm3, 1.0, %v4952_v9 }
0x272c   :  { %v2821_v63 = vpop.permute.xlu2 %2820 }
0x272d   :  { %4317 = vmatmul.msk.f32.vlgmr.msrb.gmra.mxu2 %vm219_vm8, %v2821_v63 }
0x272e   :  { %3125 = vmatpush.msrb.mxu2 %v5841_v49 }
0x2730   :  { %3126 = vmatpush.msrb.mxu2 %v5851_v45 }
0x2735   :  { %4325 = vmatmul.msk.f32.vlgmr.msra.gmra.mxu2 %vm219_vm8, %v2821_v63 }
0x2736   :  { %v2963_v53 = vpop.permute.xlu1 %2962  ;;  %3284 = vmatpush.msra.mxu2 %v6020_v57 }
0x2737   :  { %v2965_v8 = vmul.f32 %v2963_v53, %v2946_v7 }
0x2738   :  { %3285 = vmatpush.msra.mxu2 %v6022_v37 }
0x2739   :  { %2987 = vrot.lane.b32.xlu1 %v2965_v8, %s4954_s28 }
0x273a   :  { %3286 = vmatpush.msra.mxu2 %v6028_v28 }
0x273c   :  { %3287 = vmatpush.msra.mxu2 %v6033_v13 }
0x273d   :  { %4333 = vmatmul.msk.f32.vlgmr.msrb.gmra.mxu2 %vm243_vm0, %v4331_v39 }
0x273e   :  { %3426 = vmatpush.msrb.mxu2 %v5974_v59 }
0x2740   :  { %3427 = vmatpush.msrb.mxu2 %v5976_v10 }
0x2742   :  { %3428 = vmatpush.msrb.mxu2 %v5979_v19 }
0x2744   :  { %3429 = vmatpush.msrb.mxu2 %v5983_v54 }
0x27ab   :  { %v2988_v20 = vpop.permute.xlu1 %2987 }
0x27ac   :  { %4326 = vmatmul.msk.f32.vlgmr.msrb.gmra.mxu1 %vm219_vm8, %v2988_v20  ;;  %4332 = vmatmul.msk.f32.vlgmr.msrb.gmra.mxu0 %vm219_vm8, %v2988_v20 }
0x27ad   :  { %3324 = vmatpush.msrb.mxu1 %v5898_v51  ;;  %3367 = vmatpush.msrb.mxu0 %v5839_v46 }
0x27af   :  { %3325 = vmatpush.msrb.mxu1 %v5904_v24  ;;  %3368 = vmatpush.msrb.mxu0 %v5846_v42 }
0x27b0   :  { %v6080_v16 = vpop.f32.mrf.mxu2 }
0x27b1   :  { %3326 = vmatpush.msrb.mxu1 %v5912_v35  ;;  %3369 = vmatpush.msrb.mxu0 %v5856_v62 }
0x27b3   :  { %3327 = vmatpush.msrb.mxu1 %v5919_v43  ;;  %3370 = vmatpush.msrb.mxu0 %v5863_v27 }
0x27b4   :  { %4334 = vmatmul.msk.f32.vlgmr.msra.gmra.mxu1 %vm219_vm8, %v2988_v20 }
0x27b5   :  { %3451 = vmatpush.msra.mxu1 %v5953_v2 }
0x27b7   :  { %3452 = vmatpush.msra.mxu1 %v5955_v48 }
0x27b8   :  { %v2983_v40 = vpop.f32.mrf.mxu2 }
0x27b9   :  { %3453 = vmatpush.msra.mxu1 %v5959_v50 }
0x27bb   :  { %3454 = vmatpush.msra.mxu1 %v5963_v17 }
0x27c0   :  { %v3128_v23 = vpop.f32.mrf.mxu2 }
0x2829   :  { %v3008_v41 = vpop.f32.mrf.mxu1  ;;  %v3105_v31 = vpop.f32.mrf.mxu0 }
0x282a   :  { %v3009_v18 = vadd.f32 %v3008_v41, %v2983_v40  ;;  %v3129_v3 = vadd.f32 %v3128_v23, %v3105_v31 }
0x282c   :  { %v3011_v44 = vadd.f32 %v6008_v34, %v3009_v18 }
0x282e   :  { %4626 = vtanh.f32 %v3011_v44  ;;  %v4327_v25 = vmul.f32 -1.442695, %v3011_v44 }
0x2831   :  { %v3148_v4 = vpop.f32.mrf.mxu1 }
0x2832   :  { %v3151_v5 = vadd.f32 %v3148_v4, %v3129_v3  ;;  %v4341_v4 = vld [vmem:[%s6401_s21 + $0x18] sm:$0xff] }
0x2834   :  { %v4627_v56 = vpop.eup %4626  ;;  %v3152_v30 = vadd.f32 %v5933_v14, %v3151_v5 }
0x2835   :  { %3033 = vrot.lane.b32.xlu0 %v4627_v56, %s4953_s26 }
0x2836   :  { %4628 = vtanh.f32 %v3152_v30  ;;  %v4335_v38 = vmul.f32 -1.442695, %v3152_v30 }
0x2838   :  { %4630 = vpow2.f32 %v4335_v38 }
0x283c   :  { %v4629_v36 = vpop.eup %4628 }
0x283d   :  { %3175 = vrot.lane.b32.xlu2 %v4629_v36, %s4953_s26 }
0x283e   :  { %v4631_v21 = vpop.eup %4630 }
0x283f   :  { %v3156_v47 = vadd.f32 1.0, %v4631_v21 }
0x2841   :  { %4632 = vrcp.f32 %v3156_v47  ;;  %v3168_v0 = vand.u32 2147483648, %v3156_v47  ;;  %vm3162_vm5 = vweird.f32 %v3156_v47  ;;  %v3166_v61 = vand.u32 2147483647, %v3156_v47 }
0x2842   :  { %4634 = vpow2.f32 %v4327_v25 }
0x2843   :  { %v3169_v29 = vor.u32 1.1754944e-38, %v3168_v0  ;;  %vm3167_vm7 = vcmp.eq.f32.partialorder %v3166_v61, 8.507059e+37 }
0x2847   :  { %v4633_v22 = vpop.eup %4632 }
0x2848   :  { %v4635_v32 = vpop.eup %4634  ;;  %v3158_v55 = vmul.f32 %v4633_v22, %v3156_v47  ;;  %vm3163_vm4 = vweird.f32 %v4633_v22 }
0x2849   :  { %v3015_v33 = vadd.f32 1.0, %v4635_v32  ;;  %vm3164_vm6 = vmor %vm3162_vm5, %vm3163_vm4 }
0x284a   :  { %v3159_v58 = vsub.f32 1.0, %v3158_v55 }
0x284b   :  { %4636 = vrcp.f32 %v3015_v33  ;;  %v3027_v20 = vand.u32 2147483648, %v3015_v33  ;;  %vm3021_vm10 = vweird.f32 %v3015_v33  ;;  %v3025_v40 = vand.u32 2147483647, %v3015_v33 }
0x284c   :  { %v3160_v15 = vmul.f32 %v4633_v22, %v3159_v58 }
0x284d   :  { %v3028_v18 = vor.u32 1.1754944e-38, %v3027_v20  ;;  %vm3026_vm12 = vcmp.eq.f32.partialorder %v3025_v40, 8.507059e+37 }
0x284e   :  { %v3161_v7 = vadd.f32 %v4633_v22, %v3160_v15 }
0x2850   :  { %v3165_v52 = vsel %vm3164_vm6, %v4633_v22, %v3161_v7 }
0x2851   :  { %v4637_v60 = vpop.eup %4636  ;;  %v3170_v63 = vsel %vm3167_vm7, %v3169_v29, %v3165_v52 }
0x2852   :  { %v3017_v1 = vmul.f32 %v4637_v60, %v3015_v33  ;;  %vm3022_vm9 = vweird.f32 %v4637_v60  ;;  %v3173_v56 = vmul.f32 %v3170_v63, %v6026_v26 }
0x2853   :  { %vm3023_vm11 = vmor %vm3021_vm10, %vm3022_vm9 }
0x2854   :  { %v3018_v53 = vsub.f32 1.0, %v3017_v1 }
0x2856   :  { %v3019_v8 = vmul.f32 %v4637_v60, %v3018_v53 }
0x2858   :  { %v3020_v39 = vadd.f32 %v4637_v60, %v3019_v8 }
0x285a   :  { %v3024_v41 = vsel %vm3023_vm11, %v4637_v60, %v3020_v39 }
0x285b   :  { %v3029_v31 = vsel %vm3026_vm12, %v3028_v18, %v3024_v41 }
0x2897   :  { %v3176_v6 = vpop.permute.xlu2 %3175 }
0x2898   :  { %v3178_v12 = vmul.f32 %v3176_v6, %v3170_v63 }
0x289a   :  { %3180 = vrot.lane.b32.xlu1 %v3178_v12, %s4954_s28 }
0x28a7   :  { %v3034_v44 = vpop.permute.xlu0 %3033 }
0x28a8   :  { %v3036_v23 = vmul.f32 %v3034_v44, %v3029_v31 }
0x28aa   :  { %4638 = vtanh.f32 %v3036_v23 }
0x28b0   :  { %v4639_v3 = vpop.eup %4638 }
0x28b1   :  { %3039 = vrot.lane.b32.xlu2 %v4639_v3, %s4955_s18 }
0x28b9   :  { %3307 = vperm.xlu2 %4400, %v4341_v4  }
0x290b   :  { %v3040_v5 = vpop.permute.xlu2 %3039 }
0x290c   :  { %v3042_v30 = vmul.f32 %v3040_v5, %v3029_v31  ;;  %v3181_v36 = vpop.permute.xlu1 %3180 }
0x290d   :  { %v6092_v38 = vadd.f32 %v3181_v36, %v3173_v56 }
0x290e   :  { %3044 = vrot.lane.b32.xlu1 %v3042_v30, %s4954_s28 }
0x290f   :  { %4640 = vtanh.f32 %v6092_v38 }
0x2913   :  { %v3308_v22 = vpop.permute.xlu2 %3307 }
0x2914   :  { %vm3309_vm13 = vcmp.eq.s32.totalorder %v5164_v11, %v3308_v22 }
0x2915   :  { %v4641_v21 = vpop.eup %4640  ;;  %v4342_v32 = vsel %vm3309_vm13, 1.0, %v4952_v9 }
0x2916   :  { %3186 = vrot.lane.b32.xlu0 %v4641_v21, %s4953_s26 }
0x2980   :  { %v3045_v47 = vpop.permute.xlu1 %3044 }
0x2981   :  { %4328 = vmatmul.msk.f32.vlgmr.msrb.gmra.mxu3 %vm219_vm8, %v3045_v47 }
0x2982   :  { %3349 = vmatpush.msrb.mxu3 %v5841_v49 }
0x2984   :  { %3350 = vmatpush.msrb.mxu3 %v5851_v45 }
0x2988   :  { %v3187_v25 = vpop.permute.xlu0 %3186 }
0x2989   :  { %v3189_v26 = vmul.f32 %v3187_v25, %v3170_v63  ;;  %4336 = vmatmul.msk.f32.vlgmr.msra.gmra.mxu3 %vm219_vm8, %v3045_v47  ;;  %v4352_v47 = vld [vmem:[%s6401_s21 + $0x20] sm:$0xff] }
0x298a   :  { %3508 = vmatpush.msra.mxu3 %v6020_v57 }
0x298b   :  { %3211 = vrot.lane.b32.xlu0 %v3189_v26, %s4954_s28 }
0x298c   :  { %3509 = vmatpush.msra.mxu3 %v6022_v37 }
0x298e   :  { %3510 = vmatpush.msra.mxu3 %v6028_v28 }
0x2990   :  { %3511 = vmatpush.msra.mxu3 %v6033_v13 }
0x2991   :  { %4344 = vmatmul.msk.f32.vlgmr.msrb.gmra.mxu3 %vm243_vm0, %v4342_v32 }
0x2992   :  { %3650 = vmatpush.msrb.mxu3 %v5974_v59 }
0x2994   :  { %3651 = vmatpush.msrb.mxu3 %v5976_v10 }
0x2996   :  { %3652 = vmatpush.msrb.mxu3 %v5979_v19 }
0x2998   :  { %3653 = vmatpush.msrb.mxu3 %v5983_v54 }
0x29fd   :  { %v3212_v55 = vpop.permute.xlu0 %3211 }
0x29fe   :  { %4337 = vmatmul.msk.f32.vlgmr.msra.gmra.mxu0 %vm219_vm8, %v3212_v55  ;;  %4343 = vmatmul.msk.f32.vlgmr.msrb.gmra.mxu1 %vm219_vm8, %v3212_v55 }
0x29ff   :  { %3548 = vmatpush.msra.mxu0 %v5898_v51  ;;  %3591 = vmatpush.msrb.mxu1 %v5839_v46 }
0x2a01   :  { %3549 = vmatpush.msra.mxu0 %v5904_v24  ;;  %3592 = vmatpush.msrb.mxu1 %v5846_v42 }
0x2a03   :  { %3550 = vmatpush.msra.mxu0 %v5912_v35  ;;  %3593 = vmatpush.msrb.mxu1 %v5856_v62 }
0x2a04   :  { %v6128_v46 = vpop.f32.mrf.mxu3 }
0x2a05   :  { %3551 = vmatpush.msra.mxu0 %v5919_v43  ;;  %3594 = vmatpush.msrb.mxu1 %v5863_v27 }
0x2a06   :  { %4345 = vmatmul.msk.f32.vlgmr.msrb.gmra.mxu0 %vm219_vm8, %v3212_v55 }
0x2a07   :  { %3675 = vmatpush.msrb.mxu0 %v5953_v2 }
0x2a09   :  { %3676 = vmatpush.msrb.mxu0 %v5955_v48 }
0x2a0b   :  { %3677 = vmatpush.msrb.mxu0 %v5959_v50 }
0x2a0c   :  { %v3207_v42 = vpop.f32.mrf.mxu3 }
0x2a0d   :  { %3678 = vmatpush.msrb.mxu0 %v5963_v17 }
0x2a14   :  { %v3352_v27 = vpop.f32.mrf.mxu3 }
0x2a7b   :  { %v3232_v33 = vpop.f32.mrf.mxu0  ;;  %v3329_v15 = vpop.f32.mrf.mxu1 }
0x2a7c   :  { %v3233_v58 = vadd.f32 %v3232_v33, %v3207_v42  ;;  %v3353_v7 = vadd.f32 %v3352_v27, %v3329_v15 }
0x2a7e   :  { %v3235_v62 = vadd.f32 %v6008_v34, %v3233_v58 }
0x2a80   :  { %4642 = vtanh.f32 %v3235_v62  ;;  %v4338_v29 = vmul.f32 -1.442695, %v3235_v62 }
0x2a83   :  { %v3372_v60 = vpop.f32.mrf.mxu0 }
0x2a84   :  { %v3375_v0 = vadd.f32 %v3372_v60, %v3353_v7 }
0x2a86   :  { %v4643_v61 = vpop.eup %4642  ;;  %v3376_v52 = vadd.f32 %v5933_v14, %v3375_v0 }
0x2a87   :  { %3257 = vrot.lane.b32.xlu2 %v4643_v61, %s4953_s26 }
0x2a88   :  { %4644 = vtanh.f32 %v3376_v52  ;;  %v4346_v39 = vmul.f32 -1.442695, %v3376_v52 }
0x2a89   :  { %4646 = vpow2.f32 %v4338_v29 }
0x2a8e   :  { %v4645_v1 = vpop.eup %4644 }
0x2a8f   :  { %3399 = vrot.lane.b32.xlu1 %v4645_v1, %s4953_s26  ;;  %v4647_v6 = vpop.eup %4646 }
0x2a90   :  { %v3239_v63 = vadd.f32 1.0, %v4647_v6 }
0x2a92   :  { %4648 = vrcp.f32 %v3239_v63  ;;  %v3251_v41 = vand.u32 2147483648, %v3239_v63  ;;  %vm3245_vm15 = vweird.f32 %v3239_v63  ;;  %v3249_v18 = vand.u32 2147483647, %v3239_v63 }
0x2a93   :  { %4650 = vpow2.f32 %v4346_v39 }
0x2a94   :  { %v3252_v23 = vor.u32 1.1754944e-38, %v3251_v41  ;;  %vm3250_vm2 = vcmp.eq.f32.partialorder %v3249_v18, 8.507059e+37 }
0x2a98   :  { %v4649_v12 = vpop.eup %4648 }
0x2a99   :  { %v3241_v53 = vmul.f32 %v4649_v12, %v3239_v63  ;;  %vm3246_vm14 = vweird.f32 %v4649_v12  ;;  %v4651_v44 = vpop.eup %4650 }
0x2a9a   :  { %vm3247_vm1 = vmor %vm3245_vm15, %vm3246_vm14  ;;  %v3380_v3 = vadd.f32 1.0, %v4651_v44 }
0x2a9b   :  { %v3242_v8 = vsub.f32 1.0, %v3241_v53 }
0x2a9c   :  { %v3392_v32 = vand.u32 2147483648, %v3380_v3  ;;  %vm3386_vm4 = vweird.f32 %v3380_v3  ;;  %v3390_v55 = vand.u32 2147483647, %v3380_v3 }
0x2a9d   :  { %v3243_v20 = vmul.f32 %v4649_v12, %v3242_v8 }
0x2a9e   :  { %v3393_v33 = vor.u32 1.1754944e-38, %v3392_v32  ;;  %vm3391_vm6 = vcmp.eq.f32.partialorder %v3390_v55, 8.507059e+37 }
0x2a9f   :  { %v3244_v40 = vadd.f32 %v4649_v12, %v3243_v20 }
0x2aa1   :  { %v3248_v31 = vsel %vm3247_vm1, %v4649_v12, %v3244_v40  ;;  %v6174_v12 = vld [vmem:[%s6370_s17 + $0x10] sm:$0xff] }
0x2aa2   :  { %v3253_v4 = vsel %vm3250_vm2, %v3252_v23, %v3248_v31 }
0x2ae1   :  { %v3258_v5 = vpop.permute.xlu2 %3257 }
0x2ae2   :  { %v3260_v56 = vmul.f32 %v3258_v5, %v3253_v4 }
0x2ae4   :  { %4652 = vtanh.f32 %v3260_v56 }
0x2ae5   :  { %4654 = vrcp.f32 %v3380_v3 }
0x2aea   :  { %v4653_v30 = vpop.eup %4652 }
0x2aeb   :  { %v4655_v36 = vpop.eup %4654  ;;  %3263 = vrot.lane.b32.xlu1 %v4653_v30, %s4955_s18 }
0x2aec   :  { %v3382_v21 = vmul.f32 %v4655_v36, %v3380_v3  ;;  %vm3387_vm3 = vweird.f32 %v4655_v36 }
0x2aed   :  { %vm3388_vm5 = vmor %vm3386_vm4, %vm3387_vm3 }
0x2aee   :  { %v3383_v25 = vsub.f32 1.0, %v3382_v21 }
0x2af0   :  { %v3384_v26 = vmul.f32 %v4655_v36, %v3383_v25 }
0x2af2   :  { %v3385_v22 = vadd.f32 %v4655_v36, %v3384_v26 }
0x2af3   :  { %3531 = vperm.xlu1 %4401, %v4352_v47  }
0x2af4   :  { %v3389_v42 = vsel %vm3388_vm5, %v4655_v36, %v3385_v22 }
0x2af5   :  { %v3394_v62 = vsel %vm3391_vm6, %v3393_v33, %v3389_v42 }
0x2af6   :  { %v3397_v60 = vmul.f32 %v3394_v62, %v6092_v38 }
0x2b01   :  { %v3400_v58 = vpop.permute.xlu1 %3399 }
0x2b02   :  { %v3402_v15 = vmul.f32 %v3400_v58, %v3394_v62 }
0x2b04   :  { %3404 = vrot.lane.b32.xlu0 %v3402_v15, %s4954_s28 }
0x2b5d   :  { %v3264_v27 = vpop.permute.xlu1 %3263 }
0x2b5e   :  { %v3266_v7 = vmul.f32 %v3264_v27, %v3253_v4 }
0x2b60   :  { %3268 = vrot.lane.b32.xlu0 %v3266_v7, %s4954_s28 }
0x2b65   :  { %v3532_v38 = vpop.permute.xlu1 %3531 }
0x2b66   :  { %vm3533_vm7 = vcmp.eq.s32.totalorder %v5164_v11, %v3532_v38 }
0x2b67   :  { %v4353_v63 = vsel %vm3533_vm7, 1.0, %v4952_v9 }
0x2b76   :  { %v3405_v0 = vpop.permute.xlu0 %3404 }
0x2b77   :  { %v6141_v61 = vadd.f32 %v3405_v0, %v3397_v60 }
0x2b79   :  { %4656 = vtanh.f32 %v6141_v61 }
0x2b7f   :  { %v4657_v52 = vpop.eup %4656 }
0x2b80   :  { %3410 = vrot.lane.b32.xlu2 %v4657_v52, %s4953_s26 }
0x2bd2   :  { %v3269_v1 = vpop.permute.xlu0 %3268 }
0x2bd3   :  { %4339 = vmatmul.msk.f32.vlgmr.msra.gmra.mxu2 %vm219_vm8, %v3269_v1 }
0x2bd4   :  { %3573 = vmatpush.msra.mxu2 %v5841_v49 }
0x2bd6   :  { %3574 = vmatpush.msra.mxu2 %v5851_v45  ;;  %v6167_v45 = vld [vmem:[%s6370_s17 + $0x18] sm:$0xff] }
0x2bda   :  { %v3411_v29 = vpop.permute.xlu2 %3410 }
0x2bdb   :  { %v3413_v6 = vmul.f32 %v3411_v29, %v3394_v62  ;;  %4347 = vmatmul.msk.f32.vlgmr.msrb.gmra.mxu2 %vm219_vm8, %v3269_v1 }
0x2bdc   :  { %3732 = vmatpush.msrb.mxu2 %v6020_v57 }
0x2bdd   :  { %3435 = vrot.lane.b32.xlu2 %v3413_v6, %s4954_s28 }
0x2bde   :  { %3733 = vmatpush.msrb.mxu2 %v6022_v37 }
0x2be0   :  { %3734 = vmatpush.msrb.mxu2 %v6028_v28 }
0x2be2   :  { %3735 = vmatpush.msrb.mxu2 %v6033_v13 }
0x2be3   :  { %4355 = vmatmul.msk.f32.vlgmr.msra.gmra.mxu2 %vm243_vm0, %v4353_v63 }
0x2be4   :  { %3874 = vmatpush.msra.mxu2 %v5974_v59 }
0x2be6   :  { %3875 = vmatpush.msra.mxu2 %v5976_v10 }
0x2be8   :  { %3876 = vmatpush.msra.mxu2 %v5979_v19 }
0x2bea   :  { %3877 = vmatpush.msra.mxu2 %v5983_v54 }
0x2c37   :  { %v3436_v49 = vpop.permute.xlu2 %3435 }
0x2c38   :  { %4348 = vmatmul.msk.f32.vlgmr.msra.gmra.mxu1 %vm219_vm8, %v3436_v49  ;;  %4354 = vmatmul.msk.f32.vlgmr.msra.gmra.mxu0 %vm219_vm8, %v3436_v49 }
0x2c39   :  { %3772 = vmatpush.msra.mxu1 %v5898_v51  ;;  %3815 = vmatpush.msra.mxu0 %v6167_v45  ;;  %v6181_v51 = vld [vmem:[%s6370_s17 + $0x8] sm:$0xff] }
0x2c3b   :  { %3773 = vmatpush.msra.mxu1 %v5904_v24  ;;  %3816 = vmatpush.msra.mxu0 %v6174_v12  ;;  %v6188_v24 = vld [vmem:[%s6370_s17] sm:$0xff] }
0x2c3d   :  { %3774 = vmatpush.msra.mxu1 %v5912_v35  ;;  %3817 = vmatpush.msra.mxu0 %v6181_v51 }
0x2c3f   :  { %3775 = vmatpush.msra.mxu1 %v5919_v43  ;;  %3818 = vmatpush.msra.mxu0 %v6188_v24 }
0x2c40   :  { %4356 = vmatmul.msk.f32.vlgmr.msrb.gmra.mxu1 %vm219_vm8, %v3436_v49 }
0x2c41   :  { %3899 = vmatpush.msrb.mxu1 %v5953_v2 }
0x2c43   :  { %3900 = vmatpush.msrb.mxu1 %v5955_v48 }
0x2c45   :  { %3901 = vmatpush.msrb.mxu1 %v5959_v50 }
0x2c47   :  { %3902 = vmatpush.msrb.mxu1 %v5963_v17 }
0x2c56   :  { %v6196_v35 = vpop.f32.mrf.mxu2 }
0x2c5e   :  { %v3431_v43 = vpop.f32.mrf.mxu2 }
0x2c66   :  { %v3576_v40 = vpop.f32.mrf.mxu2 }
0x2cb5   :  { %v3456_v53 = vpop.f32.mrf.mxu1  ;;  %v3553_v20 = vpop.f32.mrf.mxu0 }
0x2cb6   :  { %v3457_v8 = vadd.f32 %v3456_v53, %v3431_v43  ;;  %v3577_v41 = vadd.f32 %v3576_v40, %v3553_v20 }
0x2cb8   :  { %v3459_v39 = vadd.f32 %v6008_v34, %v3457_v8  ;;  %v4363_v8 = vld [vmem:[%s6401_s21 + $0x28] sm:$0xff] }
0x2cba   :  { %4658 = vtanh.f32 %v3459_v39  ;;  %v4349_v4 = vmul.f32 -1.442695, %v3459_v39 }
0x2cbd   :  { %v3596_v18 = vpop.f32.mrf.mxu1 }
0x2cbe   :  { %v3599_v44 = vadd.f32 %v3596_v18, %v3577_v41 }
0x2cc0   :  { %v4659_v31 = vpop.eup %4658  ;;  %v3600_v23 = vadd.f32 %v5933_v14, %v3599_v44 }
0x2cc1   :  { %3481 = vrot.lane.b32.xlu1 %v4659_v31, %s4953_s26 }
0x2cc2   :  { %4660 = vtanh.f32 %v3600_v23  ;;  %v4357_v5 = vmul.f32 -1.442695, %v3600_v23  ;;  %v6214_v23 = vld [vmem:[#allocation6 + $0x8] sm:$0xff] }
0x2cc3   :  { %4662 = vpow2.f32 %v4349_v4 }
0x2cc4   :  { %4664 = vpow2.f32 %v4357_v5 }
0x2cc8   :  { %v4661_v3 = vpop.eup %4660 }
0x2cc9   :  { %3623 = vrot.lane.b32.xlu0 %v4661_v3, %s4953_s26  ;;  %v4663_v56 = vpop.eup %4662 }
0x2cca   :  { %v3463_v30 = vadd.f32 1.0, %v4663_v56  ;;  %v4665_v36 = vpop.eup %4664 }
0x2ccb   :  { %v3604_v21 = vadd.f32 1.0, %v4665_v36  ;;  %v4760_v36 = vld [vmem:[%s6369_s16 + $0x18] sm:$0xff] }
0x2ccc   :  { %4666 = vrcp.f32 %v3463_v30  ;;  %v3475_v33 = vand.u32 2147483648, %v3463_v30  ;;  %vm3469_vm10 = vweird.f32 %v3463_v30  ;;  %v3473_v58 = vand.u32 2147483647, %v3463_v30 }
0x2ccd   :  { %4668 = vrcp.f32 %v3604_v21  ;;  %v3616_v1 = vand.u32 2147483648, %v3604_v21  ;;  %vm3610_vm14 = vweird.f32 %v3604_v21  ;;  %v3614_v29 = vand.u32 2147483647, %v3604_v21 }
0x2cce   :  { %v3476_v27 = vor.u32 1.1754944e-38, %v3475_v33  ;;  %vm3474_vm12 = vcmp.eq.f32.partialorder %v3473_v58, 8.507059e+37 }
0x2ccf   :  { %v3617_v38 = vor.u32 1.1754944e-38, %v3616_v1  ;;  %vm3615_vm1 = vcmp.eq.f32.partialorder %v3614_v29, 8.507059e+37 }
0x2cd2   :  { %v4667_v47 = vpop.eup %4666 }
0x2cd3   :  { %v3465_v25 = vmul.f32 %v4667_v47, %v3463_v30  ;;  %v4669_v14 = vpop.eup %4668  ;;  %vm3470_vm9 = vweird.f32 %v4667_v47 }
0x2cd4   :  { %v3606_v32 = vmul.f32 %v4669_v14, %v3604_v21  ;;  %vm3471_vm11 = vmor %vm3469_vm10, %vm3470_vm9  ;;  %vm3611_vm13 = vweird.f32 %v4669_v14 }
0x2cd5   :  { %v3466_v26 = vsub.f32 1.0, %v3465_v25  ;;  %vm3612_vm15 = vmor %vm3610_vm14, %vm3611_vm13 }
0x2cd6   :  { %v3607_v42 = vsub.f32 1.0, %v3606_v32 }
0x2cd7   :  { %v3467_v22 = vmul.f32 %v4667_v47, %v3466_v26 }
0x2cd8   :  { %v3608_v15 = vmul.f32 %v4669_v14, %v3607_v42 }
0x2cd9   :  { %v3468_v55 = vadd.f32 %v4667_v47, %v3467_v22  ;;  %v6259_v22 = vld [vmem:[#allocation8] ss:$0 sm:$0xff] }
0x2cda   :  { %v3609_v52 = vadd.f32 %v4669_v14, %v3608_v15 }
0x2cdb   :  { %v3472_v62 = vsel %vm3471_vm11, %v4667_v47, %v3468_v55 }
0x2cdc   :  { %v3477_v60 = vsel %vm3474_vm12, %v3476_v27, %v3472_v62  ;;  %v3613_v6 = vsel %vm3612_vm15, %v4669_v14, %v3609_v52 }
0x2cdd   :  { %v3618_v49 = vsel %vm3615_vm1, %v3617_v38, %v3613_v6 }
0x2cde   :  { %v3621_v39 = vmul.f32 %v3618_v49, %v6141_v61  ;;  %v6217_v61 = vld [vmem:[#allocation6] sm:$0xff] }
0x2d33   :  { %v3482_v7 = vpop.permute.xlu1 %3481 }
0x2d34   :  { %v3484_v0 = vmul.f32 %v3482_v7, %v3477_v60 }
0x2d36   :  { %4670 = vtanh.f32 %v3484_v0 }
0x2d3b   :  { %v3624_v63 = vpop.permute.xlu0 %3623 }
0x2d3c   :  { %v4671_v43 = vpop.eup %4670  ;;  %v3626_v53 = vmul.f32 %v3624_v63, %v3618_v49 }
0x2d3d   :  { %3487 = vrot.lane.b32.xlu0 %v4671_v43, %s4955_s18 }
0x2d3e   :  { %3628 = vrot.lane.b32.xlu2 %v3626_v53, %s4954_s28 }
0x2d45   :  { %3755 = vperm.xlu0 %4399, %v4363_v8  }
0x2d98   :  { %v3629_v20 = vpop.permute.xlu2 %3628 }
0x2d99   :  { %v6208_v40 = vadd.f32 %v3629_v20, %v3621_v39 }
0x2d9b   :  { %4672 = vtanh.f32 %v6208_v40 }
0x2da1   :  { %v4673_v41 = vpop.eup %4672 }
0x2da2   :  { %3634 = vrot.lane.b32.xlu1 %v4673_v41, %s4953_s26 }
0x2daf   :  { %v3488_v18 = vpop.permute.xlu0 %3487 }
0x2db0   :  { %v3490_v44 = vmul.f32 %v3488_v18, %v3477_v60 }
0x2db2   :  { %3492 = vrot.lane.b32.xlu2 %v3490_v44, %s4954_s28 }
0x2db7   :  { %v3756_v5 = vpop.permute.xlu0 %3755 }
0x2db8   :  { %vm3757_vm2 = vcmp.eq.s32.totalorder %v5164_v11, %v3756_v5  ;;  %v4374_v5 = vld [vmem:[%s6401_s21 + $0x30] sm:$0xff] }
0x2db9   :  { %v4364_v56 = vsel %vm3757_vm2, 1.0, %v4952_v9 }
0x2e0c   :  { %v3493_v31 = vpop.permute.xlu2 %3492 }
0x2e0d   :  { %4350 = vmatmul.msk.f32.vlgmr.msra.gmra.mxu3 %vm219_vm8, %v3493_v31 }
0x2e0e   :  { %3797 = vmatpush.msra.mxu3 %v6214_v23 }
0x2e10   :  { %3798 = vmatpush.msra.mxu3 %v6217_v61 }
0x2e14   :  { %v3635_v3 = vpop.permute.xlu1 %3634 }
0x2e15   :  { %v3637_v4 = vmul.f32 %v3635_v3, %v3618_v49  ;;  %4358 = vmatmul.msk.f32.vlgmr.msrb.gmra.mxu3 %vm219_vm8, %v3493_v31 }
0x2e16   :  { %3956 = vmatpush.msrb.mxu3 %v6020_v57 }
0x2e17   :  { %3659 = vrot.lane.b32.xlu1 %v3637_v4, %s4954_s28 }
0x2e18   :  { %3957 = vmatpush.msrb.mxu3 %v6022_v37 }
0x2e1a   :  { %3958 = vmatpush.msrb.mxu3 %v6028_v28 }
0x2e1c   :  { %3959 = vmatpush.msrb.mxu3 %v6033_v13 }
0x2e1d   :  { %4366 = vmatmul.msk.f32.vlgmr.msra.gmra.mxu3 %vm243_vm0, %v4364_v56 }
0x2e1e   :  { %4098 = vmatpush.msra.mxu3 %v5974_v59  ;;  %v4761_v59 = vld [vmem:[%s6369_s16 + $0x10] sm:$0xff] }
0x2e20   :  { %4099 = vmatpush.msra.mxu3 %v5976_v10  ;;  %v4762_v10 = vld [vmem:[%s6369_s16 + $0x8] sm:$0xff] }
0x2e22   :  { %4100 = vmatpush.msra.mxu3 %v5979_v19  ;;  %v4763_v19 = vld [vmem:[%s6369_s16] sm:$0xff] }
0x2e24   :  { %4101 = vmatpush.msra.mxu3 %v5983_v54 }
0x2e89   :  { %v3660_v30 = vpop.permute.xlu1 %3659 }
0x2e8a   :  { %4359 = vmatmul.msk.f32.vlgmr.msrb.gmra.mxu0 %vm219_vm8, %v3660_v30  ;;  %4365 = vmatmul.msk.f32.vlgmr.msra.gmra.mxu1 %vm219_vm8, %v3660_v30 }
0x2e8b   :  { %3996 = vmatpush.msrb.mxu0 %v4760_v36  ;;  %4039 = vmatpush.msra.mxu1 %v6167_v45 }
0x2e8d   :  { %3997 = vmatpush.msrb.mxu0 %v4761_v59  ;;  %4040 = vmatpush.msra.mxu1 %v6174_v12 }
0x2e8f   :  { %3998 = vmatpush.msrb.mxu0 %v4762_v10  ;;  %4041 = vmatpush.msra.mxu1 %v6181_v51 }
0x2e90   :  { %v6256_v54 = vpop.f32.mrf.mxu3 }
0x2e91   :  { %3999 = vmatpush.msrb.mxu0 %v4763_v19  ;;  %4042 = vmatpush.msra.mxu1 %v6188_v24 }
0x2e92   :  { %4367 = vmatmul.msk.f32.vlgmr.msra.gmra.mxu0 %vm219_vm8, %v3660_v30 }
0x2e93   :  { %4123 = vmatpush.msra.mxu0 %v5953_v2 }
0x2e95   :  { %4124 = vmatpush.msra.mxu0 %v5955_v48 }
0x2e97   :  { %4125 = vmatpush.msra.mxu0 %v5959_v50 }
0x2e98   :  { %v3655_v45 = vpop.f32.mrf.mxu3 }
0x2e99   :  { %4126 = vmatpush.msra.mxu0 %v5963_v17 }
0x2ea0   :  { %v3800_v24 = vpop.f32.mrf.mxu3 }
0x2f07   :  { %v3680_v12 = vpop.f32.mrf.mxu0  ;;  %v3777_v47 = vpop.f32.mrf.mxu1 }
0x2f08   :  { %v3681_v51 = vadd.f32 %v3680_v12, %v3655_v45  ;;  %v3801_v25 = vadd.f32 %v3800_v24, %v3777_v47  ;;  %v6292_v47 = vld [vmem:[#allocation12] ss:$0 sm:$0xff] }
0x2f0a   :  { %v3683_v21 = vadd.f32 %v6008_v34, %v3681_v51 }
0x2f0c   :  { %4674 = vtanh.f32 %v3683_v21  ;;  %v4360_v55 = vmul.f32 -1.442695, %v3683_v21 }
0x2f0f   :  { %v3820_v26 = vpop.f32.mrf.mxu0 }
0x2f10   :  { %v3823_v14 = vadd.f32 %v3820_v26, %v3801_v25 }
0x2f12   :  { %v4675_v2 = vpop.eup %4674  ;;  %v3824_v48 = vadd.f32 %v6259_v22, %v3823_v14 }
0x2f13   :  { %3705 = vrot.lane.b32.xlu0 %v4675_v2, %s4953_s26 }
0x2f14   :  { %4676 = vtanh.f32 %v3824_v48  ;;  %v4368_v17 = vmul.f32 -1.442695, %v3824_v48 }
0x2f16   :  { %4678 = vpow2.f32 %v4368_v17 }
0x2f1a   :  { %v4677_v50 = vpop.eup %4676 }
0x2f1b   :  { %3847 = vrot.lane.b32.xlu2 %v4677_v50, %s4953_s26 }
0x2f1c   :  { %v4679_v34 = vpop.eup %4678 }
0x2f1d   :  { %v3828_v32 = vadd.f32 1.0, %v4679_v34 }
0x2f1f   :  { %4680 = vrcp.f32 %v3828_v32  ;;  %v3840_v0 = vand.u32 2147483648, %v3828_v32  ;;  %vm3834_vm4 = vweird.f32 %v3828_v32  ;;  %v3838_v52 = vand.u32 2147483647, %v3828_v32 }
0x2f20   :  { %4682 = vpow2.f32 %v4360_v55 }
0x2f21   :  { %v3841_v6 = vor.u32 1.1754944e-38, %v3840_v0  ;;  %vm3839_vm6 = vcmp.eq.f32.partialorder %v3838_v52, 8.507059e+37 }
0x2f25   :  { %v4681_v42 = vpop.eup %4680 }
0x2f26   :  { %v4683_v33 = vpop.eup %4682  ;;  %v3830_v58 = vmul.f32 %v4681_v42, %v3828_v32  ;;  %vm3835_vm3 = vweird.f32 %v4681_v42 }
0x2f27   :  { %v3687_v62 = vadd.f32 1.0, %v4683_v33  ;;  %vm3836_vm5 = vmor %vm3834_vm4, %vm3835_vm3 }
0x2f28   :  { %v3831_v15 = vsub.f32 1.0, %v3830_v58 }
0x2f29   :  { %4684 = vrcp.f32 %v3687_v62  ;;  %v3699_v39 = vand.u32 2147483648, %v3687_v62  ;;  %vm3693_vm9 = vweird.f32 %v3687_v62  ;;  %v3697_v20 = vand.u32 2147483647, %v3687_v62 }
0x2f2a   :  { %v3832_v27 = vmul.f32 %v4681_v42, %v3831_v15 }
0x2f2b   :  { %v3700_v18 = vor.u32 1.1754944e-38, %v3699_v39  ;;  %vm3698_vm11 = vcmp.eq.f32.partialorder %v3697_v20, 8.507059e+37 }
0x2f2c   :  { %v3833_v7 = vadd.f32 %v4681_v42, %v3832_v27 }
0x2f2e   :  { %v3837_v1 = vsel %vm3836_vm5, %v4681_v42, %v3833_v7 }
0x2f2f   :  { %v4685_v60 = vpop.eup %4684  ;;  %v3842_v63 = vsel %vm3839_vm6, %v3841_v6, %v3837_v1 }
0x2f30   :  { %v3689_v29 = vmul.f32 %v4685_v60, %v3687_v62  ;;  %vm3694_vm7 = vweird.f32 %v4685_v60  ;;  %v3845_v30 = vmul.f32 %v3842_v63, %v6208_v40 }
0x2f31   :  { %vm3695_vm10 = vmor %vm3693_vm9, %vm3694_vm7 }
0x2f32   :  { %v3690_v43 = vsub.f32 1.0, %v3689_v29 }
0x2f34   :  { %v3691_v53 = vmul.f32 %v4685_v60, %v3690_v43 }
0x2f36   :  { %v3692_v8 = vadd.f32 %v4685_v60, %v3691_v53 }
0x2f38   :  { %v3696_v41 = vsel %vm3695_vm10, %v4685_v60, %v3692_v8 }
0x2f39   :  { %v3701_v44 = vsel %vm3698_vm11, %v3700_v18, %v3696_v41 }
0x2f75   :  { %v3848_v38 = vpop.permute.xlu2 %3847 }
0x2f76   :  { %v3850_v49 = vmul.f32 %v3848_v38, %v3842_v63 }
0x2f78   :  { %3852 = vrot.lane.b32.xlu1 %v3850_v49, %s4954_s28 }
0x2f85   :  { %v3706_v31 = vpop.permute.xlu0 %3705 }
0x2f86   :  { %v3708_v3 = vmul.f32 %v3706_v31, %v3701_v44 }
0x2f88   :  { %4686 = vtanh.f32 %v3708_v3 }
0x2f8e   :  { %v4687_v4 = vpop.eup %4686 }
0x2f8f   :  { %3711 = vrot.lane.b32.xlu2 %v4687_v4, %s4955_s18 }
0x2f97   :  { %3979 = vperm.xlu2 %4400, %v4374_v5  }
0x2fe9   :  { %v3712_v56 = vpop.permute.xlu2 %3711 }
0x2fea   :  { %v3714_v36 = vmul.f32 %v3712_v56, %v3701_v44  ;;  %v3853_v59 = vpop.permute.xlu1 %3852 }
0x2feb   :  { %v6270_v10 = vadd.f32 %v3853_v59, %v3845_v30 }
0x2fec   :  { %3716 = vrot.lane.b32.xlu1 %v3714_v36, %s4954_s28 }
0x2fed   :  { %4688 = vtanh.f32 %v6270_v10 }
0x2ff1   :  { %v3980_v51 = vpop.permute.xlu2 %3979 }
0x2ff2   :  { %vm3981_vm12 = vcmp.eq.s32.totalorder %v5164_v11, %v3980_v51 }
0x2ff3   :  { %v4689_v19 = vpop.eup %4688  ;;  %v4375_v21 = vsel %vm3981_vm12, 1.0, %v4952_v9 }
0x2ff4   :  { %3858 = vrot.lane.b32.xlu0 %v4689_v19, %s4953_s26 }
0x305e   :  { %v3717_v45 = vpop.permute.xlu1 %3716 }
0x305f   :  { %4361 = vmatmul.msk.f32.vlgmr.msrb.gmra.mxu2 %vm219_vm8, %v3717_v45 }
0x3060   :  { %4021 = vmatpush.msrb.mxu2 %v6214_v23 }
0x3062   :  { %4022 = vmatpush.msrb.mxu2 %v6217_v61 }
0x3066   :  { %v3859_v12 = vpop.permute.xlu0 %3858 }
0x3067   :  { %v3861_v40 = vmul.f32 %v3859_v12, %v3842_v63  ;;  %4369 = vmatmul.msk.f32.vlgmr.msra.gmra.mxu2 %vm219_vm8, %v3717_v45 }
0x3068   :  { %4180 = vmatpush.msra.mxu2 %v6020_v57 }
0x3069   :  { %3883 = vrot.lane.b32.xlu0 %v3861_v40, %s4954_s28 }
0x306a   :  { %4181 = vmatpush.msra.mxu2 %v6022_v37 }
0x306c   :  { %4182 = vmatpush.msra.mxu2 %v6028_v28 }
0x306e   :  { %4183 = vmatpush.msra.mxu2 %v6033_v13 }
0x306f   :  { %4377 = vmatmul.msk.f32.vlgmr.msrb.gmra.mxu2 %vm243_vm0, %v4375_v21 }
0x30db   :  { %v3884_v23 = vpop.permute.xlu0 %3883 }
0x30dc   :  { %4370 = vmatmul.msk.f32.vlgmr.msrb.gmra.mxu1 %vm219_vm8, %v3884_v23  ;;  %4376 = vmatmul.msk.f32.vlgmr.msrb.gmra.mxu0 %vm219_vm8, %v3884_v23 }
0x30e2   :  { %v6290_v57 = vpop.f32.mrf.mxu2 }
0x30e4   :  { %4378 = vmatmul.msk.f32.vlgmr.msra.gmra.mxu1 %vm219_vm8, %v3884_v23 }
0x30ea   :  { %v3879_v37 = vpop.f32.mrf.mxu2 }
0x30f2   :  { %v4024_v13 = vpop.f32.mrf.mxu2 }
0x3159   :  { %v3904_v61 = vpop.f32.mrf.mxu1  ;;  %v4001_v28 = vpop.f32.mrf.mxu0 }
0x315a   :  { %v3905_v11 = vadd.f32 %v3904_v61, %v3879_v37  ;;  %v4025_v24 = vadd.f32 %v4024_v13, %v4001_v28  ;;  %v6314_v61 = vld [vmem:[%s6376_s23] ss:$0 sm:$0xff] }
0x315c   :  { %v3907_v9 = vadd.f32 %v6292_v47, %v3905_v11  ;;  %v2842_v11 = vadd.f32 %v6314_v61, %v6080_v16 }
0x315e   :  { %4690 = vtanh.f32 %v3907_v9  ;;  %v4371_v50 = vmul.f32 -1.442695, %v3907_v9 }
0x3161   :  { %v4044_v25 = vpop.f32.mrf.mxu1 }
0x3162   :  { %v4047_v26 = vadd.f32 %v4044_v25, %v4025_v24 }
0x3164   :  { %v4691_v14 = vpop.eup %4690  ;;  %v4048_v2 = vadd.f32 %v6259_v22, %v4047_v26 }
0x3165   :  { %3929 = vrot.lane.b32.xlu2 %v4691_v14, %s4953_s26 }
0x3166   :  { %4692 = vtanh.f32 %v4048_v2  ;;  %v4379_v33 = vmul.f32 -1.442695, %v4048_v2 }
0x3167   :  { %4694 = vpow2.f32 %v4371_v50 }
0x316c   :  { %v4693_v48 = vpop.eup %4692 }
0x316d   :  { %4071 = vrot.lane.b32.xlu1 %v4693_v48, %s4953_s26  ;;  %v4695_v17 = vpop.eup %4694 }
0x316e   :  { %v3911_v34 = vadd.f32 1.0, %v4695_v17 }
0x3170   :  { %4696 = vrcp.f32 %v3911_v34  ;;  %v3923_v22 = vand.u32 2147483648, %v3911_v34  ;;  %vm3917_vm13 = vweird.f32 %v3911_v34  ;;  %v3921_v15 = vand.u32 2147483647, %v3911_v34 }
0x3171   :  { %4698 = vpow2.f32 %v4379_v33 }
0x3172   :  { %v3924_v60 = vor.u32 1.1754944e-38, %v3923_v22  ;;  %vm3922_vm15 = vcmp.eq.f32.partialorder %v3921_v15, 8.507059e+37 }
0x3176   :  { %v4697_v32 = vpop.eup %4696 }
0x3177   :  { %v3913_v55 = vmul.f32 %v4697_v32, %v3911_v34  ;;  %vm3918_vm0 = vweird.f32 %v4697_v32  ;;  %v4699_v27 = vpop.eup %4698 }
0x3178   :  { %vm3919_vm14 = vmor %vm3917_vm13, %vm3918_vm0  ;;  %v4052_v0 = vadd.f32 1.0, %v4699_v27  ;;  %v3066_v27 = vadd.f32 %v6314_v61, %v6128_v46 }
0x3179   :  { %v3914_v42 = vsub.f32 1.0, %v3913_v55 }
0x317a   :  { %v4064_v8 = vand.u32 2147483648, %v4052_v0  ;;  %vm4058_vm2 = vweird.f32 %v4052_v0  ;;  %v4062_v39 = vand.u32 2147483647, %v4052_v0 }
0x317b   :  { %v3915_v58 = vmul.f32 %v4697_v32, %v3914_v42 }
0x317c   :  { %v4065_v41 = vor.u32 1.1754944e-38, %v4064_v8  ;;  %vm4063_vm4 = vcmp.eq.f32.partialorder %v4062_v39, 8.507059e+37 }
0x317d   :  { %v3916_v62 = vadd.f32 %v4697_v32, %v3915_v58 }
0x317f   :  { %v3920_v7 = vsel %vm3919_vm14, %v4697_v32, %v3916_v62 }
0x3180   :  { %v3925_v1 = vsel %vm3922_vm15, %v3924_v60, %v3920_v7  ;;  %v3514_v7 = vadd.f32 %v6314_v61, %v6256_v54 }
0x31bf   :  { %v3930_v52 = vpop.permute.xlu2 %3929 }
0x31c0   :  { %v3932_v29 = vmul.f32 %v3930_v52, %v3925_v1 }
0x31c2   :  { %4700 = vtanh.f32 %v3932_v29 }
0x31c3   :  { %4702 = vrcp.f32 %v4052_v0 }
0x31c8   :  { %v4701_v6 = vpop.eup %4700 }
0x31c9   :  { %v4703_v38 = vpop.eup %4702  ;;  %3935 = vrot.lane.b32.xlu1 %v4701_v6, %s4955_s18 }
0x31ca   :  { %v4054_v63 = vmul.f32 %v4703_v38, %v4052_v0  ;;  %vm4059_vm1 = vweird.f32 %v4703_v38 }
0x31cb   :  { %vm4060_vm3 = vmor %vm4058_vm2, %vm4059_vm1 }
0x31cc   :  { %v4055_v49 = vsub.f32 1.0, %v4054_v63 }
0x31ce   :  { %v4056_v43 = vmul.f32 %v4703_v38, %v4055_v49 }
0x31d0   :  { %v4057_v53 = vadd.f32 %v4703_v38, %v4056_v43 }
0x31d2   :  { %v4061_v20 = vsel %vm4060_vm3, %v4703_v38, %v4057_v53  ;;  %v3290_v53 = vadd.f32 %v6314_v61, %v6196_v35 }
0x31d3   :  { %v4066_v44 = vsel %vm4063_vm4, %v4065_v41, %v4061_v20 }
0x31d4   :  { %v4069_v5 = vmul.f32 %v4066_v44, %v6270_v10 }
0x31df   :  { %v4072_v18 = vpop.permute.xlu1 %4071 }
0x31e0   :  { %v4074_v31 = vmul.f32 %v4072_v18, %v4066_v44 }
0x31e2   :  { %4076 = vrot.lane.b32.xlu0 %v4074_v31, %s4954_s28 }
0x323b   :  { %v3936_v3 = vpop.permute.xlu1 %3935 }
0x323c   :  { %v3938_v4 = vmul.f32 %v3936_v3, %v3925_v1 }
0x323e   :  { %3940 = vrot.lane.b32.xlu0 %v3938_v4, %s4954_s28 }
0x3254   :  { %v4077_v56 = vpop.permute.xlu0 %4076 }
0x3255   :  { %v4079_v30 = vadd.f32 %v4077_v56, %v4069_v5 }
0x3257   :  { %4704 = vtanh.f32 %v4079_v30 }
0x325d   :  { %v4705_v36 = vpop.eup %4704 }
0x325e   :  { %4082 = vrot.lane.b32.xlu2 %v4705_v36, %s4953_s26 }
0x32b0   :  { %v3941_v59 = vpop.permute.xlu0 %3940 }
0x32b1   :  { %4372 = vmatmul.msk.f32.vlgmr.msrb.gmra.mxu3 %vm219_vm8, %v3941_v59 }
0x32b8   :  { %v4083_v19 = vpop.permute.xlu2 %4082 }
0x32b9   :  { %v4085_v45 = vmul.f32 %v4083_v19, %v4066_v44  ;;  %4380 = vmatmul.msk.f32.vlgmr.msra.gmra.mxu3 %vm219_vm8, %v3941_v59  ;;  %v3738_v19 = vadd.f32 %v6314_v61, %v6290_v57 }
0x32bb   :  { %4107 = vrot.lane.b32.xlu1 %v4085_v45, %s4954_s28 }
0x332d   :  { %v4108_v12 = vpop.permute.xlu1 %4107 }
0x332e   :  { %4381 = vmatmul.msk.f32.vlgmr.msra.gmra.mxu0 %vm219_vm8, %v4108_v12 }
0x3334   :  { %v6307_v40 = vpop.f32.mrf.mxu3 }
0x3335   :  { %v3962_v39 = vadd.f32 %v6314_v61, %v6307_v40 }
0x333c   :  { %v4103_v10 = vpop.f32.mrf.mxu3 }
0x33ab   :  { %v4128_v51 = vpop.f32.mrf.mxu0 }
0x33ac   :  { %v4129_v21 = vadd.f32 %v4128_v51, %v4103_v10 }
0x33ae   :  { %v4131_v23 = vadd.f32 %v6292_v47, %v4129_v21 }
0x33b0   :  { %4706 = vtanh.f32 %v4131_v23  ;;  %v4382_v9 = vmul.f32 -1.442695, %v4131_v23 }
0x33b2   :  { %4708 = vpow2.f32 %v4382_v9 }
0x33b6   :  { %v4707_v37 = vpop.eup %4706 }
0x33b7   :  { %4153 = vrot.lane.b32.xlu2 %v4707_v37, %s4953_s26 }
0x33b8   :  { %v4709_v28 = vpop.eup %4708 }
0x33b9   :  { %v4135_v13 = vadd.f32 1.0, %v4709_v28 }
0x33bb   :  { %4710 = vrcp.f32 %v4135_v13  ;;  %v4147_v2 = vand.u32 2147483648, %v4135_v13  ;;  %vm4141_vm6 = vweird.f32 %v4135_v13  ;;  %v4145_v48 = vand.u32 2147483647, %v4135_v13 }
0x33bd   :  { %v4148_v17 = vor.u32 1.1754944e-38, %v4147_v2  ;;  %vm4146_vm9 = vcmp.eq.f32.partialorder %v4145_v48, 8.507059e+37 }
0x33c1   :  { %v4711_v24 = vpop.eup %4710 }
0x33c2   :  { %v4137_v47 = vmul.f32 %v4711_v24, %v4135_v13  ;;  %vm4142_vm5 = vweird.f32 %v4711_v24 }
0x33c3   :  { %vm4143_vm7 = vmor %vm4141_vm6, %vm4142_vm5 }
0x33c4   :  { %v4138_v25 = vsub.f32 1.0, %v4137_v47 }
0x33c6   :  { %v4139_v26 = vmul.f32 %v4711_v24, %v4138_v25 }
0x33c8   :  { %v4140_v14 = vadd.f32 %v4711_v24, %v4139_v26 }
0x33ca   :  { %v4144_v50 = vsel %vm4143_vm7, %v4711_v24, %v4140_v14 }
0x33cb   :  { %v4149_v34 = vsel %vm4146_vm9, %v4148_v17, %v4144_v50 }
0x33e0   :  { %2844 = vmax.xlane.f32.xlu2 %v2842_v11 }
0x3411   :  { %v4154_v16 = vpop.permute.xlu2 %4153 }
0x3412   :  { %v4156_v32 = vmul.f32 %v4154_v16, %v4149_v34 }
0x3414   :  { %4712 = vtanh.f32 %v4156_v32 }
0x341a   :  { %v4713_v55 = vpop.eup %4712 }
0x341b   :  { %4159 = vrot.lane.b32.xlu0 %v4713_v55, %s4955_s18 }
0x3453   :  { %v2845_v42 = vpop.xlane.xlu2 %2844 }
0x3454   :  { %v2846_v33 = vsub.f32 %v2842_v11, %v2845_v42 }
0x3456   :  { %v2847_v58 = vmul.f32 1.442695, %v2846_v33 }
0x3458   :  { %4714 = vpow2.f32 %v2847_v58 }
0x345e   :  { %v4715_v62 = vpop.eup %4714 }
0x345f   :  { %2849 = vadd.xlane.f32.xlu0 %v4715_v62 }
0x348d   :  { %v4160_v22 = vpop.permute.xlu0 %4159 }
0x348e   :  { %v4162_v15 = vmul.f32 %v4160_v22, %v4149_v34 }
0x3490   :  { %4164 = vrot.lane.b32.xlu1 %v4162_v15, %s4954_s28 }
0x34ba   :  { %3068 = vmax.xlane.f32.xlu1 %v3066_v27 }
0x34c2   :  { %3516 = vmax.xlane.f32.xlu1 %v3514_v7 }
0x34d2   :  { %v2850_v60 = vpop.xlane.xlu0 %2849 }
0x34d3   :  { %4716 = vlog2.f32 %v2850_v60 }
0x34d9   :  { %v4717_v0 = vpop.eup %4716 }
0x34da   :  { %v2852_v52 = vmul.f32 0.6931472, %v4717_v0 }
0x34dc   :  { %v2853_v1 = vsub.f32 %v2846_v33, %v2852_v52 }
0x34de   :  { %4318 = vst [vmem:[%s6377_s24 + $0x8] sm:$0xff] %v2853_v1 }
0x3502   :  { %v4165_v29 = vpop.permute.xlu1 %4164 }
0x3503   :  { %4383 = vmatmul.msk.f32.vlgmr.msra.gmra.mxu2 %vm219_vm8, %v4165_v29 }
0x352d   :  { %v3069_v6 = vpop.xlane.xlu1 %3068 }
0x352e   :  { %v3070_v38 = vsub.f32 %v3066_v27, %v3069_v6 }
0x3530   :  { %v3071_v46 = vmul.f32 1.442695, %v3070_v38 }
0x3532   :  { %4718 = vpow2.f32 %v3071_v46 }
0x3535   :  { %v3517_v63 = vpop.xlane.xlu1 %3516 }
0x3536   :  { %v3518_v54 = vsub.f32 %v3514_v7, %v3517_v63 }
0x3538   :  { %v4719_v49 = vpop.eup %4718  ;;  %v3519_v43 = vmul.f32 1.442695, %v3518_v54 }
0x3539   :  { %3073 = vadd.xlane.f32.xlu2 %v4719_v49 }
0x353a   :  { %4720 = vpow2.f32 %v3519_v43 }
0x3540   :  { %v4721_v8 = vpop.eup %4720 }
0x3541   :  { %3292 = vmax.xlane.f32.xlu2 %v3290_v53 }
0x3549   :  { %3521 = vadd.xlane.f32.xlu2 %v4721_v8 }
0x3551   :  { %3964 = vmax.xlane.f32.xlu2 %v3962_v39 }
0x3586   :  { %v4185_v24 = vpop.f32.mrf.mxu2 }
0x3587   :  { %v4186_v25 = vadd.f32 %v6314_v61, %v4185_v24 }
0x35ac   :  { %v3074_v20 = vpop.xlane.xlu2 %3073 }
0x35ad   :  { %4722 = vlog2.f32 %v3074_v20 }
0x35b3   :  { %v4723_v41 = vpop.eup %4722 }
0x35b4   :  { %v3076_v18 = vmul.f32 0.6931472, %v4723_v41  ;;  %v3293_v44 = vpop.xlane.xlu2 %3292 }
0x35b5   :  { %v3294_v31 = vsub.f32 %v3290_v53, %v3293_v44 }
0x35b6   :  { %v3077_v3 = vsub.f32 %v3070_v38, %v3076_v18 }
0x35b7   :  { %v3295_v4 = vmul.f32 1.442695, %v3294_v31 }
0x35b8   :  { %4329 = vst [vmem:[%s6377_s24 + $0x10] sm:$0xff] %v3077_v3 }
0x35b9   :  { %4724 = vpow2.f32 %v3295_v4 }
0x35bc   :  { %v3522_v35 = vpop.xlane.xlu2 %3521 }
0x35bd   :  { %4726 = vlog2.f32 %v3522_v35 }
0x35bf   :  { %v4725_v5 = vpop.eup %4724 }
0x35c0   :  { %3297 = vadd.xlane.f32.xlu0 %v4725_v5 }
0x35c3   :  { %v4727_v56 = vpop.eup %4726 }
0x35c4   :  { %v3524_v30 = vmul.f32 0.6931472, %v4727_v56  ;;  %v3965_v36 = vpop.xlane.xlu2 %3964 }
0x35c5   :  { %v3966_v59 = vsub.f32 %v3962_v39, %v3965_v36 }
0x35c6   :  { %v3525_v45 = vsub.f32 %v3518_v54, %v3524_v30 }
0x35c7   :  { %v3967_v12 = vmul.f32 1.442695, %v3966_v59 }
0x35c8   :  { %4351 = vst [vmem:[%s6377_s24 + $0x20] sm:$0xff] %v3525_v45  ;;  %3740 = vmax.xlane.f32.xlu0 %v3738_v19 }
0x35c9   :  { %4728 = vpow2.f32 %v3967_v12 }
0x35cf   :  { %v4729_v40 = vpop.eup %4728 }
0x35d0   :  { %3969 = vadd.xlane.f32.xlu0 %v4729_v40 }
0x3633   :  { %v3298_v10 = vpop.xlane.xlu0 %3297 }
0x3634   :  { %4730 = vlog2.f32 %v3298_v10 }
0x363a   :  { %v4731_v51 = vpop.eup %4730 }
0x363b   :  { %v3300_v21 = vmul.f32 0.6931472, %v4731_v51  ;;  %v3741_v23 = vpop.xlane.xlu0 %3740 }
0x363c   :  { %v3742_v37 = vsub.f32 %v3738_v19, %v3741_v23 }
0x363d   :  { %v3301_v11 = vsub.f32 %v3294_v31, %v3300_v21 }
0x363e   :  { %v3743_v9 = vmul.f32 1.442695, %v3742_v37 }
0x363f   :  { %4340 = vst [vmem:[%s6377_s24 + $0x18] sm:$0xff] %v3301_v11 }
0x3640   :  { %4732 = vpow2.f32 %v3743_v9 }
0x3643   :  { %v3970_v57 = vpop.xlane.xlu0 %3969 }
0x3644   :  { %4734 = vlog2.f32 %v3970_v57 }
0x3646   :  { %v4733_v28 = vpop.eup %4732 }
0x3647   :  { %3745 = vadd.xlane.f32.xlu1 %v4733_v28 }
0x364a   :  { %v4735_v13 = vpop.eup %4734 }
0x364b   :  { %v3972_v47 = vmul.f32 0.6931472, %v4735_v13 }
0x364d   :  { %v3973_v26 = vsub.f32 %v3966_v59, %v3972_v47 }
0x364f   :  { %4373 = vst [vmem:[%s6377_s24 + $0x30] sm:$0xff] %v3973_v26  ;;  %4188 = vmax.xlane.f32.xlu1 %v4186_v25 }
0x36ba   :  { %v3746_v14 = vpop.xlane.xlu1 %3745 }
0x36bb   :  { %4736 = vlog2.f32 %v3746_v14 }
0x36c1   :  { %v4737_v2 = vpop.eup %4736 }
0x36c2   :  { %v3748_v48 = vmul.f32 0.6931472, %v4737_v2  ;;  %v4189_v50 = vpop.xlane.xlu1 %4188 }
0x36c3   :  { %v4190_v17 = vsub.f32 %v4186_v25, %v4189_v50 }
0x36c4   :  { %v3749_v16 = vsub.f32 %v3742_v37, %v3748_v48 }
0x36c5   :  { %v4191_v34 = vmul.f32 1.442695, %v4190_v17 }
0x36c6   :  { %4362 = vst [vmem:[%s6377_s24 + $0x28] sm:$0xff] %v3749_v16 }
0x36c7   :  { %4738 = vpow2.f32 %v4191_v34 }
0x36cd   :  { %v4739_v61 = vpop.eup %4738 }
0x36ce   :  { %4193 = vadd.xlane.f32.xlu2 %v4739_v61 }
0x3741   :  { %v4194_v32 = vpop.xlane.xlu2 %4193 }
0x3742   :  { %4740 = vlog2.f32 %v4194_v32 }
0x3748   :  { %v4741_v55 = vpop.eup %4740 }
0x3749   :  { %v4196_v42 = vmul.f32 0.6931472, %v4741_v55 }
0x374b   :  { %v4197_v33 = vsub.f32 %v4190_v17, %v4196_v42 }
0x374d   :  { %4384 = vst [vmem:[%s6377_s24 + $0x38] sm:$0xff] %v4197_v33 }
0x374e   :  { %4204 = vsyncpa [#allocation5], 1 }
0x374f   :  { %4205 = vsyncpa [#allocation7], 1 }
0x3750   :  { %4206 = vsyncpa [#allocation10], 1 }
0x3751   :  { %4207 = vsyncpa [#allocation13], 1 }

</bundles_post_ra>
